<compile_context>
chip_gen: v5e
topology: v5e:2x2
jax: 0.10.0
libtpu: 0.0.40
codegen_flags: <defaults>
</compile_context>

<pallas_src>
import functools

import jax
import jax.numpy as jnp
from jax.experimental import pallas as pl
from jax.experimental.pallas import tpu as pltpu

LANES = 128   # pad all output-channel / logit dims to a full vreg lane width
K5 = 5        # conv kernel size
PAD = 2       # conv spatial padding (and zero border carried between convs)


# ----------------------------------------------------------------------------
# Fused conv(5x5, pad=2) + bias + ReLU + 2x2/stride-2 max-pool kernel
# ----------------------------------------------------------------------------
def _conv_relu_pool_kernel(x_ref, w_ref, b_ref, o_ref, patch_ref, hp_ref, *,
                           H, W, Cin, pad_out):
    """One image per grid step.

    x_ref:     (1, H+4, W+4, Cin)  bf16   spatially pre-padded input
    w_ref:     (25*Cin, 128)       bf16   rows ordered (dy, dx, ci)
    b_ref:     (1, 128)            f32
    o_ref:     (1, H//2 [+4], W//2 [+4], 128) bf16  pooled output
               (if pad_out, the pooled map sits inside a 2-pixel zero border
                so it can feed the next conv without a jnp.pad round trip)
    patch_ref: (2, W, 25*Cin) bf16 VMEM   im2col rows for conv rows h, h+1
    hp_ref:    (W, 128)       f32  VMEM   row-pair max (pre column pooling)
    """
    Ho, Wo = H // 2, W // 2

    if pad_out:
        o_ref[...] = jnp.zeros_like(o_ref)   # zero border rows/cols

    def body(ho, carry):
        # --- assemble im2col patches for conv output rows 2*ho, 2*ho + 1 ----
        for h_local in range(2):
            for dy in range(K5):
                row = x_ref[0, 2 * ho + h_local + dy]          # [W+4, Cin]
                for dx in range(K5):
                    tap = dy * K5 + dx
                    patch_ref[h_local, :, tap * Cin:(tap + 1) * Cin] = (
                        row[dx:dx + W, :])
        # --- MXU matmuls: K = 25*Cin, N = 128 lanes --------------------------
        y0 = jnp.dot(patch_ref[0], w_ref[...],
                     preferred_element_type=jnp.float32)        # [W, 128]
        y1 = jnp.dot(patch_ref[1], w_ref[...],
                     preferred_element_type=jnp.float32)        # [W, 128]
        # --- fused epilogue (f32): row-pair max, bias, ReLU ------------------
        # relu(max(y0, y1) + b) == max(relu(y0 + b), relu(y1 + b))
        hp_ref[...] = jnp.maximum(jnp.maximum(y0, y1) + b_ref[...], 0.0)
        # column-pair max via strided VMEM reads -> lane-dense [Wo, 128]
        pooled = jnp.maximum(hp_ref[pl.ds(0, Wo, 2), :],
                             hp_ref[pl.ds(1, Wo, 2), :])
        if pad_out:
            zrow = jnp.zeros((PAD, LANES), jnp.float32)
            full = jnp.concatenate([zrow, pooled, zrow], axis=0)  # [Wo+4, 128]
            o_ref[0, ho + PAD, :, :] = full.astype(o_ref.dtype)
        else:
            o_ref[0, ho, :, :] = pooled.astype(o_ref.dtype)
        return carry

    jax.lax.fori_loop(0, Ho, body, 0)


def conv_relu_pool(x_padded, w_mat, b_vec, *, pad_out):
    """x_padded: [N, H+4, W+4, Cin] bf16; w_mat: [25*Cin, 128] bf16;
    b_vec: [1, 128] f32.  Returns pooled activations (channels padded to 128):
    [N, H//2+4, W//2+4, 128] if pad_out else [N, H//2, W//2, 128], bf16."""
    N, Hp, Wp, Cin = x_padded.shape
    H, W = Hp - 2 * PAD, Wp - 2 * PAD
    Ho, Wo = H // 2, W // 2
    out_h, out_w = (Ho + 2 * PAD, Wo + 2 * PAD) if pad_out else (Ho, Wo)
    kernel = functools.partial(_conv_relu_pool_kernel,
                               H=H, W=W, Cin=Cin, pad_out=pad_out)
    return pl.pallas_call(
        kernel,
        out_shape=jax.ShapeDtypeStruct((N, out_h, out_w, LANES), jnp.bfloat16),
        grid=(N,),
        in_specs=[
            pl.BlockSpec((1, Hp, Wp, Cin), lambda n: (n, 0, 0, 0)),
            pl.BlockSpec((K5 * K5 * Cin, LANES), lambda n: (0, 0)),
            pl.BlockSpec((1, LANES), lambda n: (0, 0)),
        ],
        out_specs=pl.BlockSpec((1, out_h, out_w, LANES),
                               lambda n: (n, 0, 0, 0)),
        scratch_shapes=[
            pltpu.VMEM((2, W, K5 * K5 * Cin), jnp.bfloat16),
            pltpu.VMEM((W, LANES), jnp.float32),
        ],
        compiler_params=pltpu.CompilerParams(
            dimension_semantics=("parallel",),       # both TCs on v7x
            vmem_limit_bytes=32 * 1024 * 1024,       # explicit, safe on all gens
        ),
    )(x_padded, w_mat, b_vec)


# ----------------------------------------------------------------------------
# Fused fc1 + ReLU + fc2 kernel (hidden stays in VMEM, single pallas_call)
# ----------------------------------------------------------------------------
def _fc_fused_kernel(x_ref, w1_ref, b1_ref, w2_ref, b2_ref, o_ref):
    h = jnp.dot(x_ref[...], w1_ref[...], preferred_element_type=jnp.float32)
    h = jnp.maximum(h + b1_ref[...], 0.0)                      # f32 epilogue
    y = jnp.dot(h.astype(jnp.bfloat16), w2_ref[...],
                preferred_element_type=jnp.float32)
    o_ref[...] = (y + b2_ref[...]).astype(o_ref.dtype)


def fc_fused(x, w1, b1, w2, b2):
    """x: [M, K] bf16 -> [M, 128] f32 (lane-dense; real logits in cols 0:10)."""
    M, K = x.shape
    tm = M if M <= 256 else 256          # row tile (256 keeps v7x VMEM happy)
    return pl.pallas_call(
        _fc_fused_kernel,
        out_shape=jax.ShapeDtypeStruct((M, LANES), jnp.float32),
        grid=(pl.cdiv(M, tm),),
        in_specs=[
            pl.BlockSpec((tm, K), lambda i: (i, 0)),
            pl.BlockSpec((K, LANES), lambda i: (0, 0)),
            pl.BlockSpec((1, LANES), lambda i: (0, 0)),
            pl.BlockSpec((LANES, LANES), lambda i: (0, 0)),
            pl.BlockSpec((1, LANES), lambda i: (0, 0)),
        ],
        out_specs=pl.BlockSpec((tm, LANES), lambda i: (i, 0)),
        compiler_params=pltpu.CompilerParams(
            dimension_semantics=("parallel",),
            vmem_limit_bytes=32 * 1024 * 1024,
        ),
    )(x, w1, b1, w2, b2)


# ----------------------------------------------------------------------------
# Parameter setup (PyTorch layouts) and one-time conversion to kernel layouts
# ----------------------------------------------------------------------------
def init_params(key):
    """Deterministic synthetic parameters with PyTorch-convention shapes."""
    ks = jax.random.split(key, 8)
    return {
        "w_conv1": 0.10 * jax.random.normal(ks[0], (32, 1, 5, 5), jnp.float32),
        "b_conv1": 0.10 * jax.random.normal(ks[1], (32,), jnp.float32),
        "w_conv2": 0.05 * jax.random.normal(ks[2], (64, 32, 5, 5), jnp.float32),
        "b_conv2": 0.05 * jax.random.normal(ks[3], (64,), jnp.float32),
        "w_fc1": 0.02 * jax.random.normal(ks[4], (128, 64 * 7 * 7), jnp.float32),
        "b_fc1": 0.02 * jax.random.normal(ks[5], (128,), jnp.float32),
        "w_fc2": 0.10 * jax.random.normal(ks[6], (10, 128), jnp.float32),
        "b_fc2": 0.10 * jax.random.normal(ks[7], (10,), jnp.float32),
    }


def prepare_params(p):
    """One-time (outside jit) conversion to the layouts the kernels consume:
    conv weights as [(dy,dx,ci), co] matrices, channels/logits zero-padded to
    128 lanes, bf16 weights + f32 biases, and the NCHW flatten before fc1
    folded into a row permutation of w_fc1."""
    def conv_w(w, cin_pad):
        cout, cin = w.shape[0], w.shape[1]
        w = jnp.transpose(w, (2, 3, 1, 0))                      # [5,5,ci,co]
        w = jnp.pad(w, ((0, 0), (0, 0),
                        (0, cin_pad - cin), (0, LANES - cout)))
        return w.reshape(K5 * K5 * cin_pad, LANES).astype(jnp.bfloat16)

    def bias(b):
        return (jnp.pad(b, (0, LANES - b.shape[0]))
                .reshape(1, LANES).astype(jnp.float32))

    # fc1: torch input index = c*49 + h*7 + w; our activation is flattened
    # NHWC with channels padded to 128 -> index h*(7*128) + w*128 + c.
    w_fc1 = p["w_fc1"].reshape(128, 64, 7, 7)           # (out, c, h, w)
    w_fc1 = jnp.transpose(w_fc1, (2, 3, 1, 0))          # (h, w, c, out)
    w_fc1 = jnp.pad(w_fc1, ((0, 0), (0, 0), (0, LANES - 64), (0, 0)))
    w_fc1 = w_fc1.reshape(7 * 7 * LANES, 128).astype(jnp.bfloat16)

    w_fc2 = jnp.pad(p["w_fc2"].T, ((0, 0), (0, LANES - 10))).astype(jnp.bfloat16)

    return {
        "w1": conv_w(p["w_conv1"], 1),     "b1": bias(p["b_conv1"]),
        "w2": conv_w(p["w_conv2"], LANES), "b2": bias(p["b_conv2"]),
        "wf1": w_fc1, "bf1": bias(p["b_fc1"]),
        "wf2": w_fc2, "bf2": bias(p["b_fc2"]),
    }


# ----------------------------------------------------------------------------
# Forward pass
# ----------------------------------------------------------------------------
def cnn_forward(prep, x_nchw):
    N = x_nchw.shape[0]
    # NCHW -> NHWC, spatial pre-pad for conv1 (padding=2), cast to bf16.
    x = jnp.transpose(x_nchw, (0, 2, 3, 1))                       # [N,28,28,1]
    x = jnp.pad(x, ((0, 0), (PAD, PAD), (PAD, PAD), (0, 0))).astype(jnp.bfloat16)

    # conv1+relu+pool -> [N, 18, 18, 128] (already zero-bordered for conv2)
    a1 = conv_relu_pool(x, prep["w1"], prep["b1"], pad_out=True)
    # conv2+relu+pool -> [N, 7, 7, 128]
    a2 = conv_relu_pool(a1, prep["w2"], prep["b2"], pad_out=False)

    # Flatten (the NCHW-order permutation lives in prep["wf1"]); fc1+relu+fc2.
    flat = a2.reshape(N, 7 * 7 * LANES)
    logits_padded = fc_fused(flat, prep["wf1"], prep["bf1"],
                             prep["wf2"], prep["bf2"])            # [N, 128] f32
    return logits_padded[:, :10]


if __name__ == "__main__":
    key = jax.random.PRNGKey(0)
    k_params, k_x = jax.random.split(key)
    params = init_params(k_params)
    prep = prepare_params(params)        # one-time layout conversion (not jitted)

    # fc1 hardcodes 64*7*7, so spatial must be 28x28, 1 channel; batch kept small.
    x = jax.random.normal(k_x, (2, 1, 28, 28), jnp.float32)

    out = jax.jit(cnn_forward)(prep, x)
    jax.block_until_ready(out)
    assert out.shape == (2, 10) and out.dtype == jnp.float32
    print("KERNEL_OK")
</pallas_src>

<mosaic_0001>
module attributes {stable_mosaic.version = 11 : i64} {
  func.func @_conv_relu_pool_kernel(%arg0: i32, %arg1: memref<1x32x32x1xbf16, #tpu.memory_space<vmem>>, %arg2: memref<25x128xbf16, #tpu.memory_space<vmem>>, %arg3: memref<1x128xf32, #tpu.memory_space<vmem>>, %arg4: memref<1x18x18x128xbf16, #tpu.memory_space<vmem>>, %arg5: memref<2x28x25xbf16, #tpu.memory_space<vmem>>, %arg6: memref<28x128xf32, #tpu.memory_space<vmem>>) attributes {dimension_semantics = [#tpu.dimension_semantics<parallel>], iteration_bounds = array<i64: 2>, scalar_prefetch = 0 : i64, scratch_operands = 2 : i64, tpu.core_type = #tpu.core_type<tc>, window_params = [{transform_indices = @transform_0, window_bounds = array<i64: 1, 32, 32, 1>}, {pipeline_mode = #tpu.pipeline_mode<synchronous>, transform_indices = @transform_1, window_bounds = array<i64: 25, 128>}, {pipeline_mode = #tpu.pipeline_mode<synchronous>, transform_indices = @transform_2, window_bounds = array<i64: 1, 128>}, {transform_indices = @transform_3, window_bounds = array<i64: 1, 18, 18, 128>}]} {
    %cst = arith.constant 0.000000e+00 : bf16
    %0 = vector.broadcast %cst : bf16 to vector<1x18x18x128xbf16>
    %c0 = arith.constant 0 : index
    %c0_0 = arith.constant 0 : index
    %c0_1 = arith.constant 0 : index
    %c0_2 = arith.constant 0 : index
    %1 = vector.load %arg4[%c0, %c0_0, %c0_1, %c0_2] : memref<1x18x18x128xbf16, #tpu.memory_space<vmem>>, vector<1x18x18x128xbf16>
    tpu.vector_store %arg4[%c0, %c0_0, %c0_1, %c0_2], %0 {strides = array<i32>} : memref<1x18x18x128xbf16, #tpu.memory_space<vmem>>, vector<1x18x18x128xbf16>,
    %c0_i32 = arith.constant 0 : i32
    %c14_i32 = arith.constant 14 : i32
    %2 = arith.addi %c0_i32, %c14_i32 : i32
    %c1_i32 = arith.constant 1 : i32
    scf.for %arg7 = %c0_i32 to %2 step %c1_i32  : i32 {
      %c2_i32 = arith.constant 2 : i32
      %3 = arith.muli %c2_i32, %arg7 : i32
      %c0_i32_4 = arith.constant 0 : i32
      %4 = arith.addi %3, %c0_i32_4 : i32
      %c0_i32_5 = arith.constant 0 : i32
      %5 = arith.addi %4, %c0_i32_5 : i32
      %c0_6 = arith.constant 0 : index
      %6 = arith.index_cast %5 : i32 to index
      %c0_7 = arith.constant 0 : index
      %c0_8 = arith.constant 0 : index
      %7 = vector.load %arg1[%c0_6, %6, %c0_7, %c0_8] : memref<1x32x32x1xbf16, #tpu.memory_space<vmem>>, vector<1x1x32x1xbf16>
      %8 = vector.shape_cast %7 : vector<1x1x32x1xbf16> to vector<32x1xbf16>
      %9 = vector.extract_strided_slice %8 {offsets = [0, 0], sizes = [28, 1], strides = [1, 1]} : vector<32x1xbf16> to vector<28x1xbf16>
      %c0_9 = arith.constant 0 : index
      %c0_10 = arith.constant 0 : index
      %c0_11 = arith.constant 0 : index
      %10 = vector.load %arg5[%c0_9, %c0_10, %c0_11] : memref<2x28x25xbf16, #tpu.memory_space<vmem>>, vector<1x28x1xbf16>
      %11 = vector.shape_cast %10 : vector<1x28x1xbf16> to vector<28x1xbf16>
      %12 = vector.shape_cast %9 : vector<28x1xbf16> to vector<1x28x1xbf16>
      tpu.vector_store %arg5[%c0_9, %c0_10, %c0_11], %12 {strides = array<i32>} : memref<2x28x25xbf16, #tpu.memory_space<vmem>>, vector<1x28x1xbf16>,
      %13 = vector.extract_strided_slice %8 {offsets = [1, 0], sizes = [28, 1], strides = [1, 1]} : vector<32x1xbf16> to vector<28x1xbf16>
      %c0_12 = arith.constant 0 : index
      %c0_13 = arith.constant 0 : index
      %c1 = arith.constant 1 : index
      %14 = vector.load %arg5[%c0_12, %c0_13, %c1] : memref<2x28x25xbf16, #tpu.memory_space<vmem>>, vector<1x28x1xbf16>
      %15 = vector.shape_cast %14 : vector<1x28x1xbf16> to vector<28x1xbf16>
      %16 = vector.shape_cast %13 : vector<28x1xbf16> to vector<1x28x1xbf16>
      tpu.vector_store %arg5[%c0_12, %c0_13, %c1], %16 {strides = array<i32>} : memref<2x28x25xbf16, #tpu.memory_space<vmem>>, vector<1x28x1xbf16>,
      %17 = vector.extract_strided_slice %8 {offsets = [2, 0], sizes = [28, 1], strides = [1, 1]} : vector<32x1xbf16> to vector<28x1xbf16>
      %c0_14 = arith.constant 0 : index
      %c0_15 = arith.constant 0 : index
      %c2 = arith.constant 2 : index
      %18 = vector.load %arg5[%c0_14, %c0_15, %c2] : memref<2x28x25xbf16, #tpu.memory_space<vmem>>, vector<1x28x1xbf16>
      %19 = vector.shape_cast %18 : vector<1x28x1xbf16> to vector<28x1xbf16>
      %20 = vector.shape_cast %17 : vector<28x1xbf16> to vector<1x28x1xbf16>
      tpu.vector_store %arg5[%c0_14, %c0_15, %c2], %20 {strides = array<i32>} : memref<2x28x25xbf16, #tpu.memory_space<vmem>>, vector<1x28x1xbf16>,
      %21 = vector.extract_strided_slice %8 {offsets = [3, 0], sizes = [28, 1], strides = [1, 1]} : vector<32x1xbf16> to vector<28x1xbf16>
      %c0_16 = arith.constant 0 : index
      %c0_17 = arith.constant 0 : index
      %c3 = arith.constant 3 : index
      %22 = vector.load %arg5[%c0_16, %c0_17, %c3] : memref<2x28x25xbf16, #tpu.memory_space<vmem>>, vector<1x28x1xbf16>
      %23 = vector.shape_cast %22 : vector<1x28x1xbf16> to vector<28x1xbf16>
      %24 = vector.shape_cast %21 : vector<28x1xbf16> to vector<1x28x1xbf16>
      tpu.vector_store %arg5[%c0_16, %c0_17, %c3], %24 {strides = array<i32>} : memref<2x28x25xbf16, #tpu.memory_space<vmem>>, vector<1x28x1xbf16>,
      %25 = vector.extract_strided_slice %8 {offsets = [4, 0], sizes = [28, 1], strides = [1, 1]} : vector<32x1xbf16> to vector<28x1xbf16>
      %c0_18 = arith.constant 0 : index
      %c0_19 = arith.constant 0 : index
      %c4 = arith.constant 4 : index
      %26 = vector.load %arg5[%c0_18, %c0_19, %c4] : memref<2x28x25xbf16, #tpu.memory_space<vmem>>, vector<1x28x1xbf16>
      %27 = vector.shape_cast %26 : vector<1x28x1xbf16> to vector<28x1xbf16>
      %28 = vector.shape_cast %25 : vector<28x1xbf16> to vector<1x28x1xbf16>
      tpu.vector_store %arg5[%c0_18, %c0_19, %c4], %28 {strides = array<i32>} : memref<2x28x25xbf16, #tpu.memory_space<vmem>>, vector<1x28x1xbf16>,
      %c2_i32_20 = arith.constant 2 : i32
      %29 = arith.muli %c2_i32_20, %arg7 : i32
      %c0_i32_21 = arith.constant 0 : i32
      %30 = arith.addi %29, %c0_i32_21 : i32
      %c1_i32_22 = arith.constant 1 : i32
      %31 = arith.addi %30, %c1_i32_22 : i32
      %c0_23 = arith.constant 0 : index
      %32 = arith.index_cast %31 : i32 to index
      %c0_24 = arith.constant 0 : index
      %c0_25 = arith.constant 0 : index
      %33 = vector.load %arg1[%c0_23, %32, %c0_24, %c0_25] : memref<1x32x32x1xbf16, #tpu.memory_space<vmem>>, vector<1x1x32x1xbf16>
      %34 = vector.shape_cast %33 : vector<1x1x32x1xbf16> to vector<32x1xbf16>
      %35 = vector.extract_strided_slice %34 {offsets = [0, 0], sizes = [28, 1], strides = [1, 1]} : vector<32x1xbf16> to vector<28x1xbf16>
      %c0_26 = arith.constant 0 : index
      %c0_27 = arith.constant 0 : index
      %c5 = arith.constant 5 : index
      %36 = vector.load %arg5[%c0_26, %c0_27, %c5] : memref<2x28x25xbf16, #tpu.memory_space<vmem>>, vector<1x28x1xbf16>
      %37 = vector.shape_cast %36 : vector<1x28x1xbf16> to vector<28x1xbf16>
      %38 = vector.shape_cast %35 : vector<28x1xbf16> to vector<1x28x1xbf16>
      tpu.vector_store %arg5[%c0_26, %c0_27, %c5], %38 {strides = array<i32>} : memref<2x28x25xbf16, #tpu.memory_space<vmem>>, vector<1x28x1xbf16>,
      %39 = vector.extract_strided_slice %34 {offsets = [1, 0], sizes = [28, 1], strides = [1, 1]} : vector<32x1xbf16> to vector<28x1xbf16>
      %c0_28 = arith.constant 0 : index
      %c0_29 = arith.constant 0 : index
      %c6 = arith.constant 6 : index
      %40 = vector.load %arg5[%c0_28, %c0_29, %c6] : memref<2x28x25xbf16, #tpu.memory_space<vmem>>, vector<1x28x1xbf16>
      %41 = vector.shape_cast %40 : vector<1x28x1xbf16> to vector<28x1xbf16>
      %42 = vector.shape_cast %39 : vector<28x1xbf16> to vector<1x28x1xbf16>
      tpu.vector_store %arg5[%c0_28, %c0_29, %c6], %42 {strides = array<i32>} : memref<2x28x25xbf16, #tpu.memory_space<vmem>>, vector<1x28x1xbf16>,
      %43 = vector.extract_strided_slice %34 {offsets = [2, 0], sizes = [28, 1], strides = [1, 1]} : vector<32x1xbf16> to vector<28x1xbf16>
      %c0_30 = arith.constant 0 : index
      %c0_31 = arith.constant 0 : index
      %c7 = arith.constant 7 : index
      %44 = vector.load %arg5[%c0_30, %c0_31, %c7] : memref<2x28x25xbf16, #tpu.memory_space<vmem>>, vector<1x28x1xbf16>
      %45 = vector.shape_cast %44 : vector<1x28x1xbf16> to vector<28x1xbf16>
      %46 = vector.shape_cast %43 : vector<28x1xbf16> to vector<1x28x1xbf16>
      tpu.vector_store %arg5[%c0_30, %c0_31, %c7], %46 {strides = array<i32>} : memref<2x28x25xbf16, #tpu.memory_space<vmem>>, vector<1x28x1xbf16>,
      %47 = vector.extract_strided_slice %34 {offsets = [3, 0], sizes = [28, 1], strides = [1, 1]} : vector<32x1xbf16> to vector<28x1xbf16>
      %c0_32 = arith.constant 0 : index
      %c0_33 = arith.constant 0 : index
      %c8 = arith.constant 8 : index
      %48 = vector.load %arg5[%c0_32, %c0_33, %c8] : memref<2x28x25xbf16, #tpu.memory_space<vmem>>, vector<1x28x1xbf16>
      %49 = vector.shape_cast %48 : vector<1x28x1xbf16> to vector<28x1xbf16>
      %50 = vector.shape_cast %47 : vector<28x1xbf16> to vector<1x28x1xbf16>
      tpu.vector_store %arg5[%c0_32, %c0_33, %c8], %50 {strides = array<i32>} : memref<2x28x25xbf16, #tpu.memory_space<vmem>>, vector<1x28x1xbf16>,
      %51 = vector.extract_strided_slice %34 {offsets = [4, 0], sizes = [28, 1], strides = [1, 1]} : vector<32x1xbf16> to vector<28x1xbf16>
      %c0_34 = arith.constant 0 : index
      %c0_35 = arith.constant 0 : index
      %c9 = arith.constant 9 : index
      %52 = vector.load %arg5[%c0_34, %c0_35, %c9] : memref<2x28x25xbf16, #tpu.memory_space<vmem>>, vector<1x28x1xbf16>
      %53 = vector.shape_cast %52 : vector<1x28x1xbf16> to vector<28x1xbf16>
      %54 = vector.shape_cast %51 : vector<28x1xbf16> to vector<1x28x1xbf16>
      tpu.vector_store %arg5[%c0_34, %c0_35, %c9], %54 {strides = array<i32>} : memref<2x28x25xbf16, #tpu.memory_space<vmem>>, vector<1x28x1xbf16>,
      %c2_i32_36 = arith.constant 2 : i32
      %55 = arith.muli %c2_i32_36, %arg7 : i32
      %c0_i32_37 = arith.constant 0 : i32
      %56 = arith.addi %55, %c0_i32_37 : i32
      %c2_i32_38 = arith.constant 2 : i32
      %57 = arith.addi %56, %c2_i32_38 : i32
      %c0_39 = arith.constant 0 : index
      %58 = arith.index_cast %57 : i32 to index
      %c0_40 = arith.constant 0 : index
      %c0_41 = arith.constant 0 : index
      %59 = vector.load %arg1[%c0_39, %58, %c0_40, %c0_41] : memref<1x32x32x1xbf16, #tpu.memory_space<vmem>>, vector<1x1x32x1xbf16>
      %60 = vector.shape_cast %59 : vector<1x1x32x1xbf16> to vector<32x1xbf16>
      %61 = vector.extract_strided_slice %60 {offsets = [0, 0], sizes = [28, 1], strides = [1, 1]} : vector<32x1xbf16> to vector<28x1xbf16>
      %c0_42 = arith.constant 0 : index
      %c0_43 = arith.constant 0 : index
      %c10 = arith.constant 10 : index
      %62 = vector.load %arg5[%c0_42, %c0_43, %c10] : memref<2x28x25xbf16, #tpu.memory_space<vmem>>, vector<1x28x1xbf16>
      %63 = vector.shape_cast %62 : vector<1x28x1xbf16> to vector<28x1xbf16>
      %64 = vector.shape_cast %61 : vector<28x1xbf16> to vector<1x28x1xbf16>
      tpu.vector_store %arg5[%c0_42, %c0_43, %c10], %64 {strides = array<i32>} : memref<2x28x25xbf16, #tpu.memory_space<vmem>>, vector<1x28x1xbf16>,
      %65 = vector.extract_strided_slice %60 {offsets = [1, 0], sizes = [28, 1], strides = [1, 1]} : vector<32x1xbf16> to vector<28x1xbf16>
      %c0_44 = arith.constant 0 : index
      %c0_45 = arith.constant 0 : index
      %c11 = arith.constant 11 : index
      %66 = vector.load %arg5[%c0_44, %c0_45, %c11] : memref<2x28x25xbf16, #tpu.memory_space<vmem>>, vector<1x28x1xbf16>
      %67 = vector.shape_cast %66 : vector<1x28x1xbf16> to vector<28x1xbf16>
      %68 = vector.shape_cast %65 : vector<28x1xbf16> to vector<1x28x1xbf16>
      tpu.vector_store %arg5[%c0_44, %c0_45, %c11], %68 {strides = array<i32>} : memref<2x28x25xbf16, #tpu.memory_space<vmem>>, vector<1x28x1xbf16>,
      %69 = vector.extract_strided_slice %60 {offsets = [2, 0], sizes = [28, 1], strides = [1, 1]} : vector<32x1xbf16> to vector<28x1xbf16>
      %c0_46 = arith.constant 0 : index
      %c0_47 = arith.constant 0 : index
      %c12 = arith.constant 12 : index
      %70 = vector.load %arg5[%c0_46, %c0_47, %c12] : memref<2x28x25xbf16, #tpu.memory_space<vmem>>, vector<1x28x1xbf16>
      %71 = vector.shape_cast %70 : vector<1x28x1xbf16> to vector<28x1xbf16>
      %72 = vector.shape_cast %69 : vector<28x1xbf16> to vector<1x28x1xbf16>
      tpu.vector_store %arg5[%c0_46, %c0_47, %c12], %72 {strides = array<i32>} : memref<2x28x25xbf16, #tpu.memory_space<vmem>>, vector<1x28x1xbf16>,
      %73 = vector.extract_strided_slice %60 {offsets = [3, 0], sizes = [28, 1], strides = [1, 1]} : vector<32x1xbf16> to vector<28x1xbf16>
      %c0_48 = arith.constant 0 : index
      %c0_49 = arith.constant 0 : index
      %c13 = arith.constant 13 : index
      %74 = vector.load %arg5[%c0_48, %c0_49, %c13] : memref<2x28x25xbf16, #tpu.memory_space<vmem>>, vector<1x28x1xbf16>
      %75 = vector.shape_cast %74 : vector<1x28x1xbf16> to vector<28x1xbf16>
      %76 = vector.shape_cast %73 : vector<28x1xbf16> to vector<1x28x1xbf16>
      tpu.vector_store %arg5[%c0_48, %c0_49, %c13], %76 {strides = array<i32>} : memref<2x28x25xbf16, #tpu.memory_space<vmem>>, vector<1x28x1xbf16>,
      %77 = vector.extract_strided_slice %60 {offsets = [4, 0], sizes = [28, 1], strides = [1, 1]} : vector<32x1xbf16> to vector<28x1xbf16>
      %c0_50 = arith.constant 0 : index
      %c0_51 = arith.constant 0 : index
      %c14 = arith.constant 14 : index
      %78 = vector.load %arg5[%c0_50, %c0_51, %c14] : memref<2x28x25xbf16, #tpu.memory_space<vmem>>, vector<1x28x1xbf16>
      %79 = vector.shape_cast %78 : vector<1x28x1xbf16> to vector<28x1xbf16>
      %80 = vector.shape_cast %77 : vector<28x1xbf16> to vector<1x28x1xbf16>
      tpu.vector_store %arg5[%c0_50, %c0_51, %c14], %80 {strides = array<i32>} : memref<2x28x25xbf16, #tpu.memory_space<vmem>>, vector<1x28x1xbf16>,
      %c2_i32_52 = arith.constant 2 : i32
      %81 = arith.muli %c2_i32_52, %arg7 : i32
      %c0_i32_53 = arith.constant 0 : i32
      %82 = arith.addi %81, %c0_i32_53 : i32
      %c3_i32 = arith.constant 3 : i32
      %83 = arith.addi %82, %c3_i32 : i32
      %c0_54 = arith.constant 0 : index
      %84 = arith.index_cast %83 : i32 to index
      %c0_55 = arith.constant 0 : index
      %c0_56 = arith.constant 0 : index
      %85 = vector.load %arg1[%c0_54, %84, %c0_55, %c0_56] : memref<1x32x32x1xbf16, #tpu.memory_space<vmem>>, vector<1x1x32x1xbf16>
      %86 = vector.shape_cast %85 : vector<1x1x32x1xbf16> to vector<32x1xbf16>
      %87 = vector.extract_strided_slice %86 {offsets = [0, 0], sizes = [28, 1], strides = [1, 1]} : vector<32x1xbf16> to vector<28x1xbf16>
      %c0_57 = arith.constant 0 : index
      %c0_58 = arith.constant 0 : index
      %c15 = arith.constant 15 : index
      %88 = vector.load %arg5[%c0_57, %c0_58, %c15] : memref<2x28x25xbf16, #tpu.memory_space<vmem>>, vector<1x28x1xbf16>
      %89 = vector.shape_cast %88 : vector<1x28x1xbf16> to vector<28x1xbf16>
      %90 = vector.shape_cast %87 : vector<28x1xbf16> to vector<1x28x1xbf16>
      tpu.vector_store %arg5[%c0_57, %c0_58, %c15], %90 {strides = array<i32>} : memref<2x28x25xbf16, #tpu.memory_space<vmem>>, vector<1x28x1xbf16>,
      %91 = vector.extract_strided_slice %86 {offsets = [1, 0], sizes = [28, 1], strides = [1, 1]} : vector<32x1xbf16> to vector<28x1xbf16>
      %c0_59 = arith.constant 0 : index
      %c0_60 = arith.constant 0 : index
      %c16 = arith.constant 16 : index
      %92 = vector.load %arg5[%c0_59, %c0_60, %c16] : memref<2x28x25xbf16, #tpu.memory_space<vmem>>, vector<1x28x1xbf16>
      %93 = vector.shape_cast %92 : vector<1x28x1xbf16> to vector<28x1xbf16>
      %94 = vector.shape_cast %91 : vector<28x1xbf16> to vector<1x28x1xbf16>
      tpu.vector_store %arg5[%c0_59, %c0_60, %c16], %94 {strides = array<i32>} : memref<2x28x25xbf16, #tpu.memory_space<vmem>>, vector<1x28x1xbf16>,
      %95 = vector.extract_strided_slice %86 {offsets = [2, 0], sizes = [28, 1], strides = [1, 1]} : vector<32x1xbf16> to vector<28x1xbf16>
      %c0_61 = arith.constant 0 : index
      %c0_62 = arith.constant 0 : index
      %c17 = arith.constant 17 : index
      %96 = vector.load %arg5[%c0_61, %c0_62, %c17] : memref<2x28x25xbf16, #tpu.memory_space<vmem>>, vector<1x28x1xbf16>
      %97 = vector.shape_cast %96 : vector<1x28x1xbf16> to vector<28x1xbf16>
      %98 = vector.shape_cast %95 : vector<28x1xbf16> to vector<1x28x1xbf16>
      tpu.vector_store %arg5[%c0_61, %c0_62, %c17], %98 {strides = array<i32>} : memref<2x28x25xbf16, #tpu.memory_space<vmem>>, vector<1x28x1xbf16>,
      %99 = vector.extract_strided_slice %86 {offsets = [3, 0], sizes = [28, 1], strides = [1, 1]} : vector<32x1xbf16> to vector<28x1xbf16>
      %c0_63 = arith.constant 0 : index
      %c0_64 = arith.constant 0 : index
      %c18 = arith.constant 18 : index
      %100 = vector.load %arg5[%c0_63, %c0_64, %c18] : memref<2x28x25xbf16, #tpu.memory_space<vmem>>, vector<1x28x1xbf16>
      %101 = vector.shape_cast %100 : vector<1x28x1xbf16> to vector<28x1xbf16>
      %102 = vector.shape_cast %99 : vector<28x1xbf16> to vector<1x28x1xbf16>
      tpu.vector_store %arg5[%c0_63, %c0_64, %c18], %102 {strides = array<i32>} : memref<2x28x25xbf16, #tpu.memory_space<vmem>>, vector<1x28x1xbf16>,
      %103 = vector.extract_strided_slice %86 {offsets = [4, 0], sizes = [28, 1], strides = [1, 1]} : vector<32x1xbf16> to vector<28x1xbf16>
      %c0_65 = arith.constant 0 : index
      %c0_66 = arith.constant 0 : index
      %c19 = arith.constant 19 : index
      %104 = vector.load %arg5[%c0_65, %c0_66, %c19] : memref<2x28x25xbf16, #tpu.memory_space<vmem>>, vector<1x28x1xbf16>
      %105 = vector.shape_cast %104 : vector<1x28x1xbf16> to vector<28x1xbf16>
      %106 = vector.shape_cast %103 : vector<28x1xbf16> to vector<1x28x1xbf16>
      tpu.vector_store %arg5[%c0_65, %c0_66, %c19], %106 {strides = array<i32>} : memref<2x28x25xbf16, #tpu.memory_space<vmem>>, vector<1x28x1xbf16>,
      %c2_i32_67 = arith.constant 2 : i32
      %107 = arith.muli %c2_i32_67, %arg7 : i32
      %c0_i32_68 = arith.constant 0 : i32
      %108 = arith.addi %107, %c0_i32_68 : i32
      %c4_i32 = arith.constant 4 : i32
      %109 = arith.addi %108, %c4_i32 : i32
      %c0_69 = arith.constant 0 : index
      %110 = arith.index_cast %109 : i32 to index
      %c0_70 = arith.constant 0 : index
      %c0_71 = arith.constant 0 : index
      %111 = vector.load %arg1[%c0_69, %110, %c0_70, %c0_71] : memref<1x32x32x1xbf16, #tpu.memory_space<vmem>>, vector<1x1x32x1xbf16>
      %112 = vector.shape_cast %111 : vector<1x1x32x1xbf16> to vector<32x1xbf16>
      %113 = vector.extract_strided_slice %112 {offsets = [0, 0], sizes = [28, 1], strides = [1, 1]} : vector<32x1xbf16> to vector<28x1xbf16>
      %c0_72 = arith.constant 0 : index
      %c0_73 = arith.constant 0 : index
      %c20 = arith.constant 20 : index
      %114 = vector.load %arg5[%c0_72, %c0_73, %c20] : memref<2x28x25xbf16, #tpu.memory_space<vmem>>, vector<1x28x1xbf16>
      %115 = vector.shape_cast %114 : vector<1x28x1xbf16> to vector<28x1xbf16>
      %116 = vector.shape_cast %113 : vector<28x1xbf16> to vector<1x28x1xbf16>
      tpu.vector_store %arg5[%c0_72, %c0_73, %c20], %116 {strides = array<i32>} : memref<2x28x25xbf16, #tpu.memory_space<vmem>>, vector<1x28x1xbf16>,
      %117 = vector.extract_strided_slice %112 {offsets = [1, 0], sizes = [28, 1], strides = [1, 1]} : vector<32x1xbf16> to vector<28x1xbf16>
      %c0_74 = arith.constant 0 : index
      %c0_75 = arith.constant 0 : index
      %c21 = arith.constant 21 : index
      %118 = vector.load %arg5[%c0_74, %c0_75, %c21] : memref<2x28x25xbf16, #tpu.memory_space<vmem>>, vector<1x28x1xbf16>
      %119 = vector.shape_cast %118 : vector<1x28x1xbf16> to vector<28x1xbf16>
      %120 = vector.shape_cast %117 : vector<28x1xbf16> to vector<1x28x1xbf16>
      tpu.vector_store %arg5[%c0_74, %c0_75, %c21], %120 {strides = array<i32>} : memref<2x28x25xbf16, #tpu.memory_space<vmem>>, vector<1x28x1xbf16>,
      %121 = vector.extract_strided_slice %112 {offsets = [2, 0], sizes = [28, 1], strides = [1, 1]} : vector<32x1xbf16> to vector<28x1xbf16>
      %c0_76 = arith.constant 0 : index
      %c0_77 = arith.constant 0 : index
      %c22 = arith.constant 22 : index
      %122 = vector.load %arg5[%c0_76, %c0_77, %c22] : memref<2x28x25xbf16, #tpu.memory_space<vmem>>, vector<1x28x1xbf16>
      %123 = vector.shape_cast %122 : vector<1x28x1xbf16> to vector<28x1xbf16>
      %124 = vector.shape_cast %121 : vector<28x1xbf16> to vector<1x28x1xbf16>
      tpu.vector_store %arg5[%c0_76, %c0_77, %c22], %124 {strides = array<i32>} : memref<2x28x25xbf16, #tpu.memory_space<vmem>>, vector<1x28x1xbf16>,
      %125 = vector.extract_strided_slice %112 {offsets = [3, 0], sizes = [28, 1], strides = [1, 1]} : vector<32x1xbf16> to vector<28x1xbf16>
      %c0_78 = arith.constant 0 : index
      %c0_79 = arith.constant 0 : index
      %c23 = arith.constant 23 : index
      %126 = vector.load %arg5[%c0_78, %c0_79, %c23] : memref<2x28x25xbf16, #tpu.memory_space<vmem>>, vector<1x28x1xbf16>
      %127 = vector.shape_cast %126 : vector<1x28x1xbf16> to vector<28x1xbf16>
      %128 = vector.shape_cast %125 : vector<28x1xbf16> to vector<1x28x1xbf16>
      tpu.vector_store %arg5[%c0_78, %c0_79, %c23], %128 {strides = array<i32>} : memref<2x28x25xbf16, #tpu.memory_space<vmem>>, vector<1x28x1xbf16>,
      %129 = vector.extract_strided_slice %112 {offsets = [4, 0], sizes = [28, 1], strides = [1, 1]} : vector<32x1xbf16> to vector<28x1xbf16>
      %c0_80 = arith.constant 0 : index
      %c0_81 = arith.constant 0 : index
      %c24 = arith.constant 24 : index
      %130 = vector.load %arg5[%c0_80, %c0_81, %c24] : memref<2x28x25xbf16, #tpu.memory_space<vmem>>, vector<1x28x1xbf16>
      %131 = vector.shape_cast %130 : vector<1x28x1xbf16> to vector<28x1xbf16>
      %132 = vector.shape_cast %129 : vector<28x1xbf16> to vector<1x28x1xbf16>
      tpu.vector_store %arg5[%c0_80, %c0_81, %c24], %132 {strides = array<i32>} : memref<2x28x25xbf16, #tpu.memory_space<vmem>>, vector<1x28x1xbf16>,
      %c2_i32_82 = arith.constant 2 : i32
      %133 = arith.muli %c2_i32_82, %arg7 : i32
      %c1_i32_83 = arith.constant 1 : i32
      %134 = arith.addi %133, %c1_i32_83 : i32
      %c0_i32_84 = arith.constant 0 : i32
      %135 = arith.addi %134, %c0_i32_84 : i32
      %c0_85 = arith.constant 0 : index
      %136 = arith.index_cast %135 : i32 to index
      %c0_86 = arith.constant 0 : index
      %c0_87 = arith.constant 0 : index
      %137 = vector.load %arg1[%c0_85, %136, %c0_86, %c0_87] : memref<1x32x32x1xbf16, #tpu.memory_space<vmem>>, vector<1x1x32x1xbf16>
      %138 = vector.shape_cast %137 : vector<1x1x32x1xbf16> to vector<32x1xbf16>
      %139 = vector.extract_strided_slice %138 {offsets = [0, 0], sizes = [28, 1], strides = [1, 1]} : vector<32x1xbf16> to vector<28x1xbf16>
      %c1_88 = arith.constant 1 : index
      %c0_89 = arith.constant 0 : index
      %c0_90 = arith.constant 0 : index
      %140 = vector.load %arg5[%c1_88, %c0_89, %c0_90] : memref<2x28x25xbf16, #tpu.memory_space<vmem>>, vector<1x28x1xbf16>
      %141 = vector.shape_cast %140 : vector<1x28x1xbf16> to vector<28x1xbf16>
      %142 = vector.shape_cast %139 : vector<28x1xbf16> to vector<1x28x1xbf16>
      tpu.vector_store %arg5[%c1_88, %c0_89, %c0_90], %142 {strides = array<i32>} : memref<2x28x25xbf16, #tpu.memory_space<vmem>>, vector<1x28x1xbf16>,
      %143 = vector.extract_strided_slice %138 {offsets = [1, 0], sizes = [28, 1], strides = [1, 1]} : vector<32x1xbf16> to vector<28x1xbf16>
      %c1_91 = arith.constant 1 : index
      %c0_92 = arith.constant 0 : index
      %c1_93 = arith.constant 1 : index
      %144 = vector.load %arg5[%c1_91, %c0_92, %c1_93] : memref<2x28x25xbf16, #tpu.memory_space<vmem>>, vector<1x28x1xbf16>
      %145 = vector.shape_cast %144 : vector<1x28x1xbf16> to vector<28x1xbf16>
      %146 = vector.shape_cast %143 : vector<28x1xbf16> to vector<1x28x1xbf16>
      tpu.vector_store %arg5[%c1_91, %c0_92, %c1_93], %146 {strides = array<i32>} : memref<2x28x25xbf16, #tpu.memory_space<vmem>>, vector<1x28x1xbf16>,
      %147 = vector.extract_strided_slice %138 {offsets = [2, 0], sizes = [28, 1], strides = [1, 1]} : vector<32x1xbf16> to vector<28x1xbf16>
      %c1_94 = arith.constant 1 : index
      %c0_95 = arith.constant 0 : index
      %c2_96 = arith.constant 2 : index
      %148 = vector.load %arg5[%c1_94, %c0_95, %c2_96] : memref<2x28x25xbf16, #tpu.memory_space<vmem>>, vector<1x28x1xbf16>
      %149 = vector.shape_cast %148 : vector<1x28x1xbf16> to vector<28x1xbf16>
      %150 = vector.shape_cast %147 : vector<28x1xbf16> to vector<1x28x1xbf16>
      tpu.vector_store %arg5[%c1_94, %c0_95, %c2_96], %150 {strides = array<i32>} : memref<2x28x25xbf16, #tpu.memory_space<vmem>>, vector<1x28x1xbf16>,
      %151 = vector.extract_strided_slice %138 {offsets = [3, 0], sizes = [28, 1], strides = [1, 1]} : vector<32x1xbf16> to vector<28x1xbf16>
      %c1_97 = arith.constant 1 : index
      %c0_98 = arith.constant 0 : index
      %c3_99 = arith.constant 3 : index
      %152 = vector.load %arg5[%c1_97, %c0_98, %c3_99] : memref<2x28x25xbf16, #tpu.memory_space<vmem>>, vector<1x28x1xbf16>
      %153 = vector.shape_cast %152 : vector<1x28x1xbf16> to vector<28x1xbf16>
      %154 = vector.shape_cast %151 : vector<28x1xbf16> to vector<1x28x1xbf16>
      tpu.vector_store %arg5[%c1_97, %c0_98, %c3_99], %154 {strides = array<i32>} : memref<2x28x25xbf16, #tpu.memory_space<vmem>>, vector<1x28x1xbf16>,
      %155 = vector.extract_strided_slice %138 {offsets = [4, 0], sizes = [28, 1], strides = [1, 1]} : vector<32x1xbf16> to vector<28x1xbf16>
      %c1_100 = arith.constant 1 : index
      %c0_101 = arith.constant 0 : index
      %c4_102 = arith.constant 4 : index
      %156 = vector.load %arg5[%c1_100, %c0_101, %c4_102] : memref<2x28x25xbf16, #tpu.memory_space<vmem>>, vector<1x28x1xbf16>
      %157 = vector.shape_cast %156 : vector<1x28x1xbf16> to vector<28x1xbf16>
      %158 = vector.shape_cast %155 : vector<28x1xbf16> to vector<1x28x1xbf16>
      tpu.vector_store %arg5[%c1_100, %c0_101, %c4_102], %158 {strides = array<i32>} : memref<2x28x25xbf16, #tpu.memory_space<vmem>>, vector<1x28x1xbf16>,
      %c2_i32_103 = arith.constant 2 : i32
      %159 = arith.muli %c2_i32_103, %arg7 : i32
      %c1_i32_104 = arith.constant 1 : i32
      %160 = arith.addi %159, %c1_i32_104 : i32
      %c1_i32_105 = arith.constant 1 : i32
      %161 = arith.addi %160, %c1_i32_105 : i32
      %c0_106 = arith.constant 0 : index
      %162 = arith.index_cast %161 : i32 to index
      %c0_107 = arith.constant 0 : index
      %c0_108 = arith.constant 0 : index
      %163 = vector.load %arg1[%c0_106, %162, %c0_107, %c0_108] : memref<1x32x32x1xbf16, #tpu.memory_space<vmem>>, vector<1x1x32x1xbf16>
      %164 = vector.shape_cast %163 : vector<1x1x32x1xbf16> to vector<32x1xbf16>
      %165 = vector.extract_strided_slice %164 {offsets = [0, 0], sizes = [28, 1], strides = [1, 1]} : vector<32x1xbf16> to vector<28x1xbf16>
      %c1_109 = arith.constant 1 : index
      %c0_110 = arith.constant 0 : index
      %c5_111 = arith.constant 5 : index
      %166 = vector.load %arg5[%c1_109, %c0_110, %c5_111] : memref<2x28x25xbf16, #tpu.memory_space<vmem>>, vector<1x28x1xbf16>
      %167 = vector.shape_cast %166 : vector<1x28x1xbf16> to vector<28x1xbf16>
      %168 = vector.shape_cast %165 : vector<28x1xbf16> to vector<1x28x1xbf16>
      tpu.vector_store %arg5[%c1_109, %c0_110, %c5_111], %168 {strides = array<i32>} : memref<2x28x25xbf16, #tpu.memory_space<vmem>>, vector<1x28x1xbf16>,
      %169 = vector.extract_strided_slice %164 {offsets = [1, 0], sizes = [28, 1], strides = [1, 1]} : vector<32x1xbf16> to vector<28x1xbf16>
      %c1_112 = arith.constant 1 : index
      %c0_113 = arith.constant 0 : index
      %c6_114 = arith.constant 6 : index
      %170 = vector.load %arg5[%c1_112, %c0_113, %c6_114] : memref<2x28x25xbf16, #tpu.memory_space<vmem>>, vector<1x28x1xbf16>
      %171 = vector.shape_cast %170 : vector<1x28x1xbf16> to vector<28x1xbf16>
      %172 = vector.shape_cast %169 : vector<28x1xbf16> to vector<1x28x1xbf16>
      tpu.vector_store %arg5[%c1_112, %c0_113, %c6_114], %172 {strides = array<i32>} : memref<2x28x25xbf16, #tpu.memory_space<vmem>>, vector<1x28x1xbf16>,
      %173 = vector.extract_strided_slice %164 {offsets = [2, 0], sizes = [28, 1], strides = [1, 1]} : vector<32x1xbf16> to vector<28x1xbf16>
      %c1_115 = arith.constant 1 : index
      %c0_116 = arith.constant 0 : index
      %c7_117 = arith.constant 7 : index
      %174 = vector.load %arg5[%c1_115, %c0_116, %c7_117] : memref<2x28x25xbf16, #tpu.memory_space<vmem>>, vector<1x28x1xbf16>
      %175 = vector.shape_cast %174 : vector<1x28x1xbf16> to vector<28x1xbf16>
      %176 = vector.shape_cast %173 : vector<28x1xbf16> to vector<1x28x1xbf16>
      tpu.vector_store %arg5[%c1_115, %c0_116, %c7_117], %176 {strides = array<i32>} : memref<2x28x25xbf16, #tpu.memory_space<vmem>>, vector<1x28x1xbf16>,
      %177 = vector.extract_strided_slice %164 {offsets = [3, 0], sizes = [28, 1], strides = [1, 1]} : vector<32x1xbf16> to vector<28x1xbf16>
      %c1_118 = arith.constant 1 : index
      %c0_119 = arith.constant 0 : index
      %c8_120 = arith.constant 8 : index
      %178 = vector.load %arg5[%c1_118, %c0_119, %c8_120] : memref<2x28x25xbf16, #tpu.memory_space<vmem>>, vector<1x28x1xbf16>
      %179 = vector.shape_cast %178 : vector<1x28x1xbf16> to vector<28x1xbf16>
      %180 = vector.shape_cast %177 : vector<28x1xbf16> to vector<1x28x1xbf16>
      tpu.vector_store %arg5[%c1_118, %c0_119, %c8_120], %180 {strides = array<i32>} : memref<2x28x25xbf16, #tpu.memory_space<vmem>>, vector<1x28x1xbf16>,
      %181 = vector.extract_strided_slice %164 {offsets = [4, 0], sizes = [28, 1], strides = [1, 1]} : vector<32x1xbf16> to vector<28x1xbf16>
      %c1_121 = arith.constant 1 : index
      %c0_122 = arith.constant 0 : index
      %c9_123 = arith.constant 9 : index
      %182 = vector.load %arg5[%c1_121, %c0_122, %c9_123] : memref<2x28x25xbf16, #tpu.memory_space<vmem>>, vector<1x28x1xbf16>
      %183 = vector.shape_cast %182 : vector<1x28x1xbf16> to vector<28x1xbf16>
      %184 = vector.shape_cast %181 : vector<28x1xbf16> to vector<1x28x1xbf16>
      tpu.vector_store %arg5[%c1_121, %c0_122, %c9_123], %184 {strides = array<i32>} : memref<2x28x25xbf16, #tpu.memory_space<vmem>>, vector<1x28x1xbf16>,
      %c2_i32_124 = arith.constant 2 : i32
      %185 = arith.muli %c2_i32_124, %arg7 : i32
      %c1_i32_125 = arith.constant 1 : i32
      %186 = arith.addi %185, %c1_i32_125 : i32
      %c2_i32_126 = arith.constant 2 : i32
      %187 = arith.addi %186, %c2_i32_126 : i32
      %c0_127 = arith.constant 0 : index
      %188 = arith.index_cast %187 : i32 to index
      %c0_128 = arith.constant 0 : index
      %c0_129 = arith.constant 0 : index
      %189 = vector.load %arg1[%c0_127, %188, %c0_128, %c0_129] : memref<1x32x32x1xbf16, #tpu.memory_space<vmem>>, vector<1x1x32x1xbf16>
      %190 = vector.shape_cast %189 : vector<1x1x32x1xbf16> to vector<32x1xbf16>
      %191 = vector.extract_strided_slice %190 {offsets = [0, 0], sizes = [28, 1], strides = [1, 1]} : vector<32x1xbf16> to vector<28x1xbf16>
      %c1_130 = arith.constant 1 : index
      %c0_131 = arith.constant 0 : index
      %c10_132 = arith.constant 10 : index
      %192 = vector.load %arg5[%c1_130, %c0_131, %c10_132] : memref<2x28x25xbf16, #tpu.memory_space<vmem>>, vector<1x28x1xbf16>
      %193 = vector.shape_cast %192 : vector<1x28x1xbf16> to vector<28x1xbf16>
      %194 = vector.shape_cast %191 : vector<28x1xbf16> to vector<1x28x1xbf16>
      tpu.vector_store %arg5[%c1_130, %c0_131, %c10_132], %194 {strides = array<i32>} : memref<2x28x25xbf16, #tpu.memory_space<vmem>>, vector<1x28x1xbf16>,
      %195 = vector.extract_strided_slice %190 {offsets = [1, 0], sizes = [28, 1], strides = [1, 1]} : vector<32x1xbf16> to vector<28x1xbf16>
      %c1_133 = arith.constant 1 : index
      %c0_134 = arith.constant 0 : index
      %c11_135 = arith.constant 11 : index
      %196 = vector.load %arg5[%c1_133, %c0_134, %c11_135] : memref<2x28x25xbf16, #tpu.memory_space<vmem>>, vector<1x28x1xbf16>
      %197 = vector.shape_cast %196 : vector<1x28x1xbf16> to vector<28x1xbf16>
      %198 = vector.shape_cast %195 : vector<28x1xbf16> to vector<1x28x1xbf16>
      tpu.vector_store %arg5[%c1_133, %c0_134, %c11_135], %198 {strides = array<i32>} : memref<2x28x25xbf16, #tpu.memory_space<vmem>>, vector<1x28x1xbf16>,
      %199 = vector.extract_strided_slice %190 {offsets = [2, 0], sizes = [28, 1], strides = [1, 1]} : vector<32x1xbf16> to vector<28x1xbf16>
      %c1_136 = arith.constant 1 : index
      %c0_137 = arith.constant 0 : index
      %c12_138 = arith.constant 12 : index
      %200 = vector.load %arg5[%c1_136, %c0_137, %c12_138] : memref<2x28x25xbf16, #tpu.memory_space<vmem>>, vector<1x28x1xbf16>
      %201 = vector.shape_cast %200 : vector<1x28x1xbf16> to vector<28x1xbf16>
      %202 = vector.shape_cast %199 : vector<28x1xbf16> to vector<1x28x1xbf16>
      tpu.vector_store %arg5[%c1_136, %c0_137, %c12_138], %202 {strides = array<i32>} : memref<2x28x25xbf16, #tpu.memory_space<vmem>>, vector<1x28x1xbf16>,
      %203 = vector.extract_strided_slice %190 {offsets = [3, 0], sizes = [28, 1], strides = [1, 1]} : vector<32x1xbf16> to vector<28x1xbf16>
      %c1_139 = arith.constant 1 : index
      %c0_140 = arith.constant 0 : index
      %c13_141 = arith.constant 13 : index
      %204 = vector.load %arg5[%c1_139, %c0_140, %c13_141] : memref<2x28x25xbf16, #tpu.memory_space<vmem>>, vector<1x28x1xbf16>
      %205 = vector.shape_cast %204 : vector<1x28x1xbf16> to vector<28x1xbf16>
      %206 = vector.shape_cast %203 : vector<28x1xbf16> to vector<1x28x1xbf16>
      tpu.vector_store %arg5[%c1_139, %c0_140, %c13_141], %206 {strides = array<i32>} : memref<2x28x25xbf16, #tpu.memory_space<vmem>>, vector<1x28x1xbf16>,
      %207 = vector.extract_strided_slice %190 {offsets = [4, 0], sizes = [28, 1], strides = [1, 1]} : vector<32x1xbf16> to vector<28x1xbf16>
      %c1_142 = arith.constant 1 : index
      %c0_143 = arith.constant 0 : index
      %c14_144 = arith.constant 14 : index
      %208 = vector.load %arg5[%c1_142, %c0_143, %c14_144] : memref<2x28x25xbf16, #tpu.memory_space<vmem>>, vector<1x28x1xbf16>
      %209 = vector.shape_cast %208 : vector<1x28x1xbf16> to vector<28x1xbf16>
      %210 = vector.shape_cast %207 : vector<28x1xbf16> to vector<1x28x1xbf16>
      tpu.vector_store %arg5[%c1_142, %c0_143, %c14_144], %210 {strides = array<i32>} : memref<2x28x25xbf16, #tpu.memory_space<vmem>>, vector<1x28x1xbf16>,
      %c2_i32_145 = arith.constant 2 : i32
      %211 = arith.muli %c2_i32_145, %arg7 : i32
      %c1_i32_146 = arith.constant 1 : i32
      %212 = arith.addi %211, %c1_i32_146 : i32
      %c3_i32_147 = arith.constant 3 : i32
      %213 = arith.addi %212, %c3_i32_147 : i32
      %c0_148 = arith.constant 0 : index
      %214 = arith.index_cast %213 : i32 to index
      %c0_149 = arith.constant 0 : index
      %c0_150 = arith.constant 0 : index
      %215 = vector.load %arg1[%c0_148, %214, %c0_149, %c0_150] : memref<1x32x32x1xbf16, #tpu.memory_space<vmem>>, vector<1x1x32x1xbf16>
      %216 = vector.shape_cast %215 : vector<1x1x32x1xbf16> to vector<32x1xbf16>
      %217 = vector.extract_strided_slice %216 {offsets = [0, 0], sizes = [28, 1], strides = [1, 1]} : vector<32x1xbf16> to vector<28x1xbf16>
      %c1_151 = arith.constant 1 : index
      %c0_152 = arith.constant 0 : index
      %c15_153 = arith.constant 15 : index
      %218 = vector.load %arg5[%c1_151, %c0_152, %c15_153] : memref<2x28x25xbf16, #tpu.memory_space<vmem>>, vector<1x28x1xbf16>
      %219 = vector.shape_cast %218 : vector<1x28x1xbf16> to vector<28x1xbf16>
      %220 = vector.shape_cast %217 : vector<28x1xbf16> to vector<1x28x1xbf16>
      tpu.vector_store %arg5[%c1_151, %c0_152, %c15_153], %220 {strides = array<i32>} : memref<2x28x25xbf16, #tpu.memory_space<vmem>>, vector<1x28x1xbf16>,
      %221 = vector.extract_strided_slice %216 {offsets = [1, 0], sizes = [28, 1], strides = [1, 1]} : vector<32x1xbf16> to vector<28x1xbf16>
      %c1_154 = arith.constant 1 : index
      %c0_155 = arith.constant 0 : index
      %c16_156 = arith.constant 16 : index
      %222 = vector.load %arg5[%c1_154, %c0_155, %c16_156] : memref<2x28x25xbf16, #tpu.memory_space<vmem>>, vector<1x28x1xbf16>
      %223 = vector.shape_cast %222 : vector<1x28x1xbf16> to vector<28x1xbf16>
      %224 = vector.shape_cast %221 : vector<28x1xbf16> to vector<1x28x1xbf16>
      tpu.vector_store %arg5[%c1_154, %c0_155, %c16_156], %224 {strides = array<i32>} : memref<2x28x25xbf16, #tpu.memory_space<vmem>>, vector<1x28x1xbf16>,
      %225 = vector.extract_strided_slice %216 {offsets = [2, 0], sizes = [28, 1], strides = [1, 1]} : vector<32x1xbf16> to vector<28x1xbf16>
      %c1_157 = arith.constant 1 : index
      %c0_158 = arith.constant 0 : index
      %c17_159 = arith.constant 17 : index
      %226 = vector.load %arg5[%c1_157, %c0_158, %c17_159] : memref<2x28x25xbf16, #tpu.memory_space<vmem>>, vector<1x28x1xbf16>
      %227 = vector.shape_cast %226 : vector<1x28x1xbf16> to vector<28x1xbf16>
      %228 = vector.shape_cast %225 : vector<28x1xbf16> to vector<1x28x1xbf16>
      tpu.vector_store %arg5[%c1_157, %c0_158, %c17_159], %228 {strides = array<i32>} : memref<2x28x25xbf16, #tpu.memory_space<vmem>>, vector<1x28x1xbf16>,
      %229 = vector.extract_strided_slice %216 {offsets = [3, 0], sizes = [28, 1], strides = [1, 1]} : vector<32x1xbf16> to vector<28x1xbf16>
      %c1_160 = arith.constant 1 : index
      %c0_161 = arith.constant 0 : index
      %c18_162 = arith.constant 18 : index
      %230 = vector.load %arg5[%c1_160, %c0_161, %c18_162] : memref<2x28x25xbf16, #tpu.memory_space<vmem>>, vector<1x28x1xbf16>
      %231 = vector.shape_cast %230 : vector<1x28x1xbf16> to vector<28x1xbf16>
      %232 = vector.shape_cast %229 : vector<28x1xbf16> to vector<1x28x1xbf16>
      tpu.vector_store %arg5[%c1_160, %c0_161, %c18_162], %232 {strides = array<i32>} : memref<2x28x25xbf16, #tpu.memory_space<vmem>>, vector<1x28x1xbf16>,
      %233 = vector.extract_strided_slice %216 {offsets = [4, 0], sizes = [28, 1], strides = [1, 1]} : vector<32x1xbf16> to vector<28x1xbf16>
      %c1_163 = arith.constant 1 : index
      %c0_164 = arith.constant 0 : index
      %c19_165 = arith.constant 19 : index
      %234 = vector.load %arg5[%c1_163, %c0_164, %c19_165] : memref<2x28x25xbf16, #tpu.memory_space<vmem>>, vector<1x28x1xbf16>
      %235 = vector.shape_cast %234 : vector<1x28x1xbf16> to vector<28x1xbf16>
      %236 = vector.shape_cast %233 : vector<28x1xbf16> to vector<1x28x1xbf16>
      tpu.vector_store %arg5[%c1_163, %c0_164, %c19_165], %236 {strides = array<i32>} : memref<2x28x25xbf16, #tpu.memory_space<vmem>>, vector<1x28x1xbf16>,
      %c2_i32_166 = arith.constant 2 : i32
      %237 = arith.muli %c2_i32_166, %arg7 : i32
      %c1_i32_167 = arith.constant 1 : i32
      %238 = arith.addi %237, %c1_i32_167 : i32
      %c4_i32_168 = arith.constant 4 : i32
      %239 = arith.addi %238, %c4_i32_168 : i32
      %c0_169 = arith.constant 0 : index
      %240 = arith.index_cast %239 : i32 to index
      %c0_170 = arith.constant 0 : index
      %c0_171 = arith.constant 0 : index
      %241 = vector.load %arg1[%c0_169, %240, %c0_170, %c0_171] : memref<1x32x32x1xbf16, #tpu.memory_space<vmem>>, vector<1x1x32x1xbf16>
      %242 = vector.shape_cast %241 : vector<1x1x32x1xbf16> to vector<32x1xbf16>
      %243 = vector.extract_strided_slice %242 {offsets = [0, 0], sizes = [28, 1], strides = [1, 1]} : vector<32x1xbf16> to vector<28x1xbf16>
      %c1_172 = arith.constant 1 : index
      %c0_173 = arith.constant 0 : index
      %c20_174 = arith.constant 20 : index
      %244 = vector.load %arg5[%c1_172, %c0_173, %c20_174] : memref<2x28x25xbf16, #tpu.memory_space<vmem>>, vector<1x28x1xbf16>
      %245 = vector.shape_cast %244 : vector<1x28x1xbf16> to vector<28x1xbf16>
      %246 = vector.shape_cast %243 : vector<28x1xbf16> to vector<1x28x1xbf16>
      tpu.vector_store %arg5[%c1_172, %c0_173, %c20_174], %246 {strides = array<i32>} : memref<2x28x25xbf16, #tpu.memory_space<vmem>>, vector<1x28x1xbf16>,
      %247 = vector.extract_strided_slice %242 {offsets = [1, 0], sizes = [28, 1], strides = [1, 1]} : vector<32x1xbf16> to vector<28x1xbf16>
      %c1_175 = arith.constant 1 : index
      %c0_176 = arith.constant 0 : index
      %c21_177 = arith.constant 21 : index
      %248 = vector.load %arg5[%c1_175, %c0_176, %c21_177] : memref<2x28x25xbf16, #tpu.memory_space<vmem>>, vector<1x28x1xbf16>
      %249 = vector.shape_cast %248 : vector<1x28x1xbf16> to vector<28x1xbf16>
      %250 = vector.shape_cast %247 : vector<28x1xbf16> to vector<1x28x1xbf16>
      tpu.vector_store %arg5[%c1_175, %c0_176, %c21_177], %250 {strides = array<i32>} : memref<2x28x25xbf16, #tpu.memory_space<vmem>>, vector<1x28x1xbf16>,
      %251 = vector.extract_strided_slice %242 {offsets = [2, 0], sizes = [28, 1], strides = [1, 1]} : vector<32x1xbf16> to vector<28x1xbf16>
      %c1_178 = arith.constant 1 : index
      %c0_179 = arith.constant 0 : index
      %c22_180 = arith.constant 22 : index
      %252 = vector.load %arg5[%c1_178, %c0_179, %c22_180] : memref<2x28x25xbf16, #tpu.memory_space<vmem>>, vector<1x28x1xbf16>
      %253 = vector.shape_cast %252 : vector<1x28x1xbf16> to vector<28x1xbf16>
      %254 = vector.shape_cast %251 : vector<28x1xbf16> to vector<1x28x1xbf16>
      tpu.vector_store %arg5[%c1_178, %c0_179, %c22_180], %254 {strides = array<i32>} : memref<2x28x25xbf16, #tpu.memory_space<vmem>>, vector<1x28x1xbf16>,
      %255 = vector.extract_strided_slice %242 {offsets = [3, 0], sizes = [28, 1], strides = [1, 1]} : vector<32x1xbf16> to vector<28x1xbf16>
      %c1_181 = arith.constant 1 : index
      %c0_182 = arith.constant 0 : index
      %c23_183 = arith.constant 23 : index
      %256 = vector.load %arg5[%c1_181, %c0_182, %c23_183] : memref<2x28x25xbf16, #tpu.memory_space<vmem>>, vector<1x28x1xbf16>
      %257 = vector.shape_cast %256 : vector<1x28x1xbf16> to vector<28x1xbf16>
      %258 = vector.shape_cast %255 : vector<28x1xbf16> to vector<1x28x1xbf16>
      tpu.vector_store %arg5[%c1_181, %c0_182, %c23_183], %258 {strides = array<i32>} : memref<2x28x25xbf16, #tpu.memory_space<vmem>>, vector<1x28x1xbf16>,
      %259 = vector.extract_strided_slice %242 {offsets = [4, 0], sizes = [28, 1], strides = [1, 1]} : vector<32x1xbf16> to vector<28x1xbf16>
      %c1_184 = arith.constant 1 : index
      %c0_185 = arith.constant 0 : index
      %c24_186 = arith.constant 24 : index
      %260 = vector.load %arg5[%c1_184, %c0_185, %c24_186] : memref<2x28x25xbf16, #tpu.memory_space<vmem>>, vector<1x28x1xbf16>
      %261 = vector.shape_cast %260 : vector<1x28x1xbf16> to vector<28x1xbf16>
      %262 = vector.shape_cast %259 : vector<28x1xbf16> to vector<1x28x1xbf16>
      tpu.vector_store %arg5[%c1_184, %c0_185, %c24_186], %262 {strides = array<i32>} : memref<2x28x25xbf16, #tpu.memory_space<vmem>>, vector<1x28x1xbf16>,
      %c0_187 = arith.constant 0 : index
      %c0_188 = arith.constant 0 : index
      %c0_189 = arith.constant 0 : index
      %263 = vector.load %arg5[%c0_187, %c0_188, %c0_189] : memref<2x28x25xbf16, #tpu.memory_space<vmem>>, vector<1x28x25xbf16>
      %264 = vector.shape_cast %263 : vector<1x28x25xbf16> to vector<28x25xbf16>
      %c0_190 = arith.constant 0 : index
      %c0_191 = arith.constant 0 : index
      %265 = vector.load %arg2[%c0_190, %c0_191] : memref<25x128xbf16, #tpu.memory_space<vmem>>, vector<25x128xbf16>
      %cst_192 = arith.constant dense<0.000000e+00> : vector<28x128xf32>
      %266 = tpu.matmul %264, %265, %cst_192 {dimension_numbers = #tpu.dot_dimension_numbers<[1], [0], [0], [1], [0, 0, 1, 1], [], []>} : vector<28x25xbf16>, vector<25x128xbf16>, vector<28x128xf32> -> vector<28x128xf32>
      %c1_193 = arith.constant 1 : index
      %c0_194 = arith.constant 0 : index
      %c0_195 = arith.constant 0 : index
      %267 = vector.load %arg5[%c1_193, %c0_194, %c0_195] : memref<2x28x25xbf16, #tpu.memory_space<vmem>>, vector<1x28x25xbf16>
      %268 = vector.shape_cast %267 : vector<1x28x25xbf16> to vector<28x25xbf16>
      %c0_196 = arith.constant 0 : index
      %c0_197 = arith.constant 0 : index
      %269 = vector.load %arg2[%c0_196, %c0_197] : memref<25x128xbf16, #tpu.memory_space<vmem>>, vector<25x128xbf16>
      %cst_198 = arith.constant dense<0.000000e+00> : vector<28x128xf32>
      %270 = tpu.matmul %268, %269, %cst_198 {dimension_numbers = #tpu.dot_dimension_numbers<[1], [0], [0], [1], [0, 0, 1, 1], [], []>} : vector<28x25xbf16>, vector<25x128xbf16>, vector<28x128xf32> -> vector<28x128xf32>
      %271 = arith.maximumf %266, %270 : vector<28x128xf32>
      %c0_199 = arith.constant 0 : index
      %c0_200 = arith.constant 0 : index
      %272 = vector.load %arg3[%c0_199, %c0_200] : memref<1x128xf32, #tpu.memory_space<vmem>>, vector<1x128xf32>
      %273 = vector.broadcast %272 : vector<1x128xf32> to vector<28x128xf32>
      %274 = arith.addf %271, %273 : vector<28x128xf32>
      %cst_201 = arith.constant 0.000000e+00 : f32
      %275 = vector.broadcast %cst_201 : f32 to vector<28x128xf32>
      %276 = arith.maximumf %274, %275 : vector<28x128xf32>
      %c0_202 = arith.constant 0 : index
      %c0_203 = arith.constant 0 : index
      %277 = vector.load %arg6[%c0_202, %c0_203] : memref<28x128xf32, #tpu.memory_space<vmem>>, vector<28x128xf32>
      tpu.vector_store %arg6[%c0_202, %c0_203], %276 {strides = array<i32>} : memref<28x128xf32, #tpu.memory_space<vmem>>, vector<28x128xf32>,
      %c0_204 = arith.constant 0 : index
      %c0_205 = arith.constant 0 : index
      %278 = tpu.strided_load %arg6[%c0_204, %c0_205] {strides = array<i32: 2, 1>} : memref<28x128xf32, #tpu.memory_space<vmem>>, vector<14x128xf32>
      %c1_206 = arith.constant 1 : index
      %c0_207 = arith.constant 0 : index
      %279 = tpu.strided_load %arg6[%c1_206, %c0_207] {strides = array<i32: 2, 1>} : memref<28x128xf32, #tpu.memory_space<vmem>>, vector<14x128xf32>
      %280 = arith.maximumf %278, %279 : vector<14x128xf32>
      %cst_208 = arith.constant 0.000000e+00 : f32
      %281 = vector.broadcast %cst_208 : f32 to vector<2x128xf32>
      %282 = tpu.concatenate %281, %280, %281 in 0 : vector<2x128xf32>, vector<14x128xf32>, vector<2x128xf32> -> vector<18x128xf32>
      %283 = arith.truncf %282 : vector<18x128xf32> to vector<18x128xbf16>
      %c2_i32_209 = arith.constant 2 : i32
      %284 = arith.addi %arg7, %c2_i32_209 : i32
      %c0_210 = arith.constant 0 : index
      %285 = arith.index_cast %284 : i32 to index
      %c0_211 = arith.constant 0 : index
      %c0_212 = arith.constant 0 : index
      %286 = vector.load %arg4[%c0_210, %285, %c0_211, %c0_212] : memref<1x18x18x128xbf16, #tpu.memory_space<vmem>>, vector<1x1x18x128xbf16>
      %287 = vector.shape_cast %286 : vector<1x1x18x128xbf16> to vector<18x128xbf16>
      %288 = vector.shape_cast %283 : vector<18x128xbf16> to vector<1x1x18x128xbf16>
      tpu.vector_store %arg4[%c0_210, %285, %c0_211, %c0_212], %288 {strides = array<i32>} : memref<1x18x18x128xbf16, #tpu.memory_space<vmem>>, vector<1x1x18x128xbf16>,
    }
    %c14_i32_3 = arith.constant 14 : i32
    return
  }
  func.func @transform_0(%arg0: i32) -> (i32, i32, i32, i32) {
    %c0_i32 = arith.constant 0 : i32
    %c0_i32_0 = arith.constant 0 : i32
    %c0_i32_1 = arith.constant 0 : i32
    %c0_i32_2 = arith.constant 0 : i32
    return %arg0, %c0_i32, %c0_i32_0, %c0_i32_1 : i32, i32, i32, i32
  }
  func.func @transform_1(%arg0: i32) -> (i32, i32) {
    %c0_i32 = arith.constant 0 : i32
    %c0_i32_0 = arith.constant 0 : i32
    %c0_i32_1 = arith.constant 0 : i32
    return %c0_i32, %c0_i32_0 : i32, i32
  }
  func.func @transform_2(%arg0: i32) -> (i32, i32) {
    %c0_i32 = arith.constant 0 : i32
    %c0_i32_0 = arith.constant 0 : i32
    %c0_i32_1 = arith.constant 0 : i32
    return %c0_i32, %c0_i32_0 : i32, i32
  }
  func.func @transform_3(%arg0: i32) -> (i32, i32, i32, i32) {
    %c0_i32 = arith.constant 0 : i32
    %c0_i32_0 = arith.constant 0 : i32
    %c0_i32_1 = arith.constant 0 : i32
    %c0_i32_2 = arith.constant 0 : i32
    return %arg0, %c0_i32, %c0_i32_0, %c0_i32_1 : i32, i32, i32, i32
  }
}

module attributes {stable_mosaic.version = 11 : i64} {
  func.func @_conv_relu_pool_kernel(%arg0: i32, %arg1: memref<1x18x18x128xbf16, #tpu.memory_space<vmem>>, %arg2: memref<3200x128xbf16, #tpu.memory_space<vmem>>, %arg3: memref<1x128xf32, #tpu.memory_space<vmem>>, %arg4: memref<1x7x7x128xbf16, #tpu.memory_space<vmem>>, %arg5: memref<2x14x3200xbf16, #tpu.memory_space<vmem>>, %arg6: memref<14x128xf32, #tpu.memory_space<vmem>>) attributes {dimension_semantics = [#tpu.dimension_semantics<parallel>], iteration_bounds = array<i64: 2>, scalar_prefetch = 0 : i64, scratch_operands = 2 : i64, tpu.core_type = #tpu.core_type<tc>, window_params = [{transform_indices = @transform_0, window_bounds = array<i64: 1, 18, 18, 128>}, {pipeline_mode = #tpu.pipeline_mode<synchronous>, transform_indices = @transform_1, window_bounds = array<i64: 3200, 128>}, {pipeline_mode = #tpu.pipeline_mode<synchronous>, transform_indices = @transform_2, window_bounds = array<i64: 1, 128>}, {transform_indices = @transform_3, window_bounds = array<i64: 1, 7, 7, 128>}]} {
    %c0_i32 = arith.constant 0 : i32
    %c7_i32 = arith.constant 7 : i32
    %0 = arith.addi %c0_i32, %c7_i32 : i32
    %c1_i32 = arith.constant 1 : i32
    scf.for %arg7 = %c0_i32 to %0 step %c1_i32  : i32 {
      %c2_i32 = arith.constant 2 : i32
      %1 = arith.muli %c2_i32, %arg7 : i32
      %c0_i32_1 = arith.constant 0 : i32
      %2 = arith.addi %1, %c0_i32_1 : i32
      %c0_i32_2 = arith.constant 0 : i32
      %3 = arith.addi %2, %c0_i32_2 : i32
      %c0 = arith.constant 0 : index
      %4 = arith.index_cast %3 : i32 to index
      %c0_3 = arith.constant 0 : index
      %c0_4 = arith.constant 0 : index
      %5 = vector.load %arg1[%c0, %4, %c0_3, %c0_4] : memref<1x18x18x128xbf16, #tpu.memory_space<vmem>>, vector<1x1x18x128xbf16>
      %6 = vector.shape_cast %5 : vector<1x1x18x128xbf16> to vector<18x128xbf16>
      %7 = vector.extract_strided_slice %6 {offsets = [0, 0], sizes = [14, 128], strides = [1, 1]} : vector<18x128xbf16> to vector<14x128xbf16>
      %c0_5 = arith.constant 0 : index
      %c0_6 = arith.constant 0 : index
      %c0_7 = arith.constant 0 : index
      %8 = vector.load %arg5[%c0_5, %c0_6, %c0_7] : memref<2x14x3200xbf16, #tpu.memory_space<vmem>>, vector<1x14x128xbf16>
      %9 = vector.shape_cast %8 : vector<1x14x128xbf16> to vector<14x128xbf16>
      %10 = vector.shape_cast %7 : vector<14x128xbf16> to vector<1x14x128xbf16>
      tpu.vector_store %arg5[%c0_5, %c0_6, %c0_7], %10 {strides = array<i32>} : memref<2x14x3200xbf16, #tpu.memory_space<vmem>>, vector<1x14x128xbf16>,
      %11 = vector.extract_strided_slice %6 {offsets = [1, 0], sizes = [14, 128], strides = [1, 1]} : vector<18x128xbf16> to vector<14x128xbf16>
      %c0_8 = arith.constant 0 : index
      %c0_9 = arith.constant 0 : index
      %c128 = arith.constant 128 : index
      %12 = vector.load %arg5[%c0_8, %c0_9, %c128] : memref<2x14x3200xbf16, #tpu.memory_space<vmem>>, vector<1x14x128xbf16>
      %13 = vector.shape_cast %12 : vector<1x14x128xbf16> to vector<14x128xbf16>
      %14 = vector.shape_cast %11 : vector<14x128xbf16> to vector<1x14x128xbf16>
      tpu.vector_store %arg5[%c0_8, %c0_9, %c128], %14 {strides = array<i32>} : memref<2x14x3200xbf16, #tpu.memory_space<vmem>>, vector<1x14x128xbf16>,
      %15 = vector.extract_strided_slice %6 {offsets = [2, 0], sizes = [14, 128], strides = [1, 1]} : vector<18x128xbf16> to vector<14x128xbf16>
      %c0_10 = arith.constant 0 : index
      %c0_11 = arith.constant 0 : index
      %c256 = arith.constant 256 : index
      %16 = vector.load %arg5[%c0_10, %c0_11, %c256] : memref<2x14x3200xbf16, #tpu.memory_space<vmem>>, vector<1x14x128xbf16>
      %17 = vector.shape_cast %16 : vector<1x14x128xbf16> to vector<14x128xbf16>
      %18 = vector.shape_cast %15 : vector<14x128xbf16> to vector<1x14x128xbf16>
      tpu.vector_store %arg5[%c0_10, %c0_11, %c256], %18 {strides = array<i32>} : memref<2x14x3200xbf16, #tpu.memory_space<vmem>>, vector<1x14x128xbf16>,
      %19 = vector.extract_strided_slice %6 {offsets = [3, 0], sizes = [14, 128], strides = [1, 1]} : vector<18x128xbf16> to vector<14x128xbf16>
      %c0_12 = arith.constant 0 : index
      %c0_13 = arith.constant 0 : index
      %c384 = arith.constant 384 : index
      %20 = vector.load %arg5[%c0_12, %c0_13, %c384] : memref<2x14x3200xbf16, #tpu.memory_space<vmem>>, vector<1x14x128xbf16>
      %21 = vector.shape_cast %20 : vector<1x14x128xbf16> to vector<14x128xbf16>
      %22 = vector.shape_cast %19 : vector<14x128xbf16> to vector<1x14x128xbf16>
      tpu.vector_store %arg5[%c0_12, %c0_13, %c384], %22 {strides = array<i32>} : memref<2x14x3200xbf16, #tpu.memory_space<vmem>>, vector<1x14x128xbf16>,
      %23 = vector.extract_strided_slice %6 {offsets = [4, 0], sizes = [14, 128], strides = [1, 1]} : vector<18x128xbf16> to vector<14x128xbf16>
      %c0_14 = arith.constant 0 : index
      %c0_15 = arith.constant 0 : index
      %c512 = arith.constant 512 : index
      %24 = vector.load %arg5[%c0_14, %c0_15, %c512] : memref<2x14x3200xbf16, #tpu.memory_space<vmem>>, vector<1x14x128xbf16>
      %25 = vector.shape_cast %24 : vector<1x14x128xbf16> to vector<14x128xbf16>
      %26 = vector.shape_cast %23 : vector<14x128xbf16> to vector<1x14x128xbf16>
      tpu.vector_store %arg5[%c0_14, %c0_15, %c512], %26 {strides = array<i32>} : memref<2x14x3200xbf16, #tpu.memory_space<vmem>>, vector<1x14x128xbf16>,
      %c2_i32_16 = arith.constant 2 : i32
      %27 = arith.muli %c2_i32_16, %arg7 : i32
      %c0_i32_17 = arith.constant 0 : i32
      %28 = arith.addi %27, %c0_i32_17 : i32
      %c1_i32_18 = arith.constant 1 : i32
      %29 = arith.addi %28, %c1_i32_18 : i32
      %c0_19 = arith.constant 0 : index
      %30 = arith.index_cast %29 : i32 to index
      %c0_20 = arith.constant 0 : index
      %c0_21 = arith.constant 0 : index
      %31 = vector.load %arg1[%c0_19, %30, %c0_20, %c0_21] : memref<1x18x18x128xbf16, #tpu.memory_space<vmem>>, vector<1x1x18x128xbf16>
      %32 = vector.shape_cast %31 : vector<1x1x18x128xbf16> to vector<18x128xbf16>
      %33 = vector.extract_strided_slice %32 {offsets = [0, 0], sizes = [14, 128], strides = [1, 1]} : vector<18x128xbf16> to vector<14x128xbf16>
      %c0_22 = arith.constant 0 : index
      %c0_23 = arith.constant 0 : index
      %c640 = arith.constant 640 : index
      %34 = vector.load %arg5[%c0_22, %c0_23, %c640] : memref<2x14x3200xbf16, #tpu.memory_space<vmem>>, vector<1x14x128xbf16>
      %35 = vector.shape_cast %34 : vector<1x14x128xbf16> to vector<14x128xbf16>
      %36 = vector.shape_cast %33 : vector<14x128xbf16> to vector<1x14x128xbf16>
      tpu.vector_store %arg5[%c0_22, %c0_23, %c640], %36 {strides = array<i32>} : memref<2x14x3200xbf16, #tpu.memory_space<vmem>>, vector<1x14x128xbf16>,
      %37 = vector.extract_strided_slice %32 {offsets = [1, 0], sizes = [14, 128], strides = [1, 1]} : vector<18x128xbf16> to vector<14x128xbf16>
      %c0_24 = arith.constant 0 : index
      %c0_25 = arith.constant 0 : index
      %c768 = arith.constant 768 : index
      %38 = vector.load %arg5[%c0_24, %c0_25, %c768] : memref<2x14x3200xbf16, #tpu.memory_space<vmem>>, vector<1x14x128xbf16>
      %39 = vector.shape_cast %38 : vector<1x14x128xbf16> to vector<14x128xbf16>
      %40 = vector.shape_cast %37 : vector<14x128xbf16> to vector<1x14x128xbf16>
      tpu.vector_store %arg5[%c0_24, %c0_25, %c768], %40 {strides = array<i32>} : memref<2x14x3200xbf16, #tpu.memory_space<vmem>>, vector<1x14x128xbf16>,
      %41 = vector.extract_strided_slice %32 {offsets = [2, 0], sizes = [14, 128], strides = [1, 1]} : vector<18x128xbf16> to vector<14x128xbf16>
      %c0_26 = arith.constant 0 : index
      %c0_27 = arith.constant 0 : index
      %c896 = arith.constant 896 : index
      %42 = vector.load %arg5[%c0_26, %c0_27, %c896] : memref<2x14x3200xbf16, #tpu.memory_space<vmem>>, vector<1x14x128xbf16>
      %43 = vector.shape_cast %42 : vector<1x14x128xbf16> to vector<14x128xbf16>
      %44 = vector.shape_cast %41 : vector<14x128xbf16> to vector<1x14x128xbf16>
      tpu.vector_store %arg5[%c0_26, %c0_27, %c896], %44 {strides = array<i32>} : memref<2x14x3200xbf16, #tpu.memory_space<vmem>>, vector<1x14x128xbf16>,
      %45 = vector.extract_strided_slice %32 {offsets = [3, 0], sizes = [14, 128], strides = [1, 1]} : vector<18x128xbf16> to vector<14x128xbf16>
      %c0_28 = arith.constant 0 : index
      %c0_29 = arith.constant 0 : index
      %c1024 = arith.constant 1024 : index
      %46 = vector.load %arg5[%c0_28, %c0_29, %c1024] : memref<2x14x3200xbf16, #tpu.memory_space<vmem>>, vector<1x14x128xbf16>
      %47 = vector.shape_cast %46 : vector<1x14x128xbf16> to vector<14x128xbf16>
      %48 = vector.shape_cast %45 : vector<14x128xbf16> to vector<1x14x128xbf16>
      tpu.vector_store %arg5[%c0_28, %c0_29, %c1024], %48 {strides = array<i32>} : memref<2x14x3200xbf16, #tpu.memory_space<vmem>>, vector<1x14x128xbf16>,
      %49 = vector.extract_strided_slice %32 {offsets = [4, 0], sizes = [14, 128], strides = [1, 1]} : vector<18x128xbf16> to vector<14x128xbf16>
      %c0_30 = arith.constant 0 : index
      %c0_31 = arith.constant 0 : index
      %c1152 = arith.constant 1152 : index
      %50 = vector.load %arg5[%c0_30, %c0_31, %c1152] : memref<2x14x3200xbf16, #tpu.memory_space<vmem>>, vector<1x14x128xbf16>
      %51 = vector.shape_cast %50 : vector<1x14x128xbf16> to vector<14x128xbf16>
      %52 = vector.shape_cast %49 : vector<14x128xbf16> to vector<1x14x128xbf16>
      tpu.vector_store %arg5[%c0_30, %c0_31, %c1152], %52 {strides = array<i32>} : memref<2x14x3200xbf16, #tpu.memory_space<vmem>>, vector<1x14x128xbf16>,
      %c2_i32_32 = arith.constant 2 : i32
      %53 = arith.muli %c2_i32_32, %arg7 : i32
      %c0_i32_33 = arith.constant 0 : i32
      %54 = arith.addi %53, %c0_i32_33 : i32
      %c2_i32_34 = arith.constant 2 : i32
      %55 = arith.addi %54, %c2_i32_34 : i32
      %c0_35 = arith.constant 0 : index
      %56 = arith.index_cast %55 : i32 to index
      %c0_36 = arith.constant 0 : index
      %c0_37 = arith.constant 0 : index
      %57 = vector.load %arg1[%c0_35, %56, %c0_36, %c0_37] : memref<1x18x18x128xbf16, #tpu.memory_space<vmem>>, vector<1x1x18x128xbf16>
      %58 = vector.shape_cast %57 : vector<1x1x18x128xbf16> to vector<18x128xbf16>
      %59 = vector.extract_strided_slice %58 {offsets = [0, 0], sizes = [14, 128], strides = [1, 1]} : vector<18x128xbf16> to vector<14x128xbf16>
      %c0_38 = arith.constant 0 : index
      %c0_39 = arith.constant 0 : index
      %c1280 = arith.constant 1280 : index
      %60 = vector.load %arg5[%c0_38, %c0_39, %c1280] : memref<2x14x3200xbf16, #tpu.memory_space<vmem>>, vector<1x14x128xbf16>
      %61 = vector.shape_cast %60 : vector<1x14x128xbf16> to vector<14x128xbf16>
      %62 = vector.shape_cast %59 : vector<14x128xbf16> to vector<1x14x128xbf16>
      tpu.vector_store %arg5[%c0_38, %c0_39, %c1280], %62 {strides = array<i32>} : memref<2x14x3200xbf16, #tpu.memory_space<vmem>>, vector<1x14x128xbf16>,
      %63 = vector.extract_strided_slice %58 {offsets = [1, 0], sizes = [14, 128], strides = [1, 1]} : vector<18x128xbf16> to vector<14x128xbf16>
      %c0_40 = arith.constant 0 : index
      %c0_41 = arith.constant 0 : index
      %c1408 = arith.constant 1408 : index
      %64 = vector.load %arg5[%c0_40, %c0_41, %c1408] : memref<2x14x3200xbf16, #tpu.memory_space<vmem>>, vector<1x14x128xbf16>
      %65 = vector.shape_cast %64 : vector<1x14x128xbf16> to vector<14x128xbf16>
      %66 = vector.shape_cast %63 : vector<14x128xbf16> to vector<1x14x128xbf16>
      tpu.vector_store %arg5[%c0_40, %c0_41, %c1408], %66 {strides = array<i32>} : memref<2x14x3200xbf16, #tpu.memory_space<vmem>>, vector<1x14x128xbf16>,
      %67 = vector.extract_strided_slice %58 {offsets = [2, 0], sizes = [14, 128], strides = [1, 1]} : vector<18x128xbf16> to vector<14x128xbf16>
      %c0_42 = arith.constant 0 : index
      %c0_43 = arith.constant 0 : index
      %c1536 = arith.constant 1536 : index
      %68 = vector.load %arg5[%c0_42, %c0_43, %c1536] : memref<2x14x3200xbf16, #tpu.memory_space<vmem>>, vector<1x14x128xbf16>
      %69 = vector.shape_cast %68 : vector<1x14x128xbf16> to vector<14x128xbf16>
      %70 = vector.shape_cast %67 : vector<14x128xbf16> to vector<1x14x128xbf16>
      tpu.vector_store %arg5[%c0_42, %c0_43, %c1536], %70 {strides = array<i32>} : memref<2x14x3200xbf16, #tpu.memory_space<vmem>>, vector<1x14x128xbf16>,
      %71 = vector.extract_strided_slice %58 {offsets = [3, 0], sizes = [14, 128], strides = [1, 1]} : vector<18x128xbf16> to vector<14x128xbf16>
      %c0_44 = arith.constant 0 : index
      %c0_45 = arith.constant 0 : index
      %c1664 = arith.constant 1664 : index
      %72 = vector.load %arg5[%c0_44, %c0_45, %c1664] : memref<2x14x3200xbf16, #tpu.memory_space<vmem>>, vector<1x14x128xbf16>
      %73 = vector.shape_cast %72 : vector<1x14x128xbf16> to vector<14x128xbf16>
      %74 = vector.shape_cast %71 : vector<14x128xbf16> to vector<1x14x128xbf16>
      tpu.vector_store %arg5[%c0_44, %c0_45, %c1664], %74 {strides = array<i32>} : memref<2x14x3200xbf16, #tpu.memory_space<vmem>>, vector<1x14x128xbf16>,
      %75 = vector.extract_strided_slice %58 {offsets = [4, 0], sizes = [14, 128], strides = [1, 1]} : vector<18x128xbf16> to vector<14x128xbf16>
      %c0_46 = arith.constant 0 : index
      %c0_47 = arith.constant 0 : index
      %c1792 = arith.constant 1792 : index
      %76 = vector.load %arg5[%c0_46, %c0_47, %c1792] : memref<2x14x3200xbf16, #tpu.memory_space<vmem>>, vector<1x14x128xbf16>
      %77 = vector.shape_cast %76 : vector<1x14x128xbf16> to vector<14x128xbf16>
      %78 = vector.shape_cast %75 : vector<14x128xbf16> to vector<1x14x128xbf16>
      tpu.vector_store %arg5[%c0_46, %c0_47, %c1792], %78 {strides = array<i32>} : memref<2x14x3200xbf16, #tpu.memory_space<vmem>>, vector<1x14x128xbf16>,
      %c2_i32_48 = arith.constant 2 : i32
      %79 = arith.muli %c2_i32_48, %arg7 : i32
      %c0_i32_49 = arith.constant 0 : i32
      %80 = arith.addi %79, %c0_i32_49 : i32
      %c3_i32 = arith.constant 3 : i32
      %81 = arith.addi %80, %c3_i32 : i32
      %c0_50 = arith.constant 0 : index
      %82 = arith.index_cast %81 : i32 to index
      %c0_51 = arith.constant 0 : index
      %c0_52 = arith.constant 0 : index
      %83 = vector.load %arg1[%c0_50, %82, %c0_51, %c0_52] : memref<1x18x18x128xbf16, #tpu.memory_space<vmem>>, vector<1x1x18x128xbf16>
      %84 = vector.shape_cast %83 : vector<1x1x18x128xbf16> to vector<18x128xbf16>
      %85 = vector.extract_strided_slice %84 {offsets = [0, 0], sizes = [14, 128], strides = [1, 1]} : vector<18x128xbf16> to vector<14x128xbf16>
      %c0_53 = arith.constant 0 : index
      %c0_54 = arith.constant 0 : index
      %c1920 = arith.constant 1920 : index
      %86 = vector.load %arg5[%c0_53, %c0_54, %c1920] : memref<2x14x3200xbf16, #tpu.memory_space<vmem>>, vector<1x14x128xbf16>
      %87 = vector.shape_cast %86 : vector<1x14x128xbf16> to vector<14x128xbf16>
      %88 = vector.shape_cast %85 : vector<14x128xbf16> to vector<1x14x128xbf16>
      tpu.vector_store %arg5[%c0_53, %c0_54, %c1920], %88 {strides = array<i32>} : memref<2x14x3200xbf16, #tpu.memory_space<vmem>>, vector<1x14x128xbf16>,
      %89 = vector.extract_strided_slice %84 {offsets = [1, 0], sizes = [14, 128], strides = [1, 1]} : vector<18x128xbf16> to vector<14x128xbf16>
      %c0_55 = arith.constant 0 : index
      %c0_56 = arith.constant 0 : index
      %c2048 = arith.constant 2048 : index
      %90 = vector.load %arg5[%c0_55, %c0_56, %c2048] : memref<2x14x3200xbf16, #tpu.memory_space<vmem>>, vector<1x14x128xbf16>
      %91 = vector.shape_cast %90 : vector<1x14x128xbf16> to vector<14x128xbf16>
      %92 = vector.shape_cast %89 : vector<14x128xbf16> to vector<1x14x128xbf16>
      tpu.vector_store %arg5[%c0_55, %c0_56, %c2048], %92 {strides = array<i32>} : memref<2x14x3200xbf16, #tpu.memory_space<vmem>>, vector<1x14x128xbf16>,
      %93 = vector.extract_strided_slice %84 {offsets = [2, 0], sizes = [14, 128], strides = [1, 1]} : vector<18x128xbf16> to vector<14x128xbf16>
      %c0_57 = arith.constant 0 : index
      %c0_58 = arith.constant 0 : index
      %c2176 = arith.constant 2176 : index
      %94 = vector.load %arg5[%c0_57, %c0_58, %c2176] : memref<2x14x3200xbf16, #tpu.memory_space<vmem>>, vector<1x14x128xbf16>
      %95 = vector.shape_cast %94 : vector<1x14x128xbf16> to vector<14x128xbf16>
      %96 = vector.shape_cast %93 : vector<14x128xbf16> to vector<1x14x128xbf16>
      tpu.vector_store %arg5[%c0_57, %c0_58, %c2176], %96 {strides = array<i32>} : memref<2x14x3200xbf16, #tpu.memory_space<vmem>>, vector<1x14x128xbf16>,
      %97 = vector.extract_strided_slice %84 {offsets = [3, 0], sizes = [14, 128], strides = [1, 1]} : vector<18x128xbf16> to vector<14x128xbf16>
      %c0_59 = arith.constant 0 : index
      %c0_60 = arith.constant 0 : index
      %c2304 = arith.constant 2304 : index
      %98 = vector.load %arg5[%c0_59, %c0_60, %c2304] : memref<2x14x3200xbf16, #tpu.memory_space<vmem>>, vector<1x14x128xbf16>
      %99 = vector.shape_cast %98 : vector<1x14x128xbf16> to vector<14x128xbf16>
      %100 = vector.shape_cast %97 : vector<14x128xbf16> to vector<1x14x128xbf16>
      tpu.vector_store %arg5[%c0_59, %c0_60, %c2304], %100 {strides = array<i32>} : memref<2x14x3200xbf16, #tpu.memory_space<vmem>>, vector<1x14x128xbf16>,
      %101 = vector.extract_strided_slice %84 {offsets = [4, 0], sizes = [14, 128], strides = [1, 1]} : vector<18x128xbf16> to vector<14x128xbf16>
      %c0_61 = arith.constant 0 : index
      %c0_62 = arith.constant 0 : index
      %c2432 = arith.constant 2432 : index
      %102 = vector.load %arg5[%c0_61, %c0_62, %c2432] : memref<2x14x3200xbf16, #tpu.memory_space<vmem>>, vector<1x14x128xbf16>
      %103 = vector.shape_cast %102 : vector<1x14x128xbf16> to vector<14x128xbf16>
      %104 = vector.shape_cast %101 : vector<14x128xbf16> to vector<1x14x128xbf16>
      tpu.vector_store %arg5[%c0_61, %c0_62, %c2432], %104 {strides = array<i32>} : memref<2x14x3200xbf16, #tpu.memory_space<vmem>>, vector<1x14x128xbf16>,
      %c2_i32_63 = arith.constant 2 : i32
      %105 = arith.muli %c2_i32_63, %arg7 : i32
      %c0_i32_64 = arith.constant 0 : i32
      %106 = arith.addi %105, %c0_i32_64 : i32
      %c4_i32 = arith.constant 4 : i32
      %107 = arith.addi %106, %c4_i32 : i32
      %c0_65 = arith.constant 0 : index
      %108 = arith.index_cast %107 : i32 to index
      %c0_66 = arith.constant 0 : index
      %c0_67 = arith.constant 0 : index
      %109 = vector.load %arg1[%c0_65, %108, %c0_66, %c0_67] : memref<1x18x18x128xbf16, #tpu.memory_space<vmem>>, vector<1x1x18x128xbf16>
      %110 = vector.shape_cast %109 : vector<1x1x18x128xbf16> to vector<18x128xbf16>
      %111 = vector.extract_strided_slice %110 {offsets = [0, 0], sizes = [14, 128], strides = [1, 1]} : vector<18x128xbf16> to vector<14x128xbf16>
      %c0_68 = arith.constant 0 : index
      %c0_69 = arith.constant 0 : index
      %c2560 = arith.constant 2560 : index
      %112 = vector.load %arg5[%c0_68, %c0_69, %c2560] : memref<2x14x3200xbf16, #tpu.memory_space<vmem>>, vector<1x14x128xbf16>
      %113 = vector.shape_cast %112 : vector<1x14x128xbf16> to vector<14x128xbf16>
      %114 = vector.shape_cast %111 : vector<14x128xbf16> to vector<1x14x128xbf16>
      tpu.vector_store %arg5[%c0_68, %c0_69, %c2560], %114 {strides = array<i32>} : memref<2x14x3200xbf16, #tpu.memory_space<vmem>>, vector<1x14x128xbf16>,
      %115 = vector.extract_strided_slice %110 {offsets = [1, 0], sizes = [14, 128], strides = [1, 1]} : vector<18x128xbf16> to vector<14x128xbf16>
      %c0_70 = arith.constant 0 : index
      %c0_71 = arith.constant 0 : index
      %c2688 = arith.constant 2688 : index
      %116 = vector.load %arg5[%c0_70, %c0_71, %c2688] : memref<2x14x3200xbf16, #tpu.memory_space<vmem>>, vector<1x14x128xbf16>
      %117 = vector.shape_cast %116 : vector<1x14x128xbf16> to vector<14x128xbf16>
      %118 = vector.shape_cast %115 : vector<14x128xbf16> to vector<1x14x128xbf16>
      tpu.vector_store %arg5[%c0_70, %c0_71, %c2688], %118 {strides = array<i32>} : memref<2x14x3200xbf16, #tpu.memory_space<vmem>>, vector<1x14x128xbf16>,
      %119 = vector.extract_strided_slice %110 {offsets = [2, 0], sizes = [14, 128], strides = [1, 1]} : vector<18x128xbf16> to vector<14x128xbf16>
      %c0_72 = arith.constant 0 : index
      %c0_73 = arith.constant 0 : index
      %c2816 = arith.constant 2816 : index
      %120 = vector.load %arg5[%c0_72, %c0_73, %c2816] : memref<2x14x3200xbf16, #tpu.memory_space<vmem>>, vector<1x14x128xbf16>
      %121 = vector.shape_cast %120 : vector<1x14x128xbf16> to vector<14x128xbf16>
      %122 = vector.shape_cast %119 : vector<14x128xbf16> to vector<1x14x128xbf16>
      tpu.vector_store %arg5[%c0_72, %c0_73, %c2816], %122 {strides = array<i32>} : memref<2x14x3200xbf16, #tpu.memory_space<vmem>>, vector<1x14x128xbf16>,
      %123 = vector.extract_strided_slice %110 {offsets = [3, 0], sizes = [14, 128], strides = [1, 1]} : vector<18x128xbf16> to vector<14x128xbf16>
      %c0_74 = arith.constant 0 : index
      %c0_75 = arith.constant 0 : index
      %c2944 = arith.constant 2944 : index
      %124 = vector.load %arg5[%c0_74, %c0_75, %c2944] : memref<2x14x3200xbf16, #tpu.memory_space<vmem>>, vector<1x14x128xbf16>
      %125 = vector.shape_cast %124 : vector<1x14x128xbf16> to vector<14x128xbf16>
      %126 = vector.shape_cast %123 : vector<14x128xbf16> to vector<1x14x128xbf16>
      tpu.vector_store %arg5[%c0_74, %c0_75, %c2944], %126 {strides = array<i32>} : memref<2x14x3200xbf16, #tpu.memory_space<vmem>>, vector<1x14x128xbf16>,
      %127 = vector.extract_strided_slice %110 {offsets = [4, 0], sizes = [14, 128], strides = [1, 1]} : vector<18x128xbf16> to vector<14x128xbf16>
      %c0_76 = arith.constant 0 : index
      %c0_77 = arith.constant 0 : index
      %c3072 = arith.constant 3072 : index
      %128 = vector.load %arg5[%c0_76, %c0_77, %c3072] : memref<2x14x3200xbf16, #tpu.memory_space<vmem>>, vector<1x14x128xbf16>
      %129 = vector.shape_cast %128 : vector<1x14x128xbf16> to vector<14x128xbf16>
      %130 = vector.shape_cast %127 : vector<14x128xbf16> to vector<1x14x128xbf16>
      tpu.vector_store %arg5[%c0_76, %c0_77, %c3072], %130 {strides = array<i32>} : memref<2x14x3200xbf16, #tpu.memory_space<vmem>>, vector<1x14x128xbf16>,
      %c2_i32_78 = arith.constant 2 : i32
      %131 = arith.muli %c2_i32_78, %arg7 : i32
      %c1_i32_79 = arith.constant 1 : i32
      %132 = arith.addi %131, %c1_i32_79 : i32
      %c0_i32_80 = arith.constant 0 : i32
      %133 = arith.addi %132, %c0_i32_80 : i32
      %c0_81 = arith.constant 0 : index
      %134 = arith.index_cast %133 : i32 to index
      %c0_82 = arith.constant 0 : index
      %c0_83 = arith.constant 0 : index
      %135 = vector.load %arg1[%c0_81, %134, %c0_82, %c0_83] : memref<1x18x18x128xbf16, #tpu.memory_space<vmem>>, vector<1x1x18x128xbf16>
      %136 = vector.shape_cast %135 : vector<1x1x18x128xbf16> to vector<18x128xbf16>
      %137 = vector.extract_strided_slice %136 {offsets = [0, 0], sizes = [14, 128], strides = [1, 1]} : vector<18x128xbf16> to vector<14x128xbf16>
      %c1 = arith.constant 1 : index
      %c0_84 = arith.constant 0 : index
      %c0_85 = arith.constant 0 : index
      %138 = vector.load %arg5[%c1, %c0_84, %c0_85] : memref<2x14x3200xbf16, #tpu.memory_space<vmem>>, vector<1x14x128xbf16>
      %139 = vector.shape_cast %138 : vector<1x14x128xbf16> to vector<14x128xbf16>
      %140 = vector.shape_cast %137 : vector<14x128xbf16> to vector<1x14x128xbf16>
      tpu.vector_store %arg5[%c1, %c0_84, %c0_85], %140 {strides = array<i32>} : memref<2x14x3200xbf16, #tpu.memory_space<vmem>>, vector<1x14x128xbf16>,
      %141 = vector.extract_strided_slice %136 {offsets = [1, 0], sizes = [14, 128], strides = [1, 1]} : vector<18x128xbf16> to vector<14x128xbf16>
      %c1_86 = arith.constant 1 : index
      %c0_87 = arith.constant 0 : index
      %c128_88 = arith.constant 128 : index
      %142 = vector.load %arg5[%c1_86, %c0_87, %c128_88] : memref<2x14x3200xbf16, #tpu.memory_space<vmem>>, vector<1x14x128xbf16>
      %143 = vector.shape_cast %142 : vector<1x14x128xbf16> to vector<14x128xbf16>
      %144 = vector.shape_cast %141 : vector<14x128xbf16> to vector<1x14x128xbf16>
      tpu.vector_store %arg5[%c1_86, %c0_87, %c128_88], %144 {strides = array<i32>} : memref<2x14x3200xbf16, #tpu.memory_space<vmem>>, vector<1x14x128xbf16>,
      %145 = vector.extract_strided_slice %136 {offsets = [2, 0], sizes = [14, 128], strides = [1, 1]} : vector<18x128xbf16> to vector<14x128xbf16>
      %c1_89 = arith.constant 1 : index
      %c0_90 = arith.constant 0 : index
      %c256_91 = arith.constant 256 : index
      %146 = vector.load %arg5[%c1_89, %c0_90, %c256_91] : memref<2x14x3200xbf16, #tpu.memory_space<vmem>>, vector<1x14x128xbf16>
      %147 = vector.shape_cast %146 : vector<1x14x128xbf16> to vector<14x128xbf16>
      %148 = vector.shape_cast %145 : vector<14x128xbf16> to vector<1x14x128xbf16>
      tpu.vector_store %arg5[%c1_89, %c0_90, %c256_91], %148 {strides = array<i32>} : memref<2x14x3200xbf16, #tpu.memory_space<vmem>>, vector<1x14x128xbf16>,
      %149 = vector.extract_strided_slice %136 {offsets = [3, 0], sizes = [14, 128], strides = [1, 1]} : vector<18x128xbf16> to vector<14x128xbf16>
      %c1_92 = arith.constant 1 : index
      %c0_93 = arith.constant 0 : index
      %c384_94 = arith.constant 384 : index
      %150 = vector.load %arg5[%c1_92, %c0_93, %c384_94] : memref<2x14x3200xbf16, #tpu.memory_space<vmem>>, vector<1x14x128xbf16>
      %151 = vector.shape_cast %150 : vector<1x14x128xbf16> to vector<14x128xbf16>
      %152 = vector.shape_cast %149 : vector<14x128xbf16> to vector<1x14x128xbf16>
      tpu.vector_store %arg5[%c1_92, %c0_93, %c384_94], %152 {strides = array<i32>} : memref<2x14x3200xbf16, #tpu.memory_space<vmem>>, vector<1x14x128xbf16>,
      %153 = vector.extract_strided_slice %136 {offsets = [4, 0], sizes = [14, 128], strides = [1, 1]} : vector<18x128xbf16> to vector<14x128xbf16>
      %c1_95 = arith.constant 1 : index
      %c0_96 = arith.constant 0 : index
      %c512_97 = arith.constant 512 : index
      %154 = vector.load %arg5[%c1_95, %c0_96, %c512_97] : memref<2x14x3200xbf16, #tpu.memory_space<vmem>>, vector<1x14x128xbf16>
      %155 = vector.shape_cast %154 : vector<1x14x128xbf16> to vector<14x128xbf16>
      %156 = vector.shape_cast %153 : vector<14x128xbf16> to vector<1x14x128xbf16>
      tpu.vector_store %arg5[%c1_95, %c0_96, %c512_97], %156 {strides = array<i32>} : memref<2x14x3200xbf16, #tpu.memory_space<vmem>>, vector<1x14x128xbf16>,
      %c2_i32_98 = arith.constant 2 : i32
      %157 = arith.muli %c2_i32_98, %arg7 : i32
      %c1_i32_99 = arith.constant 1 : i32
      %158 = arith.addi %157, %c1_i32_99 : i32
      %c1_i32_100 = arith.constant 1 : i32
      %159 = arith.addi %158, %c1_i32_100 : i32
      %c0_101 = arith.constant 0 : index
      %160 = arith.index_cast %159 : i32 to index
      %c0_102 = arith.constant 0 : index
      %c0_103 = arith.constant 0 : index
      %161 = vector.load %arg1[%c0_101, %160, %c0_102, %c0_103] : memref<1x18x18x128xbf16, #tpu.memory_space<vmem>>, vector<1x1x18x128xbf16>
      %162 = vector.shape_cast %161 : vector<1x1x18x128xbf16> to vector<18x128xbf16>
      %163 = vector.extract_strided_slice %162 {offsets = [0, 0], sizes = [14, 128], strides = [1, 1]} : vector<18x128xbf16> to vector<14x128xbf16>
      %c1_104 = arith.constant 1 : index
      %c0_105 = arith.constant 0 : index
      %c640_106 = arith.constant 640 : index
      %164 = vector.load %arg5[%c1_104, %c0_105, %c640_106] : memref<2x14x3200xbf16, #tpu.memory_space<vmem>>, vector<1x14x128xbf16>
      %165 = vector.shape_cast %164 : vector<1x14x128xbf16> to vector<14x128xbf16>
      %166 = vector.shape_cast %163 : vector<14x128xbf16> to vector<1x14x128xbf16>
      tpu.vector_store %arg5[%c1_104, %c0_105, %c640_106], %166 {strides = array<i32>} : memref<2x14x3200xbf16, #tpu.memory_space<vmem>>, vector<1x14x128xbf16>,
      %167 = vector.extract_strided_slice %162 {offsets = [1, 0], sizes = [14, 128], strides = [1, 1]} : vector<18x128xbf16> to vector<14x128xbf16>
      %c1_107 = arith.constant 1 : index
      %c0_108 = arith.constant 0 : index
      %c768_109 = arith.constant 768 : index
      %168 = vector.load %arg5[%c1_107, %c0_108, %c768_109] : memref<2x14x3200xbf16, #tpu.memory_space<vmem>>, vector<1x14x128xbf16>
      %169 = vector.shape_cast %168 : vector<1x14x128xbf16> to vector<14x128xbf16>
      %170 = vector.shape_cast %167 : vector<14x128xbf16> to vector<1x14x128xbf16>
      tpu.vector_store %arg5[%c1_107, %c0_108, %c768_109], %170 {strides = array<i32>} : memref<2x14x3200xbf16, #tpu.memory_space<vmem>>, vector<1x14x128xbf16>,
      %171 = vector.extract_strided_slice %162 {offsets = [2, 0], sizes = [14, 128], strides = [1, 1]} : vector<18x128xbf16> to vector<14x128xbf16>
      %c1_110 = arith.constant 1 : index
      %c0_111 = arith.constant 0 : index
      %c896_112 = arith.constant 896 : index
      %172 = vector.load %arg5[%c1_110, %c0_111, %c896_112] : memref<2x14x3200xbf16, #tpu.memory_space<vmem>>, vector<1x14x128xbf16>
      %173 = vector.shape_cast %172 : vector<1x14x128xbf16> to vector<14x128xbf16>
      %174 = vector.shape_cast %171 : vector<14x128xbf16> to vector<1x14x128xbf16>
      tpu.vector_store %arg5[%c1_110, %c0_111, %c896_112], %174 {strides = array<i32>} : memref<2x14x3200xbf16, #tpu.memory_space<vmem>>, vector<1x14x128xbf16>,
      %175 = vector.extract_strided_slice %162 {offsets = [3, 0], sizes = [14, 128], strides = [1, 1]} : vector<18x128xbf16> to vector<14x128xbf16>
      %c1_113 = arith.constant 1 : index
      %c0_114 = arith.constant 0 : index
      %c1024_115 = arith.constant 1024 : index
      %176 = vector.load %arg5[%c1_113, %c0_114, %c1024_115] : memref<2x14x3200xbf16, #tpu.memory_space<vmem>>, vector<1x14x128xbf16>
      %177 = vector.shape_cast %176 : vector<1x14x128xbf16> to vector<14x128xbf16>
      %178 = vector.shape_cast %175 : vector<14x128xbf16> to vector<1x14x128xbf16>
      tpu.vector_store %arg5[%c1_113, %c0_114, %c1024_115], %178 {strides = array<i32>} : memref<2x14x3200xbf16, #tpu.memory_space<vmem>>, vector<1x14x128xbf16>,
      %179 = vector.extract_strided_slice %162 {offsets = [4, 0], sizes = [14, 128], strides = [1, 1]} : vector<18x128xbf16> to vector<14x128xbf16>
      %c1_116 = arith.constant 1 : index
      %c0_117 = arith.constant 0 : index
      %c1152_118 = arith.constant 1152 : index
      %180 = vector.load %arg5[%c1_116, %c0_117, %c1152_118] : memref<2x14x3200xbf16, #tpu.memory_space<vmem>>, vector<1x14x128xbf16>
      %181 = vector.shape_cast %180 : vector<1x14x128xbf16> to vector<14x128xbf16>
      %182 = vector.shape_cast %179 : vector<14x128xbf16> to vector<1x14x128xbf16>
      tpu.vector_store %arg5[%c1_116, %c0_117, %c1152_118], %182 {strides = array<i32>} : memref<2x14x3200xbf16, #tpu.memory_space<vmem>>, vector<1x14x128xbf16>,
      %c2_i32_119 = arith.constant 2 : i32
      %183 = arith.muli %c2_i32_119, %arg7 : i32
      %c1_i32_120 = arith.constant 1 : i32
      %184 = arith.addi %183, %c1_i32_120 : i32
      %c2_i32_121 = arith.constant 2 : i32
      %185 = arith.addi %184, %c2_i32_121 : i32
      %c0_122 = arith.constant 0 : index
      %186 = arith.index_cast %185 : i32 to index
      %c0_123 = arith.constant 0 : index
      %c0_124 = arith.constant 0 : index
      %187 = vector.load %arg1[%c0_122, %186, %c0_123, %c0_124] : memref<1x18x18x128xbf16, #tpu.memory_space<vmem>>, vector<1x1x18x128xbf16>
      %188 = vector.shape_cast %187 : vector<1x1x18x128xbf16> to vector<18x128xbf16>
      %189 = vector.extract_strided_slice %188 {offsets = [0, 0], sizes = [14, 128], strides = [1, 1]} : vector<18x128xbf16> to vector<14x128xbf16>
      %c1_125 = arith.constant 1 : index
      %c0_126 = arith.constant 0 : index
      %c1280_127 = arith.constant 1280 : index
      %190 = vector.load %arg5[%c1_125, %c0_126, %c1280_127] : memref<2x14x3200xbf16, #tpu.memory_space<vmem>>, vector<1x14x128xbf16>
      %191 = vector.shape_cast %190 : vector<1x14x128xbf16> to vector<14x128xbf16>
      %192 = vector.shape_cast %189 : vector<14x128xbf16> to vector<1x14x128xbf16>
      tpu.vector_store %arg5[%c1_125, %c0_126, %c1280_127], %192 {strides = array<i32>} : memref<2x14x3200xbf16, #tpu.memory_space<vmem>>, vector<1x14x128xbf16>,
      %193 = vector.extract_strided_slice %188 {offsets = [1, 0], sizes = [14, 128], strides = [1, 1]} : vector<18x128xbf16> to vector<14x128xbf16>
      %c1_128 = arith.constant 1 : index
      %c0_129 = arith.constant 0 : index
      %c1408_130 = arith.constant 1408 : index
      %194 = vector.load %arg5[%c1_128, %c0_129, %c1408_130] : memref<2x14x3200xbf16, #tpu.memory_space<vmem>>, vector<1x14x128xbf16>
      %195 = vector.shape_cast %194 : vector<1x14x128xbf16> to vector<14x128xbf16>
      %196 = vector.shape_cast %193 : vector<14x128xbf16> to vector<1x14x128xbf16>
      tpu.vector_store %arg5[%c1_128, %c0_129, %c1408_130], %196 {strides = array<i32>} : memref<2x14x3200xbf16, #tpu.memory_space<vmem>>, vector<1x14x128xbf16>,
      %197 = vector.extract_strided_slice %188 {offsets = [2, 0], sizes = [14, 128], strides = [1, 1]} : vector<18x128xbf16> to vector<14x128xbf16>
      %c1_131 = arith.constant 1 : index
      %c0_132 = arith.constant 0 : index
      %c1536_133 = arith.constant 1536 : index
      %198 = vector.load %arg5[%c1_131, %c0_132, %c1536_133] : memref<2x14x3200xbf16, #tpu.memory_space<vmem>>, vector<1x14x128xbf16>
      %199 = vector.shape_cast %198 : vector<1x14x128xbf16> to vector<14x128xbf16>
      %200 = vector.shape_cast %197 : vector<14x128xbf16> to vector<1x14x128xbf16>
      tpu.vector_store %arg5[%c1_131, %c0_132, %c1536_133], %200 {strides = array<i32>} : memref<2x14x3200xbf16, #tpu.memory_space<vmem>>, vector<1x14x128xbf16>,
      %201 = vector.extract_strided_slice %188 {offsets = [3, 0], sizes = [14, 128], strides = [1, 1]} : vector<18x128xbf16> to vector<14x128xbf16>
      %c1_134 = arith.constant 1 : index
      %c0_135 = arith.constant 0 : index
      %c1664_136 = arith.constant 1664 : index
      %202 = vector.load %arg5[%c1_134, %c0_135, %c1664_136] : memref<2x14x3200xbf16, #tpu.memory_space<vmem>>, vector<1x14x128xbf16>
      %203 = vector.shape_cast %202 : vector<1x14x128xbf16> to vector<14x128xbf16>
      %204 = vector.shape_cast %201 : vector<14x128xbf16> to vector<1x14x128xbf16>
      tpu.vector_store %arg5[%c1_134, %c0_135, %c1664_136], %204 {strides = array<i32>} : memref<2x14x3200xbf16, #tpu.memory_space<vmem>>, vector<1x14x128xbf16>,
      %205 = vector.extract_strided_slice %188 {offsets = [4, 0], sizes = [14, 128], strides = [1, 1]} : vector<18x128xbf16> to vector<14x128xbf16>
      %c1_137 = arith.constant 1 : index
      %c0_138 = arith.constant 0 : index
      %c1792_139 = arith.constant 1792 : index
      %206 = vector.load %arg5[%c1_137, %c0_138, %c1792_139] : memref<2x14x3200xbf16, #tpu.memory_space<vmem>>, vector<1x14x128xbf16>
      %207 = vector.shape_cast %206 : vector<1x14x128xbf16> to vector<14x128xbf16>
      %208 = vector.shape_cast %205 : vector<14x128xbf16> to vector<1x14x128xbf16>
      tpu.vector_store %arg5[%c1_137, %c0_138, %c1792_139], %208 {strides = array<i32>} : memref<2x14x3200xbf16, #tpu.memory_space<vmem>>, vector<1x14x128xbf16>,
      %c2_i32_140 = arith.constant 2 : i32
      %209 = arith.muli %c2_i32_140, %arg7 : i32
      %c1_i32_141 = arith.constant 1 : i32
      %210 = arith.addi %209, %c1_i32_141 : i32
      %c3_i32_142 = arith.constant 3 : i32
      %211 = arith.addi %210, %c3_i32_142 : i32
      %c0_143 = arith.constant 0 : index
      %212 = arith.index_cast %211 : i32 to index
      %c0_144 = arith.constant 0 : index
      %c0_145 = arith.constant 0 : index
      %213 = vector.load %arg1[%c0_143, %212, %c0_144, %c0_145] : memref<1x18x18x128xbf16, #tpu.memory_space<vmem>>, vector<1x1x18x128xbf16>
      %214 = vector.shape_cast %213 : vector<1x1x18x128xbf16> to vector<18x128xbf16>
      %215 = vector.extract_strided_slice %214 {offsets = [0, 0], sizes = [14, 128], strides = [1, 1]} : vector<18x128xbf16> to vector<14x128xbf16>
      %c1_146 = arith.constant 1 : index
      %c0_147 = arith.constant 0 : index
      %c1920_148 = arith.constant 1920 : index
      %216 = vector.load %arg5[%c1_146, %c0_147, %c1920_148] : memref<2x14x3200xbf16, #tpu.memory_space<vmem>>, vector<1x14x128xbf16>
      %217 = vector.shape_cast %216 : vector<1x14x128xbf16> to vector<14x128xbf16>
      %218 = vector.shape_cast %215 : vector<14x128xbf16> to vector<1x14x128xbf16>
      tpu.vector_store %arg5[%c1_146, %c0_147, %c1920_148], %218 {strides = array<i32>} : memref<2x14x3200xbf16, #tpu.memory_space<vmem>>, vector<1x14x128xbf16>,
      %219 = vector.extract_strided_slice %214 {offsets = [1, 0], sizes = [14, 128], strides = [1, 1]} : vector<18x128xbf16> to vector<14x128xbf16>
      %c1_149 = arith.constant 1 : index
      %c0_150 = arith.constant 0 : index
      %c2048_151 = arith.constant 2048 : index
      %220 = vector.load %arg5[%c1_149, %c0_150, %c2048_151] : memref<2x14x3200xbf16, #tpu.memory_space<vmem>>, vector<1x14x128xbf16>
      %221 = vector.shape_cast %220 : vector<1x14x128xbf16> to vector<14x128xbf16>
      %222 = vector.shape_cast %219 : vector<14x128xbf16> to vector<1x14x128xbf16>
      tpu.vector_store %arg5[%c1_149, %c0_150, %c2048_151], %222 {strides = array<i32>} : memref<2x14x3200xbf16, #tpu.memory_space<vmem>>, vector<1x14x128xbf16>,
      %223 = vector.extract_strided_slice %214 {offsets = [2, 0], sizes = [14, 128], strides = [1, 1]} : vector<18x128xbf16> to vector<14x128xbf16>
      %c1_152 = arith.constant 1 : index
      %c0_153 = arith.constant 0 : index
      %c2176_154 = arith.constant 2176 : index
      %224 = vector.load %arg5[%c1_152, %c0_153, %c2176_154] : memref<2x14x3200xbf16, #tpu.memory_space<vmem>>, vector<1x14x128xbf16>
      %225 = vector.shape_cast %224 : vector<1x14x128xbf16> to vector<14x128xbf16>
      %226 = vector.shape_cast %223 : vector<14x128xbf16> to vector<1x14x128xbf16>
      tpu.vector_store %arg5[%c1_152, %c0_153, %c2176_154], %226 {strides = array<i32>} : memref<2x14x3200xbf16, #tpu.memory_space<vmem>>, vector<1x14x128xbf16>,
      %227 = vector.extract_strided_slice %214 {offsets = [3, 0], sizes = [14, 128], strides = [1, 1]} : vector<18x128xbf16> to vector<14x128xbf16>
      %c1_155 = arith.constant 1 : index
      %c0_156 = arith.constant 0 : index
      %c2304_157 = arith.constant 2304 : index
      %228 = vector.load %arg5[%c1_155, %c0_156, %c2304_157] : memref<2x14x3200xbf16, #tpu.memory_space<vmem>>, vector<1x14x128xbf16>
      %229 = vector.shape_cast %228 : vector<1x14x128xbf16> to vector<14x128xbf16>
      %230 = vector.shape_cast %227 : vector<14x128xbf16> to vector<1x14x128xbf16>
      tpu.vector_store %arg5[%c1_155, %c0_156, %c2304_157], %230 {strides = array<i32>} : memref<2x14x3200xbf16, #tpu.memory_space<vmem>>, vector<1x14x128xbf16>,
      %231 = vector.extract_strided_slice %214 {offsets = [4, 0], sizes = [14, 128], strides = [1, 1]} : vector<18x128xbf16> to vector<14x128xbf16>
      %c1_158 = arith.constant 1 : index
      %c0_159 = arith.constant 0 : index
      %c2432_160 = arith.constant 2432 : index
      %232 = vector.load %arg5[%c1_158, %c0_159, %c2432_160] : memref<2x14x3200xbf16, #tpu.memory_space<vmem>>, vector<1x14x128xbf16>
      %233 = vector.shape_cast %232 : vector<1x14x128xbf16> to vector<14x128xbf16>
      %234 = vector.shape_cast %231 : vector<14x128xbf16> to vector<1x14x128xbf16>
      tpu.vector_store %arg5[%c1_158, %c0_159, %c2432_160], %234 {strides = array<i32>} : memref<2x14x3200xbf16, #tpu.memory_space<vmem>>, vector<1x14x128xbf16>,
      %c2_i32_161 = arith.constant 2 : i32
      %235 = arith.muli %c2_i32_161, %arg7 : i32
      %c1_i32_162 = arith.constant 1 : i32
      %236 = arith.addi %235, %c1_i32_162 : i32
      %c4_i32_163 = arith.constant 4 : i32
      %237 = arith.addi %236, %c4_i32_163 : i32
      %c0_164 = arith.constant 0 : index
      %238 = arith.index_cast %237 : i32 to index
      %c0_165 = arith.constant 0 : index
      %c0_166 = arith.constant 0 : index
      %239 = vector.load %arg1[%c0_164, %238, %c0_165, %c0_166] : memref<1x18x18x128xbf16, #tpu.memory_space<vmem>>, vector<1x1x18x128xbf16>
      %240 = vector.shape_cast %239 : vector<1x1x18x128xbf16> to vector<18x128xbf16>
      %241 = vector.extract_strided_slice %240 {offsets = [0, 0], sizes = [14, 128], strides = [1, 1]} : vector<18x128xbf16> to vector<14x128xbf16>
      %c1_167 = arith.constant 1 : index
      %c0_168 = arith.constant 0 : index
      %c2560_169 = arith.constant 2560 : index
      %242 = vector.load %arg5[%c1_167, %c0_168, %c2560_169] : memref<2x14x3200xbf16, #tpu.memory_space<vmem>>, vector<1x14x128xbf16>
      %243 = vector.shape_cast %242 : vector<1x14x128xbf16> to vector<14x128xbf16>
      %244 = vector.shape_cast %241 : vector<14x128xbf16> to vector<1x14x128xbf16>
      tpu.vector_store %arg5[%c1_167, %c0_168, %c2560_169], %244 {strides = array<i32>} : memref<2x14x3200xbf16, #tpu.memory_space<vmem>>, vector<1x14x128xbf16>,
      %245 = vector.extract_strided_slice %240 {offsets = [1, 0], sizes = [14, 128], strides = [1, 1]} : vector<18x128xbf16> to vector<14x128xbf16>
      %c1_170 = arith.constant 1 : index
      %c0_171 = arith.constant 0 : index
      %c2688_172 = arith.constant 2688 : index
      %246 = vector.load %arg5[%c1_170, %c0_171, %c2688_172] : memref<2x14x3200xbf16, #tpu.memory_space<vmem>>, vector<1x14x128xbf16>
      %247 = vector.shape_cast %246 : vector<1x14x128xbf16> to vector<14x128xbf16>
      %248 = vector.shape_cast %245 : vector<14x128xbf16> to vector<1x14x128xbf16>
      tpu.vector_store %arg5[%c1_170, %c0_171, %c2688_172], %248 {strides = array<i32>} : memref<2x14x3200xbf16, #tpu.memory_space<vmem>>, vector<1x14x128xbf16>,
      %249 = vector.extract_strided_slice %240 {offsets = [2, 0], sizes = [14, 128], strides = [1, 1]} : vector<18x128xbf16> to vector<14x128xbf16>
      %c1_173 = arith.constant 1 : index
      %c0_174 = arith.constant 0 : index
      %c2816_175 = arith.constant 2816 : index
      %250 = vector.load %arg5[%c1_173, %c0_174, %c2816_175] : memref<2x14x3200xbf16, #tpu.memory_space<vmem>>, vector<1x14x128xbf16>
      %251 = vector.shape_cast %250 : vector<1x14x128xbf16> to vector<14x128xbf16>
      %252 = vector.shape_cast %249 : vector<14x128xbf16> to vector<1x14x128xbf16>
      tpu.vector_store %arg5[%c1_173, %c0_174, %c2816_175], %252 {strides = array<i32>} : memref<2x14x3200xbf16, #tpu.memory_space<vmem>>, vector<1x14x128xbf16>,
      %253 = vector.extract_strided_slice %240 {offsets = [3, 0], sizes = [14, 128], strides = [1, 1]} : vector<18x128xbf16> to vector<14x128xbf16>
      %c1_176 = arith.constant 1 : index
      %c0_177 = arith.constant 0 : index
      %c2944_178 = arith.constant 2944 : index
      %254 = vector.load %arg5[%c1_176, %c0_177, %c2944_178] : memref<2x14x3200xbf16, #tpu.memory_space<vmem>>, vector<1x14x128xbf16>
      %255 = vector.shape_cast %254 : vector<1x14x128xbf16> to vector<14x128xbf16>
      %256 = vector.shape_cast %253 : vector<14x128xbf16> to vector<1x14x128xbf16>
      tpu.vector_store %arg5[%c1_176, %c0_177, %c2944_178], %256 {strides = array<i32>} : memref<2x14x3200xbf16, #tpu.memory_space<vmem>>, vector<1x14x128xbf16>,
      %257 = vector.extract_strided_slice %240 {offsets = [4, 0], sizes = [14, 128], strides = [1, 1]} : vector<18x128xbf16> to vector<14x128xbf16>
      %c1_179 = arith.constant 1 : index
      %c0_180 = arith.constant 0 : index
      %c3072_181 = arith.constant 3072 : index
      %258 = vector.load %arg5[%c1_179, %c0_180, %c3072_181] : memref<2x14x3200xbf16, #tpu.memory_space<vmem>>, vector<1x14x128xbf16>
      %259 = vector.shape_cast %258 : vector<1x14x128xbf16> to vector<14x128xbf16>
      %260 = vector.shape_cast %257 : vector<14x128xbf16> to vector<1x14x128xbf16>
      tpu.vector_store %arg5[%c1_179, %c0_180, %c3072_181], %260 {strides = array<i32>} : memref<2x14x3200xbf16, #tpu.memory_space<vmem>>, vector<1x14x128xbf16>,
      %c0_182 = arith.constant 0 : index
      %c0_183 = arith.constant 0 : index
      %c0_184 = arith.constant 0 : index
      %261 = vector.load %arg5[%c0_182, %c0_183, %c0_184] : memref<2x14x3200xbf16, #tpu.memory_space<vmem>>, vector<1x14x3200xbf16>
      %262 = vector.shape_cast %261 : vector<1x14x3200xbf16> to vector<14x3200xbf16>
      %c0_185 = arith.constant 0 : index
      %c0_186 = arith.constant 0 : index
      %263 = vector.load %arg2[%c0_185, %c0_186] : memref<3200x128xbf16, #tpu.memory_space<vmem>>, vector<3200x128xbf16>
      %cst = arith.constant dense<0.000000e+00> : vector<14x128xf32>
      %264 = tpu.matmul %262, %263, %cst {dimension_numbers = #tpu.dot_dimension_numbers<[1], [0], [0], [1], [0, 0, 1, 1], [], []>} : vector<14x3200xbf16>, vector<3200x128xbf16>, vector<14x128xf32> -> vector<14x128xf32>
      %c1_187 = arith.constant 1 : index
      %c0_188 = arith.constant 0 : index
      %c0_189 = arith.constant 0 : index
      %265 = vector.load %arg5[%c1_187, %c0_188, %c0_189] : memref<2x14x3200xbf16, #tpu.memory_space<vmem>>, vector<1x14x3200xbf16>
      %266 = vector.shape_cast %265 : vector<1x14x3200xbf16> to vector<14x3200xbf16>
      %c0_190 = arith.constant 0 : index
      %c0_191 = arith.constant 0 : index
      %267 = vector.load %arg2[%c0_190, %c0_191] : memref<3200x128xbf16, #tpu.memory_space<vmem>>, vector<3200x128xbf16>
      %cst_192 = arith.constant dense<0.000000e+00> : vector<14x128xf32>
      %268 = tpu.matmul %266, %267, %cst_192 {dimension_numbers = #tpu.dot_dimension_numbers<[1], [0], [0], [1], [0, 0, 1, 1], [], []>} : vector<14x3200xbf16>, vector<3200x128xbf16>, vector<14x128xf32> -> vector<14x128xf32>
      %269 = arith.maximumf %264, %268 : vector<14x128xf32>
      %c0_193 = arith.constant 0 : index
      %c0_194 = arith.constant 0 : index
      %270 = vector.load %arg3[%c0_193, %c0_194] : memref<1x128xf32, #tpu.memory_space<vmem>>, vector<1x128xf32>
      %271 = vector.broadcast %270 : vector<1x128xf32> to vector<14x128xf32>
      %272 = arith.addf %269, %271 : vector<14x128xf32>
      %cst_195 = arith.constant 0.000000e+00 : f32
      %273 = vector.broadcast %cst_195 : f32 to vector<14x128xf32>
      %274 = arith.maximumf %272, %273 : vector<14x128xf32>
      %c0_196 = arith.constant 0 : index
      %c0_197 = arith.constant 0 : index
      %275 = vector.load %arg6[%c0_196, %c0_197] : memref<14x128xf32, #tpu.memory_space<vmem>>, vector<14x128xf32>
      tpu.vector_store %arg6[%c0_196, %c0_197], %274 {strides = array<i32>} : memref<14x128xf32, #tpu.memory_space<vmem>>, vector<14x128xf32>,
      %c0_198 = arith.constant 0 : index
      %c0_199 = arith.constant 0 : index
      %276 = tpu.strided_load %arg6[%c0_198, %c0_199] {strides = array<i32: 2, 1>} : memref<14x128xf32, #tpu.memory_space<vmem>>, vector<7x128xf32>
      %c1_200 = arith.constant 1 : index
      %c0_201 = arith.constant 0 : index
      %277 = tpu.strided_load %arg6[%c1_200, %c0_201] {strides = array<i32: 2, 1>} : memref<14x128xf32, #tpu.memory_space<vmem>>, vector<7x128xf32>
      %278 = arith.maximumf %276, %277 : vector<7x128xf32>
      %279 = arith.truncf %278 : vector<7x128xf32> to vector<7x128xbf16>
      %c0_202 = arith.constant 0 : index
      %280 = arith.index_cast %arg7 : i32 to index
      %c0_203 = arith.constant 0 : index
      %c0_204 = arith.constant 0 : index
      %281 = vector.load %arg4[%c0_202, %280, %c0_203, %c0_204] : memref<1x7x7x128xbf16, #tpu.memory_space<vmem>>, vector<1x1x7x128xbf16>
      %282 = vector.shape_cast %281 : vector<1x1x7x128xbf16> to vector<7x128xbf16>
      %283 = vector.shape_cast %279 : vector<7x128xbf16> to vector<1x1x7x128xbf16>
      tpu.vector_store %arg4[%c0_202, %280, %c0_203, %c0_204], %283 {strides = array<i32>} : memref<1x7x7x128xbf16, #tpu.memory_space<vmem>>, vector<1x1x7x128xbf16>,
    }
    %c7_i32_0 = arith.constant 7 : i32
    return
  }
  func.func @transform_0(%arg0: i32) -> (i32, i32, i32, i32) {
    %c0_i32 = arith.constant 0 : i32
    %c0_i32_0 = arith.constant 0 : i32
    %c0_i32_1 = arith.constant 0 : i32
    %c0_i32_2 = arith.constant 0 : i32
    return %arg0, %c0_i32, %c0_i32_0, %c0_i32_1 : i32, i32, i32, i32
  }
  func.func @transform_1(%arg0: i32) -> (i32, i32) {
    %c0_i32 = arith.constant 0 : i32
    %c0_i32_0 = arith.constant 0 : i32
    %c0_i32_1 = arith.constant 0 : i32
    return %c0_i32, %c0_i32_0 : i32, i32
  }
  func.func @transform_2(%arg0: i32) -> (i32, i32) {
    %c0_i32 = arith.constant 0 : i32
    %c0_i32_0 = arith.constant 0 : i32
    %c0_i32_1 = arith.constant 0 : i32
    return %c0_i32, %c0_i32_0 : i32, i32
  }
  func.func @transform_3(%arg0: i32) -> (i32, i32, i32, i32) {
    %c0_i32 = arith.constant 0 : i32
    %c0_i32_0 = arith.constant 0 : i32
    %c0_i32_1 = arith.constant 0 : i32
    %c0_i32_2 = arith.constant 0 : i32
    return %arg0, %c0_i32, %c0_i32_0, %c0_i32_1 : i32, i32, i32, i32
  }
}

module attributes {stable_mosaic.version = 11 : i64} {
  func.func @_fc_fused_kernel(%arg0: i32, %arg1: memref<2x6272xbf16, #tpu.memory_space<vmem>>, %arg2: memref<6272x128xbf16, #tpu.memory_space<vmem>>, %arg3: memref<1x128xf32, #tpu.memory_space<vmem>>, %arg4: memref<128x128xbf16, #tpu.memory_space<vmem>>, %arg5: memref<1x128xf32, #tpu.memory_space<vmem>>, %arg6: memref<2x128xf32, #tpu.memory_space<vmem>>) attributes {dimension_semantics = [#tpu.dimension_semantics<parallel>], iteration_bounds = array<i64: 1>, scalar_prefetch = 0 : i64, scratch_operands = 0 : i64, tpu.core_type = #tpu.core_type<tc>, window_params = [{transform_indices = @transform_0, window_bounds = array<i64: 2, 6272>}, {pipeline_mode = #tpu.pipeline_mode<synchronous>, transform_indices = @transform_1, window_bounds = array<i64: 6272, 128>}, {pipeline_mode = #tpu.pipeline_mode<synchronous>, transform_indices = @transform_2, window_bounds = array<i64: 1, 128>}, {pipeline_mode = #tpu.pipeline_mode<synchronous>, transform_indices = @transform_3, window_bounds = array<i64: 128, 128>}, {pipeline_mode = #tpu.pipeline_mode<synchronous>, transform_indices = @transform_4, window_bounds = array<i64: 1, 128>}, {transform_indices = @transform_5, window_bounds = array<i64: 2, 128>}]} {
    %c0 = arith.constant 0 : index
    %c0_0 = arith.constant 0 : index
    %0 = vector.load %arg1[%c0, %c0_0] : memref<2x6272xbf16, #tpu.memory_space<vmem>>, vector<2x6272xbf16>
    %c0_1 = arith.constant 0 : index
    %c0_2 = arith.constant 0 : index
    %1 = vector.load %arg2[%c0_1, %c0_2] : memref<6272x128xbf16, #tpu.memory_space<vmem>>, vector<6272x128xbf16>
    %cst = arith.constant dense<0.000000e+00> : vector<2x128xf32>
    %2 = tpu.matmul %0, %1, %cst {dimension_numbers = #tpu.dot_dimension_numbers<[1], [0], [0], [1], [0, 0, 1, 1], [], []>} : vector<2x6272xbf16>, vector<6272x128xbf16>, vector<2x128xf32> -> vector<2x128xf32>
    %c0_3 = arith.constant 0 : index
    %c0_4 = arith.constant 0 : index
    %3 = vector.load %arg3[%c0_3, %c0_4] : memref<1x128xf32, #tpu.memory_space<vmem>>, vector<1x128xf32>
    %4 = vector.broadcast %3 : vector<1x128xf32> to vector<2x128xf32>
    %5 = arith.addf %2, %4 : vector<2x128xf32>
    %cst_5 = arith.constant 0.000000e+00 : f32
    %6 = vector.broadcast %cst_5 : f32 to vector<2x128xf32>
    %7 = arith.maximumf %5, %6 : vector<2x128xf32>
    %8 = arith.truncf %7 : vector<2x128xf32> to vector<2x128xbf16>
    %c0_6 = arith.constant 0 : index
    %c0_7 = arith.constant 0 : index
    %9 = vector.load %arg4[%c0_6, %c0_7] : memref<128x128xbf16, #tpu.memory_space<vmem>>, vector<128x128xbf16>
    %cst_8 = arith.constant dense<0.000000e+00> : vector<2x128xf32>
    %10 = tpu.matmul %8, %9, %cst_8 {dimension_numbers = #tpu.dot_dimension_numbers<[1], [0], [0], [1], [0, 0, 1, 1], [], []>} : vector<2x128xbf16>, vector<128x128xbf16>, vector<2x128xf32> -> vector<2x128xf32>
    %c0_9 = arith.constant 0 : index
    %c0_10 = arith.constant 0 : index
    %11 = vector.load %arg5[%c0_9, %c0_10] : memref<1x128xf32, #tpu.memory_space<vmem>>, vector<1x128xf32>
    %12 = vector.broadcast %11 : vector<1x128xf32> to vector<2x128xf32>
    %13 = arith.addf %10, %12 : vector<2x128xf32>
    %c0_11 = arith.constant 0 : index
    %c0_12 = arith.constant 0 : index
    %14 = vector.load %arg6[%c0_11, %c0_12] : memref<2x128xf32, #tpu.memory_space<vmem>>, vector<2x128xf32>
    tpu.vector_store %arg6[%c0_11, %c0_12], %13 {strides = array<i32>} : memref<2x128xf32, #tpu.memory_space<vmem>>, vector<2x128xf32>,
    return
  }
  func.func @transform_0(%arg0: i32) -> (i32, i32) {
    %c0_i32 = arith.constant 0 : i32
    %c0_i32_0 = arith.constant 0 : i32
    return %arg0, %c0_i32 : i32, i32
  }
  func.func @transform_1(%arg0: i32) -> (i32, i32) {
    %c0_i32 = arith.constant 0 : i32
    %c0_i32_0 = arith.constant 0 : i32
    %c0_i32_1 = arith.constant 0 : i32
    return %c0_i32, %c0_i32_0 : i32, i32
  }
  func.func @transform_2(%arg0: i32) -> (i32, i32) {
    %c0_i32 = arith.constant 0 : i32
    %c0_i32_0 = arith.constant 0 : i32
    %c0_i32_1 = arith.constant 0 : i32
    return %c0_i32, %c0_i32_0 : i32, i32
  }
  func.func @transform_3(%arg0: i32) -> (i32, i32) {
    %c0_i32 = arith.constant 0 : i32
    %c0_i32_0 = arith.constant 0 : i32
    %c0_i32_1 = arith.constant 0 : i32
    return %c0_i32, %c0_i32_0 : i32, i32
  }
  func.func @transform_4(%arg0: i32) -> (i32, i32) {
    %c0_i32 = arith.constant 0 : i32
    %c0_i32_0 = arith.constant 0 : i32
    %c0_i32_1 = arith.constant 0 : i32
    return %c0_i32, %c0_i32_0 : i32, i32
  }
  func.func @transform_5(%arg0: i32) -> (i32, i32) {
    %c0_i32 = arith.constant 0 : i32
    %c0_i32_0 = arith.constant 0 : i32
    return %arg0, %c0_i32 : i32, i32
  }
}

</mosaic_0001>

<bundles_post_ra>
// kernel: cnn_forward.3
= control target key start
LH: loop header
LB: loop body
LE: loop exit
PB: predicated region body
PF: predicated region fallthrough
CT: control target
= control target key end

     0   :  { %8 = vsyncpa [#allocation5], 0  ;;  %s3894_s0 = inlined_call_operand.vmem [shape: bf16[2,32,32,1], index: 0, kind: input, shape index: {}]   ;;  %s3895_s1 = inlined_call_operand.hbm [shape: bf16[25,128], index: 1, kind: input, shape index: {}]   ;;  %s3896_s2 = inlined_call_operand.hbm [shape: f32[1,128], index: 2, kind: input, shape index: {}]   ;;  %s3897_s3 = inlined_call_operand.vmem [shape: bf16[2,18,18,128], index: 3, kind: output, shape index: {}]  }
   0x1   :  { %9 = vsyncpa [#allocation7], 0  ;;  %s2604_s12 = smov 0  }
   0x2 LB: > { %s125_s15 = sshll.u32 %s3895_s1, 4  ;;  %s2263_s16 = sadd.s32 4294967295, %s2547_s12   ;;  %s2547_s12 = sphi %s2604_s12, %s15_s12   ;;  %s126_s15 = int_to_ptr.hbm [resolvable:$true] %s125_s15 }
   0x3   : > { %p2265_p0 = scmp.ge.s32.totalorder %s2547_s12, 1  ;;  %p114_p1 = scmp.lt.s32.totalorder %s2547_s12, 3 }
   0x4   : > { %p2417_p2 = scmp.eq.s32.totalorder %s2263_s16, 0  ;;  %s2553_s18 = smov [#allocation4]  }
   0x5   : > { %p2615_p3 = pnand %p2265_p0, %p114_p1  ;;  %s127_s19 = sshll.u32 %s2553_s18, 4  ;;  %s128_s19 = int_to_ptr.vmem [resolvable:$true] %s127_s19 }
   0x6   : > { %s140_s22 = sshll.u32 %s3896_s2, 4  ;;  %s2554_s23 = smov [#allocation6]   ;;  %s141_s22 = int_to_ptr.hbm [resolvable:$true] %s140_s22 }
   0x7   : > { %p2410_p4 = pneg %p2615_p3  ;;  %s142_s24 = sshll.u32 %s2554_s23, 4  ;;  %s143_s24 = int_to_ptr.vmem [resolvable:$true] %s142_s24 }
   0x8   : > { %s2555_s25 = smov 64   ;;  %s2556_s26 = smov 4  }
   0x9   : > { %p2411_p5 = pnand %p2417_p2, %p2410_p4  ;;  %163 = sbr.rel (%p2615_p3) target bundleno = 873 (0x369), region = 32 }
   0xb   : > { %2413 = dma.hbm_to_vmem [thread:$0]  (!%p2411_p5), %s126_s15, 256, %s128_s19, [#allocation5], %s2555_s25, %s2555_s25, %s2556_s26  }
   0xc   : > { %2416 = dma.hbm_to_vmem [thread:$0]  (!%p2411_p5), %s141_s22, 16, %s143_s24, [#allocation7]  }
   0xe   : > { %2538 = dma.done.wait (%p2417_p2), [#allocation5], 256  }
   0xf   : > { %2540 = vsyncadd (%p2417_p2), [#allocation5], 4294967040 }
  0x10   : > { %2542 = dma.done.wait (%p2417_p2), [#allocation7], 16  }
  0x11   : > { %2544 = vsyncadd (%p2417_p2), [#allocation7], 4294967280  ;;  %p193_p6 = scmp.lt.s32.totalorder %s2263_s16, 1  ;;  %v2557_v0 = vmov 0   ;;  %s2695_s8 = smov 0  }
  0x13   : > { %s4028_s16 = smov (!%p193_p6, %s2263_s16), 1 }
  0x14   : > { %s2377_s27 = sshll.u32 %s4028_s16, 9  ;;  %s2401_s28 = smul.u32 216, %s4028_s16 }
  0x15   : > { %s2634_s4 = scalar_lea.vmem %s3894_s0, %s2377_s27 }
  0x16   : > { %s2639_s7 = scalar_lea.vmem %s3897_s3, %s2401_s28 }
  0x17   : > { %204 = vst [vmem:[%s2639_s7] sm:$0xf] %v2557_v0 }
  0x18   : > { %205 = vst [vmem:[%s2639_s7 + $0x4] sm:$0xf] %v2557_v0 }
  0x19   : > { %206 = vst [vmem:[%s2639_s7 + $0x8] sm:$0x1] %v2557_v0 }
  0x1a   : > { %207 = vst [vmem:[%s2639_s7 + $0xc] sm:$0xf] %v2557_v0 }
  0x1b   : > { %208 = vst [vmem:[%s2639_s7 + $0x10] sm:$0xf] %v2557_v0 }
  0x1c   : > { %209 = vst [vmem:[%s2639_s7 + $0x14] sm:$0x1] %v2557_v0 }
  0x1d   : > { %210 = vst [vmem:[%s2639_s7 + $0x18] sm:$0xf] %v2557_v0 }
  0x1e   : > { %211 = vst [vmem:[%s2639_s7 + $0x1c] sm:$0xf] %v2557_v0 }
  0x1f   : > { %212 = vst [vmem:[%s2639_s7 + $0x20] sm:$0x1] %v2557_v0 }
  0x20   : > { %213 = vst [vmem:[%s2639_s7 + $0x24] sm:$0xf] %v2557_v0 }
  0x21   : > { %214 = vst [vmem:[%s2639_s7 + $0x28] sm:$0xf] %v2557_v0 }
  0x22   : > { %215 = vst [vmem:[%s2639_s7 + $0x2c] sm:$0x1] %v2557_v0 }
  0x23   : > { %216 = vst [vmem:[%s2639_s7 + $0x30] sm:$0xf] %v2557_v0 }
  0x24   : > { %217 = vst [vmem:[%s2639_s7 + $0x34] sm:$0xf] %v2557_v0 }
  0x25   : > { %218 = vst [vmem:[%s2639_s7 + $0x38] sm:$0x1] %v2557_v0 }
  0x26   : > { %219 = vst [vmem:[%s2639_s7 + $0x3c] sm:$0xf] %v2557_v0 }
  0x27   : > { %220 = vst [vmem:[%s2639_s7 + $0x40] sm:$0xf] %v2557_v0 }
  0x28   : > { %221 = vst [vmem:[%s2639_s7 + $0x44] sm:$0x1] %v2557_v0 }
  0x29   : > { %222 = vst [vmem:[%s2639_s7 + $0x48] sm:$0xf] %v2557_v0 }
  0x2a   : > { %223 = vst [vmem:[%s2639_s7 + $0x4c] sm:$0xf] %v2557_v0 }
  0x2b   : > { %224 = vst [vmem:[%s2639_s7 + $0x50] sm:$0x1] %v2557_v0 }
  0x2c   : > { %225 = vst [vmem:[%s2639_s7 + $0x54] sm:$0xf] %v2557_v0 }
  0x2d   : > { %226 = vst [vmem:[%s2639_s7 + $0x58] sm:$0xf] %v2557_v0 }
  0x2e   : > { %227 = vst [vmem:[%s2639_s7 + $0x5c] sm:$0x1] %v2557_v0 }
  0x2f   : > { %228 = vst [vmem:[%s2639_s7 + $0x60] sm:$0xf] %v2557_v0 }
  0x30   : > { %229 = vst [vmem:[%s2639_s7 + $0x64] sm:$0xf] %v2557_v0 }
  0x31   : > { %230 = vst [vmem:[%s2639_s7 + $0x68] sm:$0x1] %v2557_v0 }
  0x32   : > { %231 = vst [vmem:[%s2639_s7 + $0x6c] sm:$0xf] %v2557_v0 }
  0x33   : > { %232 = vst [vmem:[%s2639_s7 + $0x70] sm:$0xf] %v2557_v0 }
  0x34   : > { %233 = vst [vmem:[%s2639_s7 + $0x74] sm:$0x1] %v2557_v0 }
  0x35   : > { %234 = vst [vmem:[%s2639_s7 + $0x78] sm:$0xf] %v2557_v0 }
  0x36   : > { %235 = vst [vmem:[%s2639_s7 + $0x7c] sm:$0xf] %v2557_v0 }
  0x37   : > { %236 = vst [vmem:[%s2639_s7 + $0x80] sm:$0x1] %v2557_v0 }
  0x38   : > { %237 = vst [vmem:[%s2639_s7 + $0x84] sm:$0xf] %v2557_v0 }
  0x39   : > { %238 = vst [vmem:[%s2639_s7 + $0x88] sm:$0xf] %v2557_v0 }
  0x3a   : > { %239 = vst [vmem:[%s2639_s7 + $0x8c] sm:$0x1] %v2557_v0 }
  0x3b   : > { %240 = vst [vmem:[%s2639_s7 + $0x90] sm:$0xf] %v2557_v0 }
  0x3c   : > { %241 = vst [vmem:[%s2639_s7 + $0x94] sm:$0xf] %v2557_v0 }
  0x3d   : > { %242 = vst [vmem:[%s2639_s7 + $0x98] sm:$0x1] %v2557_v0 }
  0x3e   : > { %243 = vst [vmem:[%s2639_s7 + $0x9c] sm:$0xf] %v2557_v0 }
  0x3f   : > { %244 = vst [vmem:[%s2639_s7 + $0xa0] sm:$0xf] %v2557_v0 }
  0x40   : > { %245 = vst [vmem:[%s2639_s7 + $0xa4] sm:$0x1] %v2557_v0 }
  0x41   : > { %246 = vst [vmem:[%s2639_s7 + $0xa8] sm:$0xf] %v2557_v0 }
  0x42   : > { %247 = vst [vmem:[%s2639_s7 + $0xac] sm:$0xf] %v2557_v0 }
  0x43   : > { %248 = vst [vmem:[%s2639_s7 + $0xb0] sm:$0x1] %v2557_v0 }
  0x44   : > { %249 = vst [vmem:[%s2639_s7 + $0xb4] sm:$0xf] %v2557_v0 }
  0x45   : > { %250 = vst [vmem:[%s2639_s7 + $0xb8] sm:$0xf] %v2557_v0 }
  0x46   : > { %251 = vst [vmem:[%s2639_s7 + $0xbc] sm:$0x1] %v2557_v0 }
  0x47   : > { %252 = vst [vmem:[%s2639_s7 + $0xc0] sm:$0xf] %v2557_v0 }
  0x48   : > { %253 = vst [vmem:[%s2639_s7 + $0xc4] sm:$0xf] %v2557_v0 }
  0x49   : > { %254 = vst [vmem:[%s2639_s7 + $0xc8] sm:$0x1] %v2557_v0 }
  0x4a   : > { %255 = vst [vmem:[%s2639_s7 + $0xcc] sm:$0xf] %v2557_v0 }
  0x4b   : > { %256 = vst [vmem:[%s2639_s7 + $0xd0] sm:$0xf] %v2557_v0 }
  0x4c   : > { %257 = vst [vmem:[%s2639_s7 + $0xd4] sm:$0x1] %v2557_v0 }
  0x4d LB: >> { %s2379_s9 = sshll.u32 %s2551_s8, 5  ;;  %vm278_vm0 = vsmask.f32 3328  ;;  %vm279_vm1 = vsmask.f32 7440  ;;  %vm342_vm3 = vcmask 1042432   ;;  %s2551_s8 = sphi %s2695_s8, %s263_s8  }
  0x4e   : >> { %s2702_s10 = scalar_lea.vmem %s2634_s4, %s2379_s9  ;;  %vm2724_vm2 = vmor %vm278_vm0, %vm279_vm1  ;;  %vm343_vm4 = vcmask 1046532   ;;  %s2558_s11 = smov 1   ;;  %vm374_vm6 = vsmask.f32 2304  ;;  %vm375_vm7 = vsmask.f32 6416 }
  0x4f   : >> { %v2705_v1 = vld [vmem:[%s2702_s10 + $0xc] sm:$0xf]  ;;  %v2708_v2 = vld [vmem:[%s2702_s10] sm:$0xf]  ;;  %v2711_v3 = vld [vmem:[%s2702_s10 + $0x4] sm:$0xf] }
  0x50   : >> { %v311_v4 = vshll.u32 %v2705_v1, 16  ;;  %v315_v5 = vshrl.u32 %v2705_v1, 16  ;;  %v282_v6 = vshrl.u32 %v2708_v2, 16  ;;  %v285_v7 = vshll.u32 %v2708_v2, 16  ;;  %v2718_v8 = vld [vmem:[%s2702_s10 + $0x8] sm:$0xf]  ;;  %vm2734_vm5 = vmor %vm342_vm3, %vm343_vm4 }
  0x51   : >> { %v291_v9 = vshll.u32 %v2711_v3, 16  ;;  %v301_v10 = vshll.u32 %v2718_v8, 16  ;;  %v305_v11 = vshrl.u32 %v2718_v8, 16  ;;  %v295_v12 = vshrl.u32 %v2711_v3, 16  ;;  %s2559_s13 = smov 2   ;;  %vm2755_vm8 = vmor %vm374_vm6, %vm375_vm7  ;;  %s2560_s14 = smov 3  }
  0x52   : >> { %v313_v13 = vrot.slane %v311_v4, 5  ;;  %v317_v14 = vrot.slane %v315_v5, 4  ;;  %v284_v15 = vrot.slane %v282_v6, 4  ;;  %v287_v16 = vrot.slane %v285_v7, 5  ;;  %s2561_s15 = smov 4   ;;  %s2562_s16 = smov 5  }
  0x53   : >> { %v303_v18 = vrot.slane %v301_v10, 5  ;;  %v307_v19 = vrot.slane %v305_v11, 4  ;;  %v297_v20 = vrot.slane %v295_v12, 4  ;;  %v293_v22 = vrot.slane %v291_v9, 5  ;;  %s2563_s17 = smov 6   ;;  %s2564_s18 = smov 7  }
  0x54   : >> { %v318_v17 = vor.u32 %v317_v14, %v313_v13  ;;  %v288_v21 = vor.u32 %v287_v16, %v284_v15  ;;  %v2278_v28 = vrot.slane %v2708_v2, 9  ;;  %v347_v31 = vrot.slane %v2711_v3, 5  ;;  %s2565_s19 = smov 8   ;;  %s2566_s20 = smov 9  }
  0x55   : >> { %v308_v25 = vor.u32 %v307_v19, %v303_v18  ;;  %v298_v27 = vor.u32 %v297_v20, %v293_v22  ;;  %v377_v37 = vrot.slane %v282_v6, 5  ;;  %v378_v38 = vrot.slane %v285_v7, 6  ;;  %s2567_s21 = smov 10   ;;  %s2568_s22 = smov 11  }
  0x56   : >> { %v319_v23 = vrot.slane %v318_v17, 4  ;;  %v289_v26 = vrot.slane %v288_v21, 4  ;;  %v348_v34 = vsel %vm2734_vm5, %v2278_v28, %v347_v31  ;;  %v349_v36 = vrot.slane %v347_v31, 4  ;;  %v2793_v17 = vld [vmem:[%s2702_s10 + $0x18] sm:$0xf]  ;;  %s2569_s23 = smov 12  }
  0x57   : >> { %v309_v30 = vrot.slane %v308_v25, 4  ;;  %v299_v33 = vrot.slane %v298_v27, 4  ;;  %356 = vrot.lane.b32.xlu2 %v348_v34, %s2559_s13  ;;  %v350_v40 = vrot.slane %v2718_v8, 5  ;;  %v353_v41 = vrot.slane %v2705_v1, 5  ;;  %s2570_s24 = smov 13   ;;  %s2571_s25 = smov 14  }
  0x58   : >> { %326 = vrot.lane.b32.xlu1 %v319_v23, %s2558_s11  ;;  %v294_v29 = vsel %vm2724_vm2, %v289_v26, %v293_v22  ;;  %v386_v42 = vrot.slane %v305_v11, 5  ;;  %v387_v43 = vrot.slane %v301_v10, 6  ;;  %v379_v45 = vor.u32 %v378_v38, %v377_v37  ;;  %s2572_s26 = smov 15   ;;  %s2573_s27 = smov 16  }
  0x59   : >> { %320 = vrot.lane.b32.xlu0 %v294_v29, %s2558_s11  ;;  %v314_v35 = vsel %vm2724_vm2, %v309_v30, %v313_v13  ;;  %v304_v39 = vsel %vm2724_vm2, %v299_v33, %v303_v18  ;;  %v351_v44 = vsel %vm2734_vm5, %v349_v36, %v350_v40  ;;  %v382_v46 = vrot.slane %v291_v9, 6  ;;  %v2785_v13 = vld [vmem:[%s2702_s10 + $0x10] sm:$0xf]  ;;  %v2797_v18 = vld [vmem:[%s2702_s10 + $0x14] sm:$0xf]  ;;  %s2574_s28 = smov 17  }
  0x5a   : >> { %v352_v47 = vrot.slane %v350_v40, 4  ;;  %v381_v48 = vrot.slane %v295_v12, 5  ;;  %v355_v49 = vrot.slane %v353_v41, 4  ;;  %v391_v50 = vrot.slane %v315_v5, 5  ;;  %v2807_v30 = vld [vmem:[%s2702_s10 + $0x1c] sm:$0xf] }
  0x5b   : >> { %v392_v51 = vrot.slane %v311_v4, 6  ;;  %v388_v52 = vor.u32 %v387_v43, %v386_v42  ;;  %v380_v53 = vrot.slane %v379_v45, 4  ;;  %v419_v62 = vrot.slane %v2711_v3, 6  ;;  %s2575_s29 = smov 18   ;;  %s2576_s30 = smov 19  }
  0x5c   : >> { %v354_v54 = vsel %vm2734_vm5, %v352_v47, %v353_v41  ;;  %v383_v55 = vor.u32 %v382_v46, %v381_v48  ;;  %vm3898_vm9 = vcmask 1041408   ;;  %vm415_vm10 = vcmask 1045508   ;;  %s2577_s5 = smov 20   ;;  %s3913_s6 = smov 21  }
  0x5d   : >> { %v390_v57 = vrot.slane %v388_v52, 4  ;;  %v393_v58 = vor.u32 %v392_v51, %v391_v50  ;;  %v421_v4 = vrot.slane %v419_v62, 4  ;;  %v422_v5 = vrot.slane %v2718_v8, 6  ;;  %vm2772_vm11 = vmor %vm3898_vm9, %vm415_vm10  ;;  %s3915_s9 = smov 22  }
  0x5e   : >> { %v384_v59 = vsel %vm2755_vm8, %v380_v53, %v383_v55  ;;  %v385_v60 = vrot.slane %v383_v55, 4  ;;  %v2279_v7 = vrot.slane %v2708_v2, 10  ;;  %v425_v12 = vrot.slane %v2705_v1, 6 }
  0x5f   : >> { %358 = vrot.lane.b32.xlu2 %v351_v44, %s2559_s13  ;;  %v394_v61 = vsel %vm2755_vm8, %v390_v57, %v393_v58  ;;  %v395_v0 = vrot.slane %v393_v58, 4  ;;  %v423_v9 = vsel %vm2772_vm11, %v421_v4, %v422_v5  ;;  %v424_v10 = vrot.slane %v422_v5, 4 }
  0x60   : >> { %324 = vrot.lane.b32.xlu1 %v314_v35, %s2558_s11  ;;  %v389_v63 = vsel %vm2755_vm8, %v385_v60, %v388_v52  ;;  %v420_v11 = vsel %vm2772_vm11, %v2279_v7, %v419_v62  ;;  %v477_v15 = vshrl.u32 %v2785_v13, 16  ;;  %v480_v16 = vshll.u32 %v2785_v13, 16 }
  0x61   : >> { %322 = vrot.lane.b32.xlu0 %v304_v39, %s2558_s11  ;;  %v426_v14 = vsel %vm2772_vm11, %v424_v10, %v425_v12  ;;  %v496_v19 = vshll.u32 %v2793_v17, 16  ;;  %v500_v20 = vshrl.u32 %v2793_v17, 16  ;;  %v427_v23 = vrot.slane %v425_v12, 4 }
  0x62   : >> { %v479_v21 = vrot.slane %v477_v15, 4  ;;  %v482_v22 = vrot.slane %v480_v16, 5  ;;  %v486_v25 = vshll.u32 %v2797_v18, 16  ;;  %v490_v26 = vshrl.u32 %v2797_v18, 16 }
  0x63   : >> { %v498_v27 = vrot.slane %v496_v19, 5  ;;  %v502_v28 = vrot.slane %v500_v20, 4  ;;  %v510_v34 = vshrl.u32 %v2807_v30, 16  ;;  %v506_v36 = vshll.u32 %v2807_v30, 16 }
  0x64   : >> { %v483_v29 = vor.u32 %v482_v22, %v479_v21  ;;  %v488_v31 = vrot.slane %v486_v25, 5  ;;  %v492_v33 = vrot.slane %v490_v26, 4  ;;  %v535_v44 = vrot.slane %v2797_v18, 5 }
  0x65   : >> { %v503_v35 = vor.u32 %v502_v28, %v498_v27  ;;  %v512_v39 = vrot.slane %v510_v34, 4  ;;  %v508_v41 = vrot.slane %v506_v36, 5  ;;  %v562_v51 = vrot.slane %v477_v15, 5 }
  0x66   : >> { %v484_v37 = vrot.slane %v483_v29, 4  ;;  %v493_v38 = vor.u32 %v492_v33, %v488_v31  ;;  %v537_v48 = vrot.slane %v535_v44, 4  ;;  %v563_v52 = vrot.slane %v480_v16, 6  ;;  %v2858_v29 = vld [vmem:[%s2702_s10 + $0x20] sm:$0xf] }
  0x67   : >> { %396 = vrot.lane.b32.xlu2 %v384_v59, %s2560_s14  ;;  %v504_v40 = vrot.slane %v503_v35, 4  ;;  %v513_v45 = vor.u32 %v512_v39, %v508_v41  ;;  %v2286_v53 = vrot.slane %v2785_v13, 9  ;;  %v566_v57 = vrot.slane %v490_v26, 5 }
  0x68   : >> { %362 = vrot.lane.b32.xlu1 %v355_v49, %s2559_s13  ;;  %v489_v42 = vsel %vm2724_vm2, %v484_v37, %v488_v31  ;;  %v494_v43 = vrot.slane %v493_v38, 4  ;;  %v538_v49 = vrot.slane %v2793_v17, 5  ;;  %v564_v55 = vor.u32 %v563_v52, %v562_v51  ;;  %v2887_v37 = vld [vmem:[%s2702_s10 + $0x2c] sm:$0xf] }
  0x69   : >> { %360 = vrot.lane.b32.xlu0 %v354_v54, %s2559_s13  ;;  %v509_v46 = vsel %vm2724_vm2, %v504_v40, %v508_v41  ;;  %v514_v50 = vrot.slane %v513_v45, 4  ;;  %v567_v58 = vrot.slane %v486_v25, 6  ;;  %v536_v60 = vsel %vm2734_vm5, %v2286_v53, %v535_v44 }
  0x6a   : >> { %v499_v47 = vsel %vm2724_vm2, %v494_v43, %v498_v27  ;;  %v539_v54 = vsel %vm2734_vm5, %v537_v48, %v538_v49  ;;  %v540_v59 = vrot.slane %v538_v49, 4  ;;  %v565_v62 = vrot.slane %v564_v55, 4 }
  0x6b   : >> { %v571_v4 = vrot.slane %v500_v20, 5  ;;  %v572_v5 = vrot.slane %v496_v19, 6  ;;  %v576_v7 = vrot.slane %v510_v34, 5  ;;  %v604_v21 = vrot.slane %v2793_v17, 6 }
  0x6c   : >> { %v2287_v22 = vrot.slane %v2785_v13, 10  ;;  %v601_v25 = vrot.slane %v2797_v18, 6  ;;  %v607_v27 = vrot.slane %v2807_v30, 6  ;;  %vm276_vm12 = vcmask 1024  }
  0x6d   : >> { %v606_v26 = vrot.slane %v604_v21, 4  ;;  %277 = vst.msk [vmem:[#allocation2 + $0xc] sm:$0x3] %vm276_vm12, %v2705_v1  ;;  %vm272_vm13 = vcmask 3072   ;;  %v688_v43 = vshll.u32 %v2887_v37, 16  ;;  %v692_v44 = vshrl.u32 %v2887_v37, 16 }
  0x6e   : >> { %v602_v28 = vsel %vm2772_vm11, %v2287_v22, %v601_v25  ;;  %273 = vst.msk [vmem:[#allocation2] sm:$0xf] %vm272_vm13, %v2708_v2  ;;  %v2877_v2 = vld [vmem:[%s2702_s10 + $0x24] sm:$0xf]  ;;  %v609_v31 = vrot.slane %v607_v27, 4  ;;  %vm336_vm14 = vcmask 9224  }
  0x6f   : >> { %402 = vrot.lane.b32.xlu2 %v395_v0, %s2560_s14  ;;  %274 = vst.msk [vmem:[#allocation2 + $0x4] sm:$0xf] %vm272_vm13, %v2711_v3  ;;  %v672_v33 = vshrl.u32 %v2877_v2, 16  ;;  %v2884_v3 = vld [vmem:[%s2702_s10 + $0x28] sm:$0xf]  ;;  %v690_v49 = vrot.slane %v688_v43, 5 }
  0x70   : >> { %400 = vrot.lane.b32.xlu1 %v394_v61, %s2560_s14  ;;  %v541_v61 = vrot.slane %v2807_v30, 5  ;;  %275 = vst.msk [vmem:[#allocation2 + $0x8] sm:$0xf] %vm272_vm13, %v2718_v8  ;;  %v678_v41 = vshll.u32 %v2884_v3, 16  ;;  %vm332_vm15 = vcmask 11272   ;;  %vm368_vm0 = vcmask 19472  }
  0x71   : >> { %398 = vrot.lane.b32.xlu0 %v389_v63, %s2560_s14  ;;  %v568_v63 = vor.u32 %v567_v58, %v566_v57  ;;  %v674_v38 = vrot.slane %v672_v33, 4  ;;  %vm408_vm1 = vcmask 27672   ;;  %vm372_vm3 = vcmask 17424  }
  0x72   : >> { %v542_v0 = vsel %vm2734_vm5, %v540_v59, %v541_v61  ;;  %v543_v12 = vrot.slane %v541_v61, 4  ;;  %v2294_v61 = vrot.slane %v2858_v29, 9  ;;  %v754_v22 = vrot.slane %v678_v41, 6 }
  0x73   : >> { %v569_v10 = vsel %vm2755_vm8, %v565_v62, %v568_v63  ;;  %vm3900_vm4 = vcmask 25624   ;;  %vm3899_vm6 = vcmask 35872   ;;  %vm3906_vm7 = vcmask 44072  }
  0x74   : >> { %vm3903_vm10 = vcmask 52272   ;;  %vm3905_vm9 = vcmask 33824  }
  0x77   : >> { %432 = vrot.lane.b32.xlu2 %v426_v14, %s2561_s15  ;;  %v573_v14 = vor.u32 %v572_v5, %v571_v4  ;;  %v723_v4 = vrot.slane %v2887_v37, 5 }
  0x78   : >> { %430 = vrot.lane.b32.xlu1 %v423_v9, %s2561_s15  ;;  %v577_v9 = vrot.slane %v506_v36, 6  ;;  %v668_v36 = vshll.u32 %v2877_v2, 16 }
  0x79   : >> { %428 = vrot.lane.b32.xlu0 %v420_v11, %s2561_s15  ;;  %v570_v11 = vrot.slane %v568_v63, 4  ;;  %v575_v19 = vrot.slane %v573_v14, 4 }
  0x7a   : >> { %v578_v15 = vor.u32 %v577_v9, %v576_v7  ;;  %v670_v40 = vrot.slane %v668_v36, 5  ;;  %v748_v7 = vrot.slane %v672_v33, 5  ;;  %v749_v9 = vrot.slane %v668_v36, 6 }
  0x7b   : >> { %v574_v16 = vsel %vm2755_vm8, %v570_v11, %v573_v14 }
  0x7c   : >> { %v580_v20 = vrot.slane %v578_v15, 4 }
  0x7f   : >> { %460 = vrot.lane.b32.xlu2 %v2797_v18, %s2562_s16  ;;  %v659_v18 = vshrl.u32 %v2858_v29, 16 }
  0x80   : >> { %458 = vrot.lane.b32.xlu1 %v2785_v13, %s2562_s16  ;;  %v603_v13 = vrot.slane %v601_v25, 4 }
  0x81   : >> { %434 = vrot.lane.b32.xlu0 %v427_v23, %s2561_s15  ;;  %v579_v23 = vsel %vm2755_vm8, %v575_v19, %v578_v15  ;;  %v661_v34 = vrot.slane %v659_v18, 4  ;;  %v744_v14 = vrot.slane %v659_v18, 5 }
  0x82   : >> { %v605_v1 = vsel %vm2772_vm11, %v603_v13, %v604_v21 }
  0x87   : >> { %515 = vrot.lane.b32.xlu2 %v489_v42, %s2563_s17  ;;  %v682_v42 = vshrl.u32 %v2884_v3, 16 }
  0x88   : >> { %464 = vrot.lane.b32.xlu1 %v2807_v30, %s2562_s16  ;;  %v662_v30 = vshll.u32 %v2858_v29, 16 }
  0x89   : >> { %462 = vrot.lane.b32.xlu0 %v2793_v17, %s2562_s16  ;;  %v608_v17 = vsel %vm2772_vm11, %v606_v26, %v607_v27  ;;  %v684_v48 = vrot.slane %v682_v42, 4  ;;  %v753_v21 = vrot.slane %v682_v42, 5  ;;  %v725_v27 = vrot.slane %v723_v4, 4 }
  0x8a   : >> { %v664_v35 = vrot.slane %v662_v30, 5  ;;  %v745_v15 = vrot.slane %v662_v30, 6  ;;  %v758_v30 = vrot.slane %v692_v44, 5 }
  0x8b   : >> { %v755_v13 = vor.u32 %v754_v22, %v753_v21 }
  0x8c   : >> { %v665_v8 = vor.u32 %v664_v35, %v661_v34  ;;  %v746_v26 = vor.u32 %v745_v15, %v744_v14  ;;  %v2995_v15 = vld [vmem:[%s2702_s10 + $0x3c] sm:$0xf] }
  0x8d   : >> { %v757_v34 = vrot.slane %v755_v13, 4  ;;  %v870_v21 = vshll.u32 %v2995_v15, 16  ;;  %v874_v22 = vshrl.u32 %v2995_v15, 16 }
  0x8e   : >> { %v666_v45 = vrot.slane %v665_v8, 4  ;;  %v747_v18 = vrot.slane %v746_v26, 4 }
  0x8f   : >> { %521 = vrot.lane.b32.xlu2 %v514_v50, %s2563_s17  ;;  %v694_v50 = vrot.slane %v692_v44, 4 }
  0x90   : >> { %519 = vrot.lane.b32.xlu1 %v509_v46, %s2563_s17  ;;  %v675_v46 = vor.u32 %v674_v38, %v670_v40  ;;  %v671_v51 = vsel %vm2724_vm2, %v666_v45, %v670_v40  ;;  %v2295_v38 = vrot.slane %v2858_v29, 10  ;;  %v786_v45 = vrot.slane %v2884_v3, 6 }
  0x91   : >> { %517 = vrot.lane.b32.xlu0 %v499_v47, %s2563_s17  ;;  %v680_v47 = vrot.slane %v678_v41, 5  ;;  %v695_v55 = vor.u32 %v694_v50, %v690_v49 }
  0x92   : >> { %v676_v52 = vrot.slane %v675_v46, 4  ;;  %v789_v46 = vrot.slane %v2887_v37, 6  ;;  %v788_v50 = vrot.slane %v786_v45, 4 }
  0x93   : >> { %v696_v59 = vrot.slane %v695_v55, 4 }
  0x94   : >> { %v681_v57 = vsel %vm2724_vm2, %v676_v52, %v680_v47  ;;  %v790_v55 = vsel %vm2772_vm11, %v788_v50, %v789_v46 }
  0x97   : >> { %548 = vrot.lane.b32.xlu2 %v542_v0, %s2564_s18  ;;  %v717_v0 = vrot.slane %v2877_v2, 5 }
  0x98   : >> { %546 = vrot.lane.b32.xlu1 %v539_v54, %s2564_s18  ;;  %v685_v54 = vor.u32 %v684_v48, %v680_v47 }
  0x99   : >> { %544 = vrot.lane.b32.xlu0 %v536_v60, %s2564_s18  ;;  %v720_v60 = vrot.slane %v2884_v3, 5 }
  0x9a   : >> { %v686_v58 = vrot.slane %v685_v54, 4 }
  0x9b   : >> { %v722_v5 = vrot.slane %v720_v60, 4 }
  0x9c   : >> { %v691_v63 = vsel %vm2724_vm2, %v686_v58, %v690_v49  ;;  %v2959_v49 = vld [vmem:[%s2702_s10 + $0x34] sm:$0xf] }
  0x9d   : >> { %v724_v19 = vsel %vm2734_vm5, %v722_v5, %v723_v4  ;;  %v850_v52 = vshll.u32 %v2959_v49, 16 }
  0x9f   : >> { %583 = vrot.lane.b32.xlu2 %v574_v16, %s2565_s19  ;;  %v931_v50 = vrot.slane %v850_v52, 6 }
  0xa0   : >> { %581 = vrot.lane.b32.xlu1 %v569_v10, %s2565_s19  ;;  %v718_v10 = vsel %vm2734_vm5, %v2294_v61, %v717_v0  ;;  %v852_v61 = vrot.slane %v850_v52, 5 }
  0xa1   : >> { %550 = vrot.lane.b32.xlu0 %v543_v12, %s2564_s18  ;;  %v719_v12 = vrot.slane %v717_v0, 4 }
  0xa3   : >> { %v721_v25 = vsel %vm2734_vm5, %v719_v12, %v720_v60 }
  0xa7   : >> { %610 = vrot.lane.b32.xlu2 %v602_v28, %s2566_s20 }
  0xa8   : >> { %587 = vrot.lane.b32.xlu1 %v580_v20, %s2565_s19  ;;  %v750_v20 = vor.u32 %v749_v9, %v748_v7 }
  0xa9   : >> { %585 = vrot.lane.b32.xlu0 %v579_v23, %s2565_s19 }
  0xaa   : >> { %v752_v28 = vrot.slane %v750_v20, 4  ;;  %v751_v36 = vsel %vm2755_vm8, %v747_v18, %v750_v20 }
  0xac   : >> { %v756_v33 = vsel %vm2755_vm8, %v752_v28, %v755_v13  ;;  %v872_v28 = vrot.slane %v870_v21, 5  ;;  %v876_v13 = vrot.slane %v874_v22, 4 }
  0xaf   : >> { %616 = vrot.lane.b32.xlu2 %v609_v31, %s2566_s20 }
  0xb0   : >> { %614 = vrot.lane.b32.xlu1 %v608_v17, %s2566_s20 }
  0xb1   : >> { %612 = vrot.lane.b32.xlu0 %v605_v1, %s2566_s20  ;;  %v357_v39 = vpop.permute.xlu2 %356  ;;  %v759_v1 = vrot.slane %v688_v43, 6 }
  0xb3   : >> { %v760_v8 = vor.u32 %v759_v1, %v758_v30  ;;  %v899_v1 = vrot.slane %v2959_v49, 5 }
  0xb5   : >> { %v761_v40 = vsel %vm2755_vm8, %v757_v34, %v760_v8  ;;  %v762_v43 = vrot.slane %v760_v8, 4  ;;  %v877_v34 = vor.u32 %v876_v13, %v872_v28  ;;  %v901_v8 = vrot.slane %v899_v1, 4 }
  0xb7   : >> { %644 = vrot.lane.b32.xlu2 %v2884_v3, %s2567_s21  ;;  %v791_v3 = vrot.slane %v789_v46, 4 }
  0xb8   : >> { %642 = vrot.lane.b32.xlu1 %v2877_v2, %s2567_s21 }
  0xb9   : >> { %640 = vrot.lane.b32.xlu0 %v2858_v29, %s2567_s21  ;;  %v359_v53 = vpop.permute.xlu2 %358 }
  0xbf   : >> { %699 = vrot.lane.b32.xlu2 %v681_v57, %s2568_s22 }
  0xc0   : >> { %697 = vrot.lane.b32.xlu1 %v671_v51, %s2568_s22 }
  0xc1   : >> { %646 = vrot.lane.b32.xlu0 %v2887_v37, %s2567_s21  ;;  %v397_v62 = vpop.permute.xlu2 %396  ;;  %v2965_v37 = vld [vmem:[%s2702_s10 + $0x30] sm:$0xf] }
  0xc2   : >> { %v841_v57 = vshrl.u32 %v2965_v37, 16  ;;  %v844_v58 = vshll.u32 %v2965_v37, 16  ;;  %v2302_v30 = vrot.slane %v2965_v37, 9 }
  0xc4   : >> { %v843_v4 = vrot.slane %v841_v57, 4  ;;  %v846_v5 = vrot.slane %v844_v58, 5 }
  0xc6   : >> { %v847_v14 = vor.u32 %v846_v5, %v843_v4 }
  0xc7   : >> { %726 = vrot.lane.b32.xlu2 %v718_v10, %s2569_s23 }
  0xc8   : >> { %703 = vrot.lane.b32.xlu1 %v696_v59, %s2568_s22  ;;  %v2976_v59 = vld [vmem:[%s2702_s10 + $0x38] sm:$0xf] }
  0xc9   : >> { %701 = vrot.lane.b32.xlu0 %v691_v63, %s2568_s22  ;;  %v403_v23 = vpop.permute.xlu2 %402  ;;  %v864_v60 = vshrl.u32 %v2976_v59, 16  ;;  %v860_v0 = vshll.u32 %v2976_v59, 16 }
  0xca   : >> { %v327_v11 = vpop.permute.xlu1 %326 }
  0xcb   : >> { %337 = vst.msk [vmem:[#allocation2 + $0xc] sm:$0x3] %vm336_vm14, %v327_v11  ;;  %v321_v16 = vpop.permute.xlu0 %320  ;;  %v866_v10 = vrot.slane %v864_v60, 4  ;;  %v862_v12 = vrot.slane %v860_v0, 5 }
  0xcc   : >> { %333 = vst.msk [vmem:[#allocation2] sm:$0xf] %vm332_vm15, %v321_v16 }
  0xcd   : >> { %369 = vst.msk [vmem:[#allocation2] sm:$0xf] %vm368_vm0, %v357_v39  ;;  %v783_v39 = vrot.slane %v2877_v2, 6 }
  0xce   : >> { %409 = vst.msk [vmem:[#allocation2] sm:$0xf] %vm408_vm1, %v397_v62 }
  0xcf   : >> { %732 = vrot.lane.b32.xlu2 %v725_v27, %s2569_s23  ;;  %v784_v29 = vsel %vm2772_vm11, %v2295_v38, %v783_v39  ;;  %v785_v2 = vrot.slane %v783_v39, 4  ;;  %v926_v38 = vrot.slane %v841_v57, 5  ;;  %v927_v39 = vrot.slane %v844_v58, 6 }
  0xd0   : >> { %730 = vrot.lane.b32.xlu1 %v724_v19, %s2569_s23  ;;  %v867_v19 = vor.u32 %v866_v10, %v862_v12  ;;  %v941_v57 = vrot.slane %v870_v21, 6 }
  0xd1   : >> { %728 = vrot.lane.b32.xlu0 %v721_v25, %s2569_s23  ;;  %v433_v35 = vpop.permute.xlu2 %432  ;;  %v787_v47 = vsel %vm2772_vm11, %v785_v2, %v786_v45  ;;  %v935_v2 = vrot.slane %v864_v60, 5  ;;  %v928_v45 = vor.u32 %v927_v39, %v926_v38 }
  0xd2   : >> { %v325_v17 = vpop.permute.xlu1 %324  ;;  %v868_v27 = vrot.slane %v867_v19, 4 }
  0xd3   : >> { %335 = vst.msk [vmem:[#allocation2 + $0x8] sm:$0xf] %vm332_vm15, %v325_v17  ;;  %v323_v31 = vpop.permute.xlu0 %322  ;;  %v929_v58 = vrot.slane %v928_v45, 4 }
  0xd4   : >> { %334 = vst.msk [vmem:[#allocation2 + $0x4] sm:$0xf] %vm332_vm15, %v323_v31  ;;  %v873_v31 = vsel %vm2724_vm2, %v868_v27, %v872_v28 }
  0xd5   : >> { %370 = vst.msk [vmem:[#allocation2 + $0x4] sm:$0xf] %vm368_vm0, %v359_v53  ;;  %v854_v53 = vshrl.u32 %v2959_v49, 16 }
  0xd7   : >> { %767 = vrot.lane.b32.xlu2 %v761_v40, %s2570_s24  ;;  %v856_v62 = vrot.slane %v854_v53, 4  ;;  %v878_v40 = vrot.slane %v877_v34, 4 }
  0xd8   : >> { %765 = vrot.lane.b32.xlu1 %v756_v33, %s2570_s24 }
  0xd9   : >> { %763 = vrot.lane.b32.xlu0 %v751_v36, %s2570_s24  ;;  %v461_v44 = vpop.permute.xlu2 %460  ;;  %v857_v9 = vor.u32 %v856_v62, %v852_v61  ;;  %v900_v36 = vsel %vm2734_vm5, %v2302_v30, %v899_v1 }
  0xda   : >> { %v363_v41 = vpop.permute.xlu1 %362 }
  0xdb   : >> { %373 = vst.msk [vmem:[#allocation2 + $0xc] sm:$0x3] %vm372_vm3, %v363_v41  ;;  %v361_v42 = vpop.permute.xlu0 %360  ;;  %v858_v16 = vrot.slane %v857_v9, 4  ;;  %v965_v9 = vrot.slane %v2959_v49, 6 }
  0xdc   : >> { %413 = vst.msk [vmem:[#allocation2 + $0xc] sm:$0x3] %vm3900_vm4, %v403_v23  ;;  %v848_v23 = vrot.slane %v847_v14, 4  ;;  %vm3901_vm4 = vcmask 50224  }
  0xdd   : >> { %371 = vst.msk [vmem:[#allocation2 + $0x8] sm:$0xf] %vm368_vm0, %v361_v42  ;;  %v863_v26 = vsel %vm2724_vm2, %v858_v16, %v862_v12  ;;  %v902_v42 = vrot.slane %v2976_v59, 5  ;;  %v967_v14 = vrot.slane %v965_v9, 4  ;;  %v968_v16 = vrot.slane %v2976_v59, 6 }
  0xde   : >> { %v853_v18 = vsel %vm2724_vm2, %v848_v23, %v852_v61 }
  0xdf   : >> { %794 = vrot.lane.b32.xlu2 %v787_v47, %s2571_s25  ;;  %v904_v47 = vrot.slane %v902_v42, 4  ;;  %v970_v21 = vrot.slane %v968_v16, 4 }
  0xe0   : >> { %792 = vrot.lane.b32.xlu1 %v784_v29, %s2571_s25  ;;  %v905_v29 = vrot.slane %v2995_v15, 5 }
  0xe1   : >> { %769 = vrot.lane.b32.xlu0 %v762_v43, %s2570_s24  ;;  %v516_v54 = vpop.permute.xlu2 %515  ;;  %v936_v43 = vrot.slane %v860_v0, 6 }
  0xe2   : >> { %v401_v48 = vpop.permute.xlu1 %400  ;;  %v906_v61 = vsel %vm2734_vm5, %v904_v47, %v905_v29 }
  0xe3   : >> { %411 = vst.msk [vmem:[#allocation2 + $0x8] sm:$0xf] %vm408_vm1, %v401_v48  ;;  %v399_v51 = vpop.permute.xlu0 %398  ;;  %v930_v48 = vrot.slane %v854_v53, 5 }
  0xe4   : >> { %443 = vst.msk [vmem:[#allocation2 + $0x8] sm:$0xf] %vm3899_vm6, %v433_v35 }
  0xe5   : >> { %410 = vst.msk [vmem:[#allocation2 + $0x4] sm:$0xf] %vm408_vm1, %v399_v51  ;;  %v932_v53 = vor.u32 %v931_v50, %v930_v48 }
  0xe7   : >> { %822 = vrot.lane.b32.xlu2 %v2965_v37, %s2572_s26  ;;  %v934_v4 = vrot.slane %v932_v53, 4 }
  0xe8   : >> { %798 = vrot.lane.b32.xlu1 %v791_v3, %s2571_s25  ;;  %v907_v3 = vrot.slane %v905_v29, 4 }
  0xe9   : >> { %796 = vrot.lane.b32.xlu0 %v790_v55, %s2571_s25  ;;  %v522_v11 = vpop.permute.xlu2 %521  ;;  %v940_v55 = vrot.slane %v874_v22, 5 }
  0xea   : >> { %v431_v63 = vpop.permute.xlu1 %430 }
  0xeb   : >> { %442 = vst.msk [vmem:[#allocation2 + $0x4] sm:$0xf] %vm3899_vm6, %v431_v63  ;;  %v429_v7 = vpop.permute.xlu0 %428  ;;  %v942_v62 = vor.u32 %v941_v57, %v940_v55  ;;  %v933_v63 = vsel %vm2755_vm8, %v929_v58, %v932_v53 }
  0xec   : >> { %472 = vst.msk [vmem:[#allocation2 + $0x4] sm:$0xf] %vm3906_vm7, %v461_v44  ;;  %v903_v44 = vsel %vm2734_vm5, %v901_v8, %v902_v42  ;;  %v3106_v42 = vld [vmem:[%s2702_s10 + $0x4c] sm:$0xf] }
  0xed   : >> { %441 = vst.msk [vmem:[#allocation2] sm:$0xf] %vm3899_vm6, %v429_v7  ;;  %vm3902_vm6 = vcmask 42024   ;;  %v944_v12 = vrot.slane %v942_v62, 4 }
  0xef   : >> { %828 = vrot.lane.b32.xlu2 %v2995_v15, %s2572_s26 }
  0xf0   : >> { %826 = vrot.lane.b32.xlu1 %v2976_v59, %s2572_s26  ;;  %v969_v59 = vsel %vm2772_vm11, %v967_v14, %v968_v16 }
  0xf1   : >> { %824 = vrot.lane.b32.xlu0 %v2959_v49, %s2572_s26  ;;  %v549_v17 = vpop.permute.xlu2 %548  ;;  %v2303_v49 = vrot.slane %v2965_v37, 10  ;;  %v3072_v37 = vld [vmem:[%s2702_s10 + $0x40] sm:$0xf] }
  0xf2   : >> { %v459_v20 = vpop.permute.xlu1 %458  ;;  %v1023_v27 = vshrl.u32 %v3072_v37, 16  ;;  %v1026_v28 = vshll.u32 %v3072_v37, 16  ;;  %v2310_v14 = vrot.slane %v3072_v37, 9 }
  0xf3   : >> { %471 = vst.msk [vmem:[#allocation2] sm:$0xf] %vm3906_vm7, %v459_v20  ;;  %v435_v25 = vpop.permute.xlu0 %434  ;;  %v966_v23 = vsel %vm2772_vm11, %v2303_v49, %v965_v9 }
  0xf4   : >> { %528 = vst.msk [vmem:[#allocation2] sm:$0xf] %vm3903_vm10, %v516_v54  ;;  %v937_v54 = vor.u32 %v936_v43, %v935_v2 }
  0xf5   : >> { %445 = vst.msk [vmem:[#allocation2 + $0xc] sm:$0x3] %vm3905_vm9, %v435_v25  ;;  %v971_v25 = vrot.slane %v2995_v15, 6  ;;  %vm3912_vm9 = vcmask 66624  }
  0xf6   : >> { %v939_v52 = vrot.slane %v937_v54, 4 }
  0xf7   : >> { %883 = vrot.lane.b32.xlu2 %v873_v31, %s2573_s27  ;;  %v1025_v31 = vrot.slane %v1023_v27, 4  ;;  %v973_v34 = vrot.slane %v971_v25, 4 }
  0xf8   : >> { %881 = vrot.lane.b32.xlu1 %v863_v26, %s2573_s27  ;;  %v943_v7 = vsel %vm2755_vm8, %v939_v52, %v942_v62  ;;  %v972_v26 = vsel %vm2772_vm11, %v970_v21, %v971_v25 }
  0xf9   : >> { %879 = vrot.lane.b32.xlu0 %v853_v18, %s2573_s27  ;;  %v584_v41 = vpop.permute.xlu2 %583  ;;  %v3086_v18 = vld [vmem:[%s2702_s10 + $0x44] sm:$0xf] }
  0xfa   : >> { %v465_v33 = vpop.permute.xlu1 %464  ;;  %v1036_v8 = vshrl.u32 %v3086_v18, 16  ;;  %v1081_v52 = vrot.slane %v3086_v18, 5 }
  0xfb   : >> { %475 = vst.msk [vmem:[#allocation2 + $0xc] sm:$0x3] %vm3902_vm6, %v465_v33  ;;  %v463_v35 = vpop.permute.xlu0 %462  ;;  %vm3908_vm6 = vcmask 68672   ;;  %v1028_v33 = vrot.slane %v1026_v28, 5 }
  0xfc   : >> { %532 = vst.msk [vmem:[#allocation2 + $0xc] sm:$0x3] %vm3901_vm4, %v522_v11  ;;  %vm3904_vm4 = vcmask 60472   ;;  %v938_v11 = vsel %vm2755_vm8, %v934_v4, %v937_v54  ;;  %v1038_v2 = vrot.slane %v1036_v8, 4  ;;  %v1083_v9 = vrot.slane %v1081_v52, 4 }
  0xfd   : >> { %473 = vst.msk [vmem:[#allocation2 + $0x8] sm:$0xf] %vm3906_vm7, %v463_v35  ;;  %vm3907_vm7 = vcmask 74824   ;;  %v1082_v25 = vsel %vm2734_vm5, %v2310_v14, %v1081_v52 }
  0xff   : >> { %910 = vrot.lane.b32.xlu2 %v903_v44, %s2574_s28  ;;  %v1056_v44 = vshrl.u32 %v3106_v42, 16 }
 0x100   : >> { %908 = vrot.lane.b32.xlu1 %v900_v36, %s2574_s28  ;;  %v1032_v36 = vshll.u32 %v3086_v18, 16 }
 0x101   : >> { %885 = vrot.lane.b32.xlu0 %v878_v40, %s2573_s27  ;;  %v611_v60 = vpop.permute.xlu2 %610  ;;  %v1029_v40 = vor.u32 %v1028_v33, %v1025_v31 }
 0x102   : >> { %v520_v46 = vpop.permute.xlu1 %519  ;;  %v1034_v29 = vrot.slane %v1032_v36, 5 }
 0x103   : >> { %530 = vst.msk [vmem:[#allocation2 + $0x8] sm:$0xf] %vm3903_vm10, %v520_v46  ;;  %v518_v51 = vpop.permute.xlu0 %517  ;;  %v1052_v46 = vshll.u32 %v3106_v42, 16  ;;  %v1030_v47 = vrot.slane %v1029_v40, 4 }
 0x104   : >> { %559 = vst.msk [vmem:[#allocation2 + $0x8] sm:$0xf] %vm3904_vm4, %v549_v17  ;;  %v3080_v17 = vld [vmem:[%s2702_s10 + $0x48] sm:$0xf]  ;;  %v1039_v50 = vor.u32 %v1038_v2, %v1034_v29 }
 0x105   : >> { %529 = vst.msk [vmem:[#allocation2 + $0x4] sm:$0xf] %vm3903_vm10, %v518_v51  ;;  %vm3910_vm10 = vcmask 76872   ;;  %v1042_v30 = vshll.u32 %v3080_v17, 16  ;;  %v1046_v1 = vshrl.u32 %v3080_v17, 16  ;;  %v1058_v51 = vrot.slane %v1056_v44, 4 }
 0x106   : >> { %v1054_v54 = vrot.slane %v1052_v46, 5  ;;  %v1035_v55 = vsel %vm2724_vm2, %v1030_v47, %v1034_v29  ;;  %v1040_v58 = vrot.slane %v1039_v50, 4  ;;  %v1084_v4 = vrot.slane %v3080_v17, 5 }
 0x107   : >> { %945 = vrot.lane.b32.xlu2 %v933_v63, %s2575_s29  ;;  %v1044_v38 = vrot.slane %v1042_v30, 5  ;;  %v1048_v39 = vrot.slane %v1046_v1, 4  ;;  %v1117_v33 = vrot.slane %v1046_v1, 5  ;;  %v2311_v50 = vrot.slane %v3072_v37, 10 }
 0x108   : >> { %914 = vrot.lane.b32.xlu1 %v907_v3, %s2574_s28  ;;  %v1085_v49 = vsel %vm2734_vm5, %v1083_v9, %v1084_v4  ;;  %v1086_v21 = vrot.slane %v1084_v4, 4 }
 0x109   : >> { %912 = vrot.lane.b32.xlu0 %v906_v61, %s2574_s28  ;;  %v617_v10 = vpop.permute.xlu2 %616  ;;  %v1049_v45 = vor.u32 %v1048_v39, %v1044_v38  ;;  %v1059_v61 = vor.u32 %v1058_v51, %v1054_v54  ;;  %v1045_v63 = vsel %vm2724_vm2, %v1040_v58, %v1044_v38  ;;  %v1153_v58 = vrot.slane %v3106_v42, 6 }
 0x10a   : >> { %v547_v0 = vpop.permute.xlu1 %546 }
 0x10b   : >> { %558 = vst.msk [vmem:[#allocation2 + $0x4] sm:$0xf] %vm3904_vm4, %v547_v0  ;;  %v545_v5 = vpop.permute.xlu0 %544  ;;  %v1050_v3 = vrot.slane %v1049_v45, 4  ;;  %v3136_v0 = vld [vmem:[%s2702_s10 + $0x14] sm:$0xf] }
 0x10c   : >> { %595 = vst.msk [vmem:[#allocation2 + $0x4] sm:$0xf] %vm3908_vm6, %v584_v41  ;;  %v1193_v47 = vshll.u32 %v3136_v0, 16 }
 0x10d   : >> { %557 = vst.msk [vmem:[#allocation2] sm:$0xf] %vm3904_vm4, %v545_v5  ;;  %vm560_vm4 = vcmask 58424   ;;  %v1055_v53 = vsel %vm2724_vm2, %v1050_v3, %v1054_v54  ;;  %v1060_v5 = vrot.slane %v1059_v61, 4  ;;  %v1147_v54 = vrot.slane %v3086_v18, 6 }
 0x10e   : >> { %1180 = vst.msk [vmem:[#allocation2 + $0x14] sm:$0xf] %vm272_vm13, %v3136_v0 }
 0x10f   : >> { %951 = vrot.lane.b32.xlu2 %v944_v12, %s2575_s29  ;;  %v1148_v61 = vsel %vm2772_vm11, %v2311_v50, %v1147_v54  ;;  %v1149_v52 = vrot.slane %v1147_v54, 4 }
 0x110   : >> { %949 = vrot.lane.b32.xlu1 %v943_v7, %s2575_s29  ;;  %v3143_v7 = vld [vmem:[%s2702_s10 + $0x10] sm:$0xf] }
 0x111   : >> { %947 = vrot.lane.b32.xlu0 %v938_v11, %s2575_s29  ;;  %v645_v22 = vpop.permute.xlu2 %644  ;;  %v1109_v11 = vrot.slane %v1026_v28, 6  ;;  %1179 = vst.msk [vmem:[#allocation2 + $0x10] sm:$0xf] %vm272_vm13, %v3143_v7 }
 0x112   : >> { %v582_v19 = vpop.permute.xlu1 %581 }
 0x113   : >> { %594 = vst.msk [vmem:[#allocation2] sm:$0xf] %vm3908_vm6, %v582_v19  ;;  %v551_v20 = vpop.permute.xlu0 %550  ;;  %v1112_v19 = vrot.slane %v1036_v8, 5  ;;  %v1123_v8 = vrot.slane %v1052_v46, 6  ;;  %v1150_v46 = vrot.slane %v3080_v17, 6 }
 0x114   : >> { %623 = vst.msk [vmem:[#allocation2] sm:$0xf] %vm3910_vm10, %v611_v60 }
 0x115   : >> { %561 = vst.msk [vmem:[#allocation2 + $0xc] sm:$0x3] %vm560_vm4, %v551_v20 }
 0x117   : >> { %978 = vrot.lane.b32.xlu2 %v972_v26, %s2576_s30  ;;  %v1087_v26 = vrot.slane %v3106_v42, 5 }
 0x118   : >> { %976 = vrot.lane.b32.xlu1 %v969_v59, %s2576_s30  ;;  %v1113_v59 = vrot.slane %v1032_v36, 6  ;;  %v1122_v36 = vrot.slane %v1056_v44, 5 }
 0x119   : >> { %974 = vrot.lane.b32.xlu0 %v966_v23, %s2576_s30  ;;  %v700_v35 = vpop.permute.xlu2 %699  ;;  %v1089_v39 = vrot.slane %v1087_v26, 4 }
 0x11a   : >> { %v588_v13 = vpop.permute.xlu1 %587  ;;  %v1114_v28 = vor.u32 %v1113_v59, %v1112_v19  ;;  %v1155_v19 = vrot.slane %v1153_v58, 4 }
 0x11b   : >> { %598 = vst.msk [vmem:[#allocation2 + $0xc] sm:$0x3] %vm3912_vm9, %v588_v13  ;;  %v586_v15 = vpop.permute.xlu0 %585  ;;  %vm3926_vm9 = vcmask 99424   ;;  %v1088_v13 = vsel %vm2734_vm5, %v1086_v21, %v1087_v26 }
 0x11c   : >> { %627 = vst.msk [vmem:[#allocation2 + $0xc] sm:$0x3] %vm3907_vm7, %v617_v10  ;;  %vm3909_vm7 = vcmask 85072   ;;  %v1108_v10 = vrot.slane %v1023_v27, 5  ;;  %v1116_v1 = vrot.slane %v1114_v28, 4 }
 0x11d   : >> { %596 = vst.msk [vmem:[#allocation2 + $0x8] sm:$0xf] %vm3908_vm6, %v586_v15  ;;  %vm3919_vm6 = vcmask 93272   ;;  %v3173_v15 = vld [vmem:[%s2702_s10 + $0x1c] sm:$0xf] }
 0x11e   : >> { %v1110_v20 = vor.u32 %v1109_v11, %v1108_v10  ;;  %1182 = vst.msk [vmem:[#allocation2 + $0x1c] sm:$0x3] %vm276_vm12, %v3173_v15  ;;  %vm3917_vm12 = vcmask 109672   ;;  %v1213_v21 = vshll.u32 %v3173_v15, 16 }
 0x11f   : >> { %1006 = vrot.lane.b32.xlu2 %v3086_v18, %s2577_s5 }
 0x120   : >> { %1004 = vrot.lane.b32.xlu1 %v3072_v37, %s2577_s5  ;;  %v1111_v27 = vrot.slane %v1110_v20, 4 }
 0x121   : >> { %980 = vrot.lane.b32.xlu0 %v973_v34, %s2576_s30  ;;  %v727_v48 = vpop.permute.xlu2 %726  ;;  %v1118_v34 = vrot.slane %v1042_v30, 6 }
 0x122   : >> { %v615_v41 = vpop.permute.xlu1 %614  ;;  %v1115_v38 = vsel %vm2755_vm8, %v1111_v27, %v1114_v28 }
 0x123   : >> { %625 = vst.msk [vmem:[#allocation2 + $0x8] sm:$0xf] %vm3910_vm10, %v615_v41  ;;  %v613_v43 = vpop.permute.xlu0 %612  ;;  %v1119_v30 = vor.u32 %v1118_v34, %v1117_v33  ;;  %v1124_v41 = vor.u32 %v1123_v8, %v1122_v36  ;;  %v2317_v36 = vrot.slane %v3143_v7, 10  ;;  %v2316_v8 = vrot.slane %v3143_v7, 9 }
 0x124   : >> { %655 = vst.msk [vmem:[#allocation2 + $0x8] sm:$0xf] %vm3909_vm7, %v645_v22  ;;  %v3162_v22 = vld [vmem:[%s2702_s10 + $0x18] sm:$0xf] }
 0x125   : >> { %624 = vst.msk [vmem:[#allocation2 + $0x4] sm:$0xf] %vm3910_vm10, %v613_v43  ;;  %vm3911_vm10 = vcmask 83024   ;;  %v1120_v29 = vsel %vm2755_vm8, %v1116_v1, %v1119_v30  ;;  %v1121_v43 = vrot.slane %v1119_v30, 4  ;;  %v1126_v45 = vrot.slane %v1124_v41, 4 }
 0x126   : >> { %1181 = vst.msk [vmem:[#allocation2 + $0x18] sm:$0xf] %vm272_vm13, %v3162_v22  ;;  %vm3922_vm13 = vcmask 117872   ;;  %v1207_v18 = vshrl.u32 %v3162_v22, 16  ;;  %v1247_v50 = vrot.slane %v3162_v22, 5 }
 0x127   : >> { %1061 = vrot.lane.b32.xlu2 %v1035_v55, %s3913_s6  ;;  %v1125_v3 = vsel %vm2755_vm8, %v1121_v43, %v1124_v41  ;;  %v1184_v55 = vshrl.u32 %v3143_v7, 16 }
 0x128   : >> { %1010 = vrot.lane.b32.xlu1 %v3106_v42, %s2577_s5  ;;  %v1203_v42 = vshll.u32 %v3162_v22, 16  ;;  %v1209_v10 = vrot.slane %v1207_v18, 4 }
 0x129   : >> { %1008 = vrot.lane.b32.xlu0 %v3080_v17, %s2577_s5  ;;  %v733_v62 = vpop.permute.xlu2 %732  ;;  %v1187_v17 = vshll.u32 %v3143_v7, 16  ;;  %v1269_v43 = vrot.slane %v1184_v55, 5 }
 0x12a   : >> { %v643_v57 = vpop.permute.xlu1 %642  ;;  %v1205_v14 = vrot.slane %v1203_v42, 5  ;;  %v1279_v54 = vrot.slane %v1203_v42, 6 }
 0x12b   : >> { %654 = vst.msk [vmem:[#allocation2 + $0x4] sm:$0xf] %vm3909_vm7, %v643_v57  ;;  %v641_v60 = vpop.permute.xlu0 %640  ;;  %v1152_v57 = vrot.slane %v1150_v46, 4 }
 0x12c   : >> { %711 = vst.msk [vmem:[#allocation2 + $0x4] sm:$0xf] %vm3919_vm6, %v700_v35  ;;  %v1210_v20 = vor.u32 %v1209_v10, %v1205_v14 }
 0x12d   : >> { %653 = vst.msk [vmem:[#allocation2] sm:$0xf] %vm3909_vm7, %v641_v60  ;;  %vm3918_vm7 = vcmask 101472   ;;  %v1195_v60 = vrot.slane %v1193_v47, 5 }
 0x12e   : >> { %v1211_v28 = vrot.slane %v1210_v20, 4  ;;  %v1309_v20 = vrot.slane %v3162_v22, 6 }
 0x12f   : >> { %1067 = vrot.lane.b32.xlu2 %v1060_v5, %s3913_s6  ;;  %v1154_v5 = vsel %vm2772_vm11, %v1152_v57, %v1153_v58  ;;  %v1249_v57 = vrot.slane %v1247_v50, 4 }
 0x130   : >> { %1065 = vrot.lane.b32.xlu1 %v1055_v53, %s3913_s6 }
 0x131   : >> { %1063 = vrot.lane.b32.xlu0 %v1045_v63, %s3913_s6  ;;  %v768_v23 = vpop.permute.xlu2 %767  ;;  %s2580_s6 = smov 23   ;;  %v1189_v63 = vrot.slane %v1187_v17, 5 }
 0x132   : >> { %v698_v12 = vpop.permute.xlu1 %697 }
 0x133   : >> { %710 = vst.msk [vmem:[#allocation2] sm:$0xf] %vm3919_vm6, %v698_v12  ;;  %v647_v16 = vpop.permute.xlu0 %646  ;;  %v1151_v12 = vsel %vm2772_vm11, %v1149_v52, %v1150_v46  ;;  %v1284_v52 = vrot.slane %v1213_v21, 6 }
 0x134   : >> { %739 = vst.msk [vmem:[#allocation2] sm:$0xf] %vm3918_vm7, %v727_v48  ;;  %v1197_v48 = vshrl.u32 %v3136_v0, 16 }
 0x135   : >> { %657 = vst.msk [vmem:[#allocation2 + $0xc] sm:$0x3] %vm3911_vm10, %v647_v16  ;;  %vm713_vm10 = vcmask 91224  }
 0x136   : >> { %v1199_v37 = vrot.slane %v1197_v48, 4  ;;  %v1273_v58 = vrot.slane %v1197_v48, 5 }
 0x137   : >> { %1094 = vrot.lane.b32.xlu2 %v1088_v13, %s3915_s9  ;;  %v1215_v13 = vrot.slane %v1213_v21, 5 }
 0x138   : >> { %1092 = vrot.lane.b32.xlu1 %v1085_v49, %s3915_s9  ;;  %v1200_v9 = vor.u32 %v1199_v37, %v1195_v60 }
 0x139   : >> { %1090 = vrot.lane.b32.xlu0 %v1082_v25, %s3915_s9  ;;  %v795_v40 = vpop.permute.xlu2 %794  ;;  %v1216_v1 = vsel %vm2724_vm2, %v1211_v28, %v1215_v13  ;;  %v3322_v28 = vld [vmem:[%s2702_s10 + $0x28] sm:$0xf] }
 0x13a   : >> { %v704_v31 = vpop.permute.xlu1 %703  ;;  %v1201_v49 = vrot.slane %v1200_v9, 4 }
 0x13b   : >> { %714 = vst.msk [vmem:[#allocation2 + $0xc] sm:$0x3] %vm713_vm10, %v704_v31  ;;  %v702_v35 = vpop.permute.xlu0 %701 }
 0x13c   : >> { %743 = vst.msk [vmem:[#allocation2 + $0xc] sm:$0x3] %vm3926_vm9, %v733_v62  ;;  %v1186_v62 = vrot.slane %v1184_v55, 4  ;;  %v1206_v27 = vsel %vm2724_vm2, %v1201_v49, %v1205_v14  ;;  %vm3931_vm9 = vcmask 148624  }
 0x13d   : >> { %712 = vst.msk [vmem:[#allocation2 + $0x8] sm:$0xf] %vm3919_vm6, %v702_v35  ;;  %v1306_v35 = vrot.slane %v3136_v0, 6  ;;  %vm3925_vm6 = vcmask 115824  }
 0x13e   : >> { %v1190_v16 = vor.u32 %v1189_v63, %v1186_v62 }
 0x13f   : >> { %1129 = vrot.lane.b32.xlu2 %v1120_v29, %s2580_s6  ;;  %v1308_v49 = vrot.slane %v1306_v35, 4 }
 0x140   : >> { %1127 = vrot.lane.b32.xlu1 %v1115_v38, %s2580_s6  ;;  %v1191_v25 = vrot.slane %v1190_v16, 4  ;;  %v1244_v38 = vrot.slane %v3136_v0, 5 }
 0x141   : >> { %1096 = vrot.lane.b32.xlu0 %v1089_v39, %s3915_s9  ;;  %v823_v51 = vpop.permute.xlu2 %822  ;;  %s2581_s9 = smov 24   ;;  %v3259_v39 = vsel %vm2772_vm11, %v2317_v36, %v1306_v35  ;;  %v1310_v0 = vsel %vm2772_vm11, %v1308_v49, %v1309_v20 }
 0x142   : >> { %v731_v2 = vpop.permute.xlu1 %730  ;;  %v1196_v34 = vsel %vm2724_vm2, %v1191_v25, %v1195_v60  ;;  %v1245_v29 = vsel %vm2734_vm5, %v2316_v8, %v1244_v38  ;;  %v1274_v60 = vrot.slane %v1193_v47, 6  ;;  %v1312_v25 = vrot.slane %v3173_v15, 6 }
 0x143   : >> { %741 = vst.msk [vmem:[#allocation2 + $0x8] sm:$0xf] %vm3918_vm7, %v731_v2  ;;  %v729_v44 = vpop.permute.xlu0 %728  ;;  %v1246_v2 = vrot.slane %v1244_v38, 4  ;;  %v3336_v38 = vld [vmem:[%s2702_s10 + $0x2c] sm:$0xf] }
 0x144   : >> { %778 = vst.msk [vmem:[#allocation2 + $0x8] sm:$0xf] %vm3917_vm12, %v768_v23  ;;  %v1217_v23 = vshrl.u32 %v3173_v15, 16  ;;  %v1275_v48 = vor.u32 %v1274_v60, %v1273_v58  ;;  %v1314_v36 = vrot.slane %v1312_v25, 4 }
 0x145   : >> { %740 = vst.msk [vmem:[#allocation2 + $0x4] sm:$0xf] %vm3918_vm7, %v729_v44  ;;  %vm3920_vm7 = vcmask 107624   ;;  %v1270_v44 = vrot.slane %v1187_v17, 6  ;;  %v1248_v55 = vsel %vm2734_vm5, %v1246_v2, %v1247_v50  ;;  %v1415_v2 = vrot.slane %v3322_v28, 5 }
 0x146   : >> { %v1219_v31 = vrot.slane %v1217_v23, 4  ;;  %v1277_v10 = vrot.slane %v1275_v48, 4 }
 0x147   : >> { %1156 = vrot.lane.b32.xlu2 %v1148_v61, %s2581_s9  ;;  %v1271_v7 = vor.u32 %v1270_v44, %v1269_v43  ;;  %v1417_v50 = vrot.slane %v1415_v2, 4 }
 0x148   : >> { %1133 = vrot.lane.b32.xlu1 %v1126_v45, %s2580_s6  ;;  %v1220_v30 = vor.u32 %v1219_v31, %v1215_v13  ;;  %v1375_v13 = vshll.u32 %v3322_v28, 16 }
 0x149   : >> { %1131 = vrot.lane.b32.xlu0 %v1125_v3, %s2580_s6  ;;  %v829_v11 = vpop.permute.xlu2 %828  ;;  %v1278_v3 = vrot.slane %v1207_v18, 5  ;;  %v1272_v42 = vrot.slane %v1271_v7, 4 }
 0x14a   : >> { %v766_v53 = vpop.permute.xlu1 %765  ;;  %v1221_v45 = vrot.slane %v1220_v30, 4  ;;  %v1385_v30 = vshll.u32 %v3336_v38, 16 }
 0x14b   : >> { %777 = vst.msk [vmem:[#allocation2 + $0x4] sm:$0xf] %vm3917_vm12, %v766_v53  ;;  %v764_v4 = vpop.permute.xlu0 %763  ;;  %v1280_v18 = vor.u32 %v1279_v54, %v1278_v3  ;;  %v1283_v53 = vrot.slane %v1217_v23, 5  ;;  %v1311_v23 = vrot.slane %v1309_v20, 4 }
 0x14c   : >> { %806 = vst.msk [vmem:[#allocation2 + $0x4] sm:$0xf] %vm3922_vm13, %v795_v40  ;;  %v1387_v44 = vrot.slane %v1385_v30, 5  ;;  %v1452_v60 = vrot.slane %v1385_v30, 6 }
 0x14d   : >> { %776 = vst.msk [vmem:[#allocation2] sm:$0xf] %vm3917_vm12, %v764_v4  ;;  %vm3923_vm12 = vcmask 126072   ;;  %v1282_v47 = vrot.slane %v1280_v18, 4  ;;  %v1285_v4 = vor.u32 %v1284_v52, %v1283_v53  ;;  %v1281_v16 = vsel %vm2755_vm8, %v1277_v10, %v1280_v18  ;;  %v3383_v10 = vld [vmem:[%s2702_s10 + $0x3c] sm:$0xf] }
 0x14e   : >> { %v1553_v49 = vshll.u32 %v3383_v10, 16  ;;  %v1557_v20 = vshrl.u32 %v3383_v10, 16 }
 0x14f   : >> { %1162 = vrot.lane.b32.xlu2 %v1155_v19, %s2581_s9  ;;  %v1287_v19 = vrot.slane %v1285_v4, 4 }
 0x150   : >> { %1160 = vrot.lane.b32.xlu1 %v1154_v5, %s2581_s9  ;;  %v1276_v5 = vsel %vm2755_vm8, %v1272_v42, %v1275_v48 }
 0x151   : >> { %1158 = vrot.lane.b32.xlu0 %v1151_v12, %s2581_s9  ;;  %v884_v33 = vpop.permute.xlu2 %883  ;;  %v1286_v12 = vsel %vm2755_vm8, %v1282_v47, %v1285_v4 }
 0x152   : >> { %v793_v59 = vpop.permute.xlu1 %792 }
 0x153   : >> { %805 = vst.msk [vmem:[#allocation2] sm:$0xf] %vm3922_vm13, %v793_v59  ;;  %v770_v26 = vpop.permute.xlu0 %769 }
 0x154   : >> { %835 = vst.msk [vmem:[#allocation2] sm:$0xf] %vm3923_vm12, %v823_v51  ;;  %v1250_v51 = vrot.slane %v3173_v15, 5  ;;  %v1379_v15 = vshrl.u32 %v3322_v28, 16 }
 0x155   : >> { %780 = vst.msk [vmem:[#allocation2 + $0xc] sm:$0x3] %vm3920_vm7, %v770_v26  ;;  %vm3921_vm7 = vcmask 124024   ;;  %v1313_v26 = vsel %vm2772_vm11, %v1311_v23, %v1312_v25 }
 0x156   : >> { %v1252_v61 = vrot.slane %v1250_v51, 4  ;;  %v1251_v63 = vsel %vm2734_vm5, %v1249_v57, %v1250_v51  ;;  %v1381_v35 = vrot.slane %v1379_v15, 4  ;;  %v1418_v51 = vrot.slane %v3336_v38, 5 }
 0x157   : >> { %1226 = vrot.lane.b32.xlu2 %v1216_v1, %s2558_s11  ;;  %v3341_v1 = vld [vmem:[%s2702_s10 + $0x24] sm:$0xf]  ;;  %v1446_v7 = vrot.slane %v1379_v15, 5 }
 0x158   : >> { %1224 = vrot.lane.b32.xlu1 %v1206_v27, %s2558_s11  ;;  %v1420_v42 = vrot.slane %v1418_v51, 4 }
 0x159   : >> { %1222 = vrot.lane.b32.xlu0 %v1196_v34, %s2558_s11  ;;  %v911_v46 = vpop.permute.xlu2 %910  ;;  %v3333_v34 = vrot.slane %v1375_v13, 5 }
 0x15a   : >> { %v799_v40 = vpop.permute.xlu1 %798 }
 0x15b   : >> { %809 = vst.msk [vmem:[#allocation2 + $0xc] sm:$0x3] %vm3925_vm6, %v799_v40  ;;  %v797_v41 = vpop.permute.xlu0 %796  ;;  %vm3927_vm6 = vcmask 140424  }
 0x15c   : >> { %839 = vst.msk [vmem:[#allocation2 + $0xc] sm:$0x3] %vm3921_vm7, %v829_v11  ;;  %vm3924_vm7 = vcmask 134272  }
 0x15d   : >> { %807 = vst.msk [vmem:[#allocation2 + $0x8] sm:$0xf] %vm3922_vm13, %v797_v41  ;;  %vm3928_vm13 = vcmask 142472   ;;  %v1389_v41 = vshrl.u32 %v3336_v38, 16 }
 0x15f   : >> { %1255 = vrot.lane.b32.xlu2 %v1248_v55, %s2559_s13  ;;  %v1451_v58 = vrot.slane %v1389_v41, 5 }
 0x160   : >> { %1253 = vrot.lane.b32.xlu1 %v1245_v29, %s2559_s13 }
 0x161   : >> { %1228 = vrot.lane.b32.xlu0 %v1221_v45, %s2558_s11  ;;  %v946_v62 = vpop.permute.xlu2 %945  ;;  %v1391_v45 = vrot.slane %v1389_v41, 4  ;;  %v1453_v52 = vor.u32 %v1452_v60, %v1451_v58  ;;  %s3964_s11 = smov 21  }
 0x162   : >> { %v827_v17 = vpop.permute.xlu1 %826 }
 0x163   : >> { %837 = vst.msk [vmem:[#allocation2 + $0x8] sm:$0xf] %vm3923_vm12, %v827_v17  ;;  %v825_v37 = vpop.permute.xlu0 %824  ;;  %v1392_v55 = vor.u32 %v1391_v45, %v1387_v44  ;;  %v1447_v17 = vrot.slane %v1375_v13, 6  ;;  %v1559_v13 = vrot.slane %v1557_v20, 4  ;;  %v2388_v45 = vld [vmem:[#allocation4 + $0x8] sm:$0x10] }
 0x164   : >> { %894 = vst.msk [vmem:[#allocation2 + $0x8] sm:$0xf] %vm3924_vm7, %v884_v33  ;;  %v3331_v33 = vld [vmem:[%s2702_s10 + $0x20] sm:$0xf] }
 0x165   : >> { %836 = vst.msk [vmem:[#allocation2 + $0x4] sm:$0xf] %vm3923_vm12, %v825_v37  ;;  %vm3929_vm12 = vcmask 150672   ;;  %v1419_v37 = vsel %vm2734_vm5, %v1417_v50, %v1418_v51  ;;  %v3368_v53 = vor.u32 %v1447_v17, %v1446_v7  ;;  %v1356_v23 = vshrl.u32 %v3331_v33, 16 }
 0x166   : >> { %v2582_v51 = vmov 65535  }
 0x167   : >> { %1288 = vrot.lane.b32.xlu2 %v1276_v5, %s2560_s14  ;;  %v1450_v47 = vrot.slane %v3368_v53, 4  ;;  %v1455_v5 = vrot.slane %v1453_v52, 4 }
 0x168   : >> { %1259 = vrot.lane.b32.xlu1 %v1252_v61, %s2559_s13  ;;  %v1393_v61 = vrot.slane %v1392_v55, 4 }
 0x169   : >> { %1257 = vrot.lane.b32.xlu0 %v1251_v63, %s2559_s13  ;;  %v952_v14 = vpop.permute.xlu2 %951  ;;  %v1477_v63 = vrot.slane %v3322_v28, 6  ;;  %s3969_s13 = smov 22  }
 0x16a   : >> { %v882_v9 = vpop.permute.xlu1 %881 }
 0x16b   : >> { %893 = vst.msk [vmem:[#allocation2 + $0x4] sm:$0xf] %vm3924_vm7, %v882_v9  ;;  %v880_v11 = vpop.permute.xlu0 %879 }
 0x16c   : >> { %922 = vst.msk [vmem:[#allocation2 + $0x4] sm:$0xf] %vm3928_vm13, %v911_v46 }
 0x16d   : >> { %892 = vst.msk [vmem:[#allocation2] sm:$0xf] %vm3924_vm7, %v880_v11  ;;  %vm3932_vm7 = vcmask 132224  }
 0x16f   : >> { %1294 = vrot.lane.b32.xlu2 %v1287_v19, %s2560_s14  ;;  %v1480_v19 = vrot.slane %v3336_v38, 6 }
 0x170   : >> { %1292 = vrot.lane.b32.xlu1 %v1286_v12, %s2560_s14  ;;  %v1479_v12 = vrot.slane %v1477_v63, 4 }
 0x171   : >> { %1290 = vrot.lane.b32.xlu0 %v1281_v16, %s2560_s14  ;;  %v979_v22 = vpop.permute.xlu2 %978  ;;  %v1454_v16 = vsel %vm2755_vm8, %v1450_v47, %v1453_v52  ;;  %v1586_v52 = vrot.slane %v3383_v10, 5 }
 0x172   : >> { %v909_v59 = vpop.permute.xlu1 %908 }
 0x173   : >> { %921 = vst.msk [vmem:[#allocation2] sm:$0xf] %vm3928_vm13, %v909_v59  ;;  %v886_v21 = vpop.permute.xlu0 %885 }
 0x174   : >> { %958 = vst.msk [vmem:[#allocation2] sm:$0xf] %vm3929_vm12, %v946_v62  ;;  %v3372_v62 = vld [vmem:[%s2702_s10 + $0x38] sm:$0xf] }
 0x175   : >> { %896 = vst.msk [vmem:[#allocation2 + $0xc] sm:$0x3] %vm3932_vm7, %v886_v21  ;;  %v1543_v9 = vshll.u32 %v3372_v62, 16  ;;  %v1547_v11 = vshrl.u32 %v3372_v62, 16  ;;  %vm3934_vm7 = vcmask 173224   ;;  %v1583_v17 = vrot.slane %v3372_v62, 5 }
 0x177   : >> { %1319 = vrot.lane.b32.xlu2 %v1313_v26, %s2561_s15  ;;  %v3396_v59 = vrot.slane %v1543_v9, 5  ;;  %v1549_v21 = vrot.slane %v1547_v11, 4 }
 0x178   : >> { %1317 = vrot.lane.b32.xlu1 %v1310_v0, %s2561_s15  ;;  %v1481_v0 = vsel %vm2772_vm11, %v1479_v12, %v1480_v19  ;;  %v1412_v12 = vrot.slane %v3341_v1, 5 }
 0x179   : >> { %1315 = vrot.lane.b32.xlu0 %v3259_v39, %s2561_s15  ;;  %v1007_v8 = vpop.permute.xlu2 %1006  ;;  %v1382_v39 = vor.u32 %v1381_v35, %v3333_v34  ;;  %v1550_v15 = vor.u32 %v1549_v21, %v3396_v59  ;;  %v1358_v35 = vrot.slane %v1356_v23, 4 }
 0x17a   : >> { %v915_v27 = vpop.permute.xlu1 %914 }
 0x17b   : >> { %925 = vst.msk [vmem:[#allocation2 + $0xc] sm:$0x3] %vm3927_vm6, %v915_v27  ;;  %v913_v31 = vpop.permute.xlu0 %912  ;;  %vm3930_vm6 = vcmask 158872   ;;  %v1383_v43 = vrot.slane %v1382_v39, 4  ;;  %v1555_v27 = vrot.slane %v1553_v49, 5  ;;  %v1369_v39 = vshrl.u32 %v3341_v1, 16 }
 0x17c   : >> { %962 = vst.msk [vmem:[#allocation2 + $0xc] sm:$0x3] %vm3931_vm9, %v952_v14  ;;  %vm3935_vm9 = vcmask 165024   ;;  %v1551_v30 = vrot.slane %v1550_v15, 4  ;;  %v1619_v15 = vrot.slane %v1557_v20, 5 }
 0x17d   : >> { %923 = vst.msk [vmem:[#allocation2 + $0x8] sm:$0xf] %vm3928_vm13, %v913_v31  ;;  %vm3933_vm13 = vcmask 167072   ;;  %v1388_v3 = vsel %vm2724_vm2, %v1383_v43, %v1387_v44  ;;  %v1365_v31 = vshll.u32 %v3341_v1, 16  ;;  %v2358_v44 = vld [vmem:[#allocation4 + $0x8] sm:$0xf] }
 0x17e   : >> { %v2359_v50 = vor.u32 %v2388_v45, %v2358_v44 }
 0x17f   : >> { %1341 = vrot.lane.b32.xlu2 %v3341_v1, %s2562_s16  ;;  %v1367_v41 = vrot.slane %v1365_v31, 5  ;;  %v1442_v20 = vrot.slane %v1365_v31, 6 }
 0x180   : >> { %1339 = vrot.lane.b32.xlu1 %v3331_v33, %s2562_s16 }
 0x181   : >> { %1321 = vrot.lane.b32.xlu0 %v1314_v36, %s2561_s15  ;;  %v1062_v46 = vpop.permute.xlu2 %1061 }
 0x182   : >> { %v950_v40 = vpop.permute.xlu1 %949 }
 0x183   : >> { %960 = vst.msk [vmem:[#allocation2 + $0x8] sm:$0xf] %vm3929_vm12, %v950_v40  ;;  %v948_v29 = vpop.permute.xlu0 %947  ;;  %v1560_v40 = vor.u32 %v1559_v13, %v1555_v27 }
 0x184   : >> { %989 = vst.msk [vmem:[#allocation2 + $0x8] sm:$0xf] %vm3930_vm6, %v979_v22  ;;  %v1359_v22 = vshll.u32 %v3331_v33, 16 }
 0x185   : >> { %959 = vst.msk [vmem:[#allocation2 + $0x4] sm:$0xf] %vm3929_vm12, %v948_v29  ;;  %vm3937_vm12 = vcmask 175272   ;;  %v1561_v55 = vrot.slane %v1560_v40, 4 }
 0x186   : >> { %v1361_v36 = vrot.slane %v1359_v22, 5 }
 0x187   : >> { %1398 = vrot.lane.b32.xlu2 %v1388_v3, %s2563_s17 }
 0x188   : >> { %1345 = vrot.lane.b32.xlu1 %v3336_v38, %s2562_s16  ;;  %v1362_v29 = vor.u32 %v1361_v36, %v1358_v35  ;;  %v1620_v35 = vrot.slane %v1553_v49, 6 }
 0x189   : >> { %1343 = vrot.lane.b32.xlu0 %v3322_v28, %s2562_s16  ;;  %v1068_v18 = vpop.permute.xlu2 %1067 }
 0x18a   : >> { %v977_v54 = vpop.permute.xlu1 %976 }
 0x18b   : >> { %988 = vst.msk [vmem:[#allocation2 + $0x4] sm:$0xf] %vm3930_vm6, %v977_v54  ;;  %v975_v57 = vpop.permute.xlu0 %974 }
 0x18c   : >> { %1018 = vst.msk [vmem:[#allocation2 + $0x4] sm:$0xf] %vm3933_vm13, %v1007_v8  ;;  %v1482_v8 = vrot.slane %v1480_v19, 4  ;;  %v1615_v19 = vrot.slane %v1543_v9, 6 }
 0x18d   : >> { %987 = vst.msk [vmem:[#allocation2] sm:$0xf] %vm3930_vm6, %v975_v57  ;;  %vm990_vm6 = vcmask 156824   ;;  %v1363_v57 = vrot.slane %v1362_v29, 4 }
 0x18f   : >> { %1427 = vrot.lane.b32.xlu2 %v1420_v42, %s2564_s18  ;;  %v1368_v42 = vsel %vm2724_vm2, %v1363_v57, %v1367_v41 }
 0x190   : >> { %1425 = vrot.lane.b32.xlu1 %v1419_v37, %s2564_s18  ;;  %v1556_v37 = vsel %vm2724_vm2, %v1551_v30, %v1555_v27  ;;  %v1437_v27 = vrot.slane %v1356_v23, 5 }
 0x191   : >> { %1400 = vrot.lane.b32.xlu0 %v1393_v61, %s2563_s17  ;;  %v1095_v14 = vpop.permute.xlu2 %1094 }
 0x192   : >> { %v1005_v48 = vpop.permute.xlu1 %1004 }
 0x193   : >> { %1017 = vst.msk [vmem:[#allocation2] sm:$0xf] %vm3933_vm13, %v1005_v48  ;;  %v981_v4 = vpop.permute.xlu0 %980  ;;  %v2387_v48 = vld [vmem:[#allocation4] sm:$0xff] }
 0x194   : >> { %1074 = vst.msk [vmem:[#allocation2] sm:$0xf] %vm3937_vm12, %v1062_v46  ;;  %v1371_v46 = vrot.slane %v1369_v39, 4 }
 0x195   : >> { %991 = vst.msk [vmem:[#allocation2 + $0xc] sm:$0x3] %vm990_vm6, %v981_v4 }
 0x196   : >> { %v1372_v61 = vor.u32 %v1371_v46, %v1367_v41  ;;  %v1474_v46 = vrot.slane %v3341_v1, 6 }
 0x197   : >> { %1487 = vrot.lane.b32.xlu2 %v1481_v0, %s2566_s20 }
 0x198   : >> { %1462 = vrot.lane.b32.xlu1 %v1455_v5, %s2565_s19  ;;  %v1373_v4 = vrot.slane %v1372_v61, 4 }
 0x199   : >> { %1460 = vrot.lane.b32.xlu0 %v1454_v16, %s2565_s19  ;;  %v1130_v38 = vpop.permute.xlu2 %1129  ;;  %v1614_v16 = vrot.slane %v1547_v11, 5  ;;  %v1438_v11 = vrot.slane %v1359_v22, 6 }
 0x19a   : >> { %v1011_v25 = vpop.permute.xlu1 %1010  ;;  %v1378_v0 = vsel %vm2724_vm2, %v1373_v4, %v3333_v34  ;;  %v2322_v34 = vrot.slane %v3331_v33, 9  ;;  %v1476_v4 = vrot.slane %v1474_v46, 4 }
 0x19b   : >> { %1021 = vst.msk [vmem:[#allocation2 + $0xc] sm:$0x3] %vm3935_vm9, %v1011_v25  ;;  %v1009_v26 = vpop.permute.xlu0 %1008  ;;  %vm2044_vm9 = vcmask 1044480   ;;  %v1414_v25 = vrot.slane %v1412_v12, 4  ;;  %v3461_v13 = vor.u32 %v1615_v19, %v1614_v16  ;;  %v1439_v36 = vor.u32 %v1438_v11, %v1437_v27  ;;  %v3547_v27 = vld [vmem:[%s2702_s10 + $0x34] sm:$0xf] }
 0x19c   : >> { %1078 = vst.msk [vmem:[#allocation2 + $0xc] sm:$0x3] %vm3934_vm7, %v1068_v18  ;;  %vm2043_vm7 = vcmask 1043456   ;;  %v1585_v18 = vrot.slane %v1583_v17, 4  ;;  %v1413_v40 = vsel %vm2734_vm5, %v2322_v34, %v1412_v12  ;;  %v1537_v11 = vshrl.u32 %v3547_v27, 16 }
 0x19d   : >> { %1019 = vst.msk [vmem:[#allocation2 + $0x8] sm:$0xf] %vm3933_vm13, %v1009_v26  ;;  %vm3936_vm13 = vcmask 183472   ;;  %v2045_v3 = vsel %vm2043_vm7, 4294967295, %v2582_v51  ;;  %v1588_v26 = vrot.slane %v1586_v52, 4  ;;  %vm1168_vm7 = vcmask 199872  }
 0x19e   : >> { %v2046_v7 = vsel %vm2044_vm9, %v2045_v3, 0  ;;  %vm3939_vm9 = vcmask 191672   ;;  %v1416_v22 = vsel %vm2734_vm5, %v1414_v25, %v1415_v2  ;;  %v1618_v49 = vrot.slane %v3461_v13, 4 }
 0x19f   : >> { %1513 = vrot.lane.b32.xlu2 %v3383_v10, %s2567_s21  ;;  %v2048_v58 = vand.u32 %v2359_v50, %v2046_v7  ;;  %v1621_v2 = vor.u32 %v1620_v35, %v1619_v15  ;;  %v1440_v30 = vrot.slane %v1439_v36, 4  ;;  %v2323_v51 = vrot.slane %v3331_v33, 10 }
 0x1a0   : >> { %1511 = vrot.lane.b32.xlu1 %v3372_v62, %s2567_s21  ;;  %v1645_v3 = vrot.slane %v3372_v62, 6  ;;  %v1478_v25 = vsel %vm2772_vm11, %v1476_v4, %v1477_v63 }
 0x1a1   : >> { %1489 = vrot.lane.b32.xlu0 %v1482_v8, %s2566_s20  ;;  %v1157_v60 = vpop.permute.xlu2 %1156  ;;  %2397 = vmatpush.bf16.msra.mxu2 %v2048_v58  ;;  %v1441_v8 = vrot.slane %v1369_v39, 5  ;;  %v1622_v39 = vsel %vm2755_vm8, %v1618_v49, %v1621_v2  ;;  %v1623_v45 = vrot.slane %v1621_v2, 4 }
 0x1a2   : >> { %v1066_v43 = vpop.permute.xlu1 %1065  ;;  %2056 = vmatpush.bf16.msra.mxu0 %v2048_v58  ;;  %2399 = vmatpush.bf16.msra.mxu3 %v2048_v58  ;;  %v1647_v33 = vrot.slane %v1645_v3, 4 }
 0x1a3   : >> { %1076 = vst.msk [vmem:[#allocation2 + $0x8] sm:$0xf] %vm3937_vm12, %v1066_v43  ;;  %v1064_v54 = vpop.permute.xlu0 %1063  ;;  %2095 = vmatpush.bf16.msra.mxu1 %v2048_v58  ;;  %v1443_v41 = vor.u32 %v1442_v20, %v1441_v8  ;;  %v1539_v20 = vrot.slane %v1537_v11, 4 }
 0x1a4   : >> { %1105 = vst.msk [vmem:[#allocation2 + $0x8] sm:$0xf] %vm3936_vm13, %v1095_v14  ;;  %v1587_v14 = vsel %vm2734_vm5, %v1585_v18, %v1586_v52 }
 0x1a5   : >> { %1075 = vst.msk [vmem:[#allocation2 + $0x4] sm:$0xf] %vm3937_vm12, %v1064_v54  ;;  %2398 = vmatpush.bf16.msra.mxu2 %v2387_v48  ;;  %vm1143_vm12 = vcmask 189624   ;;  %v1444_v43 = vsel %vm2755_vm8, %v1440_v30, %v1443_v41  ;;  %v1445_v44 = vrot.slane %v1443_v41, 4  ;;  %v1648_v54 = vrot.slane %v3383_v10, 6 }
 0x1a6   : >> { %2057 = vmatpush.bf16.msra.mxu0 %v2387_v48  ;;  %2400 = vmatpush.bf16.msra.mxu3 %v2387_v48 }
 0x1a7   : >> { %1394 = vrot.lane.b32.xlu2 %v1368_v42, %s2563_s17  ;;  %2096 = vmatpush.bf16.msra.mxu1 %v2387_v48  ;;  %v1449_v7 = vsel %vm2755_vm8, %v1445_v44, %v3368_v53  ;;  %v1650_v58 = vrot.slane %v1648_v54, 4  ;;  %v3521_v48 = vld [vmem:[%s2702_s10 + $0x30] sm:$0xf] }
 0x1a8   : >> { %1568 = vrot.lane.b32.xlu1 %v1561_v55, %s2568_s22  ;;  %v1475_v55 = vsel %vm2772_vm11, %v2323_v51, %v1474_v46  ;;  %v1527_v16 = vshll.u32 %v3521_v48, 16 }
 0x1a9   : >> { %1566 = vrot.lane.b32.xlu0 %v1556_v37, %s2568_s22  ;;  %v1163_v21 = vpop.permute.xlu2 %1162  ;;  %v3515_v37 = vld [vmem:[%s2702_s10 + $0x48] sm:$0xf] }
 0x1aa   : >> { %v1093_v47 = vpop.permute.xlu1 %1092  ;;  %v1711_v61 = vshll.u32 %v3515_v37, 16  ;;  %v1715_v18 = vshrl.u32 %v3515_v37, 16  ;;  %v1529_v34 = vrot.slane %v1527_v16, 5  ;;  %v1751_v51 = vrot.slane %v3515_v37, 5 }
 0x1ab   : >> { %1104 = vst.msk [vmem:[#allocation2 + $0x4] sm:$0xf] %vm3936_vm13, %v1093_v47  ;;  %v1091_v5 = vpop.permute.xlu0 %1090 }
 0x1ac   : >> { %1141 = vst.msk [vmem:[#allocation2 + $0x4] sm:$0xf] %vm3939_vm9, %v1130_v38  ;;  %v3532_v19 = vrot.slane %v1711_v61, 5 }
 0x1ad   : >> { %1103 = vst.msk [vmem:[#allocation2] sm:$0xf] %vm3936_vm13, %v1091_v5  ;;  %vm3938_vm13 = vcmask 181424  }
 0x1af   : >> { %1595 = vrot.lane.b32.xlu2 %v1588_v26, %s2569_s23  ;;  %v3542_v26 = vld [vmem:[%s2702_s10 + $0x4c] sm:$0xf] }
 0x1b0   : >> { %1593 = vrot.lane.b32.xlu1 %v1587_v14, %s2569_s23  ;;  %v1524_v14 = vshrl.u32 %v3521_v48, 16  ;;  %v1721_v15 = vshll.u32 %v3542_v26, 16  ;;  %v1725_v35 = vshrl.u32 %v3542_v26, 16 }
 0x1b1   : >> { %1396 = vrot.lane.b32.xlu0 %v1378_v0, %s2563_s17  ;;  %v1227_v38 = vpop.permute.xlu2 %1226 }
 0x1b2   : >> { %v1128_v9 = vpop.permute.xlu1 %1127  ;;  %1236 = vst.msk [vmem:[#allocation2 + $0x18] sm:$0xf] %vm332_vm15, %v1227_v38  ;;  %v1723_v49 = vrot.slane %v1721_v15, 5  ;;  %v1727_v38 = vrot.slane %v1725_v35, 4 }
 0x1b3   : >> { %1140 = vst.msk [vmem:[#allocation2] sm:$0xf] %vm3939_vm9, %v1128_v9  ;;  %v1097_v23 = vpop.permute.xlu0 %1096  ;;  %v1526_v9 = vrot.slane %v1524_v14, 4 }
 0x1b4   : >> { %1169 = vst.msk [vmem:[#allocation2] sm:$0xf] %vm1168_vm7, %v1157_v60  ;;  %v1649_v60 = vsel %vm2772_vm11, %v1647_v33, %v1648_v54  ;;  %v1754_v54 = vrot.slane %v3542_v26, 5 }
 0x1b5   : >> { %1107 = vst.msk [vmem:[#allocation2 + $0xc] sm:$0x3] %vm3938_vm13, %v1097_v23  ;;  %vm1172_vm13 = vcmask 197824   ;;  %v1533_v23 = vshll.u32 %v3547_v27, 16  ;;  %v1530_v36 = vor.u32 %v1529_v34, %v1526_v9  ;;  %v1605_v9 = vrot.slane %v1524_v14, 5 }
 0x1b6   : >> { %v1606_v34 = vrot.slane %v1527_v16, 6 }
 0x1b7   : >> { %1628 = vrot.lane.b32.xlu2 %v1622_v39, %s2570_s24  ;;  %v1535_v2 = vrot.slane %v1533_v23, 5  ;;  %v1531_v30 = vrot.slane %v1530_v36, 4 }
 0x1b8   : >> { %1423 = vrot.lane.b32.xlu1 %v1416_v22, %s2564_s18 }
 0x1b9   : >> { %1421 = vrot.lane.b32.xlu0 %v1413_v40, %s2564_s18  ;;  %v1256_v50 = vpop.permute.xlu2 %1255  ;;  %v1540_v39 = vor.u32 %v1539_v20, %v1535_v2  ;;  %v1536_v44 = vsel %vm2724_vm2, %v1531_v30, %v1535_v2  ;;  %v1816_v2 = vrot.slane %v3542_v26, 6  ;;  %v2329_v30 = vrot.slane %v3521_v48, 10 }
 0x1ba   : >> { %v1134_v31 = vpop.permute.xlu1 %1133 }
 0x1bb   : >> { %1144 = vst.msk [vmem:[#allocation2 + $0xc] sm:$0x3] %vm1143_vm12, %v1134_v31  ;;  %v1132_v29 = vpop.permute.xlu0 %1131 }
 0x1bc   : >> { %1173 = vst.msk [vmem:[#allocation2 + $0xc] sm:$0x3] %vm1172_vm13, %v1163_v21  ;;  %v1717_v21 = vrot.slane %v1715_v18, 4 }
 0x1bd   : >> { %1142 = vst.msk [vmem:[#allocation2 + $0x8] sm:$0xf] %vm3939_vm9, %v1132_v29  ;;  %vm2036_vm9 = vcmask 203776   ;;  %v1728_v29 = vor.u32 %v1727_v38, %v1723_v49 }
 0x1be   : >> { %v1718_v28 = vor.u32 %v1717_v21, %v3532_v19 }
 0x1bf   : >> { %1458 = vrot.lane.b32.xlu2 %v1449_v7, %s2565_s19  ;;  %v1729_v46 = vrot.slane %v1728_v29, 4  ;;  %v1783_v7 = vrot.slane %v1711_v61, 6  ;;  %v2328_v61 = vrot.slane %v3521_v48, 9 }
 0x1c0   : >> { %1456 = vrot.lane.b32.xlu1 %v1444_v43, %s2565_s19  ;;  %v1719_v8 = vrot.slane %v1718_v28, 4 }
 0x1c1   : >> { %1630 = vrot.lane.b32.xlu0 %v1623_v45, %s2570_s24  ;;  %v1289_v10 = vpop.permute.xlu2 %1288  ;;  %v1541_v45 = vrot.slane %v1540_v39, 4 }
 0x1c2   : >> { %v1161_v1 = vpop.permute.xlu1 %1160  ;;  %v1724_v41 = vsel %vm2724_vm2, %v1719_v8, %v1723_v49 }
 0x1c3   : >> { %1171 = vst.msk [vmem:[#allocation2 + $0x8] sm:$0xf] %vm1168_vm7, %v1161_v1  ;;  %v1159_v57 = vpop.permute.xlu0 %1158  ;;  %v2386_v53 = vld [vmem:[#allocation2 + $0x8] sm:$0x30]  ;;  %v1546_v1 = vsel %vm2724_vm2, %v1541_v45, %v3396_v59  ;;  %v1788_v59 = vrot.slane %v1721_v15, 6 }
 0x1c4   : >> { %1170 = vst.msk [vmem:[#allocation2 + $0x4] sm:$0xf] %vm1168_vm7, %v1159_v57  ;;  %v1753_v57 = vrot.slane %v1751_v51, 4 }
 0x1c7   : >> { %1483 = vrot.lane.b32.xlu2 %v1475_v55, %s2566_s20  ;;  %v1782_v55 = vrot.slane %v1715_v18, 5 }
 0x1c8   : >> { %1657 = vrot.lane.b32.xlu1 %v1650_v58, %s2571_s25 }
 0x1c9   : >> { %1655 = vrot.lane.b32.xlu0 %v1649_v60, %s2571_s25  ;;  %v1295_v0 = vpop.permute.xlu2 %1294  ;;  %v3591_v60 = vor.u32 %v1783_v7, %v1782_v55  ;;  %v3662_v7 = vld [vmem:[%s2702_s10 + $0x44] sm:$0xf] }
 0x1ca   : >> { %v1225_v52 = vpop.permute.xlu1 %1224  ;;  %v2350_v42 = vld [vmem:[#allocation2 + $0x8] sm:$0xf] }
 0x1cb   : >> { %1235 = vst.msk [vmem:[#allocation2 + $0x14] sm:$0xf] %vm332_vm15, %v1225_v52  ;;  %v2351_v47 = vor.u32 %v2386_v53, %v2350_v42  ;;  %v1223_v5 = vpop.permute.xlu0 %1222  ;;  %v2385_v12 = vld [vmem:[#allocation2] sm:$0xff]  ;;  %v1787_v53 = vrot.slane %v1725_v35, 5  ;;  %v1755_v52 = vsel %vm2734_vm5, %v1753_v57, %v1754_v54  ;;  %v1580_v42 = vrot.slane %v3547_v27, 5 }
 0x1cc   : >> { %1266 = vst.msk [vmem:[#allocation2 + $0x14] sm:$0xf] %vm368_vm0, %v1256_v50  ;;  %2360 = vmatmul.msk.bf16.vlgmr.msra.gmra.mxu0 %vm2036_vm9, %v2385_v12  ;;  %v1610_v12 = vrot.slane %v1533_v23, 6  ;;  %v1607_v35 = vor.u32 %v1606_v34, %v1605_v9 }
 0x1cd   : >> { %1234 = vst.msk [vmem:[#allocation2 + $0x10] sm:$0xf] %vm332_vm15, %v1223_v5  ;;  %2361 = vmatmul.msk.bf16.vlgmr.msra.gmra.mxu2 %vm2036_vm9, %v2351_v47  ;;  %vm3950_vm15 = vcmask 35872   ;;  %v1786_v47 = vrot.slane %v3591_v60, 4  ;;  %v1789_v4 = vor.u32 %v1788_v59, %v1787_v53  ;;  %v1609_v5 = vrot.slane %v1537_v11, 5 }
 0x1ce   : >> { %v1581_v21 = vsel %vm2734_vm5, %v2328_v61, %v1580_v42  ;;  %v1608_v8 = vrot.slane %v1607_v35, 4  ;;  %v1705_v53 = vshrl.u32 %v3662_v7, 16 }
 0x1cf   : >> { %1681 = vrot.lane.b32.xlu2 %v3542_v26, %s2572_s26  ;;  %v1790_v11 = vsel %vm2755_vm8, %v1786_v47, %v1789_v4  ;;  %v1791_v16 = vrot.slane %v1789_v4, 4 }
 0x1d0   : >> { %1679 = vrot.lane.b32.xlu1 %v3515_v37, %s2572_s26 }
 0x1d1   : >> { %1485 = vrot.lane.b32.xlu0 %v1478_v25, %s2566_s20  ;;  %v1320_v40 = vpop.permute.xlu2 %1319  ;;  %v1582_v25 = vrot.slane %v1580_v42, 4 }
 0x1d2   : >> { %v1254_v63 = vpop.permute.xlu1 %1253 }
 0x1d3   : >> { %1265 = vst.msk [vmem:[#allocation2 + $0x10] sm:$0xf] %vm368_vm0, %v1254_v63  ;;  %v1229_v22 = vpop.permute.xlu0 %1228  ;;  %v1611_v63 = vor.u32 %v1610_v12, %v1609_v5  ;;  %v1584_v14 = vsel %vm2734_vm5, %v1582_v25, %v1583_v17  ;;  %v1707_v5 = vrot.slane %v1705_v53, 4 }
 0x1d4   : >> { %1300 = vst.msk [vmem:[#allocation2 + $0x10] sm:$0xf] %vm408_vm1, %v1289_v10  ;;  %v1756_v10 = vrot.slane %v1754_v54, 4 }
 0x1d5   : >> { %1237 = vst.msk [vmem:[#allocation2 + $0x1c] sm:$0x3] %vm336_vm14, %v1229_v22  ;;  %vm3949_vm14 = vcmask 25624   ;;  %v1613_v23 = vrot.slane %v1611_v63, 4  ;;  %v1813_v22 = vrot.slane %v3515_v37, 6 }
 0x1d7   : >> { %1734 = vrot.lane.b32.xlu2 %v1724_v41, %s2573_s27  ;;  %v1617_v17 = vsel %vm2755_vm8, %v1613_v23, %v3461_v13  ;;  %v1815_v49 = vrot.slane %v1813_v22, 4  ;;  %v1642_v41 = vrot.slane %v3547_v27, 6 }
 0x1d8   : >> { %1509 = vrot.lane.b32.xlu1 %v3547_v27, %s2567_s21 }
 0x1d9   : >> { %1507 = vrot.lane.b32.xlu0 %v3521_v48, %s2567_s21  ;;  %v1342_v50 = vpop.permute.xlu2 %1341  ;;  %v1817_v39 = vsel %vm2772_vm11, %v1815_v49, %v1816_v2  ;;  %v1643_v48 = vsel %vm2772_vm11, %v2329_v30, %v1642_v41 }
 0x1da   : >> { %v1260_v31 = vpop.permute.xlu1 %1259 }
 0x1db   : >> { %1268 = vst.msk [vmem:[#allocation2 + $0x1c] sm:$0x3] %vm372_vm3, %v1260_v31  ;;  %v1258_v43 = vpop.permute.xlu0 %1257  ;;  %v3639_v31 = vld [vmem:[%s2702_s10 + $0x58] sm:$0xf] }
 0x1dc   : >> { %1303 = vst.msk [vmem:[#allocation2 + $0x1c] sm:$0x3] %vm3949_vm14, %v1295_v0  ;;  %v1883_v26 = vshll.u32 %v3639_v31, 16  ;;  %v1887_v27 = vshrl.u32 %v3639_v31, 16  ;;  %v1923_v35 = vrot.slane %v3639_v31, 5 }
 0x1dd   : >> { %1267 = vst.msk [vmem:[#allocation2 + $0x18] sm:$0xf] %vm368_vm0, %v1258_v43  ;;  %vm3951_vm0 = vmmov %vm3950_vm15  ;;  %v1644_v43 = vrot.slane %v1642_v41, 4 }
 0x1de   : >> { %vm3953_vm3 = vmmov %vm3951_vm0  ;;  %v1954_v41 = vrot.slane %v1887_v27, 5 }
 0x1df   : >> { %1564 = vrot.lane.b32.xlu2 %v1546_v1, %s2568_s22  ;;  %v1646_v54 = vsel %vm2772_vm11, %v1644_v43, %v1645_v3  ;;  %v3666_v1 = vld [vmem:[%s2702_s10 + $0x5c] sm:$0xf] }
 0x1e0   : >> { %1562 = vrot.lane.b32.xlu1 %v1536_v44, %s2568_s22  ;;  %v1818_v44 = vrot.slane %v1816_v2, 4  ;;  %v1897_v57 = vshrl.u32 %v3666_v1, 16  ;;  %v1893_v3 = vshll.u32 %v3666_v1, 16  ;;  %v1748_v2 = vrot.slane %v3662_v7, 5 }
 0x1e1   : >> { %1736 = vrot.lane.b32.xlu0 %v1729_v46, %s2573_s27  ;;  %v1399_v18 = vpop.permute.xlu2 %1398  ;;  %v3652_v46 = vrot.slane %v1883_v26, 5 }
 0x1e2   : >> { %v1293_v33 = vpop.permute.xlu1 %1292  ;;  %v1895_v47 = vrot.slane %v1893_v3, 5 }
 0x1e3   : >> { %1302 = vst.msk [vmem:[#allocation2 + $0x18] sm:$0xf] %vm408_vm1, %v1293_v33  ;;  %v1291_v58 = vpop.permute.xlu0 %1290 }
 0x1e4   : >> { %1329 = vst.msk [vmem:[#allocation2 + $0x18] sm:$0xf] %vm3950_vm15, %v1320_v40  ;;  %vm3955_vm15 = vcmask 33824   ;;  %v1612_v40 = vsel %vm2755_vm8, %v1608_v8, %v1611_v63 }
 0x1e5   : >> { %1301 = vst.msk [vmem:[#allocation2 + $0x14] sm:$0xf] %vm408_vm1, %v1291_v58  ;;  %vm3952_vm1 = vcmask 44072   ;;  %v3671_v58 = vld [vmem:[%s2702_s10 + $0x40] sm:$0xf] }
 0x1e6   : >> { %vm3954_vm14 = vmmov %vm3952_vm1  ;;  %v1692_v61 = vshrl.u32 %v3671_v58, 16 }
 0x1e7   : >> { %1589 = vrot.lane.b32.xlu2 %v1581_v21, %s2569_s23 }
 0x1e8   : >> { %1763 = vrot.lane.b32.xlu1 %v1756_v10, %s2574_s28  ;;  %v1701_v10 = vshll.u32 %v3662_v7, 16  ;;  %v1694_v21 = vrot.slane %v1692_v61, 4 }
 0x1e9   : >> { %1761 = vrot.lane.b32.xlu0 %v1755_v52, %s2574_s28  ;;  %v1428_v15 = vpop.permute.xlu2 %1427  ;;  %v1899_v52 = vrot.slane %v1897_v57, 4 }
 0x1ea   : >> { %v1318_v0 = vpop.permute.xlu1 %1317  ;;  %v1703_v4 = vrot.slane %v1701_v10, 5 }
 0x1eb   : >> { %1328 = vst.msk [vmem:[#allocation2 + $0x14] sm:$0xf] %vm3951_vm0, %v1318_v0  ;;  %v1316_v28 = vpop.permute.xlu0 %1315  ;;  %vm3956_vm0 = vcmask 42024   ;;  %v1900_v9 = vor.u32 %v1899_v52, %v1895_v47 }
 0x1ec   : >> { %1352 = vst.msk [vmem:[#allocation2 + $0x14] sm:$0xf] %vm3952_vm1, %v1342_v50  ;;  %v1889_v50 = vrot.slane %v1887_v27, 4 }
 0x1ed   : >> { %1327 = vst.msk [vmem:[#allocation2 + $0x10] sm:$0xf] %vm3953_vm3, %v1316_v28  ;;  %vm3957_vm3 = vcmask 52272   ;;  %v1708_v28 = vor.u32 %v1707_v5, %v1703_v4  ;;  %v1988_v5 = vrot.slane %v3666_v1, 6 }
 0x1ee   : >> { %v1890_v62 = vor.u32 %v1889_v50, %v3652_v46 }
 0x1ef   : >> { %1798 = vrot.lane.b32.xlu2 %v1791_v16, %s2575_s29 }
 0x1f0   : >> { %1796 = vrot.lane.b32.xlu1 %v1790_v11, %s2575_s29  ;;  %v1891_v42 = vrot.slane %v1890_v62, 4 }
 0x1f1   : >> { %1591 = vrot.lane.b32.xlu0 %v1584_v14, %s2569_s23  ;;  %v1488_v38 = vpop.permute.xlu2 %1487  ;;  %v1709_v14 = vrot.slane %v1708_v28, 4 }
 0x1f2   : >> { %v1340_v36 = vpop.permute.xlu1 %1339  ;;  %v1896_v34 = vsel %vm2724_vm2, %v1891_v42, %v1895_v47 }
 0x1f3   : >> { %1351 = vst.msk [vmem:[#allocation2 + $0x10] sm:$0xf] %vm3954_vm14, %v1340_v36  ;;  %v1322_v20 = vpop.permute.xlu0 %1321  ;;  %vm3958_vm14 = vcmask 60472   ;;  %v1714_v8 = vsel %vm2724_vm2, %v1709_v14, %v3532_v19  ;;  %v3773_v14 = vld [vmem:[%s2702_s10 + $0x54] sm:$0xf] }
 0x1f4   : >> { %1330 = vst.msk [vmem:[#allocation2 + $0x1c] sm:$0x3] %vm3955_vm15, %v1322_v20  ;;  %vm3959_vm15 = vcmask 50224   ;;  %v1925_v20 = vrot.slane %v1923_v35, 4 }
 0x1f7   : >> { %1823 = vrot.lane.b32.xlu2 %v1817_v39, %s2576_s30  ;;  %v1955_v39 = vrot.slane %v1883_v26, 6 }
 0x1f8   : >> { %1626 = vrot.lane.b32.xlu1 %v1617_v17, %s2570_s24 }
 0x1f9   : >> { %1624 = vrot.lane.b32.xlu0 %v1612_v40, %s2570_s24  ;;  %v1514_v45 = vpop.permute.xlu2 %1513  ;;  %v2334_v40 = vrot.slane %v3671_v58, 9 }
 0x1fa   : >> { %v1346_v13 = vpop.permute.xlu1 %1345 }
 0x1fb   : >> { %1354 = vst.msk [vmem:[#allocation2 + $0x1c] sm:$0x3] %vm3956_vm0, %v1346_v13  ;;  %v1344_v29 = vpop.permute.xlu0 %1343  ;;  %vm3960_vm0 = vmmov %vm3957_vm3  ;;  %v1749_v43 = vsel %vm2734_vm5, %v2334_v40, %v1748_v2 }
 0x1fc   : >> { %1353 = vst.msk [vmem:[#allocation2 + $0x18] sm:$0xf] %vm3952_vm1, %v1344_v29  ;;  %vm3962_vm1 = vcmask 68672   ;;  %v1959_v29 = vrot.slane %v1897_v57, 5 }
 0x1fd   : >> { %1408 = vst.msk [vmem:[#allocation2 + $0x18] sm:$0xf] %vm3957_vm3, %v1399_v18  ;;  %v1695_v18 = vshll.u32 %v3671_v58, 16  ;;  %vm3963_vm3 = vcmask 76872  }
 0x1ff   : >> { %1653 = vrot.lane.b32.xlu2 %v1646_v54, %s2571_s25  ;;  %v1697_v0 = vrot.slane %v1695_v18, 5  ;;  %v1774_v50 = vrot.slane %v1695_v18, 6 }
 0x200   : >> { %1651 = vrot.lane.b32.xlu1 %v1643_v48, %s2571_s25  ;;  %v1960_v48 = vrot.slane %v1893_v3, 6 }
 0x201   : >> { %1825 = vrot.lane.b32.xlu0 %v1818_v44, %s2576_s30  ;;  %v1395_v59 = vpop.permute.xlu2 %1394  ;;  %v1698_v63 = vor.u32 %v1697_v0, %v1694_v21  ;;  %v1750_v44 = vrot.slane %v1748_v2, 4  ;;  %v3756_v21 = vld [vmem:[%s2702_s10 + $0x50] sm:$0xf]  ;;  %s2213_s10 = smul.u32 12, %s2551_s8  ;;  %s263_s8 = sadd.s32 1, %s2551_s8  }
 0x202   : >> { %v1426_v55 = vpop.permute.xlu1 %1425  ;;  %1406 = vst.msk [vmem:[#allocation2 + $0x10] sm:$0xf] %vm3960_vm0, %v1395_v59  ;;  %vm3967_vm0 = vcmask 83024   ;;  %v1961_v26 = vor.u32 %v1960_v48, %v1959_v29  ;;  %v1777_v59 = vrot.slane %v1705_v53, 5  ;;  %p260_p7 = scmp.ge.s32.totalorder %s263_s8, 14  }
 0x203   : >> { %1435 = vst.msk [vmem:[#allocation2 + $0x18] sm:$0xf] %vm3958_vm14, %v1426_v55  ;;  %v1401_v33 = vpop.permute.xlu0 %1400  ;;  %vm3965_vm14 = vcmask 85072   ;;  %v1699_v23 = vrot.slane %v1698_v63, 4  ;;  %v3729_v55 = vor.u32 %v1955_v39, %v1954_v41  ;;  %s2214_s14 = scalar_lea.vmem %s2639_s7, %s2213_s10 }
 0x204   : >> { %1409 = vst.msk [vmem:[#allocation2 + $0x1c] sm:$0x3] %vm3959_vm15, %v1401_v33  ;;  %vm3966_vm15 = vcmask 74824   ;;  %v1752_v33 = vsel %vm2734_vm5, %v1750_v44, %v1751_v51  ;;  %v1963_v52 = vrot.slane %v1961_v26, 4  ;;  %v1985_v51 = vrot.slane %v3639_v31, 6 }
 0x205   : >> { %1436 = vst.msk [vmem:[#allocation2 + $0x1c] sm:$0x3] %vm560_vm4, %v1428_v15  ;;  %vm3961_vm4 = vcmask 66624   ;;  %v1901_v15 = vrot.slane %v1900_v9, 4  ;;  %v1704_v49 = vsel %vm2724_vm2, %v1699_v23, %v1703_v4  ;;  %v1958_v3 = vrot.slane %v3729_v55, 4 }
 0x207   : >> { %1675 = vrot.lane.b32.xlu2 %v3671_v58, %s2572_s26  ;;  %v1962_v4 = vsel %vm2755_vm8, %v1958_v3, %v1961_v26 }
 0x208   : >> { %1853 = vrot.lane.b32.xlu1 %v3666_v1, %s2577_s5 }
 0x209   : >> { %1851 = vrot.lane.b32.xlu0 %v3639_v31, %s2577_s5  ;;  %v1596_v11 = vpop.permute.xlu2 %1595 }
 0x20a   : >> { %v1463_v12 = vpop.permute.xlu1 %1462 }
 0x20b   : >> { %1471 = vst.msk [vmem:[#allocation2 + $0x1c] sm:$0x3] %vm3961_vm4, %v1463_v12  ;;  %v1461_v25 = vpop.permute.xlu0 %1460  ;;  %vm3968_vm4 = vcmask 99424  }
 0x20c   : >> { %1470 = vst.msk [vmem:[#allocation2 + $0x18] sm:$0xf] %vm3962_vm1, %v1461_v25  ;;  %vm3970_vm1 = vcmask 93272  }
 0x20d   : >> { %1497 = vst.msk [vmem:[#allocation2 + $0x18] sm:$0xf] %vm3963_vm3, %v1488_v38  ;;  %v1926_v38 = vrot.slane %v3666_v1, 5  ;;  %vm3972_vm3 = vcmask 109672   ;;  %v1867_v1 = vshll.u32 %v3756_v21, 16 }
 0x20f   : >> { %1908 = vrot.lane.b32.xlu2 %v1901_v15, %s3964_s11  ;;  %v1927_v19 = vsel %vm2734_vm5, %v1925_v20, %v1926_v38  ;;  %v1928_v54 = vrot.slane %v1926_v38, 4  ;;  %v1869_v23 = vrot.slane %v1867_v1, 5  ;;  %v1946_v44 = vrot.slane %v1867_v1, 6 }
 0x210   : >> { %1906 = vrot.lane.b32.xlu1 %v1896_v34, %s3964_s11  ;;  %v1864_v34 = vshrl.u32 %v3756_v21, 16 }
 0x211   : >> { %1677 = vrot.lane.b32.xlu0 %v3662_v7, %s2572_s26  ;;  %v1629_v17 = vpop.permute.xlu2 %1628 }
 0x212   : >> { %v1512_v16 = vpop.permute.xlu1 %1511 }
 0x213   : >> { %1521 = vst.msk [vmem:[#allocation2 + $0x18] sm:$0xf] %vm3965_vm14, %v1512_v16  ;;  %v1490_v36 = vpop.permute.xlu0 %1489  ;;  %vm3973_vm14 = vcmask 52272   ;;  %v1866_v16 = vrot.slane %v1864_v34, 4 }
 0x214   : >> { %1498 = vst.msk [vmem:[#allocation2 + $0x1c] sm:$0x3] %vm3966_vm15, %v1490_v36  ;;  %vm3974_vm15 = vcmask 60472   ;;  %v1990_v36 = vrot.slane %v1988_v5, 4 }
 0x215   : >> { %1522 = vst.msk [vmem:[#allocation2 + $0x1c] sm:$0x3] %vm3967_vm0, %v1514_v45  ;;  %v1773_v45 = vrot.slane %v1692_v61, 5  ;;  %v1778_v61 = vrot.slane %v1701_v10, 6  ;;  %v1987_v10 = vrot.slane %v1985_v51, 4  ;;  %vm3975_vm0 = vcmask 68672  }
 0x216   : >> { %v1870_v38 = vor.u32 %v1869_v23, %v1866_v16 }
 0x217   : >> { %1933 = vrot.lane.b32.xlu2 %v1927_v19, %s3969_s13  ;;  %v1775_v57 = vor.u32 %v1774_v50, %v1773_v45  ;;  %v1779_v53 = vor.u32 %v1778_v61, %v1777_v59  ;;  %v1989_v28 = vsel %vm2772_vm11, %v1987_v10, %v1988_v5 }
 0x218   : >> { %1732 = vrot.lane.b32.xlu1 %v1714_v8, %s2573_s27  ;;  %v1871_v41 = vrot.slane %v1870_v38, 4 }
 0x219   : >> { %1730 = vrot.lane.b32.xlu0 %v1704_v49, %s2573_s27  ;;  %v1459_v27 = vpop.permute.xlu2 %1458  ;;  %v1776_v42 = vrot.slane %v1775_v57, 4  ;;  %v1781_v25 = vrot.slane %v1779_v53, 4  ;;  %v1873_v49 = vshll.u32 %v3773_v14, 16 }
 0x21a   : >> { %v1569_v30 = vpop.permute.xlu1 %1568 }
 0x21b   : >> { %1577 = vst.msk [vmem:[#allocation2 + $0x1c] sm:$0x3] %vm713_vm10, %v1569_v30  ;;  %v1567_v13 = vpop.permute.xlu0 %1566  ;;  %vm3971_vm10 = vcmask 101472   ;;  %v1780_v12 = vsel %vm2755_vm8, %v1776_v42, %v1779_v53  ;;  %v1785_v15 = vsel %vm2755_vm8, %v1781_v25, %v3591_v60  ;;  %v1875_v30 = vrot.slane %v1873_v49, 5 }
 0x21c   : >> { %1604 = vst.msk [vmem:[#allocation2 + $0x1c] sm:$0x3] %vm3968_vm4, %v1596_v11  ;;  %vm3976_vm4 = vmmov %vm3974_vm15  ;;  %v1810_v11 = vrot.slane %v3662_v7, 6  ;;  %v2335_v7 = vrot.slane %v3671_v58, 10  ;;  %v1982_v42 = vrot.slane %v3773_v14, 6 }
 0x21d   : >> { %1576 = vst.msk [vmem:[#allocation2 + $0x18] sm:$0xf] %vm3970_vm1, %v1567_v13  ;;  %vm3977_vm1 = vmmov %vm3975_vm0  ;;  %v1876_v37 = vsel %vm2724_vm2, %v1871_v41, %v1875_v30 }
 0x21e   : >> { %v1812_v8 = vrot.slane %v1810_v11, 4  ;;  %v1811_v58 = vsel %vm2772_vm11, %v2335_v7, %v1810_v11  ;;  %v1984_v10 = vrot.slane %v1982_v42, 4 }
 0x21f   : >> { %1759 = vrot.lane.b32.xlu2 %v1752_v33, %s2574_s28  ;;  %v2342_v33 = vrot.slane %v3756_v21, 9 }
 0x220   : >> { %1757 = vrot.lane.b32.xlu1 %v1749_v43, %s2574_s28  ;;  %v1814_v40 = vsel %vm2772_vm11, %v1812_v8, %v1813_v22  ;;  %v1920_v22 = vrot.slane %v3773_v14, 5  ;;  %v1945_v43 = vrot.slane %v1864_v34, 5 }
 0x221   : >> { %1935 = vrot.lane.b32.xlu0 %v1928_v54, %s3969_s13  ;;  %v1484_v47 = vpop.permute.xlu2 %1483 }
 0x222   : >> { %v1594_v62 = vpop.permute.xlu1 %1593  ;;  %v1922_v50 = vrot.slane %v1920_v22, 4  ;;  %v1921_v61 = vsel %vm2734_vm5, %v2342_v33, %v1920_v22 }
 0x223   : >> { %1603 = vst.msk [vmem:[#allocation2 + $0x18] sm:$0xf] %vm3971_vm10, %v1594_v62  ;;  %v1397_v18 = vpop.permute.xlu0 %1396  ;;  %vm3978_vm10 = vcmask 76872   ;;  %v1950_v62 = vrot.slane %v1873_v49, 6 }
 0x224   : >> { %1638 = vst.msk [vmem:[#allocation2 + $0x18] sm:$0xf] %vm3972_vm3, %v1629_v17  ;;  %v1877_v17 = vshrl.u32 %v3773_v14, 16  ;;  %vm3979_vm3 = vcmask 107624   ;;  %v1924_v24 = vsel %vm2734_vm5, %v1922_v50, %v1923_v35 }
 0x225   : >> { %1407 = vst.msk [vmem:[#allocation2 + $0x14] sm:$0xf] %vm3973_vm14, %v1397_v18  ;;  %vm3980_vm14 = vcmask 115824  }
 0x226   : >> { %v1879_v2 = vrot.slane %v1877_v17, 4  ;;  %v1949_v57 = vrot.slane %v1877_v17, 5 }
 0x227   : >> { %1792 = vrot.lane.b32.xlu2 %v1780_v12, %s2575_s29 }
 0x228   : >> { %1970 = vrot.lane.b32.xlu1 %v1963_v52, %s2580_s6  ;;  %v1880_v39 = vor.u32 %v1879_v2, %v1875_v30  ;;  %v1951_v18 = vor.u32 %v1950_v62, %v1949_v57  ;;  %v2343_v52 = vrot.slane %v3756_v21, 10 }
 0x229   : >> { %1968 = vrot.lane.b32.xlu0 %v1962_v4, %s2580_s6  ;;  %v1682_v63 = vpop.permute.xlu2 %1681 }
 0x22a   : >> { %v1424_v0 = vpop.permute.xlu1 %1423  ;;  %v1881_v48 = vrot.slane %v1880_v39, 4  ;;  %v1953_v35 = vrot.slane %v1951_v18, 4  ;;  %v1983_v32 = vsel %vm2772_vm11, %v2343_v52, %v1982_v42 }
 0x22b   : >> { %1434 = vst.msk [vmem:[#allocation2 + $0x14] sm:$0xf] %vm3974_vm15, %v1424_v0  ;;  %v1422_v9 = vpop.permute.xlu0 %1421  ;;  %vm3981_vm15 = vcmask 124024  }
 0x22c   : >> { %1469 = vst.msk [vmem:[#allocation2 + $0x14] sm:$0xf] %vm3975_vm0, %v1459_v27  ;;  %vm3982_vm0 = vcmask 117872   ;;  %v1886_v54 = vsel %vm2724_vm2, %v1881_v48, %v3652_v46  ;;  %v1947_v27 = vor.u32 %v1946_v44, %v1945_v43  ;;  %vm3985_vm2 = vcmask 85072  }
 0x22d   : >> { %1433 = vst.msk [vmem:[#allocation2 + $0x10] sm:$0xf] %vm3976_vm4, %v1422_v9  ;;  %vm3983_vm4 = vcmask 126072   ;;  %vm3987_vm5 = vmmov %vm3985_vm2  ;;  %v1957_v12 = vsel %vm2755_vm8, %v1953_v35, %v3729_v55 }
 0x22e   : >> { %v1948_v46 = vrot.slane %v1947_v27, 4 }
 0x22f   : >> { %1997 = vrot.lane.b32.xlu2 %v1990_v36, %s2581_s9 }
 0x230   : >> { %1995 = vrot.lane.b32.xlu1 %v1989_v28, %s2581_s9 }
 0x231   : >> { %1794 = vrot.lane.b32.xlu0 %v1785_v15, %s2575_s29  ;;  %v1735_v19 = vpop.permute.xlu2 %1734 }
 0x232   : >> { %v1457_v20 = vpop.permute.xlu1 %1456 }
 0x233   : >> { %1468 = vst.msk [vmem:[#allocation2 + $0x10] sm:$0xf] %vm3977_vm1, %v1457_v20  ;;  %v1631_v60 = vpop.permute.xlu0 %1630  ;;  %vm3984_vm1 = vcmask 134272  }
 0x234   : >> { %1495 = vst.msk [vmem:[#allocation2 + $0x10] sm:$0xf] %vm3978_vm10, %v1484_v47  ;;  %v1952_v47 = vsel %vm2755_vm8, %v1948_v46, %v1951_v18  ;;  %vm3991_vm8 = vcmask 140424  }
 0x235   : >> { %1639 = vst.msk [vmem:[#allocation2 + $0x1c] sm:$0x3] %vm3979_vm3, %v1631_v60  ;;  %vm3986_vm3 = vcmask 93272  }
 0x237   : >> { %1847 = vrot.lane.b32.xlu2 %v3756_v21, %s2577_s5  ;;  %v1986_v21 = vsel %vm2772_vm11, %v1984_v10, %v1985_v51  ;;  %vm3993_vm11 = vcmask 142472  }
 0x238   : >> { %1821 = vrot.lane.b32.xlu1 %v1814_v40, %s2576_s30 }
 0x239   : >> { %1819 = vrot.lane.b32.xlu0 %v1811_v58, %s2576_s30  ;;  %v1565_v45 = vpop.permute.xlu2 %1564 }
 0x23a   : >> { %v1658_v13 = vpop.permute.xlu1 %1657 }
 0x23b   : >> { %1666 = vst.msk [vmem:[#allocation2 + $0x1c] sm:$0x3] %vm3980_vm14, %v1658_v13  ;;  %v1656_v29 = vpop.permute.xlu0 %1655  ;;  %vm3988_vm14 = vmmov %vm3986_vm3 }
 0x23c   : >> { %1690 = vst.msk [vmem:[#allocation2 + $0x1c] sm:$0x3] %vm3981_vm15, %v1682_v63  ;;  %vm3989_vm15 = vcmask 101472  }
 0x23d   : >> { %1665 = vst.msk [vmem:[#allocation2 + $0x18] sm:$0xf] %vm3982_vm0, %v1656_v29  ;;  %vm3990_vm0 = vcmask 132224  }
 0x23f   : >> { %1904 = vrot.lane.b32.xlu2 %v1886_v54, %s3964_s11 }
 0x240   : >> { %1902 = vrot.lane.b32.xlu1 %v1876_v37, %s3964_s11 }
 0x241   : >> { %1849 = vrot.lane.b32.xlu0 %v3773_v14, %s2577_s5  ;;  %v1590_v59 = vpop.permute.xlu2 %1589 }
 0x242   : >> { %v1680_v26 = vpop.permute.xlu1 %1679 }
 0x243   : >> { %1689 = vst.msk [vmem:[#allocation2 + $0x18] sm:$0xf] %vm3983_vm4, %v1680_v26  ;;  %v1486_v3 = vpop.permute.xlu0 %1485  ;;  %vm3992_vm4 = vcmask 148624  }
 0x244   : >> { %1744 = vst.msk [vmem:[#allocation2 + $0x18] sm:$0xf] %vm3984_vm1, %v1735_v19  ;;  %vm3994_vm1 = vcmask 150672  }
 0x245   : >> { %1496 = vst.msk [vmem:[#allocation2 + $0x14] sm:$0xf] %vm3978_vm10, %v1486_v3  ;;  %vm3995_vm10 = vcmask 158872   ;;  %v2468_v3 = vld [vmem:[#allocation6] ss:$0 sm:$0xff] }
 0x247   : >> { %1964 = vrot.lane.b32.xlu2 %v1952_v47, %s2580_s6 }
 0x248   : >> { %1931 = vrot.lane.b32.xlu1 %v1924_v24, %s3969_s13 }
 0x249   : >> { %1929 = vrot.lane.b32.xlu0 %v1921_v61, %s3969_s13  ;;  %v1799_v5 = vpop.permute.xlu2 %1798  ;;  %v2059_v35 = vpop.f32.mrf.mxu0 }
 0x24a   : >> { %v1510_v4 = vpop.permute.xlu1 %1509 }
 0x24b   : >> { %1520 = vst.msk [vmem:[#allocation2 + $0x14] sm:$0xf] %vm3985_vm2, %v1510_v4  ;;  %v1508_v53 = vpop.permute.xlu0 %1507  ;;  %vm3996_vm2 = vmmov %vm3989_vm15 }
 0x24c   : >> { %1575 = vst.msk [vmem:[#allocation2 + $0x14] sm:$0xf] %vm3986_vm3, %v1565_v45  ;;  %vm3997_vm3 = vcmask 109672  }
 0x24d   : >> { %1519 = vst.msk [vmem:[#allocation2 + $0x10] sm:$0xf] %vm3987_vm5, %v1508_v53  ;;  %vm3998_vm5 = vcmask 117872   ;;  %v2583_v53 = vmov 0.0|0.0  }
 0x24e   : >> { %2374 = vst [vmem:[%s2214_s14 + $0x20] sm:$0x1] %v2583_v53 }
 0x24f   : >> { %1993 = vrot.lane.b32.xlu2 %v1986_v21, %s2581_s9 }
 0x250   : >> { %1991 = vrot.lane.b32.xlu1 %v1983_v32, %s2581_s9  ;;  %v2064_v62 = vpop.f32.mrf.mxu2 }
 0x251   : >> { %1966 = vrot.lane.b32.xlu0 %v1957_v12, %s2580_s6  ;;  %v1824_v56 = vpop.permute.xlu2 %1823  ;;  %v2061_v21 = vpop.f32.mrf.mxu0 }
 0x252   : >> { %v1563_v0 = vpop.permute.xlu1 %1562 }
 0x253   : >> { %1574 = vst.msk [vmem:[#allocation2 + $0x10] sm:$0xf] %vm3988_vm14, %v1563_v0  ;;  %v1737_v25 = vpop.permute.xlu0 %1736  ;;  %vm3999_vm14 = vmmov %vm3997_vm3 }
 0x254   : >> { %1601 = vst.msk [vmem:[#allocation2 + $0x10] sm:$0xf] %vm3989_vm15, %v1590_v59  ;;  %vm4000_vm15 = vmmov %vm3998_vm5 }
 0x255   : >> { %1745 = vst.msk [vmem:[#allocation2 + $0x1c] sm:$0x3] %vm3990_vm0, %v1737_v25  ;;  %vm4001_vm0 = vcmask 126072  }
 0x258   : >> { %v2066_v18 = vpop.f32.mrf.mxu2 }
 0x259   : >> { %v1654_v6 = vpop.permute.xlu2 %1653 }
 0x25a   : >> { %v1764_v55 = vpop.permute.xlu1 %1763 }
 0x25b   : >> { %1772 = vst.msk [vmem:[#allocation2 + $0x1c] sm:$0x3] %vm3991_vm8, %v1764_v55  ;;  %v1762_v31 = vpop.permute.xlu0 %1761  ;;  %vm4002_vm8 = vcmask 165024  }
 0x25c   : >> { %1807 = vst.msk [vmem:[#allocation2 + $0x1c] sm:$0x3] %vm3992_vm4, %v1799_v5  ;;  %vm4003_vm4 = vcmask 173224  }
 0x25d   : >> { %1771 = vst.msk [vmem:[#allocation2 + $0x18] sm:$0xf] %vm3993_vm11, %v1762_v31  ;;  %vm4004_vm11 = vcmask 167072  }
 0x261   : >> { %v1676_v34 = vpop.permute.xlu2 %1675 }
 0x262   : >> { %v1797_v51 = vpop.permute.xlu1 %1796 }
 0x263   : >> { %1806 = vst.msk [vmem:[#allocation2 + $0x18] sm:$0xf] %vm3994_vm1, %v1797_v51  ;;  %v1592_v9 = vpop.permute.xlu0 %1591  ;;  %vm4005_vm1 = vcmask 175272  }
 0x264   : >> { %1833 = vst.msk [vmem:[#allocation2 + $0x18] sm:$0xf] %vm3995_vm10, %v1824_v56  ;;  %vm4006_vm10 = vcmask 183472  }
 0x265   : >> { %1602 = vst.msk [vmem:[#allocation2 + $0x14] sm:$0xf] %vm3996_vm2, %v1592_v9  ;;  %vm4007_vm2 = vmmov %vm4001_vm0 }
 0x269   : >> { %v1909_v11 = vpop.permute.xlu2 %1908 }
 0x26a   : >> { %v1627_v1 = vpop.permute.xlu1 %1626 }
 0x26b   : >> { %1637 = vst.msk [vmem:[#allocation2 + $0x14] sm:$0xf] %vm3997_vm3, %v1627_v1  ;;  %v1625_v28 = vpop.permute.xlu0 %1624  ;;  %vm4009_vm3 = vcmask 142472  }
 0x26c   : >> { %1664 = vst.msk [vmem:[#allocation2 + $0x14] sm:$0xf] %vm3998_vm5, %v1654_v6 }
 0x26d   : >> { %1636 = vst.msk [vmem:[#allocation2 + $0x10] sm:$0xf] %vm3999_vm14, %v1625_v28  ;;  %vm4011_vm14 = vmmov %vm4009_vm3 }
 0x271   : >> { %v1934_v16 = vpop.permute.xlu2 %1933 }
 0x272   : >> { %v1652_v63 = vpop.permute.xlu1 %1651 }
 0x273   : >> { %1663 = vst.msk [vmem:[#allocation2 + $0x10] sm:$0xf] %vm4000_vm15, %v1652_v63  ;;  %v1826_v15 = vpop.permute.xlu0 %1825  ;;  %vm4012_vm15 = vcmask 150672  }
 0x274   : >> { %1687 = vst.msk [vmem:[#allocation2 + $0x10] sm:$0xf] %vm4001_vm0, %v1676_v34  ;;  %vm4013_vm0 = vcmask 181424  }
 0x275   : >> { %1834 = vst.msk [vmem:[#allocation2 + $0x1c] sm:$0x3] %vm990_vm6, %v1826_v15  ;;  %vm4008_vm6 = vcmask 134272  }
 0x276   : >> { %vm4010_vm5 = vmmov %vm4008_vm6 }
 0x279   : >> { %v1760_v20 = vpop.permute.xlu2 %1759 }
 0x27a   : >> { %v1854_v14 = vpop.permute.xlu1 %1853 }
 0x27b   : >> { %1862 = vst.msk [vmem:[#allocation2 + $0x1c] sm:$0x3] %vm4002_vm8, %v1854_v14  ;;  %v1852_v23 = vpop.permute.xlu0 %1851  ;;  %vm4014_vm8 = vcmask 191672  }
 0x27c   : >> { %1917 = vst.msk [vmem:[#allocation2 + $0x1c] sm:$0x3] %vm4003_vm4, %v1909_v11  ;;  %vm4015_vm4 = vmmov %vm4012_vm15 }
 0x27d   : >> { %1861 = vst.msk [vmem:[#allocation2 + $0x18] sm:$0xf] %vm4004_vm11, %v1852_v23  ;;  %vm4016_vm11 = vcmask 158872  }
 0x281   : >> { %v1793_v49 = vpop.permute.xlu2 %1792 }
 0x282   : >> { %v1907_v36 = vpop.permute.xlu1 %1906 }
 0x283   : >> { %1916 = vst.msk [vmem:[#allocation2 + $0x18] sm:$0xf] %vm4005_vm1, %v1907_v36  ;;  %v1678_v8 = vpop.permute.xlu0 %1677 }
 0x284   : >> { %1943 = vst.msk [vmem:[#allocation2 + $0x18] sm:$0xf] %vm4006_vm10, %v1934_v16 }
 0x285   : >> { %1688 = vst.msk [vmem:[#allocation2 + $0x14] sm:$0xf] %vm4007_vm2, %v1678_v8  ;;  %vm4020_vm2 = vmmov %vm4005_vm1 }
 0x289   : >> { %v1998_v40 = vpop.permute.xlu2 %1997 }
 0x28a   : >> { %v1733_v7 = vpop.permute.xlu1 %1732 }
 0x28b   : >> { %1743 = vst.msk [vmem:[#allocation2 + $0x14] sm:$0xf] %vm4008_vm6, %v1733_v7  ;;  %v1731_v17 = vpop.permute.xlu0 %1730  ;;  %vm4021_vm6 = vcmask 183472  }
 0x28c   : >> { %1770 = vst.msk [vmem:[#allocation2 + $0x14] sm:$0xf] %vm4009_vm3, %v1760_v20  ;;  %vm4022_vm3 = vmmov %vm4021_vm6 }
 0x28d   : >> { %1742 = vst.msk [vmem:[#allocation2 + $0x10] sm:$0xf] %vm4010_vm5, %v1731_v17  ;;  %vm4023_vm5 = vmmov %vm4014_vm8 }
 0x291   : >> { %v1848_v41 = vpop.permute.xlu2 %1847 }
 0x292   : >> { %v1758_v60 = vpop.permute.xlu1 %1757 }
 0x293   : >> { %1769 = vst.msk [vmem:[#allocation2 + $0x10] sm:$0xf] %vm4011_vm14, %v1758_v60  ;;  %v1936_v38 = vpop.permute.xlu0 %1935  ;;  %vm4024_vm14 = vmmov %vm4023_vm5 }
 0x294   : >> { %1804 = vst.msk [vmem:[#allocation2 + $0x10] sm:$0xf] %vm4012_vm15, %v1793_v49 }
 0x295   : >> { %1944 = vst.msk [vmem:[#allocation2 + $0x1c] sm:$0x3] %vm4013_vm0, %v1936_v38 }
 0x299   : >> { %v1905_v48 = vpop.permute.xlu2 %1904 }
 0x29a   : >> { %v1971_v2 = vpop.permute.xlu1 %1970 }
 0x29b   : >> { %1979 = vst.msk [vmem:[#allocation2 + $0x1c] sm:$0x3] %vm1143_vm12, %v1971_v2  ;;  %v1969_v19 = vpop.permute.xlu0 %1968  ;;  %vm4017_vm12 = vmmov %vm4016_vm11 }
 0x29c   : >> { %2006 = vst.msk [vmem:[#allocation2 + $0x1c] sm:$0x3] %vm1172_vm13, %v1998_v40  ;;  %vm4018_vm13 = vcmask 167072  }
 0x29d   : >> { %1978 = vst.msk [vmem:[#allocation2 + $0x18] sm:$0xf] %vm4014_vm8, %v1969_v19  ;;  %vm4019_vm10 = vmmov %vm4018_vm13 }
 0x2a1   : >> { %v1965_v45 = vpop.permute.xlu2 %1964 }
 0x2a2   : >> { %v1996_v58 = vpop.permute.xlu1 %1995 }
 0x2a3   : >> { %2005 = vst.msk [vmem:[#allocation2 + $0x18] sm:$0xf] %vm1168_vm7, %v1996_v58  ;;  %v1795_v30 = vpop.permute.xlu0 %1794  ;;  %v2390_v39 = vld [vmem:[#allocation2 + $0x18] sm:$0x30] }
 0x2a4   : >> { %1805 = vst.msk [vmem:[#allocation2 + $0x14] sm:$0xf] %vm4015_vm4, %v1795_v30 }
 0x2a9   : >> { %v1994_v26 = vpop.permute.xlu2 %1993 }
 0x2aa   : >> { %v1822_v13 = vpop.permute.xlu1 %1821  ;;  %v2368_v29 = vld [vmem:[#allocation2 + $0x18] sm:$0xf] }
 0x2ab   : >> { %1832 = vst.msk [vmem:[#allocation2 + $0x14] sm:$0xf] %vm4016_vm11, %v1822_v13  ;;  %v2369_v37 = vor.u32 %v2390_v39, %v2368_v29  ;;  %v1820_v22 = vpop.permute.xlu0 %1819 }
 0x2ac   : >> { %1831 = vst.msk [vmem:[#allocation2 + $0x10] sm:$0xf] %vm4017_vm12, %v1820_v22 }
 0x2ad   : >> { %2371 = vmatmul.msk.bf16.vlgmr.msra.gmra.mxu3 %vm2036_vm9, %v2369_v37  ;;  %1859 = vst.msk [vmem:[#allocation2 + $0x10] sm:$0xf] %vm4018_vm13, %v1848_v41 }
 0x2b2   : >> { %v1903_v43 = vpop.permute.xlu1 %1902 }
 0x2b3   : >> { %1914 = vst.msk [vmem:[#allocation2 + $0x10] sm:$0xf] %vm4005_vm1, %v1903_v43  ;;  %v1850_v44 = vpop.permute.xlu0 %1849 }
 0x2b4   : >> { %1860 = vst.msk [vmem:[#allocation2 + $0x14] sm:$0xf] %vm4019_vm10, %v1850_v44 }
 0x2b5   : >> { %1915 = vst.msk [vmem:[#allocation2 + $0x14] sm:$0xf] %vm4020_vm2, %v1905_v48 }
 0x2ba   : >> { %v1932_v50 = vpop.permute.xlu1 %1931 }
 0x2bb   : >> { %1942 = vst.msk [vmem:[#allocation2 + $0x14] sm:$0xf] %vm4021_vm6, %v1932_v50  ;;  %v1930_v54 = vpop.permute.xlu0 %1929 }
 0x2bc   : >> { %1941 = vst.msk [vmem:[#allocation2 + $0x10] sm:$0xf] %vm4022_vm3, %v1930_v54 }
 0x2bd   : >> { %1976 = vst.msk [vmem:[#allocation2 + $0x10] sm:$0xf] %vm4023_vm5, %v1965_v45 }
 0x2c2   : >> { %v1992_v27 = vpop.permute.xlu1 %1991 }
 0x2c3   : >> { %2003 = vst.msk [vmem:[#allocation2 + $0x10] sm:$0xf] %vm1168_vm7, %v1992_v27  ;;  %v1967_v33 = vpop.permute.xlu0 %1966 }
 0x2c4   : >> { %1977 = vst.msk [vmem:[#allocation2 + $0x14] sm:$0xf] %vm4024_vm14, %v1967_v33 }
 0x2c5   : >> { %2004 = vst.msk [vmem:[#allocation2 + $0x14] sm:$0xf] %vm1168_vm7, %v1994_v26 }
 0x2cc   : >> { %v2389_v57 = vld [vmem:[#allocation2 + $0x10] sm:$0xff] }
 0x2cd   : >> { %2370 = vmatmul.msk.bf16.vlgmr.msra.gmra.mxu1 %vm2036_vm9, %v2389_v57  ;;  %vm4025_vm9 = vcmask 1041408  }
 0x2ce   : >> { %vm4026_vm7 = vmmov %vm4025_vm9 }
 0x330   : >> { %v2103_v24 = vpop.f32.mrf.mxu3 }
 0x331   : >> { %v2110_v46 = vmax.f32 %v2064_v62, %v2103_v24 }
 0x333   : >> { %v2118_v59 = vadd.f32 %v2468_v3, %v2110_v46 }
 0x335   : >> { %v2122_v61 = vmax.f32 %v2118_v59, 0.0 }
 0x337   : >> { %2126 = vst [vmem:[#allocation3 + $0x10] sm:$0xff] %v2122_v61 }
 0x338   : >> { %v2105_v52 = vpop.f32.mrf.mxu3 }
 0x339   : >> { %v2111_v42 = vmax.f32 %v2066_v18, %v2105_v52 }
 0x33b   : >> { %v2119_v47 = vadd.f32 %v2468_v3, %v2111_v42 }
 0x33d   : >> { %v2123_v4 = vmax.f32 %v2119_v47, 0.0 }
 0x33f   : >> { %2127 = vst [vmem:[#allocation3 + $0x18] sm:$0xf] %v2123_v4 }
 0x346   : >> { %v2130_v31 = vld [vmem:[#allocation3 + $0x10] ss:$2 sm:$0x3f]  ;;  %v2134_v6 = vld [vmem:[#allocation3 + $0x11] ss:$2 sm:$0x3f] }
 0x347   : >> { %v2136_v51 = vmax.f32 %v2130_v31, %v2134_v6 }
 0x349   : >> { %v2141_v28 = vrot.slane %v2136_v51, 6 }
 0x34a   : >> { %v2098_v32 = vpop.f32.mrf.mxu1 }
 0x34b   : >> { %v2108_v10 = vmax.f32 %v2059_v35, %v2098_v32 }
 0x34d   : >> { %v2116_v5 = vadd.f32 %v2468_v3, %v2108_v10 }
 0x34f   : >> { %v2120_v12 = vmax.f32 %v2116_v5, 0.0 }
 0x351   : >> { %2124 = vst [vmem:[#allocation3] sm:$0xff] %v2120_v12 }
 0x352   : >> { %v2100_v0 = vpop.f32.mrf.mxu1 }
 0x353   : >> { %v2109_v25 = vmax.f32 %v2061_v21, %v2100_v0 }
 0x355   : >> { %v2117_v56 = vadd.f32 %v2468_v3, %v2109_v25 }
 0x357   : >> { %v2121_v55 = vmax.f32 %v2117_v56, 0.0 }
 0x359   : >> { %2125 = vst [vmem:[#allocation3 + $0x8] sm:$0xff] %v2121_v55 }
 0x360   : >> { %v2128_v9 = vld [vmem:[#allocation3] ss:$2 sm:$0xff]  ;;  %v2132_v34 = vld [vmem:[#allocation3 + $0x1] ss:$2 sm:$0xff] }
 0x361   : >> { %v2135_v1 = vmax.f32 %v2128_v9, %v2132_v34 }
 0x363   : >> { %v2140_v11 = vrot.slane %v2135_v1, 6 }
 0x364   : > { %262 = sbr.rel (!%p260_p7) target bundleno = 77 (0x4d), region = 89 }
 0x365   : >> { %v2142_v63 = vsel %vm4025_vm9, %v2140_v11, %v2141_v28  ;;  %v2145_v15 = vsel %vm4026_vm7, 0.0, %v2140_v11 }
 0x366   : >> { %v2394_v14 = vpack.c.bf16 %v2142_v63, %v2145_v15 }
 0x368   : >> { %2396 = vst [vmem:[%s2214_s14 + $0x18] sm:$0xff] %v2394_v14  }
 0x369 PF: > { %s15_s12 = sadd.s32 1, %s2547_s12  }
 0x36a   : > { %p12_p8 = scmp.ge.s32.totalorder %s15_s12, 4  }
 0x36c   :  { %14 = sbr.rel (!%p12_p8) target bundleno = 2 (0x2), region = 100 }
 0x371   :  { %2177 = vsyncpa [#allocation5], 1 }
 0x372   :  { %2179 = vsyncpa [#allocation5 + $0x1], 1 }
 0x373   :  { %2180 = vsyncpa [#allocation7], 1 }

// kernel: cnn_forward.4
= control target key start
LH: loop header
LB: loop body
LE: loop exit
PB: predicated region body
PF: predicated region fallthrough
CT: control target
= control target key end

     0   :  { %8 = vsyncpa [#allocation5], 0  ;;  %s5843_s0 = inlined_call_operand.vmem [shape: bf16[2,18,18,128], index: 0, kind: input, shape index: {}]   ;;  %s5844_s1 = inlined_call_operand.hbm [shape: bf16[3200,128], index: 1, kind: input, shape index: {}]   ;;  %s5845_s2 = inlined_call_operand.hbm [shape: f32[1,128], index: 2, kind: input, shape index: {}]   ;;  %s5846_s3 = inlined_call_operand.vmem [shape: bf16[2,7,7,128], index: 3, kind: output, shape index: {}]  }
   0x1   :  { %9 = vsyncpa [#allocation7], 0  ;;  %s5345_s12 = smov 0  }
   0x2 LB: > { %s125_s15 = sshll.u32 %s5844_s1, 4  ;;  %s3670_s16 = sadd.s32 4294967295, %s5315_s12   ;;  %s5315_s12 = sphi %s5345_s12, %s15_s12   ;;  %s126_s15 = int_to_ptr.hbm [resolvable:$true] %s125_s15 }
   0x3   : > { %p3672_p0 = scmp.ge.s32.totalorder %s5315_s12, 1  ;;  %p114_p1 = scmp.lt.s32.totalorder %s5315_s12, 3 }
   0x4   : > { %p5012_p2 = scmp.eq.s32.totalorder %s3670_s16, 0  ;;  %s5321_s18 = smov [#allocation4]  }
   0x5   : > { %p5356_p3 = pnand %p3672_p0, %p114_p1  ;;  %s127_s19 = sshll.u32 %s5321_s18, 4  ;;  %s128_s19 = int_to_ptr.vmem [resolvable:$true] %s127_s19 }
   0x6   : > { %s140_s22 = sshll.u32 %s5845_s2, 4  ;;  %s5322_s23 = smov [#allocation6]   ;;  %s141_s22 = int_to_ptr.hbm [resolvable:$true] %s140_s22 }
   0x7   : > { %p5005_p4 = pneg %p5356_p3  ;;  %s142_s24 = sshll.u32 %s5322_s23, 4  ;;  %s143_s24 = int_to_ptr.vmem [resolvable:$true] %s142_s24 }
   0x8   : > { %s5323_s25 = smov 64   ;;  %s5324_s26 = smov 4  }
   0x9   : > { %p5006_p5 = pnand %p5012_p2, %p5005_p4  ;;  %163 = sbr.rel (%p5356_p3) target bundleno = 598 (0x256), region = 32 }
   0xb   : > { %5008 = dma.hbm_to_vmem [thread:$0]  (!%p5006_p5), %s126_s15, 25600, %s128_s19, [#allocation5], %s5323_s25, %s5323_s25, %s5324_s26  }
   0xc   : > { %5011 = dma.hbm_to_vmem [thread:$0]  (!%p5006_p5), %s141_s22, 16, %s143_s24, [#allocation7]  }
   0xe   : > { %5306 = dma.done.wait (%p5012_p2), [#allocation5], 25600  }
   0xf   : > { %5308 = vsyncadd (%p5012_p2), [#allocation5], 4294941696 }
  0x10   : > { %5310 = dma.done.wait (%p5012_p2), [#allocation7], 16  }
  0x11   : > { %5312 = vsyncadd (%p5012_p2), [#allocation7], 4294967280  ;;  %p193_p6 = scmp.lt.s32.totalorder %s3670_s16, 1  ;;  %s5382_s8 = smov 0  }
  0x13   : > { %s5857_s16 = smov (!%p193_p6, %s3670_s16), 1 }
  0x14   : > { %s4995_s27 = smul.u32 216, %s5857_s16 }
  0x15   : > { %s4996_s28 = smul.u32 28, %s5857_s16 }
  0x16   : > { %s5375_s4 = scalar_lea.vmem %s5843_s0, %s4995_s27 }
  0x17   : > { %s5380_s7 = scalar_lea.vmem %s5846_s3, %s4996_s28 }
  0x18 LB: >> { %v4777_v0 = vld [vmem:[#allocation4 + $0x38] sm:$0xff]  ;;  %v4776_v4 = vld [vmem:[#allocation4 + $0x30] sm:$0xff]  ;;  %v4775_v8 = vld [vmem:[#allocation4 + $0x28] sm:$0xff]  ;;  %s4744_s9 = smul.u32 24, %s5319_s8  ;;  %vm246_vm0 = vcmask 1042432   ;;  %vm247_vm1 = vcmask 1046532   ;;  %s5319_s8 = sphi %s5382_s8, %s208_s8  }
  0x19   : >> { %v4785_v1 = vld [vmem:[#allocation4 + $0x78] sm:$0xff]  ;;  %2688 = vmatpush.bf16.msra.mxu0 %v4777_v0  ;;  %v4784_v5 = vld [vmem:[#allocation4 + $0x70] sm:$0xff]  ;;  %v4783_v9 = vld [vmem:[#allocation4 + $0x68] sm:$0xff]  ;;  %vm218_vm2 = vsmask.f32 3328  ;;  %vm280_vm7 = vcmask 1041408  }
  0x1a   : >> { %v4793_v2 = vld [vmem:[#allocation4 + $0xb8] sm:$0xff]  ;;  %2702 = vmatpush.bf16.msra.mxu1 %v4785_v1  ;;  %v4792_v6 = vld [vmem:[#allocation4 + $0xb0] sm:$0xff]  ;;  %v4791_v10 = vld [vmem:[#allocation4 + $0xa8] sm:$0xff]  ;;  %s5389_s10 = scalar_lea.vmem %s5375_s4, %s4744_s9  ;;  %vm219_vm3 = vsmask.f32 7440  ;;  %vm281_vm8 = vcmask 1045508  }
  0x1b   : >> { %v4801_v3 = vld [vmem:[#allocation4 + $0xf8] sm:$0xff]  ;;  %2716 = vmatpush.bf16.msra.mxu2 %v4793_v2  ;;  %v4800_v7 = vld [vmem:[#allocation4 + $0xf0] sm:$0xff]  ;;  %v4799_v11 = vld [vmem:[#allocation4 + $0xe8] sm:$0xff]  ;;  %vm258_vm5 = vsmask.f32 2304  ;;  %s4741_s11 = sshll.u32 %s5319_s8, 2 }
  0x1c   : >> { %2730 = vmatpush.bf16.msra.mxu3 %v4801_v3  ;;  %v4774_v12 = vld [vmem:[#allocation4 + $0x20] sm:$0xff]  ;;  %v4773_v16 = vld [vmem:[#allocation4 + $0x18] sm:$0xff]  ;;  %v4772_v20 = vld [vmem:[#allocation4 + $0x10] sm:$0xff]  ;;  %vm259_vm6 = vsmask.f32 6416  ;;  %s3558_s13 = scalar_lea.vmem %s5380_s7, %s4741_s11  ;;  %vm3559_vm12 = vcmask 1043456  }
  0x1d   : >> { %2689 = vmatpush.bf16.msra.mxu0 %v4776_v4  ;;  %v4782_v13 = vld [vmem:[#allocation4 + $0x60] sm:$0xff]  ;;  %v4781_v17 = vld [vmem:[#allocation4 + $0x58] sm:$0xff]  ;;  %vm5398_vm4 = vmor %vm246_vm0, %vm247_vm1  ;;  %s208_s8 = sadd.s32 1, %s5319_s8  }
  0x1e   : >> { %2703 = vmatpush.bf16.msra.mxu1 %v4784_v5  ;;  %v4790_v14 = vld [vmem:[#allocation4 + $0xa0] sm:$0xff]  ;;  %v4789_v18 = vld [vmem:[#allocation4 + $0x98] sm:$0xff]  ;;  %v4780_v24 = vld [vmem:[#allocation4 + $0x50] sm:$0xff]  ;;  %p205_p7 = scmp.ge.s32.totalorder %s208_s8, 7  }
  0x1f   : >> { %2717 = vmatpush.bf16.msra.mxu2 %v4792_v6  ;;  %v4798_v15 = vld [vmem:[#allocation4 + $0xe0] sm:$0xff]  ;;  %v4797_v19 = vld [vmem:[#allocation4 + $0xd8] sm:$0xff]  ;;  %v4788_v25 = vld [vmem:[#allocation4 + $0x90] sm:$0xff] }
  0x20   : >> { %2731 = vmatpush.bf16.msra.mxu3 %v4800_v7  ;;  %v5392_v21 = vld [vmem:[%s5389_s10] sm:$0xf]  ;;  %v5395_v22 = vld [vmem:[%s5389_s10 + $0x4] sm:$0xf]  ;;  %v4796_v28 = vld [vmem:[#allocation4 + $0xd0] sm:$0xff] }
  0x21   : >> { %2690 = vmatpush.bf16.msra.mxu0 %v4775_v8  ;;  %216 = vst [vmem:[#allocation2] sm:$0xf] %v5392_v21  ;;  %v3684_v26 = vrot.slane %v5392_v21, 9  ;;  %v251_v27 = vrot.slane %v5395_v22, 5  ;;  %v222_v29 = vshrl.u32 %v5392_v21, 16  ;;  %v225_v30 = vshll.u32 %v5392_v21, 16  ;;  %vm5418_vm9 = vmor %vm218_vm2, %vm219_vm3 }
  0x22   : >> { %2704 = vmatpush.bf16.msra.mxu1 %v4783_v9  ;;  %217 = vst [vmem:[#allocation2 + $0x64] sm:$0x7] %v5395_v22  ;;  %v231_v31 = vshll.u32 %v5395_v22, 16  ;;  %v235_v34 = vshrl.u32 %v5395_v22, 16  ;;  %v5413_v35 = vld [vmem:[%s5389_s10 + $0x8] sm:$0x1]  ;;  %vm5424_vm10 = vmor %vm258_vm5, %vm259_vm6 }
  0x23   : >> { %2718 = vmatpush.bf16.msra.mxu2 %v4791_v10  ;;  %v252_v32 = vsel %vm5398_vm4, %v3684_v26, %v251_v27  ;;  %v253_v33 = vrot.slane %v251_v27, 4  ;;  %v224_v36 = vrot.slane %v222_v29, 4  ;;  %v227_v37 = vrot.slane %v225_v30, 5  ;;  %v4771_v44 = vld [vmem:[#allocation4 + $0x8] sm:$0xff]  ;;  %v4770_v59 = vld [vmem:[#allocation4] sm:$0xff]  ;;  %vm5432_vm11 = vmor %vm280_vm7, %vm281_vm8 }
  0x24   : >> { %2732 = vmatpush.bf16.msra.mxu3 %v4799_v11  ;;  %256 = vst [vmem:[#allocation2 + $0x8] sm:$0xf] %v252_v32  ;;  %v233_v38 = vrot.slane %v231_v31, 5  ;;  %v261_v39 = vrot.slane %v222_v29, 5  ;;  %v237_v40 = vrot.slane %v235_v34, 4  ;;  %v262_v41 = vrot.slane %v225_v30, 6  ;;  %vm3560_vm13 = vmand %vm3559_vm12, %vm218_vm2 }
  0x25   : >> { %2691 = vmatpush.bf16.msra.mxu0 %v4774_v12  ;;  %257 = vst [vmem:[#allocation2 + $0x6c] sm:$0x7] %v253_v33  ;;  %v265_v42 = vrot.slane %v235_v34, 5  ;;  %v266_v43 = vrot.slane %v231_v31, 6  ;;  %v4779_v45 = vld [vmem:[#allocation4 + $0x48] sm:$0xff]  ;;  %v228_v46 = vor.u32 %v227_v37, %v224_v36  ;;  %v271_v47 = vshll.u32 %v5413_v35, 16 }
  0x26   : >> { %2705 = vmatpush.bf16.msra.mxu1 %v4782_v13  ;;  %v4787_v48 = vld [vmem:[#allocation4 + $0x88] sm:$0xff]  ;;  %v238_v51 = vor.u32 %v237_v40, %v233_v38  ;;  %v263_v52 = vor.u32 %v262_v41, %v261_v39  ;;  %v3685_v57 = vrot.slane %v5392_v21, 10  ;;  %v285_v58 = vrot.slane %v5395_v22, 6  ;;  %v4778_v60 = vld [vmem:[#allocation4 + $0x40] sm:$0xff]  ;;  %v4809_v7 = vld [vmem:[#allocation4 + $0x138] sm:$0xff] }
  0x27   : >> { %2719 = vmatpush.bf16.msra.mxu2 %v4790_v14  ;;  %v4795_v49 = vld [vmem:[#allocation4 + $0xc8] sm:$0xff]  ;;  %v267_v53 = vor.u32 %v266_v43, %v265_v42  ;;  %v229_v54 = vrot.slane %v228_v46, 4  ;;  %v273_v56 = vrot.slane %v271_v47, 6  ;;  %v288_v1 = vrot.slane %v5413_v35, 6  ;;  %v4786_v2 = vld [vmem:[#allocation4 + $0x80] sm:$0xff]  ;;  %v4817_v8 = vld [vmem:[#allocation4 + $0x178] sm:$0xff] }
  0x28   : >> { %2733 = vmatpush.bf16.msra.mxu3 %v4798_v15  ;;  %v239_v61 = vrot.slane %v238_v51, 4  ;;  %v264_v62 = vrot.slane %v263_v52, 4  ;;  %v3743_v3 = vld [vmem:[#allocation2] sm:$0xf]  ;;  %v287_v6 = vrot.slane %v285_v58, 4  ;;  %v4825_v12 = vld [vmem:[#allocation4 + $0x1b8] sm:$0xff]  ;;  %v286_v15 = vsel %vm5432_vm11, %v3685_v57, %v285_v58 }
  0x29   : >> { %2692 = vmatpush.bf16.msra.mxu0 %v4773_v16  ;;  %v269_v63 = vrot.slane %v267_v53, 4  ;;  %v4757_v4 = vld [vmem:[#allocation2 + $0x60] sm:$0x70]  ;;  %v234_v5 = vsel %vm5418_vm9, %v229_v54, %v233_v38  ;;  %v4833_v16 = vld [vmem:[#allocation4 + $0x1f8] sm:$0xff]  ;;  %v5451_v22 = vld [vmem:[%s5389_s10 + $0x10] sm:$0xf] }
  0x2a   : >> { %2706 = vmatpush.bf16.msra.mxu1 %v4781_v17  ;;  %242 = vst [vmem:[#allocation2 + $0x4] sm:$0xf] %v234_v5  ;;  %v268_v10 = vsel %vm5424_vm10, %v264_v62, %v267_v53  ;;  %v4794_v13 = vld [vmem:[#allocation4 + $0xc0] sm:$0xff]  ;;  %v4808_v17 = vld [vmem:[#allocation4 + $0x130] sm:$0xff]  ;;  %v313_v27 = vshll.u32 %v5451_v22, 16  ;;  %v330_v33 = vrot.slane %v5451_v22, 5 }
  0x2b   : >> { %2720 = vmatpush.bf16.msra.mxu2 %v4789_v18  ;;  %v3751_v9 = vld [vmem:[#allocation2 + $0x8] sm:$0xf]  ;;  %v274_v11 = vsel %vm5424_vm10, %v269_v63, %v273_v56  ;;  %243 = vst [vmem:[#allocation2 + $0x68] sm:$0x7] %v239_v61  ;;  %v3744_v18 = vor.u32 %v4757_v4, %v3743_v3  ;;  %v4816_v26 = vld [vmem:[#allocation4 + $0x170] sm:$0xff]  ;;  %v4806_v56 = vld [vmem:[#allocation4 + $0x120] sm:$0xff] }
  0x2c   : >> { %2734 = vmatpush.bf16.msra.mxu3 %v4797_v19  ;;  %v4758_v14 = vld [vmem:[#allocation2 + $0x68] sm:$0x70]  ;;  %277 = vst [vmem:[#allocation2 + $0xc] sm:$0xf] %v268_v10  ;;  %v289_v19 = vsel %vm5432_vm11, %v287_v6, %v288_v1  ;;  %v4824_v30 = vld [vmem:[#allocation4 + $0x1b0] sm:$0xff]  ;;  %v315_v34 = vrot.slane %v313_v27, 5 }
  0x2d   : >> { %2693 = vmatpush.bf16.msra.mxu0 %v4772_v20  ;;  %v5448_v20 = vld [vmem:[%s5389_s10 + $0xc] sm:$0xf]  ;;  %v3752_v21 = vor.u32 %v4758_v14, %v3751_v9  ;;  %278 = vst [vmem:[#allocation2 + $0x70] sm:$0x7] %v274_v11  ;;  %v4832_v36 = vld [vmem:[#allocation4 + $0x1f0] sm:$0xff]  ;;  %v332_v40 = vrot.slane %v330_v33, 4 }
  0x2e   : >> { %2707 = vmatpush.bf16.msra.mxu1 %v4780_v24  ;;  %v304_v24 = vshrl.u32 %v5448_v20, 16  ;;  %292 = vst [vmem:[#allocation2 + $0x10] sm:$0xf] %v286_v15  ;;  %v3691_v29 = vrot.slane %v5448_v20, 9  ;;  %v4807_v41 = vld [vmem:[#allocation4 + $0x128] sm:$0xff]  ;;  %v4814_v57 = vld [vmem:[#allocation4 + $0x160] sm:$0xff] }
  0x2f   : >> { %2721 = vmatpush.bf16.msra.mxu2 %v4788_v25  ;;  %v307_v25 = vshll.u32 %v5448_v20, 16  ;;  %293 = vst [vmem:[#allocation2 + $0x74] sm:$0x7] %v289_v19  ;;  %v4815_v42 = vld [vmem:[#allocation4 + $0x168] sm:$0xff]  ;;  %v4822_v58 = vld [vmem:[#allocation4 + $0x1a0] sm:$0xff]  ;;  %v342_v62 = vrot.slane %v313_v27, 6 }
  0x30   : >> { %2735 = vmatpush.bf16.msra.mxu3 %v4796_v28  ;;  %v317_v28 = vshrl.u32 %v5451_v22, 16  ;;  %v306_v31 = vrot.slane %v304_v24, 4  ;;  %301 = vst [vmem:[#allocation2 + $0x14] sm:$0xf] %v5448_v20  ;;  %v331_v39 = vsel %vm5398_vm4, %v3691_v29, %v330_v33  ;;  %v4831_v52 = vld [vmem:[#allocation4 + $0x1e8] sm:$0xff]  ;;  %v4813_v63 = vld [vmem:[#allocation4 + $0x158] sm:$0xff] }
  0x31   : >> { %2694 = vmatpush.bf16.msra.mxu0 %v4771_v44  ;;  %v309_v32 = vrot.slane %v307_v25, 5  ;;  %v4745_v37 = vld [vmem:[#allocation2 + $0x4] sm:$0xf]  ;;  %302 = vst [vmem:[#allocation2 + $0x78] sm:$0x7] %v5451_v22  ;;  %v4821_v1 = vld [vmem:[#allocation4 + $0x198] sm:$0xff] }
  0x32   : >> { %2708 = vmatpush.bf16.msra.mxu1 %v4779_v45  ;;  %v319_v35 = vrot.slane %v317_v28, 4  ;;  %v3745_v43 = vld [vmem:[#allocation2 + $0x64] sm:$0x70]  ;;  %335 = vst [vmem:[#allocation2 + $0x1c] sm:$0xf] %v331_v39  ;;  %v341_v61 = vrot.slane %v317_v28, 5 }
  0x33   : >> { %2722 = vmatpush.bf16.msra.mxu2 %v4787_v48  ;;  %v310_v38 = vor.u32 %v309_v32, %v306_v31  ;;  %v4823_v45 = vld [vmem:[#allocation4 + $0x1a8] sm:$0xff]  ;;  %v3748_v46 = vor.u32 %v4745_v37, %v3745_v43  ;;  %336 = vst [vmem:[#allocation2 + $0x80] sm:$0x7] %v332_v40  ;;  %v338_v3 = vrot.slane %v307_v25, 6  ;;  %v5474_v4 = vld [vmem:[%s5389_s10 + $0x18] sm:$0xf] }
  0x34   : >> { %2736 = vmatpush.bf16.msra.mxu3 %v4795_v49  ;;  %v320_v44 = vor.u32 %v319_v35, %v315_v34  ;;  %v4746_v47 = vld [vmem:[#allocation2 + $0xc] sm:$0xf]  ;;  %v3753_v49 = vld [vmem:[#allocation2 + $0x6c] sm:$0x70]  ;;  %v4829_v5 = vld [vmem:[#allocation4 + $0x1d8] sm:$0xff]  ;;  %v343_v10 = vor.u32 %v342_v62, %v341_v61  ;;  %v3692_v31 = vrot.slane %v5448_v20, 10 }
  0x35   : >> { %2695 = vmatpush.bf16.msra.mxu0 %v4770_v59  ;;  %v311_v48 = vrot.slane %v310_v38, 4  ;;  %v3756_v53 = vor.u32 %v4746_v47, %v3753_v49  ;;  %v4830_v59 = vld [vmem:[#allocation4 + $0x1e0] sm:$0xff]  ;;  %v4804_v6 = vld [vmem:[#allocation4 + $0x110] sm:$0xff]  ;;  %374 = vst [vmem:[#allocation2 + $0x28] sm:$0xf] %v5474_v4  ;;  %v4803_v28 = vld [vmem:[#allocation4 + $0x108] sm:$0xff] }
  0x36   : >> { %2709 = vmatpush.bf16.msra.mxu1 %v4778_v60  ;;  %v321_v51 = vrot.slane %v320_v44, 4  ;;  %v4805_v60 = vld [vmem:[#allocation4 + $0x118] sm:$0xff]  ;;  %v4812_v14 = vld [vmem:[#allocation4 + $0x150] sm:$0xff]  ;;  %v4811_v32 = vld [vmem:[#allocation4 + $0x148] sm:$0xff] }
  0x37   : >> { %2723 = vmatpush.bf16.msra.mxu2 %v4786_v2  ;;  %v316_v54 = vsel %vm5418_vm9, %v311_v48, %v315_v34  ;;  %v337_v2 = vrot.slane %v304_v24, 5  ;;  %v4820_v15 = vld [vmem:[#allocation4 + $0x190] sm:$0xff]  ;;  %v4819_v33 = vld [vmem:[#allocation4 + $0x188] sm:$0xff]  ;;  %v4802_v20 = vld [vmem:[#allocation4 + $0x100] sm:$0xff] }
  0x38   : >> { %2737 = vmatpush.bf16.msra.mxu3 %v4794_v13  ;;  %2696 = vmatmul.bf16.vlgmr.msra.gmra.mxu0 %v3744_v18  ;;  %324 = vst [vmem:[#allocation2 + $0x18] sm:$0xf] %v316_v54  ;;  %v380_v13 = vshll.u32 %v5474_v4, 16  ;;  %v345_v18 = vrot.slane %v343_v10, 4  ;;  %v4828_v24 = vld [vmem:[#allocation4 + $0x1d0] sm:$0xff]  ;;  %v4810_v40 = vld [vmem:[#allocation4 + $0x140] sm:$0xff] }
  0x39   : >> { %2744 = vmatpush.bf16.msrb.mxu0 %v4809_v7  ;;  %2710 = vmatmul.bf16.vlgmr.msra.gmra.mxu1 %v3748_v46  ;;  %325 = vst [vmem:[#allocation2 + $0x7c] sm:$0x7] %v321_v51  ;;  %v3690_v7 = vld [vmem:[%s5389_s10 + $0x14] sm:$0x1]  ;;  %v339_v9 = vor.u32 %v338_v3, %v337_v2  ;;  %v4841_v44 = vld [vmem:[#allocation4 + $0x238] sm:$0xff]  ;;  %v5213_v55 = vld [vmem:[#allocation4 + $0x4c8] sm:$0xff] }
  0x3a   : >> { %2758 = vmatpush.bf16.msrb.mxu1 %v4817_v8  ;;  %2724 = vmatmul.bf16.vlgmr.msra.gmra.mxu2 %v3752_v21  ;;  %v377_v8 = vshrl.u32 %v5474_v4, 16  ;;  %v347_v11 = vshll.u32 %v3690_v7, 16  ;;  %v358_v21 = vrot.slane %v5451_v22, 6  ;;  %v382_v25 = vrot.slane %v380_v13, 5  ;;  %v3759_v46 = vld [vmem:[#allocation2 + $0x10] sm:$0xf] }
  0x3b   : >> { %2772 = vmatpush.bf16.msrb.mxu2 %v4825_v12  ;;  %2738 = vmatmul.bf16.vlgmr.msra.gmra.mxu3 %v3756_v53  ;;  %v5479_v12 = vld [vmem:[%s5389_s10 + $0x1c] sm:$0xf]  ;;  %v361_v34 = vrot.slane %v3690_v7, 6  ;;  %v4759_v47 = vld [vmem:[#allocation2 + $0x70] sm:$0x70] }
  0x3c   : >> { %2786 = vmatpush.bf16.msrb.mxu3 %v4833_v16  ;;  %375 = vst [vmem:[#allocation2 + $0x8c] sm:$0x7] %v5479_v12  ;;  %v379_v16 = vrot.slane %v377_v8, 4  ;;  %v349_v19 = vrot.slane %v347_v11, 6  ;;  %v390_v27 = vshrl.u32 %v5479_v12, 16  ;;  %v360_v22 = vrot.slane %v358_v21, 4 }
  0x3d   : >> { %2745 = vmatpush.bf16.msrb.mxu0 %v4808_v17  ;;  %v340_v17 = vrot.slane %v339_v9, 4  ;;  %v359_v37 = vsel %vm5432_vm11, %v3692_v31, %v358_v21  ;;  %v4857_v54 = vld [vmem:[#allocation4 + $0x2b8] sm:$0xff]  ;;  %v3760_v61 = vor.u32 %v4759_v47, %v3759_v46  ;;  %v4840_v3 = vld [vmem:[#allocation4 + $0x230] sm:$0xff]  ;;  %v4839_v9 = vld [vmem:[#allocation4 + $0x228] sm:$0xff]  ;;  %v411_v31 = vrot.slane %v380_v13, 6 }
  0x3e   : >> { %2759 = vmatpush.bf16.msrb.mxu1 %v4816_v26  ;;  %v386_v26 = vshll.u32 %v5479_v12, 16  ;;  %v383_v35 = vor.u32 %v382_v25, %v379_v16  ;;  %v392_v39 = vrot.slane %v390_v27, 4  ;;  %365 = vst [vmem:[#allocation2 + $0x24] sm:$0xf] %v359_v37  ;;  %v4864_v7 = vld [vmem:[#allocation4 + $0x2f0] sm:$0xff]  ;;  %v4855_v11 = vld [vmem:[#allocation4 + $0x2a8] sm:$0xff] }
  0x3f   : >> { %2773 = vmatpush.bf16.msrb.mxu2 %v4824_v30  ;;  %v344_v29 = vsel %vm5424_vm10, %v340_v17, %v343_v10  ;;  %v350_v30 = vsel %vm5424_vm10, %v345_v18, %v349_v19  ;;  %v3767_v49 = vld [vmem:[#allocation2 + $0x18] sm:$0xf]  ;;  %v4847_v10 = vld [vmem:[#allocation4 + $0x268] sm:$0xff]  ;;  %v4846_v16 = vld [vmem:[#allocation4 + $0x260] sm:$0xff] }
  0x40   : >> { %2787 = vmatpush.bf16.msrb.mxu3 %v4832_v36  ;;  %353 = vst [vmem:[#allocation2 + $0x20] sm:$0xf] %v344_v29  ;;  %v4827_v36 = vld [vmem:[#allocation4 + $0x1c8] sm:$0xff]  ;;  %v388_v38 = vrot.slane %v386_v26, 5  ;;  %v384_v43 = vrot.slane %v383_v35, 4  ;;  %v4854_v17 = vld [vmem:[#allocation4 + $0x2a0] sm:$0xff] }
  0x41   : >> { %2746 = vmatpush.bf16.msrb.mxu0 %v4807_v41  ;;  %354 = vst [vmem:[#allocation2 + $0x84] sm:$0x7] %v350_v30  ;;  %v4818_v41 = vld [vmem:[#allocation4 + $0x180] sm:$0xff]  ;;  %v4760_v51 = vld [vmem:[#allocation2 + $0x78] sm:$0x70]  ;;  %v431_v29 = vrot.slane %v5479_v12, 6 }
  0x42   : >> { %2760 = vmatpush.bf16.msrb.mxu1 %v4815_v42  ;;  %v362_v42 = vsel %vm5432_vm11, %v360_v22, %v361_v34  ;;  %v393_v48 = vor.u32 %v392_v39, %v388_v38  ;;  %v389_v53 = vsel %vm5418_vm9, %v384_v43, %v388_v38  ;;  %v3768_v62 = vor.u32 %v4760_v51, %v3767_v49  ;;  %v4862_v18 = vld [vmem:[#allocation4 + $0x2e0] sm:$0xff]  ;;  %v4837_v19 = vld [vmem:[#allocation4 + $0x218] sm:$0xff]  ;;  %v4860_v13 = vld [vmem:[#allocation4 + $0x2d0] sm:$0xff] }
  0x43   : >> { %2774 = vmatpush.bf16.msrb.mxu2 %v4823_v45  ;;  %v4849_v45 = vld [vmem:[#allocation4 + $0x278] sm:$0xff]  ;;  %366 = vst [vmem:[#allocation2 + $0x88] sm:$0x7] %v362_v42  ;;  %v410_v30 = vrot.slane %v377_v8, 5  ;;  %v414_v22 = vrot.slane %v390_v27, 5  ;;  %v403_v34 = vrot.slane %v5479_v12, 5 }
  0x44   : >> { %2788 = vmatpush.bf16.msrb.mxu3 %v4831_v52  ;;  %v4747_v52 = vld [vmem:[#allocation2 + $0x14] sm:$0xf]  ;;  %397 = vst [vmem:[#allocation2 + $0x2c] sm:$0xf] %v389_v53  ;;  %v4845_v21 = vld [vmem:[#allocation4 + $0x258] sm:$0xff]  ;;  %v415_v35 = vrot.slane %v386_v26, 6 }
  0x45   : >> { %2747 = vmatpush.bf16.msrb.mxu0 %v4806_v56  ;;  %v3761_v56 = vld [vmem:[#allocation2 + $0x74] sm:$0x70]  ;;  %v3697_v37 = vld [vmem:[%s5389_s10 + $0x20] sm:$0x1]  ;;  %v3699_v8 = vrot.slane %v5474_v4, 10  ;;  %v433_v38 = vrot.slane %v431_v29, 4  ;;  %v412_v39 = vor.u32 %v411_v31, %v410_v30 }
  0x46   : >> { %2761 = vmatpush.bf16.msrb.mxu1 %v4814_v57  ;;  %v394_v57 = vrot.slane %v393_v48, 4  ;;  %v4861_v25 = vld [vmem:[#allocation4 + $0x2d8] sm:$0xff]  ;;  %v434_v27 = vrot.slane %v3697_v37, 6  ;;  %v4835_v42 = vld [vmem:[#allocation4 + $0x208] sm:$0xff]  ;;  %v4834_v48 = vld [vmem:[#allocation4 + $0x200] sm:$0xff] }
  0x47   : >> { %2775 = vmatpush.bf16.msrb.mxu2 %v4822_v58  ;;  %v4826_v58 = vld [vmem:[#allocation4 + $0x1c0] sm:$0xff]  ;;  %v432_v12 = vsel %vm5432_vm11, %v3699_v8, %v431_v29  ;;  %v413_v26 = vrot.slane %v412_v39, 4  ;;  %v4859_v47 = vld [vmem:[#allocation4 + $0x2c8] sm:$0xff]  ;;  %v4885_v8 = vld [vmem:[#allocation4 + $0x398] sm:$0xff] }
  0x48   : >> { %2789 = vmatpush.bf16.msrb.mxu3 %v4830_v59  ;;  %v4748_v59 = vld [vmem:[#allocation2 + $0x1c] sm:$0xf]  ;;  %398 = vst [vmem:[#allocation2 + $0x90] sm:$0x7] %v394_v57  ;;  %v4850_v53 = vld [vmem:[#allocation4 + $0x280] sm:$0xff] }
  0x49   : >> { %2748 = vmatpush.bf16.msrb.mxu0 %v4805_v60  ;;  %v3769_v60 = vld [vmem:[#allocation2 + $0x7c] sm:$0x70]  ;;  %438 = vst [vmem:[#allocation2 + $0x38] sm:$0xf] %v432_v12  ;;  %v4873_v57 = vld [vmem:[#allocation4 + $0x338] sm:$0xff]  ;;  %v4868_v12 = vld [vmem:[#allocation4 + $0x310] sm:$0xff] }
  0x4a   : >> { %2762 = vmatpush.bf16.msrb.mxu1 %v4813_v63  ;;  %v4865_v63 = vld [vmem:[#allocation4 + $0x2f8] sm:$0xff]  ;;  %v3772_v2 = vor.u32 %v4748_v59, %v3769_v60  ;;  %v4761_v59 = vld [vmem:[#allocation2 + $0x80] sm:$0x70] }
  0x4b   : >> { %2776 = vmatpush.bf16.msrb.mxu2 %v4821_v1  ;;  %v3764_v1 = vor.u32 %v4747_v52, %v3761_v56  ;;  %v4842_v52 = vld [vmem:[#allocation4 + $0x240] sm:$0xff]  ;;  %v3783_v56 = vld [vmem:[#allocation2 + $0x28] sm:$0xf] }
  0x4c   : >> { %2790 = vmatpush.bf16.msrb.mxu3 %v4829_v5  ;;  %v4848_v5 = vld [vmem:[#allocation4 + $0x270] sm:$0xff]  ;;  %v4870_v29 = vld [vmem:[#allocation4 + $0x320] sm:$0xff] }
  0x4d   : >> { %2749 = vmatpush.bf16.msrb.mxu0 %v4804_v6  ;;  %v4856_v6 = vld [vmem:[#allocation4 + $0x2b0] sm:$0xff]  ;;  %v4878_v30 = vld [vmem:[#allocation4 + $0x360] sm:$0xff] }
  0x4e   : >> { %2763 = vmatpush.bf16.msrb.mxu1 %v4812_v14  ;;  %v4863_v14 = vld [vmem:[#allocation4 + $0x2e8] sm:$0xff]  ;;  %v4886_v31 = vld [vmem:[#allocation4 + $0x3a0] sm:$0xff] }
  0x4f   : >> { %2777 = vmatpush.bf16.msrb.mxu2 %v4820_v15  ;;  %v4838_v15 = vld [vmem:[#allocation4 + $0x220] sm:$0xff] }
  0x50   : >> { %2791 = vmatpush.bf16.msrb.mxu3 %v4828_v24  ;;  %v4853_v24 = vld [vmem:[#allocation4 + $0x298] sm:$0xff] }
  0x51   : >> { %2750 = vmatpush.bf16.msrb.mxu0 %v4803_v28  ;;  %v4836_v28 = vld [vmem:[#allocation4 + $0x210] sm:$0xff] }
  0x52   : >> { %2764 = vmatpush.bf16.msrb.mxu1 %v4811_v32  ;;  %v4844_v32 = vld [vmem:[#allocation4 + $0x250] sm:$0xff] }
  0x53   : >> { %2778 = vmatpush.bf16.msrb.mxu2 %v4819_v33  ;;  %v4852_v33 = vld [vmem:[#allocation4 + $0x290] sm:$0xff] }
  0x54   : >> { %2792 = vmatpush.bf16.msrb.mxu3 %v4827_v36  ;;  %v3698_v36 = vrot.slane %v5474_v4, 9  ;;  %v4843_v4 = vld [vmem:[#allocation4 + $0x248] sm:$0xff] }
  0x55   : >> { %2751 = vmatpush.bf16.msrb.mxu0 %v4802_v20  ;;  %v405_v20 = vrot.slane %v403_v34, 4 }
  0x56   : >> { %2765 = vmatpush.bf16.msrb.mxu1 %v4810_v40  ;;  %v416_v40 = vor.u32 %v415_v35, %v414_v22  ;;  %v404_v43 = vsel %vm5398_vm4, %v3698_v36, %v403_v34  ;;  %v4894_v22 = vld [vmem:[#allocation4 + $0x3e0] sm:$0xff] }
  0x57   : >> { %2779 = vmatpush.bf16.msrb.mxu2 %v4818_v41  ;;  %v420_v41 = vshll.u32 %v3697_v37, 16  ;;  %408 = vst [vmem:[#allocation2 + $0x30] sm:$0xf] %v404_v43  ;;  %v4877_v37 = vld [vmem:[#allocation4 + $0x358] sm:$0xff] }
  0x58   : >> { %2793 = vmatpush.bf16.msrb.mxu3 %v4826_v58  ;;  %2752 = vmatmul.bf16.vlgmr.msrb.gmra.mxu0 %v3760_v61  ;;  %v418_v46 = vrot.slane %v416_v40, 4  ;;  %409 = vst [vmem:[#allocation2 + $0x94] sm:$0x7] %v405_v20  ;;  %v417_v49 = vsel %vm5424_vm10, %v413_v26, %v416_v40  ;;  %v4881_v58 = vld [vmem:[#allocation4 + $0x378] sm:$0xff]  ;;  %v5530_v61 = vld [vmem:[%s5389_s10 + $0x24] sm:$0xf] }
  0x59   : >> { %2800 = vmatpush.bf16.msra.mxu0 %v4841_v44  ;;  %2766 = vmatmul.bf16.vlgmr.msrb.gmra.mxu1 %v3764_v1  ;;  %v4851_v44 = vld [vmem:[#allocation4 + $0x288] sm:$0xff]  ;;  %v422_v51 = vrot.slane %v420_v41, 6  ;;  %426 = vst [vmem:[#allocation2 + $0x34] sm:$0xf] %v417_v49  ;;  %v453_v34 = vshll.u32 %v5530_v61, 16 }
  0x5a   : >> { %2814 = vmatpush.bf16.msra.mxu1 %v4849_v45  ;;  %2780 = vmatmul.bf16.vlgmr.msrb.gmra.mxu2 %v3768_v62  ;;  %v435_v45 = vsel %vm5432_vm11, %v433_v38, %v434_v27  ;;  %v4889_v62 = vld [vmem:[#allocation4 + $0x3b8] sm:$0xff]  ;;  %v4762_v1 = vld [vmem:[#allocation2 + $0x88] sm:$0x70]  ;;  %447 = vst [vmem:[#allocation2 + $0x3c] sm:$0xf] %v5530_v61 }
  0x5b   : >> { %2828 = vmatpush.bf16.msra.mxu2 %v4857_v54  ;;  %2794 = vmatmul.bf16.vlgmr.msrb.gmra.mxu3 %v3772_v2  ;;  %v3775_v54 = vld [vmem:[#allocation2 + $0x20] sm:$0xf]  ;;  %439 = vst [vmem:[#allocation2 + $0x9c] sm:$0x7] %v435_v45  ;;  %v423_v60 = vsel %vm5424_vm10, %v418_v46, %v422_v51  ;;  %v5533_v2 = vld [vmem:[%s5389_s10 + $0x28] sm:$0xf] }
  0x5c   : >> { %2842 = vmatpush.bf16.msra.mxu3 %v4865_v63  ;;  %v4858_v63 = vld [vmem:[#allocation4 + $0x2c0] sm:$0xff]  ;;  %427 = vst [vmem:[#allocation2 + $0x98] sm:$0x7] %v423_v60  ;;  %v459_v35 = vshll.u32 %v5533_v2, 16  ;;  %v463_v36 = vshrl.u32 %v5533_v2, 16  ;;  %v455_v39 = vrot.slane %v453_v34, 5 }
  0x5d   : >> { %2801 = vmatpush.bf16.msra.mxu0 %v4840_v3  ;;  %v4749_v3 = vld [vmem:[#allocation2 + $0x24] sm:$0xf]  ;;  %448 = vst [vmem:[#allocation2 + $0xa0] sm:$0x7] %v5533_v2  ;;  %v484_v20 = vrot.slane %v453_v34, 6  ;;  %v4893_v27 = vld [vmem:[#allocation4 + $0x3d8] sm:$0xff] }
  0x5e   : >> { %2815 = vmatpush.bf16.msra.mxu1 %v4848_v5  ;;  %v3777_v5 = vld [vmem:[#allocation2 + $0x84] sm:$0x70]  ;;  %v461_v40 = vrot.slane %v459_v35, 5  ;;  %v465_v41 = vrot.slane %v463_v36, 4  ;;  %v487_v43 = vrot.slane %v463_v36, 5  ;;  %v4876_v46 = vld [vmem:[#allocation4 + $0x350] sm:$0xff] }
  0x5f   : >> { %2829 = vmatpush.bf16.msra.mxu2 %v4856_v6  ;;  %v4750_v6 = vld [vmem:[#allocation2 + $0x2c] sm:$0xf] }
  0x60   : >> { %2843 = vmatpush.bf16.msra.mxu3 %v4864_v7  ;;  %v3785_v7 = vld [vmem:[#allocation2 + $0x8c] sm:$0x70] }
  0x61   : >> { %2802 = vmatpush.bf16.msra.mxu0 %v4839_v9  ;;  %v3776_v9 = vor.u32 %v4761_v59, %v3775_v54  ;;  %v4892_v54 = vld [vmem:[#allocation4 + $0x3d0] sm:$0xff]  ;;  %v4867_v59 = vld [vmem:[#allocation4 + $0x308] sm:$0xff] }
  0x62   : >> { %2816 = vmatpush.bf16.msra.mxu1 %v4847_v10  ;;  %v3784_v10 = vor.u32 %v4762_v1, %v3783_v56  ;;  %v3705_v1 = vrot.slane %v5530_v61, 9 }
  0x63   : >> { %2830 = vmatpush.bf16.msra.mxu2 %v4855_v11  ;;  %v4897_v11 = vld [vmem:[#allocation4 + $0x3f8] sm:$0xff] }
  0x64   : >> { %2844 = vmatpush.bf16.msra.mxu3 %v4863_v14  ;;  %v3780_v14 = vor.u32 %v4749_v3, %v3777_v5  ;;  %v4875_v3 = vld [vmem:[#allocation4 + $0x348] sm:$0xff]  ;;  %v3801_v34 = vld [vmem:[#allocation2 + $0x9c] sm:$0x70] }
  0x65   : >> { %2803 = vmatpush.bf16.msra.mxu0 %v4838_v15  ;;  %v3788_v15 = vor.u32 %v4750_v6, %v3785_v7  ;;  %v4883_v5 = vld [vmem:[#allocation4 + $0x388] sm:$0xff] }
  0x66   : >> { %2817 = vmatpush.bf16.msra.mxu1 %v4846_v16  ;;  %v4872_v16 = vld [vmem:[#allocation4 + $0x330] sm:$0xff]  ;;  %v4891_v7 = vld [vmem:[#allocation4 + $0x3c8] sm:$0xff] }
  0x67   : >> { %2831 = vmatpush.bf16.msra.mxu2 %v4854_v17  ;;  %v4880_v17 = vld [vmem:[#allocation4 + $0x370] sm:$0xff] }
  0x68   : >> { %2845 = vmatpush.bf16.msra.mxu3 %v4862_v18  ;;  %v4888_v18 = vld [vmem:[#allocation4 + $0x3b0] sm:$0xff] }
  0x69   : >> { %2804 = vmatpush.bf16.msra.mxu0 %v4837_v19  ;;  %v4896_v19 = vld [vmem:[#allocation4 + $0x3f0] sm:$0xff] }
  0x6a   : >> { %2818 = vmatpush.bf16.msra.mxu1 %v4845_v21  ;;  %v4871_v21 = vld [vmem:[#allocation4 + $0x328] sm:$0xff] }
  0x6b   : >> { %2832 = vmatpush.bf16.msra.mxu2 %v4853_v24  ;;  %v4879_v24 = vld [vmem:[#allocation4 + $0x368] sm:$0xff] }
  0x6c   : >> { %2846 = vmatpush.bf16.msra.mxu3 %v4861_v25  ;;  %v4887_v25 = vld [vmem:[#allocation4 + $0x3a8] sm:$0xff] }
  0x6d   : >> { %2805 = vmatpush.bf16.msra.mxu0 %v4836_v28  ;;  %v4895_v28 = vld [vmem:[#allocation4 + $0x3e8] sm:$0xff] }
  0x6e   : >> { %2819 = vmatpush.bf16.msra.mxu1 %v4844_v32  ;;  %v4869_v32 = vld [vmem:[#allocation4 + $0x318] sm:$0xff] }
  0x6f   : >> { %2833 = vmatpush.bf16.msra.mxu2 %v4852_v33  ;;  %v450_v33 = vshrl.u32 %v5530_v61, 16 }
  0x70   : >> { %2847 = vmatpush.bf16.msra.mxu3 %v4860_v13 }
  0x71   : >> { %2806 = vmatpush.bf16.msra.mxu0 %v4835_v42  ;;  %v452_v38 = vrot.slane %v450_v33, 4  ;;  %v483_v13 = vrot.slane %v450_v33, 5  ;;  %v3704_v42 = vld [vmem:[%s5389_s10 + $0x2c] sm:$0x1]  ;;  %v4752_v33 = vld [vmem:[#allocation2 + $0x3c] sm:$0xf] }
  0x72   : >> { %2820 = vmatpush.bf16.msra.mxu1 %v4843_v4  ;;  %v493_v45 = vshll.u32 %v3704_v42, 16 }
  0x73   : >> { %2834 = vmatpush.bf16.msra.mxu2 %v4851_v44  ;;  %v456_v26 = vor.u32 %v455_v39, %v452_v38  ;;  %v485_v4 = vor.u32 %v484_v20, %v483_v13  ;;  %v488_v44 = vrot.slane %v459_v35, 6  ;;  %v3804_v38 = vor.u32 %v4752_v33, %v3801_v34  ;;  %v4904_v39 = vld [vmem:[#allocation4 + $0x430] sm:$0xff]  ;;  %v4914_v33 = vld [vmem:[#allocation4 + $0x480] sm:$0xff] }
  0x74   : >> { %2848 = vmatpush.bf16.msra.mxu3 %v4859_v47  ;;  %v4884_v47 = vld [vmem:[#allocation4 + $0x390] sm:$0xff] }
  0x75   : >> { %2807 = vmatpush.bf16.msra.mxu0 %v4834_v48  ;;  %v466_v48 = vor.u32 %v465_v41, %v461_v40  ;;  %v457_v49 = vrot.slane %v456_v26, 4  ;;  %v486_v51 = vrot.slane %v485_v4, 4  ;;  %v4912_v13 = vld [vmem:[#allocation4 + $0x470] sm:$0xff]  ;;  %v4911_v41 = vld [vmem:[#allocation4 + $0x468] sm:$0xff]  ;;  %v4910_v26 = vld [vmem:[#allocation4 + $0x460] sm:$0xff] }
  0x76   : >> { %2821 = vmatpush.bf16.msra.mxu1 %v4842_v52  ;;  %v489_v52 = vor.u32 %v488_v44, %v487_v43  ;;  %v4920_v20 = vld [vmem:[#allocation4 + $0x4b0] sm:$0xff]  ;;  %v4927_v43 = vld [vmem:[#allocation4 + $0x4e8] sm:$0xff]  ;;  %v4918_v4 = vld [vmem:[#allocation4 + $0x4a0] sm:$0xff] }
  0x77   : >> { %2835 = vmatpush.bf16.msra.mxu2 %v4850_v53  ;;  %v495_v53 = vrot.slane %v493_v45, 6  ;;  %v467_v56 = vrot.slane %v466_v48, 4  ;;  %v462_v60 = vsel %vm5418_vm9, %v457_v49, %v461_v40  ;;  %v4903_v40 = vld [vmem:[#allocation4 + $0x428] sm:$0xff]  ;;  %v4926_v44 = vld [vmem:[#allocation4 + $0x4e0] sm:$0xff]  ;;  %v4901_v45 = vld [vmem:[#allocation4 + $0x418] sm:$0xff] }
  0x78   : >> { %2849 = vmatpush.bf16.msra.mxu3 %v4858_v63  ;;  %2808 = vmatmul.bf16.vlgmr.msra.gmra.mxu0 %v3776_v9  ;;  %v491_v63 = vrot.slane %v489_v52, 4  ;;  %470 = vst [vmem:[#allocation2 + $0x40] sm:$0xf] %v462_v60  ;;  %v5559_v48 = vld [vmem:[%s5389_s10 + $0x30] sm:$0xf] }
  0x79   : >> { %2856 = vmatpush.bf16.msrb.mxu0 %v4873_v57  ;;  %2822 = vmatmul.bf16.vlgmr.msra.gmra.mxu1 %v3780_v14  ;;  %v476_v57 = vrot.slane %v5533_v2, 5  ;;  %471 = vst [vmem:[#allocation2 + $0xa4] sm:$0x7] %v467_v56  ;;  %v4866_v14 = vld [vmem:[#allocation4 + $0x300] sm:$0xff]  ;;  %v5562_v49 = vld [vmem:[%s5389_s10 + $0x34] sm:$0xf] }
  0x7a   : >> { %2870 = vmatpush.bf16.msrb.mxu1 %v4881_v58  ;;  %2836 = vmatmul.bf16.vlgmr.msra.gmra.mxu2 %v3784_v10  ;;  %v504_v58 = vrot.slane %v5533_v2, 6  ;;  %v496_v2 = vsel %vm5424_vm10, %v491_v63, %v495_v53  ;;  %v3706_v10 = vrot.slane %v5530_v61, 10  ;;  %v4890_v61 = vld [vmem:[#allocation4 + $0x3c0] sm:$0xff]  ;;  %520 = vst [vmem:[#allocation2 + $0x50] sm:$0xf] %v5559_v48  ;;  %v526_v53 = vshll.u32 %v5559_v48, 16 }
  0x7b   : >> { %2884 = vmatpush.bf16.msrb.mxu2 %v4889_v62  ;;  %2850 = vmatmul.bf16.vlgmr.msra.gmra.mxu3 %v3788_v15  ;;  %v490_v62 = vsel %vm5424_vm10, %v486_v51, %v489_v52  ;;  %v478_v6 = vrot.slane %v476_v57, 4  ;;  %v477_v9 = vsel %vm5398_vm4, %v3705_v1, %v476_v57  ;;  %v4874_v15 = vld [vmem:[#allocation4 + $0x340] sm:$0xff]  ;;  %500 = vst [vmem:[#allocation2 + $0xac] sm:$0x7] %v496_v2  ;;  %v4925_v51 = vld [vmem:[#allocation4 + $0x4d8] sm:$0xff]  ;;  %v523_v52 = vshrl.u32 %v5559_v48, 16 }
  0x7c   : >> { %2898 = vmatpush.bf16.msrb.mxu3 %v4897_v11  ;;  %v506_v11 = vrot.slane %v504_v58, 4  ;;  %499 = vst [vmem:[#allocation2 + $0x48] sm:$0xf] %v490_v62  ;;  %v4900_v56 = vld [vmem:[#allocation4 + $0x410] sm:$0xff]  ;;  %v536_v57 = vshrl.u32 %v5562_v49, 16  ;;  %v549_v60 = vrot.slane %v5562_v49, 5 }
  0x7d   : >> { %2857 = vmatpush.bf16.msrb.mxu0 %v4872_v16  ;;  %v4882_v16 = vld [vmem:[#allocation4 + $0x380] sm:$0xff]  ;;  %481 = vst [vmem:[#allocation2 + $0x44] sm:$0xf] %v477_v9  ;;  %v525_v62 = vrot.slane %v523_v52, 4  ;;  %v528_v63 = vrot.slane %v526_v53, 5  ;;  %v3712_v1 = vrot.slane %v5559_v48, 9 }
  0x7e   : >> { %2871 = vmatpush.bf16.msrb.mxu1 %v4880_v17  ;;  %v507_v17 = vrot.slane %v3704_v42, 6  ;;  %482 = vst [vmem:[#allocation2 + $0xa8] sm:$0x7] %v478_v6  ;;  %v4919_v42 = vld [vmem:[#allocation4 + $0x4a8] sm:$0xff]  ;;  %v5573_v6 = vld [vmem:[%s5389_s10 + $0x38] sm:$0x1] }
  0x7f   : >> { %2885 = vmatpush.bf16.msrb.mxu2 %v4888_v18  ;;  %v4905_v18 = vld [vmem:[#allocation4 + $0x438] sm:$0xff]  ;;  %521 = vst [vmem:[#allocation2 + $0xb4] sm:$0x7] %v5562_v49  ;;  %v4924_v2 = vld [vmem:[#allocation4 + $0x4d0] sm:$0xff]  ;;  %v551_v9 = vrot.slane %v549_v60, 4 }
  0x80   : >> { %2899 = vmatpush.bf16.msrb.mxu3 %v4896_v19  ;;  %v4913_v19 = vld [vmem:[#allocation4 + $0x478] sm:$0xff]  ;;  %v3807_v34 = vld [vmem:[#allocation2 + $0x40] sm:$0xf] }
  0x81   : >> { %2858 = vmatpush.bf16.msrb.mxu0 %v4871_v21  ;;  %v3791_v21 = vld [vmem:[#allocation2 + $0x30] sm:$0xf]  ;;  %555 = vst [vmem:[#allocation2 + $0xbc] sm:$0x7] %v551_v9  ;;  %v4941_v9 = vld [vmem:[#allocation4 + $0x558] sm:$0xff] }
  0x82   : >> { %2872 = vmatpush.bf16.msrb.mxu1 %v4879_v24  ;;  %v4763_v24 = vld [vmem:[#allocation2 + $0x90] sm:$0x70] }
  0x83   : >> { %2886 = vmatpush.bf16.msrb.mxu2 %v4887_v25  ;;  %v505_v25 = vsel %vm5432_vm11, %v3706_v10, %v504_v58  ;;  %v3792_v35 = vor.u32 %v4763_v24, %v3791_v21  ;;  %v4908_v58 = vld [vmem:[#allocation4 + $0x450] sm:$0xff]  ;;  %v529_v10 = vor.u32 %v528_v63, %v525_v62  ;;  %v4907_v21 = vld [vmem:[#allocation4 + $0x448] sm:$0xff]  ;;  %v4934_v62 = vld [vmem:[#allocation4 + $0x520] sm:$0xff] }
  0x84   : >> { %2900 = vmatpush.bf16.msrb.mxu3 %v4895_v28  ;;  %v4921_v28 = vld [vmem:[#allocation4 + $0x4b8] sm:$0xff]  ;;  %511 = vst [vmem:[#allocation2 + $0x4c] sm:$0xf] %v505_v25  ;;  %v4915_v24 = vld [vmem:[#allocation4 + $0x488] sm:$0xff]  ;;  %v4942_v63 = vld [vmem:[#allocation4 + $0x560] sm:$0xff] }
  0x85   : >> { %2859 = vmatpush.bf16.msrb.mxu0 %v4870_v29  ;;  %v3799_v29 = vld [vmem:[#allocation2 + $0x38] sm:$0xf]  ;;  %v530_v25 = vrot.slane %v529_v10, 4 }
  0x86   : >> { %2873 = vmatpush.bf16.msrb.mxu1 %v4878_v30  ;;  %v4764_v30 = vld [vmem:[#allocation2 + $0x98] sm:$0x70] }
  0x87   : >> { %2887 = vmatpush.bf16.msrb.mxu2 %v4886_v31  ;;  %v508_v31 = vsel %vm5432_vm11, %v506_v11, %v507_v17  ;;  %v3800_v36 = vor.u32 %v4764_v30, %v3799_v29  ;;  %v557_v11 = vrot.slane %v526_v53, 6  ;;  %v4898_v29 = vld [vmem:[#allocation4 + $0x400] sm:$0xff]  ;;  %v4944_v53 = vld [vmem:[#allocation4 + $0x570] sm:$0xff]  ;;  %v4949_v10 = vld [vmem:[#allocation4 + $0x598] sm:$0xff] }
  0x88   : >> { %2901 = vmatpush.bf16.msrb.mxu3 %v4894_v22  ;;  %v4751_v22 = vld [vmem:[#allocation2 + $0x34] sm:$0xf]  ;;  %512 = vst [vmem:[#allocation2 + $0xb0] sm:$0x7] %v508_v31 }
  0x89   : >> { %2860 = vmatpush.bf16.msrb.mxu0 %v4869_v32  ;;  %v3793_v32 = vld [vmem:[#allocation2 + $0x94] sm:$0x70] }
  0x8a   : >> { %2874 = vmatpush.bf16.msrb.mxu1 %v4877_v37  ;;  %v4929_v37 = vld [vmem:[#allocation4 + $0x4f8] sm:$0xff] }
  0x8b   : >> { %2888 = vmatpush.bf16.msrb.mxu2 %v4885_v8  ;;  %v3796_v8 = vor.u32 %v4751_v22, %v3793_v32  ;;  %v4906_v32 = vld [vmem:[#allocation4 + $0x440] sm:$0xff] }
  0x8c   : >> { %2902 = vmatpush.bf16.msrb.mxu3 %v4893_v27  ;;  %v4928_v27 = vld [vmem:[#allocation4 + $0x4f0] sm:$0xff] }
  0x8d   : >> { %2861 = vmatpush.bf16.msrb.mxu0 %v4868_v12  ;;  %v4902_v12 = vld [vmem:[#allocation4 + $0x420] sm:$0xff] }
  0x8e   : >> { %2875 = vmatpush.bf16.msrb.mxu1 %v4876_v46  ;;  %v4909_v46 = vld [vmem:[#allocation4 + $0x458] sm:$0xff] }
  0x8f   : >> { %2889 = vmatpush.bf16.msrb.mxu2 %v4884_v47  ;;  %v4917_v47 = vld [vmem:[#allocation4 + $0x498] sm:$0xff] }
  0x90   : >> { %2903 = vmatpush.bf16.msrb.mxu3 %v4892_v54  ;;  %v532_v54 = vshll.u32 %v5562_v49, 16 }
  0x91   : >> { %2862 = vmatpush.bf16.msrb.mxu0 %v4867_v59  ;;  %v4916_v59 = vld [vmem:[#allocation4 + $0x490] sm:$0xff] }
  0x92   : >> { %2876 = vmatpush.bf16.msrb.mxu1 %v4875_v3  ;;  %v534_v3 = vrot.slane %v532_v54, 5 }
  0x93   : >> { %2890 = vmatpush.bf16.msrb.mxu2 %v4883_v5  ;;  %v538_v5 = vrot.slane %v536_v57, 4 }
  0x94   : >> { %2904 = vmatpush.bf16.msrb.mxu3 %v4891_v7  ;;  %v556_v7 = vrot.slane %v523_v52, 5  ;;  %v4936_v52 = vld [vmem:[#allocation4 + $0x530] sm:$0xff] }
  0x95   : >> { %2863 = vmatpush.bf16.msrb.mxu0 %v4866_v14  ;;  %v560_v14 = vrot.slane %v536_v57, 5  ;;  %v539_v17 = vor.u32 %v538_v5, %v534_v3  ;;  %v4935_v57 = vld [vmem:[#allocation4 + $0x528] sm:$0xff]  ;;  %v4958_v5 = vld [vmem:[#allocation4 + $0x5e0] sm:$0xff] }
  0x96   : >> { %2877 = vmatpush.bf16.msrb.mxu1 %v4874_v15  ;;  %v4899_v15 = vld [vmem:[#allocation4 + $0x408] sm:$0xff] }
  0x97   : >> { %2891 = vmatpush.bf16.msrb.mxu2 %v4882_v16  ;;  %v550_v16 = vsel %vm5398_vm4, %v3712_v1, %v549_v60  ;;  %v540_v30 = vrot.slane %v539_v17, 4  ;;  %v4959_v60 = vld [vmem:[#allocation4 + $0x5e8] sm:$0xff]  ;;  %v4950_v1 = vld [vmem:[#allocation4 + $0x5a0] sm:$0xff]  ;;  %v4932_v17 = vld [vmem:[#allocation4 + $0x510] sm:$0xff] }
  0x98   : >> { %2905 = vmatpush.bf16.msrb.mxu3 %v4890_v61  ;;  %2864 = vmatmul.bf16.vlgmr.msrb.gmra.mxu0 %v3792_v35  ;;  %554 = vst [vmem:[#allocation2 + $0x58] sm:$0xf] %v550_v16  ;;  %v4923_v61 = vld [vmem:[#allocation4 + $0x4c8] sm:$0xff]  ;;  %v535_v35 = vsel %vm5418_vm9, %v530_v25, %v534_v3 }
  0x99   : >> { %2912 = vmatpush.bf16.msra.mxu0 %v4905_v18  ;;  %2878 = vmatmul.bf16.vlgmr.msrb.gmra.mxu1 %v3796_v8  ;;  %v561_v18 = vrot.slane %v532_v54, 6  ;;  %v4945_v8 = vld [vmem:[#allocation4 + $0x578] sm:$0xff]  ;;  %543 = vst [vmem:[#allocation2 + $0x54] sm:$0xf] %v535_v35  ;;  %v4952_v54 = vld [vmem:[#allocation4 + $0x5b0] sm:$0xff] }
  0x9a   : >> { %2926 = vmatpush.bf16.msra.mxu1 %v4913_v19  ;;  %2892 = vmatmul.bf16.vlgmr.msrb.gmra.mxu2 %v3800_v36  ;;  %v566_v19 = vshll.u32 %v5573_v6, 16  ;;  %544 = vst [vmem:[#allocation2 + $0xb8] sm:$0x7] %v540_v30 }
  0x9b   : >> { %2940 = vmatpush.bf16.msra.mxu2 %v4921_v28  ;;  %2906 = vmatmul.bf16.vlgmr.msrb.gmra.mxu3 %v3804_v38  ;;  %v558_v28 = vor.u32 %v557_v11, %v556_v7  ;;  %v562_v31 = vor.u32 %v561_v18, %v560_v14  ;;  %v4765_v38 = vld [vmem:[#allocation2 + $0xa0] sm:$0x70]  ;;  %v4933_v7 = vld [vmem:[#allocation4 + $0x518] sm:$0xff]  ;;  %v577_v18 = vrot.slane %v5562_v49, 6 }
  0x9c   : >> { %2954 = vmatpush.bf16.msra.mxu3 %v4929_v37  ;;  %v568_v22 = vrot.slane %v566_v19, 6  ;;  %v4937_v37 = vld [vmem:[#allocation4 + $0x538] sm:$0xff]  ;;  %v4940_v19 = vld [vmem:[#allocation4 + $0x550] sm:$0xff] }
  0x9d   : >> { %2913 = vmatpush.bf16.msra.mxu0 %v4904_v39  ;;  %v559_v36 = vrot.slane %v558_v28, 4  ;;  %v564_v39 = vrot.slane %v562_v31, 4  ;;  %v579_v25 = vrot.slane %v577_v18, 4  ;;  %v580_v28 = vrot.slane %v5573_v6, 6  ;;  %v4955_v6 = vld [vmem:[#allocation4 + $0x5c8] sm:$0xff] }
  0x9e   : >> { %2927 = vmatpush.bf16.msra.mxu1 %v4912_v13  ;;  %v4953_v13 = vld [vmem:[#allocation4 + $0x5b8] sm:$0xff] }
  0x9f   : >> { %2941 = vmatpush.bf16.msra.mxu2 %v4920_v20  ;;  %v4922_v20 = vld [vmem:[#allocation4 + $0x4c0] sm:$0xff]  ;;  %v581_v49 = vsel %vm5432_vm11, %v579_v25, %v580_v28  ;;  %v5042_v28 = vld [vmem:[#allocation4 + $0xb0] sm:$0xff] }
  0xa0   : >> { %2955 = vmatpush.bf16.msra.mxu3 %v4928_v27  ;;  %v3815_v27 = vld [vmem:[#allocation2 + $0x48] sm:$0xf]  ;;  %585 = vst [vmem:[#allocation2 + $0xc4] sm:$0x7] %v581_v49 }
  0xa1   : >> { %2914 = vmatpush.bf16.msra.mxu0 %v4903_v40  ;;  %v4766_v40 = vld [vmem:[#allocation2 + $0xa8] sm:$0x70] }
  0xa2   : >> { %2928 = vmatpush.bf16.msra.mxu1 %v4911_v41  ;;  %v563_v41 = vsel %vm5424_vm10, %v559_v36, %v562_v31  ;;  %v5043_v49 = vld [vmem:[#allocation4 + $0x28] sm:$0xff] }
  0xa3   : >> { %2942 = vmatpush.bf16.msra.mxu2 %v4919_v42  ;;  %v4753_v42 = vld [vmem:[#allocation2 + $0x44] sm:$0xf]  ;;  %572 = vst [vmem:[#allocation2 + $0x5c] sm:$0xf] %v563_v41  ;;  %v5594_v41 = vld [vmem:[%s5389_s10 + $0xc] sm:$0xf] }
  0xa4   : >> { %2956 = vmatpush.bf16.msra.mxu3 %v4927_v43  ;;  %v3809_v43 = vld [vmem:[#allocation2 + $0xa4] sm:$0x70]  ;;  %590 = vst [vmem:[#allocation2 + $0xc8] sm:$0xf] %v5594_v41 }
  0xa5   : >> { %2915 = vmatpush.bf16.msra.mxu0 %v4902_v12  ;;  %v569_v12 = vsel %vm5424_vm10, %v564_v39, %v568_v22  ;;  %v4939_v22 = vld [vmem:[#allocation4 + $0x548] sm:$0xff]  ;;  %v4767_v39 = vld [vmem:[#allocation2 + $0xb0] sm:$0x70] }
  0xa6   : >> { %2929 = vmatpush.bf16.msra.mxu1 %v4910_v26  ;;  %v4754_v26 = vld [vmem:[#allocation2 + $0x4c] sm:$0xf]  ;;  %573 = vst [vmem:[#allocation2 + $0xc0] sm:$0x7] %v569_v12 }
  0xa7   : >> { %2943 = vmatpush.bf16.msra.mxu2 %v4918_v4  ;;  %v3817_v4 = vld [vmem:[#allocation2 + $0xac] sm:$0x70] }
  0xa8   : >> { %2957 = vmatpush.bf16.msra.mxu3 %v4926_v44  ;;  %v3808_v44 = vor.u32 %v4765_v38, %v3807_v34  ;;  %v4930_v34 = vld [vmem:[#allocation4 + $0x500] sm:$0xff]  ;;  %v3823_v38 = vld [vmem:[#allocation2 + $0x50] sm:$0xf] }
  0xa9   : >> { %2916 = vmatpush.bf16.msra.mxu0 %v4901_v45  ;;  %v3816_v45 = vor.u32 %v4766_v40, %v3815_v27  ;;  %v4768_v27 = vld [vmem:[#allocation2 + $0xb8] sm:$0x70]  ;;  %v4755_v40 = vld [vmem:[#allocation2 + $0x54] sm:$0xf] }
  0xaa   : >> { %2930 = vmatpush.bf16.msra.mxu1 %v4909_v46  ;;  %v4961_v46 = vld [vmem:[#allocation4 + $0x5f8] sm:$0xff] }
  0xab   : >> { %2944 = vmatpush.bf16.msra.mxu2 %v4917_v47  ;;  %v3812_v47 = vor.u32 %v4753_v42, %v3809_v43  ;;  %v4954_v42 = vld [vmem:[#allocation4 + $0x5c0] sm:$0xff]  ;;  %v3825_v43 = vld [vmem:[#allocation2 + $0xb4] sm:$0x70] }
  0xac   : >> { %2958 = vmatpush.bf16.msra.mxu3 %v4925_v51  ;;  %v3820_v51 = vor.u32 %v4754_v26, %v3817_v4  ;;  %v5597_v26 = vld [vmem:[%s5389_s10 + $0x10] sm:$0xf]  ;;  %v593_v4 = vshrl.u32 %v5594_v41, 16 }
  0xad   : >> { %2917 = vmatpush.bf16.msra.mxu0 %v4900_v56  ;;  %v4960_v56 = vld [vmem:[#allocation4 + $0x5f0] sm:$0xff]  ;;  %591 = vst [vmem:[#allocation2 + $0x12c] sm:$0x7] %v5597_v26 }
  0xae   : >> { %2931 = vmatpush.bf16.msra.mxu1 %v4908_v58  ;;  %v4943_v58 = vld [vmem:[#allocation4 + $0x568] sm:$0xff] }
  0xaf   : >> { %2945 = vmatpush.bf16.msra.mxu2 %v4916_v59  ;;  %v4951_v59 = vld [vmem:[#allocation4 + $0x5a8] sm:$0xff] }
  0xb0   : >> { %2959 = vmatpush.bf16.msra.mxu3 %v4924_v2 }
  0xb1   : >> { %2918 = vmatpush.bf16.msra.mxu0 %v4899_v15  ;;  %v4957_v15 = vld [vmem:[#allocation4 + $0x5d8] sm:$0xff] }
  0xb2   : >> { %2932 = vmatpush.bf16.msra.mxu1 %v4907_v21  ;;  %v4948_v21 = vld [vmem:[#allocation4 + $0x590] sm:$0xff] }
  0xb3   : >> { %2946 = vmatpush.bf16.msra.mxu2 %v4915_v24  ;;  %v3713_v24 = vrot.slane %v5559_v48, 10 }
  0xb4   : >> { %2960 = vmatpush.bf16.msra.mxu3 %v4923_v61  ;;  %v4956_v61 = vld [vmem:[#allocation4 + $0x5d0] sm:$0xff] }
  0xb5   : >> { %2919 = vmatpush.bf16.msra.mxu0 %v4898_v29  ;;  %v2697_v3 = vpop.f32.mrf.mxu0  ;;  %v4931_v29 = vld [vmem:[#allocation4 + $0x508] sm:$0xff]  ;;  %v578_v31 = vsel %vm5432_vm11, %v3713_v24, %v577_v18  ;;  %v5041_v24 = vld [vmem:[#allocation4 + $0x70] sm:$0xff] }
  0xb6   : >> { %2933 = vmatpush.bf16.msra.mxu1 %v4906_v32  ;;  %v2711_v2 = vpop.f32.mrf.mxu1  ;;  %v4947_v32 = vld [vmem:[#allocation4 + $0x588] sm:$0xff]  ;;  %584 = vst [vmem:[#allocation2 + $0x60] sm:$0xf] %v578_v31 }
  0xb7   : >> { %2947 = vmatpush.bf16.msra.mxu2 %v4914_v33  ;;  %v2712_v11 = vadd.f32 %v2711_v2, %v2697_v3  ;;  %v4967_v18 = vld [vmem:[#allocation4 + $0x628] sm:$0xff] }
  0xb8   : >> { %2961 = vmatpush.bf16.msra.mxu3 %v4922_v20  ;;  %2920 = vmatmul.bf16.vlgmr.msra.gmra.mxu0 %v3808_v44  ;;  %v4969_v20 = vld [vmem:[#allocation4 + $0x638] sm:$0xff]  ;;  %v596_v44 = vshll.u32 %v5594_v41, 16 }
  0xb9   : >> { %2968 = vmatpush.bf16.msrb.mxu0 %v4937_v37  ;;  %2934 = vmatmul.bf16.vlgmr.msra.gmra.mxu1 %v3812_v47  ;;  %v4938_v37 = vld [vmem:[#allocation4 + $0x540] sm:$0xff]  ;;  %v602_v47 = vshll.u32 %v5597_v26, 16 }
  0xba   : >> { %2982 = vmatpush.bf16.msrb.mxu1 %v4945_v8  ;;  %2948 = vmatmul.bf16.vlgmr.msra.gmra.mxu2 %v3816_v45  ;;  %v4946_v8 = vld [vmem:[#allocation4 + $0x580] sm:$0xff]  ;;  %v4756_v45 = vld [vmem:[#allocation2 + $0x5c] sm:$0xf] }
  0xbb   : >> { %2996 = vmatpush.bf16.msrb.mxu2 %v4953_v13  ;;  %2962 = vmatmul.bf16.vlgmr.msra.gmra.mxu3 %v3820_v51  ;;  %v3831_v13 = vld [vmem:[#allocation2 + $0x58] sm:$0xf]  ;;  %v606_v51 = vshrl.u32 %v5597_v26, 16 }
  0xbc   : >> { %3010 = vmatpush.bf16.msrb.mxu3 %v4961_v46 }
  0xbd   : >> { %2969 = vmatpush.bf16.msrb.mxu0 %v4936_v52  ;;  %v2725_v14 = vpop.f32.mrf.mxu2  ;;  %v2699_v30 = vpop.f32.mrf.mxu0  ;;  %v3833_v52 = vld [vmem:[#allocation2 + $0xbc] sm:$0x70] }
  0xbe   : >> { %2983 = vmatpush.bf16.msrb.mxu1 %v4944_v53  ;;  %v2726_v16 = vadd.f32 %v2725_v14, %v2712_v11  ;;  %v2739_v33 = vpop.f32.mrf.mxu3  ;;  %v2713_v48 = vpop.f32.mrf.mxu1  ;;  %v595_v53 = vrot.slane %v593_v4, 4  ;;  %v3836_v3 = vor.u32 %v4756_v45, %v3833_v52  ;;  %v619_v14 = vrot.slane %v5597_v26, 5 }
  0xbf   : >> { %2997 = vmatpush.bf16.msrb.mxu2 %v4952_v54  ;;  %v2714_v36 = vadd.f32 %v2713_v48, %v2699_v30  ;;  %v598_v54 = vrot.slane %v596_v44, 5  ;;  %v4966_v30 = vld [vmem:[#allocation4 + $0x620] sm:$0xff]  ;;  %v4965_v48 = vld [vmem:[#allocation4 + $0x618] sm:$0xff] }
  0xc0   : >> { %3011 = vmatpush.bf16.msrb.mxu3 %v4960_v56  ;;  %v5591_v35 = vadd.f32 %v2739_v33, %v2726_v16  ;;  %v3824_v56 = vor.u32 %v4767_v39, %v3823_v38  ;;  %v5045_v33 = vld [vmem:[#allocation4 + $0xa8] sm:$0xff]  ;;  %v626_v38 = vrot.slane %v593_v4, 5  ;;  %v627_v39 = vrot.slane %v596_v44, 6 }
  0xc1   : >> { %2970 = vmatpush.bf16.msrb.mxu0 %v4935_v57  ;;  %v3832_v57 = vor.u32 %v4768_v27, %v3831_v13  ;;  %v5048_v13 = vld [vmem:[#allocation4 + $0xa0] sm:$0xff] }
  0xc2   : >> { %2984 = vmatpush.bf16.msrb.mxu1 %v4943_v58  ;;  %v604_v58 = vrot.slane %v602_v47, 5  ;;  %v628_v52 = vor.u32 %v627_v39, %v626_v38  ;;  %v5057_v39 = vld [vmem:[#allocation4 + $0x88] sm:$0xff] }
  0xc3   : >> { %2998 = vmatpush.bf16.msrb.mxu2 %v4951_v59  ;;  %v608_v59 = vrot.slane %v606_v51, 4 }
  0xc4   : >> { %3012 = vmatpush.bf16.msrb.mxu3 %v4959_v60  ;;  %v3828_v60 = vor.u32 %v4755_v40, %v3825_v43  ;;  %v630_v40 = vrot.slane %v606_v51, 5  ;;  %v5050_v51 = vld [vmem:[#allocation4 + $0x58] sm:$0xff] }
  0xc5   : >> { %2971 = vmatpush.bf16.msrb.mxu0 %v4934_v62  ;;  %v2727_v12 = vpop.f32.mrf.mxu2  ;;  %v609_v2 = vor.u32 %v608_v59, %v604_v58 }
  0xc6   : >> { %2985 = vmatpush.bf16.msrb.mxu1 %v4942_v63  ;;  %v2728_v46 = vadd.f32 %v2727_v12, %v2714_v36  ;;  %v2741_v62 = vpop.f32.mrf.mxu3  ;;  %v599_v63 = vor.u32 %v598_v54, %v595_v53  ;;  %v5635_v12 = vld [vmem:[%s5389_s10 + $0x1c] sm:$0xf] }
  0xc7   : >> { %2999 = vmatpush.bf16.msrb.mxu2 %v4950_v1  ;;  %v5037_v1 = vld [vmem:[#allocation4 + $0x38] sm:$0xff]  ;;  %v610_v11 = vrot.slane %v609_v2, 4  ;;  %660 = vst [vmem:[#allocation2 + $0x140] sm:$0x7] %v5635_v12 }
  0xc8   : >> { %3013 = vmatpush.bf16.msrb.mxu3 %v4958_v5  ;;  %v4968_v5 = vld [vmem:[#allocation4 + $0x630] sm:$0xff]  ;;  %v5049_v54 = vld [vmem:[#allocation4 + $0x18] sm:$0xff] }
  0xc9   : >> { %2972 = vmatpush.bf16.msrb.mxu0 %v4933_v7  ;;  %v5613_v7 = vadd.f32 %v2741_v62, %v2728_v46  ;;  %614 = vst [vmem:[#allocation2 + $0x130] sm:$0x7] %v610_v11  ;;  %v4964_v46 = vld [vmem:[#allocation4 + $0x610] sm:$0xff] }
  0xca   : >> { %2986 = vmatpush.bf16.msrb.mxu1 %v4941_v9  ;;  %v5038_v9 = vld [vmem:[#allocation4 + $0x78] sm:$0xff] }
  0xcb   : >> { %3000 = vmatpush.bf16.msrb.mxu2 %v4949_v10  ;;  %v600_v10 = vrot.slane %v599_v63, 4  ;;  %v671_v63 = vshll.u32 %v5635_v12, 16 }
  0xcc   : >> { %3014 = vmatpush.bf16.msrb.mxu3 %v4957_v15  ;;  %v5039_v15 = vld [vmem:[#allocation4 + $0xb8] sm:$0xff] }
  0xcd   : >> { %2973 = vmatpush.bf16.msrb.mxu0 %v4932_v17  ;;  %v605_v16 = vsel %vm5418_vm9, %v600_v10, %v604_v58  ;;  %v3717_v17 = vrot.slane %v5594_v41, 9  ;;  %v673_v11 = vrot.slane %v671_v63, 5 }
  0xce   : >> { %2987 = vmatpush.bf16.msrb.mxu1 %v4940_v19  ;;  %613 = vst [vmem:[#allocation2 + $0xcc] sm:$0xf] %v605_v16  ;;  %v621_v19 = vrot.slane %v619_v14, 4  ;;  %v5053_v16 = vld [vmem:[#allocation4 + $0x50] sm:$0xff] }
  0xcf   : >> { %3001 = vmatpush.bf16.msrb.mxu2 %v4948_v21  ;;  %v5040_v21 = vld [vmem:[#allocation4 + $0x30] sm:$0xff]  ;;  %v620_v25 = vsel %vm5398_vm4, %v3717_v17, %v619_v14  ;;  %v675_v14 = vshrl.u32 %v5635_v12, 16 }
  0xd0   : >> { %3015 = vmatpush.bf16.msrb.mxu3 %v4956_v61  ;;  %624 = vst [vmem:[#allocation2 + $0xd0] sm:$0xf] %v620_v25 }
  0xd1   : >> { %2974 = vmatpush.bf16.msrb.mxu0 %v4931_v29  ;;  %625 = vst [vmem:[#allocation2 + $0x134] sm:$0x7] %v621_v19  ;;  %v677_v25 = vrot.slane %v675_v14, 4 }
  0xd2   : >> { %2988 = vmatpush.bf16.msrb.mxu1 %v4939_v22  ;;  %v5044_v22 = vld [vmem:[#allocation4 + $0x68] sm:$0xff] }
  0xd3   : >> { %3002 = vmatpush.bf16.msrb.mxu2 %v4947_v32 }
  0xd4   : >> { %3016 = vmatpush.bf16.msrb.mxu3 %v4955_v6  ;;  %v5046_v6 = vld [vmem:[#allocation4 + $0x20] sm:$0xff] }
  0xd5   : >> { %2975 = vmatpush.bf16.msrb.mxu0 %v4930_v34  ;;  %v2753_v61 = vpop.f32.mrf.mxu0  ;;  %v5047_v34 = vld [vmem:[#allocation4 + $0x60] sm:$0xff] }
  0xd6   : >> { %2989 = vmatpush.bf16.msrb.mxu1 %v4938_v37  ;;  %v2754_v29 = vadd.f32 %v2753_v61, %v5591_v35  ;;  %v2767_v31 = vpop.f32.mrf.mxu1  ;;  %v5623_v35 = vld [vmem:[%s5389_s10 + $0x18] sm:$0xf] }
  0xd7   : >> { %3003 = vmatpush.bf16.msrb.mxu2 %v4946_v8  ;;  %v3716_v8 = vld [vmem:[%s5389_s10 + $0x14] sm:$0x1]  ;;  %659 = vst [vmem:[#allocation2 + $0xdc] sm:$0xf] %v5623_v35  ;;  %v662_v53 = vshrl.u32 %v5623_v35, 16  ;;  %v665_v58 = vshll.u32 %v5623_v35, 16 }
  0xd8   : >> { %3017 = vmatpush.bf16.msrb.mxu3 %v4954_v42  ;;  %2976 = vmatmul.bf16.vlgmr.msrb.gmra.mxu0 %v3824_v56  ;;  %v2768_v32 = vadd.f32 %v2767_v31, %v2754_v29  ;;  %v631_v42 = vrot.slane %v602_v47, 6  ;;  %v636_v43 = vshll.u32 %v3716_v8, 16  ;;  %v650_v2 = vrot.slane %v3716_v8, 6  ;;  %v3839_v31 = vld [vmem:[#allocation2 + $0x60] sm:$0xf] }
  0xd9   : >> { %3024 = vmatpush.bf16.msra.mxu0 %v4969_v20  ;;  %2990 = vmatmul.bf16.vlgmr.msrb.gmra.mxu1 %v3828_v60  ;;  %v629_v60 = vrot.slane %v628_v52, 4  ;;  %v664_v62 = vrot.slane %v662_v53, 4  ;;  %v667_v10 = vrot.slane %v665_v58, 5  ;;  %v5062_v52 = vld [vmem:[#allocation4 + $0x178] sm:$0xff] }
  0xda   : >> { %3190 = vmatpush.bf16.msra.mxu1 %v5037_v1  ;;  %3004 = vmatmul.bf16.vlgmr.msrb.gmra.mxu2 %v3832_v57  ;;  %v632_v47 = vor.u32 %v631_v42, %v630_v40  ;;  %v638_v56 = vrot.slane %v636_v43, 6  ;;  %v647_v57 = vrot.slane %v5597_v26, 6  ;;  %v5051_v1 = vld [vmem:[#allocation4 + $0x98] sm:$0xff]  ;;  %v5058_v40 = vld [vmem:[#allocation4] sm:$0xff] }
  0xdb   : >> { %3204 = vmatpush.bf16.msra.mxu2 %v5038_v9  ;;  %3018 = vmatmul.bf16.vlgmr.msrb.gmra.mxu3 %v3836_v3  ;;  %v4963_v9 = vld [vmem:[#allocation4 + $0x608] sm:$0xff]  ;;  %v5059_v42 = vld [vmem:[#allocation4 + $0x40] sm:$0xff] }
  0xdc   : >> { %3218 = vmatpush.bf16.msra.mxu3 %v5039_v15  ;;  %v634_v3 = vrot.slane %v632_v47, 4  ;;  %v633_v26 = vsel %vm5424_vm10, %v629_v60, %v632_v47  ;;  %v5052_v15 = vld [vmem:[#allocation4 + $0x10] sm:$0xff]  ;;  %v5064_v47 = vld [vmem:[#allocation4 + $0x1b8] sm:$0xff] }
  0xdd   : >> { %3025 = vmatpush.bf16.msra.mxu0 %v4968_v5  ;;  %v2781_v36 = vpop.f32.mrf.mxu2  ;;  %v2755_v20 = vpop.f32.mrf.mxu0  ;;  %v3718_v5 = vrot.slane %v5594_v41, 10  ;;  %642 = vst [vmem:[#allocation2 + $0xd4] sm:$0xf] %v633_v26  ;;  %v5068_v60 = vld [vmem:[#allocation4 + $0x1b0] sm:$0xff] }
  0xde   : >> { %3191 = vmatpush.bf16.msra.mxu1 %v5040_v21  ;;  %v2782_v37 = vadd.f32 %v2781_v36, %v2768_v32  ;;  %v2795_v27 = vpop.f32.mrf.mxu3  ;;  %v2756_v45 = vadd.f32 %v2755_v20, %v5613_v7  ;;  %v2769_v44 = vpop.f32.mrf.mxu1  ;;  %v649_v7 = vrot.slane %v647_v57, 4  ;;  %v639_v17 = vsel %vm5424_vm10, %v634_v3, %v638_v56  ;;  %v5055_v32 = vld [vmem:[#allocation4 + $0x8] sm:$0xff]  ;;  %v4651_v20 = vld [vmem:[#allocation2 + $0xd0] sm:$0xf] }
  0xdf   : >> { %3205 = vmatpush.bf16.msra.mxu2 %v5041_v24  ;;  %643 = vst [vmem:[#allocation2 + $0x138] sm:$0x7] %v639_v17  ;;  %v668_v24 = vor.u32 %v667_v10, %v664_v62  ;;  %v4643_v36 = vld [vmem:[#allocation2 + $0xc8] sm:$0xf]  ;;  %v5065_v56 = vld [vmem:[#allocation4 + $0xf0] sm:$0xff]  ;;  %v5073_v10 = vld [vmem:[#allocation4 + $0xe0] sm:$0xff] }
  0xe0   : >> { %3219 = vmatpush.bf16.msra.mxu3 %v5042_v28  ;;  %v5638_v4 = vadd.f32 %v2795_v27, %v2782_v37  ;;  %v2770_v59 = vadd.f32 %v2769_v44, %v2756_v45  ;;  %v651_v19 = vsel %vm5432_vm11, %v649_v7, %v650_v2  ;;  %v5054_v28 = vld [vmem:[#allocation4 + $0x90] sm:$0xff]  ;;  %v4982_v37 = vld [vmem:[#allocation2 + $0x128] sm:$0x70]  ;;  %v5061_v44 = vld [vmem:[#allocation4 + $0x138] sm:$0xff] }
  0xe1   : >> { %3026 = vmatpush.bf16.msra.mxu0 %v4967_v18  ;;  %v648_v18 = vsel %vm5432_vm11, %v3718_v5, %v647_v57  ;;  %655 = vst [vmem:[#allocation2 + $0x13c] sm:$0x7] %v651_v19  ;;  %v4983_v27 = vld [vmem:[#allocation2 + $0x130] sm:$0x70]  ;;  %v4644_v45 = vor.u32 %v4982_v37, %v4643_v36  ;;  %v5070_v3 = vld [vmem:[#allocation4 + $0x128] sm:$0xff] }
  0xe2   : >> { %3192 = vmatpush.bf16.msra.mxu1 %v5043_v49  ;;  %654 = vst [vmem:[#allocation2 + $0xd8] sm:$0xf] %v648_v18  ;;  %v669_v49 = vrot.slane %v668_v24, 4  ;;  %v5066_v57 = vld [vmem:[#allocation4 + $0x130] sm:$0xff]  ;;  %v5071_v2 = vld [vmem:[#allocation4 + $0x168] sm:$0xff]  ;;  %v696_v24 = vrot.slane %v665_v58, 6 }
  0xe3   : >> { %3206 = vmatpush.bf16.msra.mxu2 %v5044_v22  ;;  %v678_v22 = vor.u32 %v677_v25, %v673_v11  ;;  %v699_v25 = vrot.slane %v675_v14, 5  ;;  %v3722_v58 = vrot.slane %v5623_v35, 9  ;;  %v3723_v14 = vrot.slane %v5623_v35, 10 }
  0xe4   : >> { %3220 = vmatpush.bf16.msra.mxu3 %v5045_v33  ;;  %v5056_v33 = vld [vmem:[#allocation4 + $0x48] sm:$0xff]  ;;  %v674_v8 = vsel %vm5418_vm9, %v669_v49, %v673_v11  ;;  %v5074_v11 = vld [vmem:[#allocation4 + $0x120] sm:$0xff] }
  0xe5   : >> { %3027 = vmatpush.bf16.msra.mxu0 %v4966_v30  ;;  %v2783_v41 = vpop.f32.mrf.mxu2  ;;  %v4962_v30 = vld [vmem:[#allocation4 + $0x600] sm:$0xff]  ;;  %v679_v38 = vrot.slane %v678_v22, 4  ;;  %682 = vst [vmem:[#allocation2 + $0xe0] sm:$0xf] %v674_v8  ;;  %v688_v22 = vrot.slane %v5635_v12, 5 }
  0xe6   : >> { %3193 = vmatpush.bf16.msra.mxu1 %v5046_v6  ;;  %v2784_v21 = vadd.f32 %v2783_v41, %v2770_v59  ;;  %v2797_v61 = vpop.f32.mrf.mxu3  ;;  %v4970_v6 = vld [vmem:[#allocation2 + $0xcc] sm:$0xf]  ;;  %v5067_v59 = vld [vmem:[#allocation4 + $0x170] sm:$0xff]  ;;  %v5076_v41 = vld [vmem:[#allocation4 + $0x1a0] sm:$0xff] }
  0xe7   : >> { %3207 = vmatpush.bf16.msra.mxu2 %v5047_v34  ;;  %v4645_v34 = vld [vmem:[#allocation2 + $0x12c] sm:$0x70]  ;;  %683 = vst [vmem:[#allocation2 + $0x144] sm:$0x7] %v679_v38  ;;  %v690_v36 = vrot.slane %v688_v22, 4  ;;  %v689_v38 = vsel %vm5398_vm4, %v3722_v58, %v688_v22 }
  0xe8   : >> { %3221 = vmatpush.bf16.msra.mxu3 %v5048_v13  ;;  %v5664_v29 = vadd.f32 %v2797_v61, %v2784_v21  ;;  %v4648_v43 = vor.u32 %v4970_v6, %v4645_v34  ;;  %v695_v21 = vrot.slane %v662_v53, 5  ;;  %v5078_v61 = vld [vmem:[#allocation4 + $0x118] sm:$0xff]  ;;  %v700_v53 = vrot.slane %v671_v63, 6  ;;  %693 = vst [vmem:[#allocation2 + $0xe4] sm:$0xf] %v689_v38  ;;  %v5100_v22 = vld [vmem:[#allocation4 + $0x2b0] sm:$0xff] }
  0xe9   : >> { %3028 = vmatpush.bf16.msra.mxu0 %v4965_v48  ;;  %v4769_v48 = vld [vmem:[#allocation2 + $0xc0] sm:$0x70]  ;;  %v5080_v34 = vld [vmem:[#allocation4 + $0x198] sm:$0xff]  ;;  %694 = vst [vmem:[#allocation2 + $0x148] sm:$0x7] %v690_v36 }
  0xea   : >> { %3194 = vmatpush.bf16.msra.mxu1 %v5049_v54  ;;  %v3840_v13 = vor.u32 %v4769_v48, %v3839_v31  ;;  %v5063_v54 = vld [vmem:[#allocation4 + $0x80] sm:$0xff]  ;;  %v697_v37 = vor.u32 %v696_v24, %v695_v21  ;;  %v701_v8 = vor.u32 %v700_v53, %v699_v25  ;;  %v5094_v21 = vld [vmem:[#allocation4 + $0x278] sm:$0xff] }
  0xeb   : >> { %3208 = vmatpush.bf16.msra.mxu2 %v5050_v51  ;;  %v4652_v51 = vor.u32 %v4983_v27, %v4651_v20  ;;  %v5095_v25 = vld [vmem:[#allocation4 + $0x180] sm:$0xff] }
  0xec   : >> { %3222 = vmatpush.bf16.msra.mxu3 %v5051_v1  ;;  %v5069_v1 = vld [vmem:[#allocation4 + $0xe8] sm:$0xff]  ;;  %v698_v20 = vrot.slane %v697_v37, 4  ;;  %v703_v27 = vrot.slane %v701_v8, 4 }
  0xed   : >> { %3029 = vmatpush.bf16.msra.mxu0 %v4964_v46  ;;  %v5060_v46 = vld [vmem:[#allocation4 + $0xf8] sm:$0xff] }
  0xee   : >> { %3195 = vmatpush.bf16.msra.mxu1 %v5052_v15  ;;  %v5075_v15 = vld [vmem:[#allocation4 + $0x160] sm:$0xff] }
  0xef   : >> { %3209 = vmatpush.bf16.msra.mxu2 %v5053_v16 }
  0xf0   : >> { %3223 = vmatpush.bf16.msra.mxu3 %v5054_v28  ;;  %v5077_v28 = vld [vmem:[#allocation4 + $0xd8] sm:$0xff] }
  0xf1   : >> { %3030 = vmatpush.bf16.msra.mxu0 %v4963_v9  ;;  %v5072_v9 = vld [vmem:[#allocation4 + $0x1a8] sm:$0xff] }
  0xf2   : >> { %3196 = vmatpush.bf16.msra.mxu1 %v5055_v32  ;;  %v3721_v32 = vld [vmem:[%s5389_s10 + $0x20] sm:$0x1] }
  0xf3   : >> { %3210 = vmatpush.bf16.msra.mxu2 %v5056_v33  ;;  %v5079_v33 = vld [vmem:[#allocation4 + $0x158] sm:$0xff]  ;;  %v719_v6 = vrot.slane %v3721_v32, 6  ;;  %v705_v63 = vshll.u32 %v3721_v32, 16  ;;  %v5101_v32 = vld [vmem:[#allocation4 + $0x1e8] sm:$0xff] }
  0xf4   : >> { %3224 = vmatpush.bf16.msra.mxu3 %v5057_v39  ;;  %v5081_v39 = vld [vmem:[#allocation4 + $0xd0] sm:$0xff] }
  0xf5   : >> { %3031 = vmatpush.bf16.msra.mxu0 %v4962_v30  ;;  %v2809_v62 = vpop.f32.mrf.mxu0 }
  0xf6   : >> { %3197 = vmatpush.bf16.msra.mxu1 %v5058_v40  ;;  %v2810_v5 = vadd.f32 %v2809_v62, %v5638_v4  ;;  %v2823_v7 = vpop.f32.mrf.mxu1  ;;  %v716_v4 = vrot.slane %v5635_v12, 6  ;;  %v5083_v40 = vld [vmem:[#allocation4 + $0x150] sm:$0xff]  ;;  %v5701_v62 = vld [vmem:[%s5389_s10 + $0x28] sm:$0xf] }
  0xf7   : >> { %3211 = vmatpush.bf16.msra.mxu2 %v5059_v42  ;;  %729 = vst [vmem:[#allocation2 + $0x154] sm:$0x7] %v5701_v62  ;;  %v744_v38 = vshrl.u32 %v5701_v62, 16 }
  0xf8   : >> { %3225 = vmatpush.bf16.msra.mxu3 %v5063_v54  ;;  %3032 = vmatmul.bf16.vlgmr.msra.gmra.mxu0 %v3840_v13  ;;  %v2824_v26 = vadd.f32 %v2823_v7, %v2810_v5  ;;  %v718_v48 = vrot.slane %v716_v4, 4  ;;  %v717_v12 = vsel %vm5432_vm11, %v3723_v14, %v716_v4  ;;  %v5082_v13 = vld [vmem:[#allocation4 + $0x110] sm:$0xff]  ;;  %v4661_v5 = vld [vmem:[#allocation2 + $0x13c] sm:$0x70]  ;;  %v5088_v7 = vld [vmem:[#allocation4 + $0x188] sm:$0xff] }
  0xf9   : >> { %3232 = vmatpush.bf16.msrb.mxu0 %v5060_v46  ;;  %3198 = vmatmul.bf16.vlgmr.msra.gmra.mxu1 %v4644_v45  ;;  %v5084_v45 = vld [vmem:[#allocation4 + $0x190] sm:$0xff]  ;;  %723 = vst [vmem:[#allocation2 + $0xec] sm:$0xf] %v717_v12  ;;  %v5093_v4 = vld [vmem:[#allocation4 + $0x238] sm:$0xff]  ;;  %v5106_v12 = vld [vmem:[#allocation4 + $0x220] sm:$0xff] }
  0xfa   : >> { %3246 = vmatpush.bf16.msrb.mxu1 %v5061_v44  ;;  %3212 = vmatmul.bf16.vlgmr.msra.gmra.mxu2 %v4648_v43  ;;  %v720_v35 = vsel %vm5432_vm11, %v718_v48, %v719_v6  ;;  %v707_v43 = vrot.slane %v705_v63, 6  ;;  %v702_v44 = vsel %vm5424_vm10, %v698_v20, %v701_v8  ;;  %v4971_v54 = vld [vmem:[#allocation2 + $0xd4] sm:$0xf]  ;;  %v5103_v48 = vld [vmem:[#allocation4 + $0x268] sm:$0xff]  ;;  %v740_v8 = vshll.u32 %v5701_v62, 16 }
  0xfb   : >> { %3260 = vmatpush.bf16.msrb.mxu2 %v5062_v52  ;;  %3226 = vmatmul.bf16.vlgmr.msra.gmra.mxu3 %v4652_v51  ;;  %724 = vst [vmem:[#allocation2 + $0x150] sm:$0x7] %v720_v35  ;;  %v5104_v6 = vld [vmem:[#allocation4 + $0x2a8] sm:$0xff] }
  0xfc   : >> { %3274 = vmatpush.bf16.msrb.mxu3 %v5064_v47  ;;  %v708_v51 = vsel %vm5424_vm10, %v703_v27, %v707_v43  ;;  %v5696_v47 = vld [vmem:[%s5389_s10 + $0x24] sm:$0xf]  ;;  %711 = vst [vmem:[#allocation2 + $0xe8] sm:$0xf] %v702_v44  ;;  %v746_v43 = vrot.slane %v744_v38, 4  ;;  %v5109_v44 = vld [vmem:[#allocation4 + $0x1d8] sm:$0xff] }
  0xfd   : >> { %3233 = vmatpush.bf16.msrb.mxu0 %v5065_v56  ;;  %v2837_v16 = vpop.f32.mrf.mxu2  ;;  %v2811_v18 = vpop.f32.mrf.mxu0  ;;  %v5085_v56 = vld [vmem:[#allocation4 + $0xc8] sm:$0xff]  ;;  %712 = vst [vmem:[#allocation2 + $0x14c] sm:$0x7] %v708_v51  ;;  %v731_v36 = vshrl.u32 %v5696_v47, 16  ;;  %v734_v37 = vshll.u32 %v5696_v47, 16  ;;  %v5108_v27 = vld [vmem:[#allocation4 + $0x2a0] sm:$0xff] }
  0xfe   : >> { %3247 = vmatpush.bf16.msrb.mxu1 %v5066_v57  ;;  %v2838_v17 = vadd.f32 %v2837_v16, %v2824_v26  ;;  %v2851_v19 = vpop.f32.mrf.mxu3  ;;  %v2812_v30 = vadd.f32 %v2811_v18, %v5664_v29  ;;  %v2825_v49 = vpop.f32.mrf.mxu1  ;;  %v5086_v57 = vld [vmem:[#allocation4 + $0x108] sm:$0xff]  ;;  %728 = vst [vmem:[#allocation2 + $0xf0] sm:$0xf] %v5696_v47  ;;  %v5090_v16 = vld [vmem:[#allocation4 + $0x100] sm:$0xff]  ;;  %v5092_v18 = vld [vmem:[#allocation4 + $0x1f8] sm:$0xff] }
  0xff   : >> { %3261 = vmatpush.bf16.msrb.mxu2 %v5067_v59  ;;  %v764_v35 = vrot.slane %v731_v36, 5  ;;  %v765_v20 = vrot.slane %v734_v37, 6 }
 0x100   : >> { %3275 = vmatpush.bf16.msrb.mxu3 %v5068_v60  ;;  %v5677_v31 = vadd.f32 %v2851_v19, %v2838_v17  ;;  %v2826_v29 = vadd.f32 %v2825_v49, %v2812_v30  ;;  %v4653_v60 = vld [vmem:[#allocation2 + $0x134] sm:$0x70]  ;;  %v5091_v17 = vld [vmem:[#allocation4 + $0x140] sm:$0xff]  ;;  %v5098_v30 = vld [vmem:[#allocation4 + $0x230] sm:$0xff] }
 0x101   : >> { %3234 = vmatpush.bf16.msrb.mxu0 %v5069_v1  ;;  %v5087_v1 = vld [vmem:[#allocation4 + $0x148] sm:$0xff]  ;;  %v4656_v26 = vor.u32 %v4971_v54, %v4653_v60  ;;  %v5099_v49 = vld [vmem:[#allocation4 + $0x270] sm:$0xff] }
 0x102   : >> { %3248 = vmatpush.bf16.msrb.mxu1 %v5070_v3  ;;  %v4972_v3 = vld [vmem:[#allocation2 + $0xdc] sm:$0xf] }
 0x103   : >> { %3262 = vmatpush.bf16.msrb.mxu2 %v5071_v2  ;;  %v4659_v2 = vld [vmem:[#allocation2 + $0xd8] sm:$0xf] }
 0x104   : >> { %3276 = vmatpush.bf16.msrb.mxu3 %v5072_v9  ;;  %v4984_v9 = vld [vmem:[#allocation2 + $0x138] sm:$0x70] }
 0x105   : >> { %3235 = vmatpush.bf16.msrb.mxu0 %v5073_v10  ;;  %v2839_v42 = vpop.f32.mrf.mxu2  ;;  %v4667_v10 = vld [vmem:[#allocation2 + $0xe0] sm:$0xf]  ;;  %v4660_v19 = vor.u32 %v4984_v9, %v4659_v2  ;;  %v5111_v9 = vld [vmem:[#allocation4 + $0x258] sm:$0xff] }
 0x106   : >> { %3249 = vmatpush.bf16.msrb.mxu1 %v5074_v11  ;;  %v2840_v46 = vadd.f32 %v2839_v42, %v2826_v29  ;;  %v2853_v52 = vpop.f32.mrf.mxu3  ;;  %v4985_v11 = vld [vmem:[#allocation2 + $0x140] sm:$0x70]  ;;  %v742_v42 = vrot.slane %v740_v8, 5 }
 0x107   : >> { %3263 = vmatpush.bf16.msrb.mxu2 %v5075_v15  ;;  %v5089_v15 = vld [vmem:[#allocation4 + $0xc0] sm:$0xff]  ;;  %v4668_v24 = vor.u32 %v4985_v11, %v4667_v10 }
 0x108   : >> { %3277 = vmatpush.bf16.msrb.mxu3 %v5076_v41  ;;  %v5698_v59 = vadd.f32 %v2853_v52, %v2840_v46  ;;  %v4664_v41 = vor.u32 %v4972_v3, %v4661_v5  ;;  %v5105_v29 = vld [vmem:[#allocation4 + $0x1e0] sm:$0xff]  ;;  %v768_v46 = vrot.slane %v744_v38, 5  ;;  %v747_v2 = vor.u32 %v746_v43, %v742_v42  ;;  %v4677_v38 = vld [vmem:[#allocation2 + $0x14c] sm:$0x70]  ;;  %v5123_v43 = vld [vmem:[#allocation4 + $0x2f8] sm:$0xff] }
 0x109   : >> { %3236 = vmatpush.bf16.msrb.mxu0 %v5077_v28  ;;  %v5096_v28 = vld [vmem:[#allocation4 + $0x2b8] sm:$0xff] }
 0x10a   : >> { %3250 = vmatpush.bf16.msrb.mxu1 %v5078_v61  ;;  %v5097_v61 = vld [vmem:[#allocation4 + $0x1f0] sm:$0xff] }
 0x10b   : >> { %3264 = vmatpush.bf16.msrb.mxu2 %v5079_v33  ;;  %v5102_v33 = vld [vmem:[#allocation4 + $0x228] sm:$0xff] }
 0x10c   : >> { %3278 = vmatpush.bf16.msrb.mxu3 %v5080_v34 }
 0x10d   : >> { %3237 = vmatpush.bf16.msrb.mxu0 %v5081_v39  ;;  %v733_v39 = vrot.slane %v731_v36, 4  ;;  %v5118_v36 = vld [vmem:[#allocation4 + $0x208] sm:$0xff] }
 0x10e   : >> { %3251 = vmatpush.bf16.msrb.mxu1 %v5082_v13  ;;  %v736_v13 = vrot.slane %v734_v37, 5 }
 0x10f   : >> { %3265 = vmatpush.bf16.msrb.mxu2 %v5083_v40 }
 0x110   : >> { %3279 = vmatpush.bf16.msrb.mxu3 %v5084_v45  ;;  %v5711_v45 = vld [vmem:[%s5389_s10 + $0x2c] sm:$0x1]  ;;  %v737_v51 = vor.u32 %v736_v13, %v733_v39 }
 0x111   : >> { %3238 = vmatpush.bf16.msrb.mxu0 %v5085_v56  ;;  %v766_v56 = vor.u32 %v765_v20, %v764_v35  ;;  %v774_v60 = vshll.u32 %v5711_v45, 16  ;;  %v4986_v39 = vld [vmem:[#allocation2 + $0x148] sm:$0x70]  ;;  %v4683_v35 = vld [vmem:[#allocation2 + $0xf0] sm:$0xf] }
 0x112   : >> { %3252 = vmatpush.bf16.msrb.mxu1 %v5086_v57  ;;  %v769_v57 = vrot.slane %v740_v8, 6  ;;  %v4974_v8 = vld [vmem:[#allocation2 + $0xec] sm:$0xf]  ;;  %v4987_v20 = vld [vmem:[#allocation2 + $0x150] sm:$0x70] }
 0x113   : >> { %3266 = vmatpush.bf16.msrb.mxu2 %v5087_v1  ;;  %v5110_v1 = vld [vmem:[#allocation4 + $0x218] sm:$0xff]  ;;  %v767_v10 = vrot.slane %v766_v56, 4  ;;  %v5120_v13 = vld [vmem:[#allocation4 + $0x288] sm:$0xff]  ;;  %v5127_v56 = vld [vmem:[#allocation4 + $0x280] sm:$0xff] }
 0x114   : >> { %3280 = vmatpush.bf16.msrb.mxu3 %v5088_v7  ;;  %v770_v11 = vor.u32 %v769_v57, %v768_v46  ;;  %v5128_v57 = vld [vmem:[#allocation4 + $0x3b8] sm:$0xff] }
 0x115   : >> { %3239 = vmatpush.bf16.msrb.mxu0 %v5089_v15  ;;  %v2865_v53 = vpop.f32.mrf.mxu0  ;;  %v776_v15 = vrot.slane %v774_v60, 6  ;;  %v5129_v60 = vld [vmem:[#allocation4 + $0x2f0] sm:$0xff] }
 0x116   : >> { %3253 = vmatpush.bf16.msrb.mxu1 %v5090_v16  ;;  %v2866_v58 = vadd.f32 %v2865_v53, %v5677_v31  ;;  %v2879_v14 = vpop.f32.mrf.mxu1  ;;  %v5107_v31 = vld [vmem:[#allocation4 + $0x260] sm:$0xff]  ;;  %v5112_v16 = vld [vmem:[#allocation4 + $0x298] sm:$0xff] }
 0x117   : >> { %3267 = vmatpush.bf16.msrb.mxu2 %v5091_v17  ;;  %v748_v17 = vrot.slane %v747_v2, 4  ;;  %v5133_v2 = vld [vmem:[#allocation4 + $0x2e8] sm:$0xff] }
 0x118   : >> { %3281 = vmatpush.bf16.msrb.mxu3 %v5095_v25  ;;  %3240 = vmatmul.bf16.vlgmr.msrb.gmra.mxu0 %v4656_v26  ;;  %v2880_v34 = vadd.f32 %v2879_v14, %v2866_v58  ;;  %v738_v26 = vrot.slane %v737_v51, 4  ;;  %v3727_v25 = vrot.slane %v5696_v47, 9  ;;  %v5116_v58 = vld [vmem:[#allocation4 + $0x290] sm:$0xff]  ;;  %v5126_v51 = vld [vmem:[#allocation4 + $0x378] sm:$0xff] }
 0x119   : >> { %3288 = vmatpush.bf16.msra.mxu0 %v5092_v18  ;;  %3254 = vmatmul.bf16.vlgmr.msrb.gmra.mxu1 %v4660_v19  ;;  %v757_v18 = vrot.slane %v5701_v62, 5  ;;  %v785_v19 = vrot.slane %v5701_v62, 6  ;;  %v5115_v62 = vld [vmem:[#allocation4 + $0x250] sm:$0xff]  ;;  %752 = vst [vmem:[#allocation2 + $0x158] sm:$0x7] %v748_v17  ;;  %v5137_v17 = vld [vmem:[#allocation4 + $0x2e0] sm:$0xff] }
 0x11a   : >> { %3302 = vmatpush.bf16.msra.mxu1 %v5093_v4  ;;  %3268 = vmatmul.bf16.vlgmr.msrb.gmra.mxu2 %v4664_v41  ;;  %v5113_v4 = vld [vmem:[#allocation4 + $0x1d0] sm:$0xff] }
 0x11b   : >> { %3316 = vmatpush.bf16.msra.mxu2 %v5094_v21  ;;  %3282 = vmatmul.bf16.vlgmr.msrb.gmra.mxu3 %v4668_v24  ;;  %v771_v21 = vsel %vm5424_vm10, %v767_v10, %v770_v11  ;;  %v772_v24 = vrot.slane %v770_v11, 4  ;;  %v758_v53 = vsel %vm5398_vm4, %v3727_v25, %v757_v18  ;;  %v5135_v10 = vld [vmem:[#allocation4 + $0x368] sm:$0xff] }
 0x11c   : >> { %3330 = vmatpush.bf16.msra.mxu3 %v5096_v28  ;;  %v5114_v28 = vld [vmem:[#allocation4 + $0x210] sm:$0xff]  ;;  %780 = vst [vmem:[#allocation2 + $0xfc] sm:$0xf] %v771_v21  ;;  %v5140_v21 = vld [vmem:[#allocation4 + $0x3a0] sm:$0xff] }
 0x11d   : >> { %3289 = vmatpush.bf16.msra.mxu0 %v5097_v61  ;;  %v2893_v63 = vpop.f32.mrf.mxu2  ;;  %v2867_v52 = vpop.f32.mrf.mxu0  ;;  %v3728_v61 = vrot.slane %v5696_v47, 10  ;;  %762 = vst [vmem:[#allocation2 + $0xf8] sm:$0xf] %v758_v53 }
 0x11e   : >> { %3303 = vmatpush.bf16.msra.mxu1 %v5098_v30  ;;  %v2894_v40 = vadd.f32 %v2893_v63, %v2880_v34  ;;  %v2907_v54 = vpop.f32.mrf.mxu3  ;;  %v2868_v3 = vadd.f32 %v2867_v52, %v5698_v59  ;;  %v2881_v7 = vpop.f32.mrf.mxu1  ;;  %v743_v59 = vsel %vm5418_vm9, %v738_v26, %v742_v42  ;;  %v787_v30 = vrot.slane %v785_v19, 4  ;;  %v4669_v34 = vld [vmem:[#allocation2 + $0x144] sm:$0x70]  ;;  %v5122_v42 = vld [vmem:[#allocation4 + $0x200] sm:$0xff]  ;;  %v5125_v52 = vld [vmem:[#allocation4 + $0x338] sm:$0xff] }
 0x11f   : >> { %3317 = vmatpush.bf16.msra.mxu2 %v5099_v49  ;;  %751 = vst [vmem:[#allocation2 + $0xf4] sm:$0xf] %v743_v59  ;;  %v788_v49 = vrot.slane %v5711_v45, 6  ;;  %v4675_v63 = vld [vmem:[#allocation2 + $0xe8] sm:$0xf]  ;;  %v4680_v45 = vor.u32 %v4974_v8, %v4677_v38  ;;  %v5144_v8 = vld [vmem:[#allocation4 + $0x398] sm:$0xff] }
 0x120   : >> { %3331 = vmatpush.bf16.msra.mxu3 %v5100_v22  ;;  %v5715_v5 = vadd.f32 %v2907_v54, %v2894_v40  ;;  %v2882_v41 = vadd.f32 %v2881_v7, %v2868_v3  ;;  %v4676_v46 = vor.u32 %v4986_v39, %v4675_v63  ;;  %v4684_v54 = vor.u32 %v4987_v20, %v4683_v35  ;;  %v5131_v3 = vld [vmem:[#allocation4 + $0x370] sm:$0xff]  ;;  %v5134_v26 = vld [vmem:[#allocation4 + $0x328] sm:$0xff]  ;;  %v5755_v63 = vld [vmem:[%s5389_s10 + $0x38] sm:$0x1] }
 0x121   : >> { %3290 = vmatpush.bf16.msra.mxu0 %v5101_v32  ;;  %v777_v32 = vsel %vm5424_vm10, %v772_v24, %v776_v15  ;;  %v5132_v7 = vld [vmem:[#allocation4 + $0x3b0] sm:$0xff] }
 0x122   : >> { %3304 = vmatpush.bf16.msra.mxu1 %v5102_v33  ;;  %v759_v33 = vrot.slane %v757_v18, 4  ;;  %781 = vst [vmem:[#allocation2 + $0x160] sm:$0x7] %v777_v32  ;;  %v5138_v18 = vld [vmem:[#allocation4 + $0x320] sm:$0xff]  ;;  %v5741_v59 = vld [vmem:[%s5389_s10 + $0x34] sm:$0xf] }
 0x123   : >> { %3318 = vmatpush.bf16.msra.mxu2 %v5103_v48  ;;  %v5117_v48 = vld [vmem:[#allocation4 + $0x1c8] sm:$0xff]  ;;  %798 = vst [vmem:[#allocation2 + $0x168] sm:$0x7] %v5741_v59 }
 0x124   : >> { %3332 = vmatpush.bf16.msra.mxu3 %v5104_v6  ;;  %v4973_v6 = vld [vmem:[#allocation2 + $0xe4] sm:$0xf]  ;;  %763 = vst [vmem:[#allocation2 + $0x15c] sm:$0x7] %v759_v33 }
 0x125   : >> { %3291 = vmatpush.bf16.msra.mxu0 %v5105_v29  ;;  %v2895_v22 = vpop.f32.mrf.mxu2  ;;  %v786_v29 = vsel %vm5432_vm11, %v3728_v61, %v785_v19  ;;  %v4672_v40 = vor.u32 %v4973_v6, %v4669_v34  ;;  %v5139_v19 = vld [vmem:[#allocation4 + $0x360] sm:$0xff]  ;;  %v813_v61 = vshrl.u32 %v5741_v59, 16 }
 0x126   : >> { %3305 = vmatpush.bf16.msra.mxu1 %v5106_v12  ;;  %v2896_v14 = vadd.f32 %v2895_v22, %v2882_v41  ;;  %v2909_v47 = vpop.f32.mrf.mxu3  ;;  %v789_v12 = vsel %vm5432_vm11, %v787_v30, %v788_v49  ;;  %792 = vst [vmem:[#allocation2 + $0x100] sm:$0xf] %v786_v29  ;;  %v5141_v49 = vld [vmem:[#allocation4 + $0x2d8] sm:$0xff]  ;;  %v826_v29 = vrot.slane %v5741_v59, 5 }
 0x127   : >> { %3319 = vmatpush.bf16.msra.mxu2 %v5107_v31  ;;  %v5119_v31 = vld [vmem:[#allocation4 + $0x248] sm:$0xff]  ;;  %793 = vst [vmem:[#allocation2 + $0x164] sm:$0x7] %v789_v12  ;;  %v837_v20 = vrot.slane %v813_v61, 5 }
 0x128   : >> { %3333 = vmatpush.bf16.msra.mxu3 %v5108_v27  ;;  %v5732_v37 = vadd.f32 %v2909_v47, %v2896_v14  ;;  %v5121_v27 = vld [vmem:[#allocation4 + $0x1c0] sm:$0xff]  ;;  %v5142_v14 = vld [vmem:[#allocation4 + $0x318] sm:$0xff]  ;;  %v828_v35 = vrot.slane %v826_v29, 4 }
 0x129   : >> { %3292 = vmatpush.bf16.msra.mxu0 %v5109_v44  ;;  %v5124_v44 = vld [vmem:[#allocation4 + $0x240] sm:$0xff] }
 0x12a   : >> { %3306 = vmatpush.bf16.msra.mxu1 %v5110_v1  ;;  %v5130_v1 = vld [vmem:[#allocation4 + $0x330] sm:$0xff]  ;;  %832 = vst [vmem:[#allocation2 + $0x170] sm:$0x7] %v828_v35 }
 0x12b   : >> { %3320 = vmatpush.bf16.msra.mxu2 %v5111_v9 }
 0x12c   : >> { %3334 = vmatpush.bf16.msra.mxu3 %v5112_v16  ;;  %v5136_v16 = vld [vmem:[#allocation4 + $0x3a8] sm:$0xff] }
 0x12d   : >> { %3293 = vmatpush.bf16.msra.mxu0 %v5113_v4  ;;  %v5738_v4 = vld [vmem:[%s5389_s10 + $0x30] sm:$0xf] }
 0x12e   : >> { %3307 = vmatpush.bf16.msra.mxu1 %v5114_v28  ;;  %797 = vst [vmem:[#allocation2 + $0x104] sm:$0xf] %v5738_v4  ;;  %v803_v25 = vshll.u32 %v5738_v4, 16  ;;  %v809_v28 = vshll.u32 %v5741_v59, 16  ;;  %v3732_v38 = vrot.slane %v5738_v4, 9 }
 0x12f   : >> { %3321 = vmatpush.bf16.msra.mxu2 %v5115_v62 }
 0x130   : >> { %3335 = vmatpush.bf16.msra.mxu3 %v5116_v58  ;;  %v805_v53 = vrot.slane %v803_v25, 5  ;;  %v834_v58 = vrot.slane %v803_v25, 6  ;;  %v4699_v25 = vld [vmem:[#allocation2 + $0x100] sm:$0xf] }
 0x131   : >> { %3294 = vmatpush.bf16.msra.mxu0 %v5117_v48  ;;  %v5143_v48 = vld [vmem:[#allocation4 + $0x358] sm:$0xff] }
 0x132   : >> { %3308 = vmatpush.bf16.msra.mxu1 %v5118_v36  ;;  %v811_v36 = vrot.slane %v809_v28, 5 }
 0x133   : >> { %3322 = vmatpush.bf16.msra.mxu2 %v5119_v31  ;;  %v815_v31 = vrot.slane %v813_v61, 4  ;;  %v5153_v61 = vld [vmem:[#allocation4 + $0x2c0] sm:$0xff] }
 0x134   : >> { %3336 = vmatpush.bf16.msra.mxu3 %v5120_v13 }
 0x135   : >> { %3295 = vmatpush.bf16.msra.mxu0 %v5121_v27  ;;  %v2921_v9 = vpop.f32.mrf.mxu0  ;;  %v838_v27 = vrot.slane %v809_v28, 6  ;;  %v4989_v28 = vld [vmem:[#allocation2 + $0x160] sm:$0x70] }
 0x136   : >> { %3309 = vmatpush.bf16.msra.mxu1 %v5122_v42  ;;  %v2922_v11 = vadd.f32 %v2921_v9, %v5715_v5  ;;  %v2935_v15 = vpop.f32.mrf.mxu1  ;;  %v800_v5 = vshrl.u32 %v5738_v4, 16  ;;  %v5149_v9 = vld [vmem:[#allocation4 + $0x2c8] sm:$0xff]  ;;  %v4977_v50 = vld [vmem:[#allocation2 + $0x104] sm:$0xf] }
 0x137   : >> { %3323 = vmatpush.bf16.msra.mxu2 %v5124_v44  ;;  %v5147_v44 = vld [vmem:[#allocation4 + $0x350] sm:$0xff] }
 0x138   : >> { %3337 = vmatpush.bf16.msra.mxu3 %v5127_v56  ;;  %3296 = vmatmul.bf16.vlgmr.msra.gmra.mxu0 %v4672_v40  ;;  %v2936_v41 = vadd.f32 %v2935_v15, %v2922_v11  ;;  %v802_v32 = vrot.slane %v800_v5, 4  ;;  %v833_v33 = vrot.slane %v800_v5, 5  ;;  %v827_v40 = vsel %vm5398_vm4, %v3732_v38, %v826_v29  ;;  %v4685_v11 = vld [vmem:[#allocation2 + $0x154] sm:$0x70]  ;;  %v5150_v15 = vld [vmem:[#allocation4 + $0x308] sm:$0xff]  ;;  %v5162_v29 = vld [vmem:[#allocation4 + $0x430] sm:$0xff] }
 0x139   : >> { %3344 = vmatpush.bf16.msrb.mxu0 %v5123_v43  ;;  %3310 = vmatmul.bf16.vlgmr.msra.gmra.mxu1 %v4676_v46  ;;  %v816_v43 = vor.u32 %v815_v31, %v811_v36  ;;  %v5146_v46 = vld [vmem:[#allocation4 + $0x310] sm:$0xff]  ;;  %831 = vst [vmem:[#allocation2 + $0x10c] sm:$0xf] %v827_v40  ;;  %v4988_v5 = vld [vmem:[#allocation2 + $0x158] sm:$0x70]  ;;  %v5165_v38 = vld [vmem:[#allocation4 + $0x3e8] sm:$0xff] }
 0x13a   : >> { %3358 = vmatpush.bf16.msrb.mxu1 %v5125_v52  ;;  %3324 = vmatmul.bf16.vlgmr.msra.gmra.mxu2 %v4680_v45  ;;  %v806_v12 = vor.u32 %v805_v53, %v802_v32  ;;  %v835_v39 = vor.u32 %v834_v58, %v833_v33  ;;  %v839_v52 = vor.u32 %v838_v27, %v837_v20  ;;  %v5156_v53 = vld [vmem:[#allocation4 + $0x3f8] sm:$0xff]  ;;  %v5166_v31 = vld [vmem:[#allocation4 + $0x428] sm:$0xff]  ;;  %v5773_v40 = vld [vmem:[%s5389_s10 + $0x40] sm:$0xf] }
 0x13b   : >> { %3372 = vmatpush.bf16.msrb.mxu2 %v5126_v51  ;;  %3338 = vmatmul.bf16.vlgmr.msra.gmra.mxu3 %v4684_v54  ;;  %v843_v54 = vshll.u32 %v5755_v63, 16  ;;  %v5148_v51 = vld [vmem:[#allocation4 + $0x390] sm:$0xff]  ;;  %v5157_v33 = vld [vmem:[#allocation4 + $0x438] sm:$0xff]  ;;  %v4700_v58 = vor.u32 %v4989_v28, %v4699_v25  ;;  %v5168_v27 = vld [vmem:[#allocation4 + $0x4a8] sm:$0xff]  ;;  %871 = vst [vmem:[#allocation2 + $0x17c] sm:$0x7] %v5773_v40 }
 0x13c   : >> { %3386 = vmatpush.bf16.msrb.mxu3 %v5128_v57  ;;  %v807_v42 = vrot.slane %v806_v12, 4  ;;  %v836_v45 = vrot.slane %v835_v39, 4  ;;  %v5167_v39 = vld [vmem:[#allocation4 + $0x468] sm:$0xff]  ;;  %v5770_v20 = vld [vmem:[%s5389_s10 + $0x3c] sm:$0xf]  ;;  %v899_v25 = vrot.slane %v5773_v40, 5 }
 0x13d   : >> { %3345 = vmatpush.bf16.msrb.mxu0 %v5129_v60  ;;  %v2949_v24 = vpop.f32.mrf.mxu2  ;;  %v2923_v62 = vpop.f32.mrf.mxu0  ;;  %v817_v60 = vrot.slane %v816_v43, 4  ;;  %v876_v43 = vshll.u32 %v5770_v20, 16  ;;  %870 = vst [vmem:[#allocation2 + $0x118] sm:$0xf] %v5770_v20  ;;  %v5176_v28 = vld [vmem:[#allocation4 + $0x498] sm:$0xff] }
 0x13e   : >> { %3359 = vmatpush.bf16.msrb.mxu1 %v5130_v1  ;;  %v2950_v30 = vadd.f32 %v2949_v24, %v2936_v41  ;;  %v2963_v22 = vpop.f32.mrf.mxu3  ;;  %v2924_v47 = vadd.f32 %v2923_v62, %v5732_v37  ;;  %v2937_v34 = vpop.f32.mrf.mxu1  ;;  %v5145_v37 = vld [vmem:[#allocation4 + $0x2d0] sm:$0xff]  ;;  %v812_v57 = vsel %vm5418_vm9, %v807_v42, %v811_v36  ;;  %v4691_v24 = vld [vmem:[#allocation2 + $0xf8] sm:$0xf]  ;;  %v5154_v62 = vld [vmem:[#allocation4 + $0x300] sm:$0xff]  ;;  %v873_v42 = vshrl.u32 %v5770_v20, 16 }
 0x13f   : >> { %3373 = vmatpush.bf16.msrb.mxu2 %v5131_v3  ;;  %820 = vst [vmem:[#allocation2 + $0x108] sm:$0xf] %v812_v57  ;;  %v840_v3 = vsel %vm5424_vm10, %v836_v45, %v839_v52  ;;  %v4692_v32 = vor.u32 %v4988_v5, %v4691_v24  ;;  %v5163_v36 = vld [vmem:[#allocation4 + $0x470] sm:$0xff]  ;;  %v5169_v45 = vld [vmem:[#allocation4 + $0x3e0] sm:$0xff] }
 0x140   : >> { %3387 = vmatpush.bf16.msrb.mxu3 %v5132_v7  ;;  %v5750_v6 = vadd.f32 %v2963_v22, %v2950_v30  ;;  %v2938_v13 = vadd.f32 %v2937_v34, %v2924_v47  ;;  %v841_v7 = vrot.slane %v839_v52, 4  ;;  %821 = vst [vmem:[#allocation2 + $0x16c] sm:$0x7] %v817_v60  ;;  %v5155_v22 = vld [vmem:[#allocation4 + $0x340] sm:$0xff]  ;;  %v5160_v47 = vld [vmem:[#allocation4 + $0x4b8] sm:$0xff]  ;;  %v5161_v34 = vld [vmem:[#allocation4 + $0x3f0] sm:$0xff] }
 0x141   : >> { %3346 = vmatpush.bf16.msrb.mxu0 %v5133_v2  ;;  %v845_v2 = vrot.slane %v843_v54, 6  ;;  %849 = vst [vmem:[#allocation2 + $0x110] sm:$0xf] %v840_v3  ;;  %v5171_v52 = vld [vmem:[#allocation4 + $0x460] sm:$0xff]  ;;  %v875_v54 = vrot.slane %v873_v42, 4 }
 0x142   : >> { %3360 = vmatpush.bf16.msrb.mxu1 %v5134_v26  ;;  %v4978_v23 = vld [vmem:[#allocation2 + $0x10c] sm:$0xf] }
 0x143   : >> { %3374 = vmatpush.bf16.msrb.mxu2 %v5135_v10  ;;  %v4975_v10 = vld [vmem:[#allocation2 + $0xf4] sm:$0xf] }
 0x144   : >> { %3388 = vmatpush.bf16.msrb.mxu3 %v5136_v16  ;;  %v5151_v16 = vld [vmem:[#allocation4 + $0x348] sm:$0xff]  ;;  %v4688_v30 = vor.u32 %v4975_v10, %v4685_v11 }
 0x145   : >> { %3347 = vmatpush.bf16.msrb.mxu0 %v5137_v17  ;;  %v2951_v56 = vpop.f32.mrf.mxu2  ;;  %v4976_v17 = vld [vmem:[#allocation2 + $0xfc] sm:$0xf] }
 0x146   : >> { %3361 = vmatpush.bf16.msrb.mxu1 %v5138_v18  ;;  %v2952_v1 = vadd.f32 %v2951_v56, %v2938_v13  ;;  %v2965_v26 = vpop.f32.mrf.mxu3  ;;  %v4693_v18 = vld [vmem:[#allocation2 + $0x15c] sm:$0x70] }
 0x147   : >> { %3375 = vmatpush.bf16.msrb.mxu2 %v5139_v19  ;;  %v846_v19 = vsel %vm5424_vm10, %v841_v7, %v845_v2  ;;  %v854_v7 = vrot.slane %v5741_v59, 6  ;;  %v857_v59 = vrot.slane %v5755_v63, 6 }
 0x148   : >> { %3389 = vmatpush.bf16.msrb.mxu3 %v5140_v21  ;;  %v5764_v41 = vadd.f32 %v2965_v26, %v2952_v1  ;;  %v5152_v21 = vld [vmem:[#allocation4 + $0x388] sm:$0xff]  ;;  %850 = vst [vmem:[#allocation2 + $0x174] sm:$0x7] %v846_v19  ;;  %v5172_v1 = vld [vmem:[#allocation4 + $0x4a0] sm:$0xff] }
 0x149   : >> { %3348 = vmatpush.bf16.msrb.mxu0 %v5141_v49  ;;  %v4696_v49 = vor.u32 %v4976_v17, %v4693_v18  ;;  %v856_v24 = vrot.slane %v854_v7, 4 }
 0x14a   : >> { %3362 = vmatpush.bf16.msrb.mxu1 %v5142_v14  ;;  %v5158_v14 = vld [vmem:[#allocation4 + $0x478] sm:$0xff] }
 0x14b   : >> { %3376 = vmatpush.bf16.msrb.mxu2 %v5143_v48  ;;  %v5159_v48 = vld [vmem:[#allocation4 + $0x380] sm:$0xff] }
 0x14c   : >> { %3390 = vmatpush.bf16.msrb.mxu3 %v5144_v8  ;;  %v5164_v8 = vld [vmem:[#allocation4 + $0x4b0] sm:$0xff] }
 0x14d   : >> { %3349 = vmatpush.bf16.msrb.mxu0 %v5145_v37 }
 0x14e   : >> { %3363 = vmatpush.bf16.msrb.mxu1 %v5146_v46  ;;  %v882_v46 = vshll.u32 %v5773_v40, 16 }
 0x14f   : >> { %3377 = vmatpush.bf16.msrb.mxu2 %v5147_v44  ;;  %v5170_v44 = vld [vmem:[#allocation4 + $0x420] sm:$0xff] }
 0x150   : >> { %3391 = vmatpush.bf16.msrb.mxu3 %v5148_v51  ;;  %v878_v51 = vrot.slane %v876_v43, 5  ;;  %v884_v57 = vrot.slane %v882_v46, 5 }
 0x151   : >> { %3350 = vmatpush.bf16.msrb.mxu0 %v5149_v9  ;;  %v5173_v9 = vld [vmem:[#allocation4 + $0x3d8] sm:$0xff] }
 0x152   : >> { %3364 = vmatpush.bf16.msrb.mxu1 %v5150_v15  ;;  %v879_v2 = vor.u32 %v878_v51, %v875_v54  ;;  %v5174_v15 = vld [vmem:[#allocation4 + $0x418] sm:$0xff]  ;;  %v5187_v54 = vld [vmem:[#allocation4 + $0x440] sm:$0xff] }
 0x153   : >> { %3378 = vmatpush.bf16.msrb.mxu2 %v5151_v16  ;;  %v5175_v16 = vld [vmem:[#allocation4 + $0x458] sm:$0xff] }
 0x154   : >> { %3392 = vmatpush.bf16.msrb.mxu3 %v5152_v21  ;;  %v3733_v21 = vrot.slane %v5738_v4, 10  ;;  %v880_v5 = vrot.slane %v879_v2, 4  ;;  %v858_v4 = vsel %vm5432_vm11, %v856_v24, %v857_v59  ;;  %v5193_v2 = vld [vmem:[#allocation4 + $0x4f0] sm:$0xff]  ;;  %v911_v24 = vrot.slane %v882_v46, 6  ;;  %v5200_v59 = vld [vmem:[#allocation4 + $0x5a8] sm:$0xff] }
 0x155   : >> { %3351 = vmatpush.bf16.msrb.mxu0 %v5153_v61  ;;  %v2977_v12 = vpop.f32.mrf.mxu0  ;;  %862 = vst [vmem:[#allocation2 + $0x178] sm:$0x7] %v858_v4  ;;  %v5205_v4 = vld [vmem:[#allocation4 + $0x4d8] sm:$0xff] }
 0x156   : >> { %3365 = vmatpush.bf16.msrb.mxu1 %v5154_v62  ;;  %v2978_v13 = vadd.f32 %v2977_v12, %v5750_v6  ;;  %v2991_v35 = vpop.f32.mrf.mxu1  ;;  %v886_v6 = vshrl.u32 %v5773_v40, 16  ;;  %v5177_v62 = vld [vmem:[#allocation4 + $0x3d0] sm:$0xff]  ;;  %v885_v63 = vsel %vm5418_vm9, %v880_v5, %v884_v57  ;;  %v906_v5 = vrot.slane %v873_v42, 5 }
 0x157   : >> { %3379 = vmatpush.bf16.msrb.mxu2 %v5155_v22  ;;  %v5178_v22 = vld [vmem:[#allocation4 + $0x410] sm:$0xff]  ;;  %893 = vst [vmem:[#allocation2 + $0x11c] sm:$0xf] %v885_v63  ;;  %v5206_v63 = vld [vmem:[#allocation4 + $0x518] sm:$0xff] }
 0x158   : >> { %3393 = vmatpush.bf16.msrb.mxu3 %v5159_v48  ;;  %3352 = vmatmul.bf16.vlgmr.msrb.gmra.mxu0 %v4688_v30  ;;  %v2992_v37 = vadd.f32 %v2991_v35, %v2978_v13  ;;  %v888_v60 = vrot.slane %v886_v6, 4  ;;  %v855_v30 = vsel %vm5432_vm11, %v3733_v21, %v854_v7  ;;  %v4709_v12 = vld [vmem:[#allocation2 + $0x16c] sm:$0x70]  ;;  %v5184_v13 = vld [vmem:[#allocation4 + $0x488] sm:$0xff]  ;;  %v5192_v7 = vld [vmem:[#allocation4 + $0x5b8] sm:$0xff]  ;;  %v910_v21 = vrot.slane %v886_v6, 5 }
 0x159   : >> { %3400 = vmatpush.bf16.msra.mxu0 %v5156_v53  ;;  %3366 = vmatmul.bf16.vlgmr.msrb.gmra.mxu1 %v4692_v32  ;;  %861 = vst [vmem:[#allocation2 + $0x114] sm:$0xf] %v855_v30  ;;  %v5179_v32 = vld [vmem:[#allocation4 + $0x450] sm:$0xff]  ;;  %v5204_v6 = vld [vmem:[#allocation4 + $0x5a0] sm:$0xff] }
 0x15a   : >> { %3414 = vmatpush.bf16.msra.mxu1 %v5157_v33  ;;  %3380 = vmatmul.bf16.vlgmr.msrb.gmra.mxu2 %v4696_v49  ;;  %v889_v11 = vor.u32 %v888_v60, %v884_v57  ;;  %v901_v33 = vrot.slane %v899_v25, 4  ;;  %v4715_v35 = vld [vmem:[#allocation2 + $0x110] sm:$0xf]  ;;  %v5189_v57 = vld [vmem:[#allocation4 + $0x538] sm:$0xff]  ;;  %v912_v30 = vor.u32 %v911_v24, %v910_v21 }
 0x15b   : >> { %3428 = vmatpush.bf16.msra.mxu2 %v5158_v14  ;;  %3394 = vmatmul.bf16.vlgmr.msrb.gmra.mxu3 %v4700_v58  ;;  %v5180_v14 = vld [vmem:[#allocation4 + $0x490] sm:$0xff]  ;;  %v5230_v21 = vld [vmem:[#allocation4 + $0x618] sm:$0xff] }
 0x15c   : >> { %3442 = vmatpush.bf16.msra.mxu3 %v5160_v47  ;;  %v890_v49 = vrot.slane %v889_v11, 4  ;;  %v5181_v47 = vld [vmem:[#allocation4 + $0x3c8] sm:$0xff]  ;;  %905 = vst [vmem:[#allocation2 + $0x184] sm:$0x7] %v901_v33  ;;  %v5231_v24 = vld [vmem:[#allocation4 + $0x5d0] sm:$0xff] }
 0x15d   : >> { %3401 = vmatpush.bf16.msra.mxu0 %v5161_v34  ;;  %v3005_v56 = vpop.f32.mrf.mxu2  ;;  %v2979_v26 = vpop.f32.mrf.mxu0  ;;  %v5197_v11 = vld [vmem:[#allocation4 + $0x4e8] sm:$0xff] }
 0x15e   : >> { %3415 = vmatpush.bf16.msra.mxu1 %v5162_v29  ;;  %v3006_v3 = vadd.f32 %v3005_v56, %v2992_v37  ;;  %v3019_v10 = vpop.f32.mrf.mxu3  ;;  %v2980_v17 = vadd.f32 %v2979_v26, %v5764_v41  ;;  %v2993_v19 = vpop.f32.mrf.mxu1  ;;  %v3739_v41 = vrot.slane %v5770_v20, 9  ;;  %894 = vst [vmem:[#allocation2 + $0x180] sm:$0x7] %v890_v49  ;;  %v4701_v29 = vld [vmem:[#allocation2 + $0x164] sm:$0x70]  ;;  %v5185_v37 = vld [vmem:[#allocation4 + $0x3c0] sm:$0xff] }
 0x15f   : >> { %3429 = vmatpush.bf16.msra.mxu2 %v5163_v36  ;;  %v5182_v36 = vld [vmem:[#allocation4 + $0x408] sm:$0xff]  ;;  %v5188_v56 = vld [vmem:[#allocation4 + $0x4f8] sm:$0xff]  ;;  %v5195_v26 = vld [vmem:[#allocation4 + $0x570] sm:$0xff] }
 0x160   : >> { %3443 = vmatpush.bf16.msra.mxu3 %v5164_v8  ;;  %v5791_v18 = vadd.f32 %v3019_v10, %v3006_v3  ;;  %v2994_v61 = vadd.f32 %v2993_v19, %v2980_v17  ;;  %v900_v53 = vsel %vm5398_vm4, %v3739_v41, %v899_v25  ;;  %v5183_v8 = vld [vmem:[#allocation4 + $0x448] sm:$0xff]  ;;  %v5191_v3 = vld [vmem:[#allocation4 + $0x480] sm:$0xff]  ;;  %v5196_v10 = vld [vmem:[#allocation4 + $0x5b0] sm:$0xff]  ;;  %v907_v25 = vrot.slane %v876_v43, 6 }
 0x161   : >> { %3402 = vmatpush.bf16.msra.mxu0 %v5165_v38  ;;  %904 = vst [vmem:[#allocation2 + $0x120] sm:$0xf] %v900_v53  ;;  %v5199_v17 = vld [vmem:[#allocation4 + $0x568] sm:$0xff]  ;;  %v3738_v49 = vld [vmem:[%s5389_s10 + $0x44] sm:$0x1]  ;;  %v5207_v43 = vld [vmem:[#allocation4 + $0x558] sm:$0xff] }
 0x162   : >> { %3416 = vmatpush.bf16.msra.mxu1 %v5166_v31  ;;  %v4707_v31 = vld [vmem:[#allocation2 + $0x108] sm:$0xf]  ;;  %v908_v41 = vor.u32 %v907_v25, %v906_v5  ;;  %v916_v46 = vshll.u32 %v3738_v49, 16  ;;  %v914_v53 = vrot.slane %v912_v30, 4 }
 0x163   : >> { %3430 = vmatpush.bf16.msra.mxu2 %v5167_v39  ;;  %v4990_v39 = vld [vmem:[#allocation2 + $0x168] sm:$0x70] }
 0x164   : >> { %3444 = vmatpush.bf16.msra.mxu3 %v5168_v27  ;;  %v4991_v27 = vld [vmem:[#allocation2 + $0x170] sm:$0x70]  ;;  %v4708_v51 = vor.u32 %v4990_v39, %v4707_v31  ;;  %v918_v33 = vrot.slane %v916_v46, 6  ;;  %v4980_v31 = vld [vmem:[#allocation2 + $0x11c] sm:$0xf]  ;;  %v5214_v39 = vld [vmem:[#allocation4 + $0x508] sm:$0xff] }
 0x165   : >> { %3403 = vmatpush.bf16.msra.mxu0 %v5169_v45  ;;  %v3007_v58 = vpop.f32.mrf.mxu2  ;;  %v4704_v45 = vor.u32 %v4977_v50, %v4701_v29  ;;  %v4716_v60 = vor.u32 %v4991_v27, %v4715_v35  ;;  %v5209_v50 = vld [vmem:[#allocation4 + $0x4d0] sm:$0xff]  ;;  %v4725_v0 = vld [vmem:[#allocation2 + $0x17c] sm:$0x70]  ;;  %v4723_v35 = vld [vmem:[#allocation2 + $0x118] sm:$0xf] }
 0x166   : >> { %3417 = vmatpush.bf16.msra.mxu1 %v5170_v44  ;;  %v3008_v48 = vadd.f32 %v3007_v58, %v2994_v61  ;;  %v3021_v34 = vpop.f32.mrf.mxu3  ;;  %v4712_v44 = vor.u32 %v4978_v23, %v4709_v12  ;;  %v5202_v61 = vld [vmem:[#allocation4 + $0x520] sm:$0xff]  ;;  %v3740_v58 = vrot.slane %v5770_v20, 10  ;;  %v5210_v20 = vld [vmem:[#allocation4 + $0x510] sm:$0xff]  ;;  %v4717_v12 = vld [vmem:[#allocation2 + $0x174] sm:$0x70] }
 0x167   : >> { %3431 = vmatpush.bf16.msra.mxu2 %v5171_v52  ;;  %v5186_v52 = vld [vmem:[#allocation4 + $0x400] sm:$0xff]  ;;  %v4979_v23 = vld [vmem:[#allocation2 + $0x114] sm:$0xf]  ;;  %v4992_v27 = vld [vmem:[#allocation2 + $0x178] sm:$0x70] }
 0x168   : >> { %3445 = vmatpush.bf16.msra.mxu3 %v5172_v1  ;;  %v5805_v38 = vadd.f32 %v3021_v34, %v3008_v48  ;;  %v5190_v1 = vld [vmem:[#allocation4 + $0x578] sm:$0xff]  ;;  %v930_v48 = vrot.slane %v3738_v49, 6  ;;  %v919_v34 = vsel %vm5424_vm10, %v914_v53, %v918_v33  ;;  %v5233_v5 = vld [vmem:[#allocation4 + $0x5c8] sm:$0xff]  ;;  %v5236_v46 = vld [vmem:[#allocation4 + $0x600] sm:$0xff] }
 0x169   : >> { %3404 = vmatpush.bf16.msra.mxu0 %v5173_v9  ;;  %v5194_v9 = vld [vmem:[#allocation4 + $0x530] sm:$0xff]  ;;  %923 = vst [vmem:[#allocation2 + $0x188] sm:$0x7] %v919_v34 }
 0x16a   : >> { %3418 = vmatpush.bf16.msra.mxu1 %v5174_v15 }
 0x16b   : >> { %3432 = vmatpush.bf16.msra.mxu2 %v5175_v16  ;;  %v5198_v16 = vld [vmem:[#allocation4 + $0x528] sm:$0xff] }
 0x16c   : >> { %3446 = vmatpush.bf16.msra.mxu3 %v5176_v28  ;;  %v5201_v28 = vld [vmem:[#allocation4 + $0x4e0] sm:$0xff] }
 0x16d   : >> { %3405 = vmatpush.bf16.msra.mxu0 %v5177_v62  ;;  %v927_v62 = vrot.slane %v5773_v40, 6 }
 0x16e   : >> { %3419 = vmatpush.bf16.msra.mxu1 %v5178_v22 }
 0x16f   : >> { %3433 = vmatpush.bf16.msra.mxu2 %v5179_v32  ;;  %v909_v32 = vrot.slane %v908_v41, 4  ;;  %v928_v29 = vsel %vm5432_vm11, %v3740_v58, %v927_v62 }
 0x170   : >> { %3447 = vmatpush.bf16.msra.mxu3 %v5180_v14  ;;  %v929_v14 = vrot.slane %v927_v62, 4  ;;  %934 = vst [vmem:[#allocation2 + $0x128] sm:$0xf] %v928_v29 }
 0x171   : >> { %3406 = vmatpush.bf16.msra.mxu0 %v5181_v47  ;;  %v5208_v47 = vld [vmem:[#allocation4 + $0x598] sm:$0xff]  ;;  %v913_v40 = vsel %vm5424_vm10, %v909_v32, %v912_v30 }
 0x172   : >> { %3420 = vmatpush.bf16.msra.mxu1 %v5182_v36  ;;  %922 = vst [vmem:[#allocation2 + $0x124] sm:$0xf] %v913_v40  ;;  %v931_v36 = vsel %vm5432_vm11, %v929_v14, %v930_v48 }
 0x173   : >> { %3434 = vmatpush.bf16.msra.mxu2 %v5183_v8  ;;  %v5211_v8 = vld [vmem:[#allocation4 + $0x550] sm:$0xff]  ;;  %935 = vst [vmem:[#allocation2 + $0x18c] sm:$0x7] %v931_v36 }
 0x174   : >> { %3448 = vmatpush.bf16.msra.mxu3 %v5184_v13  ;;  %v5215_v13 = vld [vmem:[#allocation4 + $0x548] sm:$0xff] }
 0x175   : >> { %3407 = vmatpush.bf16.msra.mxu0 %v5185_v37  ;;  %v3033_v15 = vpop.f32.mrf.mxu0  ;;  %v5216_v37 = vld [vmem:[#allocation4 + $0x588] sm:$0xff] }
 0x176   : >> { %3421 = vmatpush.bf16.msra.mxu1 %v5186_v52  ;;  %v5808_v19 = vadd.f32 %v3033_v15, %v5791_v18  ;;  %v5203_v18 = vld [vmem:[#allocation4 + $0x560] sm:$0xff]  ;;  %v3199_v62 = vpop.f32.mrf.mxu1 }
 0x177   : >> { %3435 = vmatpush.bf16.msra.mxu2 %v5187_v54  ;;  %v4993_v52 = vld [vmem:[#allocation2 + $0x180] sm:$0x70] }
 0x178   : >> { %3449 = vmatpush.bf16.msra.mxu3 %v5191_v3  ;;  %3408 = vmatmul.bf16.vlgmr.msra.gmra.mxu0 %v4704_v45  ;;  %v4720_v45 = vor.u32 %v4979_v23, %v4717_v12  ;;  %v5217_v54 = vld [vmem:[#allocation4 + $0x4c0] sm:$0xff]  ;;  %v5221_v3 = vld [vmem:[#allocation4 + $0x638] sm:$0xff] }
 0x179   : >> { %3456 = vmatpush.bf16.msrb.mxu0 %v5188_v56  ;;  %3422 = vmatmul.bf16.vlgmr.msra.gmra.mxu1 %v4708_v51  ;;  %v4728_v51 = vor.u32 %v4980_v31, %v4725_v0  ;;  %v4724_v56 = vor.u32 %v4992_v27, %v4723_v35  ;;  %v5227_v15 = vld [vmem:[#allocation4 + $0x5e0] sm:$0xff] }
 0x17a   : >> { %3470 = vmatpush.bf16.msrb.mxu1 %v5189_v57  ;;  %3436 = vmatmul.bf16.vlgmr.msra.gmra.mxu2 %v4712_v44  ;;  %v4731_v44 = vld [vmem:[#allocation2 + $0x120] sm:$0xf]  ;;  %v4981_v25 = vld [vmem:[#allocation2 + $0x124] sm:$0xf]  ;;  %v4994_v30 = vld [vmem:[#allocation2 + $0x188] sm:$0x70] }
 0x17b   : >> { %3484 = vmatpush.bf16.msrb.mxu2 %v5190_v1  ;;  %3450 = vmatmul.bf16.vlgmr.msra.gmra.mxu3 %v4716_v60  ;;  %v5218_v57 = vld [vmem:[#allocation4 + $0x500] sm:$0xff]  ;;  %v5220_v1 = vld [vmem:[#allocation4 + $0x5f8] sm:$0xff] }
 0x17c   : >> { %3498 = vmatpush.bf16.msrb.mxu3 %v5192_v7  ;;  %v5219_v60 = vld [vmem:[#allocation4 + $0x540] sm:$0xff]  ;;  %v4732_v7 = vor.u32 %v4993_v52, %v4731_v44 }
 0x17d   : >> { %3457 = vmatpush.bf16.msrb.mxu0 %v5193_v2  ;;  %v3035_v42 = vpop.f32.mrf.mxu0  ;;  %v5222_v2 = vld [vmem:[#allocation4 + $0x580] sm:$0xff] }
 0x17e   : >> { %3471 = vmatpush.bf16.msrb.mxu1 %v5194_v9  ;;  %v5821_v22 = vadd.f32 %v3035_v42, %v5805_v38  ;;  %v5212_v38 = vld [vmem:[#allocation4 + $0x590] sm:$0xff]  ;;  %v3201_v42 = vpop.f32.mrf.mxu1 }
 0x17f   : >> { %3485 = vmatpush.bf16.msrb.mxu2 %v5195_v26  ;;  %v5223_v9 = vld [vmem:[#allocation4 + $0x5f0] sm:$0xff] }
 0x180   : >> { %3499 = vmatpush.bf16.msrb.mxu3 %v5196_v10  ;;  %v5224_v26 = vld [vmem:[#allocation4 + $0x630] sm:$0xff]  ;;  %v5225_v10 = vld [vmem:[#allocation4 + $0x5e8] sm:$0xff] }
 0x181   : >> { %3458 = vmatpush.bf16.msrb.mxu0 %v5197_v11  ;;  %v5226_v11 = vld [vmem:[#allocation4 + $0x628] sm:$0xff] }
 0x182   : >> { %3472 = vmatpush.bf16.msrb.mxu1 %v5198_v16  ;;  %v5228_v16 = vld [vmem:[#allocation4 + $0x620] sm:$0xff] }
 0x183   : >> { %3486 = vmatpush.bf16.msrb.mxu2 %v5199_v17  ;;  %v5229_v17 = vld [vmem:[#allocation4 + $0x5d8] sm:$0xff] }
 0x184   : >> { %3500 = vmatpush.bf16.msrb.mxu3 %v5200_v59  ;;  %v5232_v59 = vld [vmem:[#allocation4 + $0x610] sm:$0xff] }
 0x185   : >> { %3459 = vmatpush.bf16.msrb.mxu0 %v5201_v28  ;;  %v4733_v28 = vld [vmem:[#allocation2 + $0x184] sm:$0x70] }
 0x186   : >> { %3473 = vmatpush.bf16.msrb.mxu1 %v5202_v61  ;;  %v5234_v61 = vld [vmem:[#allocation4 + $0x608] sm:$0xff]  ;;  %v4736_v49 = vor.u32 %v4981_v25, %v4733_v28 }
 0x187   : >> { %3487 = vmatpush.bf16.msrb.mxu2 %v5203_v18  ;;  %v4739_v18 = vld [vmem:[#allocation2 + $0x128] sm:$0xf] }
 0x188   : >> { %3501 = vmatpush.bf16.msrb.mxu3 %v5204_v6  ;;  %v5235_v6 = vld [vmem:[#allocation4 + $0x5c0] sm:$0xff]  ;;  %v4740_v41 = vor.u32 %v4994_v30, %v4739_v18 }
 0x189   : >> { %3460 = vmatpush.bf16.msrb.mxu0 %v5205_v4  ;;  %v3213_v4 = vpop.f32.mrf.mxu2 }
 0x18a   : >> { %3474 = vmatpush.bf16.msrb.mxu1 %v5206_v63  ;;  %v3227_v63 = vpop.f32.mrf.mxu3  ;;  %v3214_v29 = vadd.f32 %v3213_v4, %v3199_v62 }
 0x18b   : >> { %3488 = vmatpush.bf16.msrb.mxu2 %v5207_v43 }
 0x18c   : >> { %3502 = vmatpush.bf16.msrb.mxu3 %v5208_v47 }
 0x18d   : >> { %3461 = vmatpush.bf16.msrb.mxu0 %v5209_v50 }
 0x18e   : >> { %3475 = vmatpush.bf16.msrb.mxu1 %v5210_v20  ;;  %v3228_v20 = vadd.f32 %v3227_v63, %v3214_v29 }
 0x18f   : >> { %3489 = vmatpush.bf16.msrb.mxu2 %v5211_v8 }
 0x190   : >> { %3503 = vmatpush.bf16.msrb.mxu3 %v5212_v38 }
 0x191   : >> { %3462 = vmatpush.bf16.msrb.mxu0 %v5213_v55  ;;  %v3215_v43 = vpop.f32.mrf.mxu2 }
 0x192   : >> { %3476 = vmatpush.bf16.msrb.mxu1 %v5214_v39  ;;  %v3229_v33 = vpop.f32.mrf.mxu3  ;;  %v3216_v31 = vadd.f32 %v3215_v43, %v3201_v42 }
 0x193   : >> { %3490 = vmatpush.bf16.msrb.mxu2 %v5215_v13 }
 0x194   : >> { %3504 = vmatpush.bf16.msrb.mxu3 %v5216_v37  ;;  %v3230_v35 = vadd.f32 %v3229_v33, %v3216_v31 }
 0x195   : >> { %3463 = vmatpush.bf16.msrb.mxu0 %v5217_v54  ;;  %v3241_v32 = vpop.f32.mrf.mxu0 }
 0x196   : >> { %3477 = vmatpush.bf16.msrb.mxu1 %v5218_v57  ;;  %v3255_v53 = vpop.f32.mrf.mxu1  ;;  %v3242_v55 = vadd.f32 %v3241_v32, %v3228_v20 }
 0x197   : >> { %3491 = vmatpush.bf16.msrb.mxu2 %v5219_v60 }
 0x198   : >> { %3505 = vmatpush.bf16.msrb.mxu3 %v5222_v2  ;;  %3464 = vmatmul.bf16.vlgmr.msrb.gmra.mxu0 %v4720_v45  ;;  %v3256_v39 = vadd.f32 %v3255_v53, %v3242_v55 }
 0x199   : >> { %3512 = vmatpush.bf16.msra.mxu0 %v5220_v1  ;;  %3478 = vmatmul.bf16.vlgmr.msrb.gmra.mxu1 %v4724_v56 }
 0x19a   : >> { %3526 = vmatpush.bf16.msra.mxu1 %v5221_v3  ;;  %3492 = vmatmul.bf16.vlgmr.msrb.gmra.mxu2 %v4728_v51 }
 0x19b   : >> { %3506 = vmatmul.bf16.vlgmr.msrb.gmra.mxu3 %v4732_v7 }
 0x19d   : >> { %3513 = vmatpush.bf16.msra.mxu0 %v5223_v9  ;;  %v3269_v58 = vpop.f32.mrf.mxu2  ;;  %v3243_v14 = vpop.f32.mrf.mxu0 }
 0x19e   : >> { %3527 = vmatpush.bf16.msra.mxu1 %v5224_v26  ;;  %v3257_v48 = vpop.f32.mrf.mxu1  ;;  %v3283_v47 = vpop.f32.mrf.mxu3  ;;  %v3270_v27 = vadd.f32 %v3269_v58, %v3256_v39  ;;  %v3244_v45 = vadd.f32 %v3243_v14, %v3230_v35 }
 0x1a0   : >> { %v3284_v52 = vadd.f32 %v3283_v47, %v3270_v27  ;;  %v3258_v54 = vadd.f32 %v3257_v48, %v3244_v45  ;;  %v5036_v45 = vld [vmem:[#allocation6] ss:$0 sm:$0xff] }
 0x1a1   : >> { %3514 = vmatpush.bf16.msra.mxu0 %v5225_v10 }
 0x1a2   : >> { %3528 = vmatpush.bf16.msra.mxu1 %v5226_v11 }
 0x1a5   : >> { %3515 = vmatpush.bf16.msra.mxu0 %v5227_v15  ;;  %v3271_v40 = vpop.f32.mrf.mxu2 }
 0x1a6   : >> { %3529 = vmatpush.bf16.msra.mxu1 %v5228_v16  ;;  %v3285_v36 = vpop.f32.mrf.mxu3  ;;  %v3272_v57 = vadd.f32 %v3271_v40, %v3258_v54 }
 0x1a8   : >> { %v3286_v2 = vadd.f32 %v3285_v36, %v3272_v57 }
 0x1a9   : >> { %3516 = vmatpush.bf16.msra.mxu0 %v5229_v17 }
 0x1aa   : >> { %3530 = vmatpush.bf16.msra.mxu1 %v5230_v21 }
 0x1ad   : >> { %3517 = vmatpush.bf16.msra.mxu0 %v5231_v24 }
 0x1ae   : >> { %3531 = vmatpush.bf16.msra.mxu1 %v5232_v59 }
 0x1b1   : >> { %3518 = vmatpush.bf16.msra.mxu0 %v5233_v5 }
 0x1b2   : >> { %3532 = vmatpush.bf16.msra.mxu1 %v5234_v61 }
 0x1b5   : >> { %3519 = vmatpush.bf16.msra.mxu0 %v5235_v6  ;;  %v3297_v34 = vpop.f32.mrf.mxu0 }
 0x1b6   : >> { %3533 = vmatpush.bf16.msra.mxu1 %v5236_v46  ;;  %v3311_v50 = vpop.f32.mrf.mxu1  ;;  %v3298_v51 = vadd.f32 %v3297_v34, %v3284_v52 }
 0x1b8   : >> { %3520 = vmatmul.bf16.vlgmr.msra.gmra.mxu0 %v4736_v49  ;;  %v3312_v1 = vadd.f32 %v3311_v50, %v3298_v51 }
 0x1b9   : >> { %3534 = vmatmul.bf16.vlgmr.msra.gmra.mxu1 %v4740_v41 }
 0x1bd   : >> { %v3325_v8 = vpop.f32.mrf.mxu2  ;;  %v3299_v38 = vpop.f32.mrf.mxu0 }
 0x1be   : >> { %v3313_v23 = vpop.f32.mrf.mxu1  ;;  %v3339_v12 = vpop.f32.mrf.mxu3  ;;  %v3326_v9 = vadd.f32 %v3325_v8, %v3312_v1  ;;  %v3300_v26 = vadd.f32 %v3299_v38, %v3286_v2 }
 0x1c0   : >> { %v3340_v10 = vadd.f32 %v3339_v12, %v3326_v9  ;;  %v3314_v16 = vadd.f32 %v3313_v23, %v3300_v26 }
 0x1c5   : >> { %v3327_v13 = vpop.f32.mrf.mxu2 }
 0x1c6   : >> { %v3341_v44 = vpop.f32.mrf.mxu3  ;;  %v3328_v24 = vadd.f32 %v3327_v13, %v3314_v16 }
 0x1c8   : >> { %v3342_v25 = vadd.f32 %v3341_v44, %v3328_v24 }
 0x1d5   : >> { %v3353_v0 = vpop.f32.mrf.mxu0 }
 0x1d6   : >> { %v3367_v37 = vpop.f32.mrf.mxu1  ;;  %v3354_v17 = vadd.f32 %v3353_v0, %v3340_v10 }
 0x1d8   : >> { %v3368_v5 = vadd.f32 %v3367_v37, %v3354_v17 }
 0x1dd   : >> { %v3381_v56 = vpop.f32.mrf.mxu2  ;;  %v3355_v60 = vpop.f32.mrf.mxu0 }
 0x1de   : >> { %v3369_v3 = vpop.f32.mrf.mxu1  ;;  %v3395_v7 = vpop.f32.mrf.mxu3  ;;  %v3382_v28 = vadd.f32 %v3381_v56, %v3368_v5  ;;  %v3356_v18 = vadd.f32 %v3355_v60, %v3342_v25 }
 0x1e0   : >> { %v3396_v49 = vadd.f32 %v3395_v7, %v3382_v28  ;;  %v3370_v46 = vadd.f32 %v3369_v3, %v3356_v18 }
 0x1e5   : >> { %v3383_v11 = vpop.f32.mrf.mxu2 }
 0x1e6   : >> { %v3397_v59 = vpop.f32.mrf.mxu3  ;;  %v3384_v4 = vadd.f32 %v3383_v11, %v3370_v46 }
 0x1e8   : >> { %v3398_v32 = vadd.f32 %v3397_v59, %v3384_v4 }
 0x1f5   : >> { %v3409_v15 = vpop.f32.mrf.mxu0 }
 0x1f6   : >> { %v3423_v21 = vpop.f32.mrf.mxu1  ;;  %v3410_v62 = vadd.f32 %v3409_v15, %v3396_v49 }
 0x1f8   : >> { %v3424_v42 = vadd.f32 %v3423_v21, %v3410_v62 }
 0x1fd   : >> { %v3437_v61 = vpop.f32.mrf.mxu2  ;;  %v3411_v30 = vpop.f32.mrf.mxu0 }
 0x1fe   : >> { %v3425_v6 = vpop.f32.mrf.mxu1  ;;  %v3451_v41 = vpop.f32.mrf.mxu3  ;;  %v3438_v53 = vadd.f32 %v3437_v61, %v3424_v42  ;;  %v3412_v58 = vadd.f32 %v3411_v30, %v3398_v32 }
 0x200   : >> { %v3452_v48 = vadd.f32 %v3451_v41, %v3438_v53  ;;  %v3426_v47 = vadd.f32 %v3425_v6, %v3412_v58 }
 0x205   : >> { %v3439_v63 = vpop.f32.mrf.mxu2 }
 0x206   : >> { %v3453_v14 = vpop.f32.mrf.mxu3  ;;  %v3440_v50 = vadd.f32 %v3439_v63, %v3426_v47 }
 0x208   : >> { %v3454_v38 = vadd.f32 %v3453_v14, %v3440_v50 }
 0x215   : >> { %v3465_v43 = vpop.f32.mrf.mxu0 }
 0x216   : >> { %v3479_v33 = vpop.f32.mrf.mxu1  ;;  %v3466_v40 = vadd.f32 %v3465_v43, %v3452_v48 }
 0x218   : >> { %v3480_v36 = vadd.f32 %v3479_v33, %v3466_v40 }
 0x21d   : >> { %v3493_v34 = vpop.f32.mrf.mxu2  ;;  %v3467_v29 = vpop.f32.mrf.mxu0 }
 0x21e   : >> { %v3481_v20 = vpop.f32.mrf.mxu1  ;;  %v3507_v8 = vpop.f32.mrf.mxu3  ;;  %v3494_v55 = vadd.f32 %v3493_v34, %v3480_v36  ;;  %v3468_v23 = vadd.f32 %v3467_v29, %v3454_v38 }
 0x220   : >> { %v3508_v12 = vadd.f32 %v3507_v8, %v3494_v55  ;;  %v3482_v13 = vadd.f32 %v3481_v20, %v3468_v23 }
 0x225   : >> { %v3495_v31 = vpop.f32.mrf.mxu2 }
 0x226   : >> { %v3496_v27 = vadd.f32 %v3495_v31, %v3482_v13  ;;  %v3509_v44 = vpop.f32.mrf.mxu3 }
 0x228   : >> { %v3510_v54 = vadd.f32 %v3509_v44, %v3496_v27 }
 0x235   : >> { %v3521_v39 = vpop.f32.mrf.mxu0 }
 0x236   : >> { %v3522_v0 = vadd.f32 %v3521_v39, %v3508_v12  ;;  %v3535_v35 = vpop.f32.mrf.mxu1 }
 0x238   : >> { %v3536_v37 = vadd.f32 %v3535_v35, %v3522_v0 }
 0x23a   : >> { %v3540_v52 = vmax.f32 %v5808_v19, %v3536_v37  ;;  %v3561_v19 = vld [vmem:[%s3558_s13] sm:$0xf] }
 0x23c   : >> { %v3546_v51 = vadd.f32 %v5036_v45, %v3540_v52 }
 0x23d   : >> { %v3523_v56 = vpop.f32.mrf.mxu0 }
 0x23e   : >> { %v3548_v57 = vmax.f32 %v3546_v51, 0.0  ;;  %v3524_v60 = vadd.f32 %v3523_v56, %v3510_v54  ;;  %v3537_v1 = vpop.f32.mrf.mxu1 }
 0x240   : >> { %3550 = vst [vmem:[#allocation3] sm:$0xff] %v3548_v57  ;;  %v3538_v3 = vadd.f32 %v3537_v1, %v3524_v60 }
 0x242   : >> { %v3541_v7 = vmax.f32 %v5821_v22, %v3538_v3 }
 0x244   : >> { %v3547_v2 = vadd.f32 %v5036_v45, %v3541_v7 }
 0x246   : >> { %v3549_v9 = vmax.f32 %v3547_v2, 0.0 }
 0x248   : >> { %3551 = vst [vmem:[#allocation3 + $0x8] sm:$0x3f] %v3549_v9 }
 0x24f   : >> { %v3552_v26 = vld [vmem:[#allocation3] ss:$2 sm:$0x7f]  ;;  %v3554_v10 = vld [vmem:[#allocation3 + $0x1] ss:$2 sm:$0x7f] }
 0x250   : >> { %v3555_v11 = vmax.f32 %v3552_v26, %v3554_v10 }
 0x251   : > { %207 = sbr.rel (!%p205_p7) target bundleno = 24 (0x18), region = 87 }
 0x252   : >> { %v3556_v15 = vpack.c.bf16 %v3555_v11, %v3555_v11 }
 0x254   : >> { %v3562_v16 = vsel %vm3560_vm13, %v3556_v15, %v3561_v19 }
 0x255   : >> { %3563 = vst [vmem:[%s3558_s13] sm:$0xf] %v3562_v16 }
 0x256 PF: > { %s15_s12 = sadd.s32 1, %s5315_s12  }
 0x257   : > { %p12_p8 = scmp.ge.s32.totalorder %s15_s12, 4  }
 0x259   :  { %14 = sbr.rel (!%p12_p8) target bundleno = 2 (0x2), region = 98 }
 0x25e   :  { %3585 = vsyncpa [#allocation5], 1 }
 0x25f   :  { %3587 = vsyncpa [#allocation5 + $0x1], 1 }
 0x260   :  { %3588 = vsyncpa [#allocation7], 1 }

// kernel: cnn_forward.5
= control target key start
LH: loop header
LB: loop body
LE: loop exit
PB: predicated region body
PF: predicated region fallthrough
CT: control target
= control target key end

     0   :  { %10 = vsyncpa [#allocation3], 0  ;;  %s7341_s0 = inlined_call_operand.vmem [shape: bf16[2,6272], index: 0, kind: input, shape index: {}]   ;;  %s7342_s1 = inlined_call_operand.vmem [shape: bf16[6272,128], index: 1, kind: input, shape index: {}]   ;;  %s7343_s2 = inlined_call_operand.vmem [shape: f32[1,128], index: 2, kind: input, shape index: {}]   ;;  %s7344_s3 = inlined_call_operand.hbm [shape: bf16[128,128], index: 3, kind: input, shape index: {}]   ;;  %s7345_s4 = inlined_call_operand.vmem [shape: f32[1,128], index: 4, kind: input, shape index: {}]   ;;  %s7346_s5 = inlined_call_operand.hbm [shape: f32[2,128], index: 5, kind: output, shape index: {}]  }
   0x1   :  { %11 = vsyncpa [#allocation4], 0  ;;  %s22_s20 = sshll.u32 %s7344_s3, 4  ;;  %s6092_s21 = smov [#allocation2]   ;;  %s23_s20 = int_to_ptr.hbm [resolvable:$true] %s22_s20 }
   0x2   :  { %s24_s22 = sshll.u32 %s6092_s21, 4  ;;  %s6093_s23 = smov 64   ;;  %s25_s22 = int_to_ptr.vmem [resolvable:$true] %s24_s22 }
   0x3   :  { %s6094_s24 = smov 4  }
   0x4   :  { %30 = dma.hbm_to_vmem [thread:$0]  %s23_s20, 1024, %s25_s22, [#allocation3], %s6093_s23, %s6093_s23, %s6094_s24  }
   0x5   :  { %6088 = dma.done.wait [#allocation3], 1024  }
   0x6   :  { %6089 = vsyncadd [#allocation3], 4294966272  ;;  %v5641_v0 = vld [vmem:[%s7342_s1 + $0x38] sm:$0xff]  ;;  %v5640_v4 = vld [vmem:[%s7342_s1 + $0x30] sm:$0xff]  ;;  %s6095_s28 = smov [#allocation5]   ;;  %s4024_s6 = sshll.u32 %s7346_s5, 4  ;;  %s4025_s6 = int_to_ptr.hbm [resolvable:$true] %s4024_s6 }
   0x7   :  { %v5657_v1 = vld [vmem:[%s7342_s1 + $0xb8] sm:$0xff]  ;;  %3296 = vmatpush.bf16.msra.mxu0 %v5641_v0  ;;  %v5656_v5 = vld [vmem:[%s7342_s1 + $0xb0] sm:$0xff]  ;;  %v5639_v8 = vld [vmem:[%s7342_s1 + $0x28] sm:$0xff]  ;;  %s4022_s29 = sshll.u32 %s6095_s28, 4  ;;  %s4023_s29 = int_to_ptr.vmem [resolvable:$true] %s4022_s29 }
   0x8   :  { %v5649_v2 = vld [vmem:[%s7342_s1 + $0x78] sm:$0xff]  ;;  %3322 = vmatpush.bf16.msra.mxu2 %v5657_v1  ;;  %v5648_v6 = vld [vmem:[%s7342_s1 + $0x70] sm:$0xff]  ;;  %v5655_v9 = vld [vmem:[%s7342_s1 + $0xa8] sm:$0xff] }
   0x9   :  { %v5665_v3 = vld [vmem:[%s7342_s1 + $0xf8] sm:$0xff]  ;;  %3309 = vmatpush.bf16.msra.mxu1 %v5649_v2  ;;  %v5664_v7 = vld [vmem:[%s7342_s1 + $0xf0] sm:$0xff]  ;;  %v5647_v10 = vld [vmem:[%s7342_s1 + $0x68] sm:$0xff] }
   0xa   :  { %3335 = vmatpush.bf16.msra.mxu3 %v5665_v3  ;;  %v5663_v11 = vld [vmem:[%s7342_s1 + $0xe8] sm:$0xff]  ;;  %v5638_v12 = vld [vmem:[%s7342_s1 + $0x20] sm:$0xff]  ;;  %v5637_v16 = vld [vmem:[%s7342_s1 + $0x18] sm:$0xff] }
   0xb   :  { %3297 = vmatpush.bf16.msra.mxu0 %v5640_v4  ;;  %v5654_v13 = vld [vmem:[%s7342_s1 + $0xa0] sm:$0xff]  ;;  %v5653_v17 = vld [vmem:[%s7342_s1 + $0x98] sm:$0xff]  ;;  %v5636_v21 = vld [vmem:[%s7342_s1 + $0x10] sm:$0xff] }
   0xc   :  { %3323 = vmatpush.bf16.msra.mxu2 %v5656_v5  ;;  %v5646_v14 = vld [vmem:[%s7342_s1 + $0x60] sm:$0xff]  ;;  %v5645_v18 = vld [vmem:[%s7342_s1 + $0x58] sm:$0xff]  ;;  %v5652_v22 = vld [vmem:[%s7342_s1 + $0x90] sm:$0xff] }
   0xd   :  { %3310 = vmatpush.bf16.msra.mxu1 %v5648_v6  ;;  %v5662_v15 = vld [vmem:[%s7342_s1 + $0xe0] sm:$0xff]  ;;  %v5661_v19 = vld [vmem:[%s7342_s1 + $0xd8] sm:$0xff]  ;;  %v5644_v23 = vld [vmem:[%s7342_s1 + $0x50] sm:$0xff] }
   0xe   :  { %3336 = vmatpush.bf16.msra.mxu3 %v5664_v7  ;;  %v37_v20 = vld [vmem:[%s7341_s0] sm:$0xff]  ;;  %v5660_v24 = vld [vmem:[%s7342_s1 + $0xd0] sm:$0xff]  ;;  %v5635_v25 = vld [vmem:[%s7342_s1 + $0x8] sm:$0xff] }
   0xf   :  { %3298 = vmatpush.bf16.msra.mxu0 %v5639_v8  ;;  %833 = vst [vmem:[#allocation1] ss:$9 sm:$0xff] %v37_v20  ;;  %v5651_v26 = vld [vmem:[%s7342_s1 + $0x88] sm:$0xff]  ;;  %v5634_v29 = vld [vmem:[%s7342_s1] sm:$0xff]  ;;  %v5673_v31 = vld [vmem:[%s7342_s1 + $0x138] sm:$0xff] }
  0x10   :  { %3324 = vmatpush.bf16.msra.mxu2 %v5655_v9  ;;  %v5643_v27 = vld [vmem:[%s7342_s1 + $0x48] sm:$0xff]  ;;  %v5650_v30 = vld [vmem:[%s7342_s1 + $0x80] sm:$0xff]  ;;  %v5689_v32 = vld [vmem:[%s7342_s1 + $0x1b8] sm:$0xff] }
  0x11   :  { %3311 = vmatpush.bf16.msra.mxu1 %v5647_v10  ;;  %v5659_v28 = vld [vmem:[%s7342_s1 + $0xc8] sm:$0xff]  ;;  %v5642_v33 = vld [vmem:[%s7342_s1 + $0x40] sm:$0xff]  ;;  %v5681_v35 = vld [vmem:[%s7342_s1 + $0x178] sm:$0xff] }
  0x12   :  { %3337 = vmatpush.bf16.msra.mxu3 %v5663_v11  ;;  %v5658_v34 = vld [vmem:[%s7342_s1 + $0xc0] sm:$0xff]  ;;  %v5697_v36 = vld [vmem:[%s7342_s1 + $0x1f8] sm:$0xff]  ;;  %v5672_v37 = vld [vmem:[%s7342_s1 + $0x130] sm:$0xff] }
  0x13   :  { %3299 = vmatpush.bf16.msra.mxu0 %v5638_v12  ;;  %v5688_v38 = vld [vmem:[%s7342_s1 + $0x1b0] sm:$0xff]  ;;  %v5671_v45 = vld [vmem:[%s7342_s1 + $0x128] sm:$0xff]  ;;  %v5670_v49 = vld [vmem:[%s7342_s1 + $0x120] sm:$0xff] }
  0x14   :  { %3325 = vmatpush.bf16.msra.mxu2 %v5654_v13  ;;  %v5680_v41 = vld [vmem:[%s7342_s1 + $0x170] sm:$0xff]  ;;  %v5687_v46 = vld [vmem:[%s7342_s1 + $0x1a8] sm:$0xff]  ;;  %v5686_v50 = vld [vmem:[%s7342_s1 + $0x1a0] sm:$0xff] }
  0x15   :  { %3312 = vmatpush.bf16.msra.mxu1 %v5646_v14  ;;  %v5696_v42 = vld [vmem:[%s7342_s1 + $0x1f0] sm:$0xff]  ;;  %v5679_v47 = vld [vmem:[%s7342_s1 + $0x168] sm:$0xff]  ;;  %v5678_v51 = vld [vmem:[%s7342_s1 + $0x160] sm:$0xff] }
  0x16   :  { %3338 = vmatpush.bf16.msra.mxu3 %v5662_v15  ;;  %v836_v39 = vld [vmem:[#allocation1 + $0x12] sm:$0xff]  ;;  %v834_v40 = vld [vmem:[#allocation1] sm:$0xff]  ;;  %v835_v44 = vld [vmem:[#allocation1 + $0x9] sm:$0xff] }
  0x17   :  { %3300 = vmatpush.bf16.msra.mxu0 %v5637_v16  ;;  %v837_v43 = vld [vmem:[#allocation1 + $0x1b] sm:$0xff]  ;;  %v5695_v48 = vld [vmem:[%s7342_s1 + $0x1e8] sm:$0xff]  ;;  %v5668_v57 = vld [vmem:[%s7342_s1 + $0x110] sm:$0xff] }
  0x18   :  { %3326 = vmatpush.bf16.msra.mxu2 %v5653_v17  ;;  %v5694_v52 = vld [vmem:[%s7342_s1 + $0x1e0] sm:$0xff]  ;;  %v5669_v53 = vld [vmem:[%s7342_s1 + $0x118] sm:$0xff]  ;;  %v5684_v58 = vld [vmem:[%s7342_s1 + $0x190] sm:$0xff] }
  0x19   :  { %3313 = vmatpush.bf16.msra.mxu1 %v5645_v18  ;;  %v5685_v54 = vld [vmem:[%s7342_s1 + $0x198] sm:$0xff]  ;;  %v5676_v59 = vld [vmem:[%s7342_s1 + $0x150] sm:$0xff]  ;;  %v838_v62 = vld [vmem:[#allocation1 + $0x24] sm:$0xff] }
  0x1a   :  { %3339 = vmatpush.bf16.msra.mxu3 %v5661_v19  ;;  %v5677_v55 = vld [vmem:[%s7342_s1 + $0x158] sm:$0xff]  ;;  %v5692_v60 = vld [vmem:[%s7342_s1 + $0x1d0] sm:$0xff]  ;;  %v38_v1 = vld [vmem:[%s7341_s0 + $0x8] sm:$0xff] }
  0x1b   :  { %3301 = vmatpush.bf16.msra.mxu0 %v5636_v21  ;;  %v5693_v56 = vld [vmem:[%s7342_s1 + $0x1d8] sm:$0xff]  ;;  %v839_v0 = vld [vmem:[#allocation1 + $0x2d] sm:$0xff]  ;;  %v5666_v6 = vld [vmem:[%s7342_s1 + $0x100] sm:$0xff] }
  0x1c   :  { %3327 = vmatpush.bf16.msra.mxu2 %v5652_v22  ;;  %v840_v61 = vld [vmem:[#allocation1 + $0x36] sm:$0xff]  ;;  %v841_v63 = vld [vmem:[#allocation1 + $0x3f] sm:$0xff]  ;;  %v5667_v2 = vld [vmem:[%s7342_s1 + $0x108] sm:$0xff] }
  0x1d   :  { %3314 = vmatpush.bf16.msra.mxu1 %v5644_v23  ;;  %v5683_v3 = vld [vmem:[%s7342_s1 + $0x188] sm:$0xff]  ;;  %843 = vst [vmem:[#allocation1] ss:$9 sm:$0xff] %v38_v1  ;;  %v5682_v7 = vld [vmem:[%s7342_s1 + $0x180] sm:$0xff]  ;;  %v5705_v8 = vld [vmem:[%s7342_s1 + $0x238] sm:$0xff] }
  0x1e   :  { %3340 = vmatpush.bf16.msra.mxu3 %v5660_v24  ;;  %v5675_v4 = vld [vmem:[%s7342_s1 + $0x148] sm:$0xff]  ;;  %v5721_v9 = vld [vmem:[%s7342_s1 + $0x2b8] sm:$0xff]  ;;  %v5674_v10 = vld [vmem:[%s7342_s1 + $0x140] sm:$0xff] }
  0x1f   :  { %3302 = vmatpush.bf16.msra.mxu0 %v5635_v25  ;;  %v5691_v5 = vld [vmem:[%s7342_s1 + $0x1c8] sm:$0xff]  ;;  %v5690_v11 = vld [vmem:[%s7342_s1 + $0x1c0] sm:$0xff]  ;;  %v5713_v12 = vld [vmem:[%s7342_s1 + $0x278] sm:$0xff] }
  0x20   :  { %3328 = vmatpush.bf16.msra.mxu2 %v5651_v26  ;;  %v5729_v13 = vld [vmem:[%s7342_s1 + $0x2f8] sm:$0xff]  ;;  %v5704_v14 = vld [vmem:[%s7342_s1 + $0x230] sm:$0xff]  ;;  %v5703_v18 = vld [vmem:[%s7342_s1 + $0x228] sm:$0xff] }
  0x21   :  { %3315 = vmatpush.bf16.msra.mxu1 %v5643_v27  ;;  %v5720_v15 = vld [vmem:[%s7342_s1 + $0x2b0] sm:$0xff]  ;;  %v5719_v19 = vld [vmem:[%s7342_s1 + $0x2a8] sm:$0xff]  ;;  %v5702_v22 = vld [vmem:[%s7342_s1 + $0x220] sm:$0xff] }
  0x22   :  { %3341 = vmatpush.bf16.msra.mxu3 %v5659_v28  ;;  %v5712_v16 = vld [vmem:[%s7342_s1 + $0x270] sm:$0xff]  ;;  %v5711_v20 = vld [vmem:[%s7342_s1 + $0x268] sm:$0xff]  ;;  %v5718_v23 = vld [vmem:[%s7342_s1 + $0x2a0] sm:$0xff] }
  0x23   :  { %3303 = vmatpush.bf16.msra.mxu0 %v5634_v29  ;;  %v5728_v17 = vld [vmem:[%s7342_s1 + $0x2f0] sm:$0xff]  ;;  %v5727_v21 = vld [vmem:[%s7342_s1 + $0x2e8] sm:$0xff]  ;;  %v5710_v24 = vld [vmem:[%s7342_s1 + $0x260] sm:$0xff] }
  0x24   :  { %3329 = vmatpush.bf16.msra.mxu2 %v5650_v30  ;;  %v5726_v25 = vld [vmem:[%s7342_s1 + $0x2e0] sm:$0xff]  ;;  %v5701_v26 = vld [vmem:[%s7342_s1 + $0x218] sm:$0xff]  ;;  %v5700_v30 = vld [vmem:[%s7342_s1 + $0x210] sm:$0xff] }
  0x25   :  { %3316 = vmatpush.bf16.msra.mxu1 %v5642_v33  ;;  %v5717_v27 = vld [vmem:[%s7342_s1 + $0x298] sm:$0xff]  ;;  %v5724_v33 = vld [vmem:[%s7342_s1 + $0x2d0] sm:$0xff] }
  0x26   :  { %3342 = vmatpush.bf16.msra.mxu3 %v5658_v34  ;;  %3304 = vmatmul.bf16.vlgmr.msra.gmra.mxu0 %v834_v40  ;;  %v5709_v28 = vld [vmem:[%s7342_s1 + $0x258] sm:$0xff]  ;;  %v5699_v34 = vld [vmem:[%s7342_s1 + $0x208] sm:$0xff] }
  0x27   :  { %3348 = vmatpush.bf16.msrb.mxu0 %v5673_v31  ;;  %3330 = vmatmul.bf16.vlgmr.msra.gmra.mxu2 %v836_v39  ;;  %v5725_v29 = vld [vmem:[%s7342_s1 + $0x2d8] sm:$0xff]  ;;  %v5716_v31 = vld [vmem:[%s7342_s1 + $0x290] sm:$0xff]  ;;  %v5714_v39 = vld [vmem:[%s7342_s1 + $0x280] sm:$0xff] }
  0x28   :  { %3374 = vmatpush.bf16.msrb.mxu2 %v5689_v32  ;;  %3317 = vmatmul.bf16.vlgmr.msra.gmra.mxu1 %v835_v44  ;;  %v5708_v32 = vld [vmem:[%s7342_s1 + $0x250] sm:$0xff]  ;;  %v5737_v40 = vld [vmem:[%s7342_s1 + $0x338] sm:$0xff] }
  0x29   :  { %3361 = vmatpush.bf16.msrb.mxu1 %v5681_v35  ;;  %3343 = vmatmul.bf16.vlgmr.msra.gmra.mxu3 %v837_v43  ;;  %v5715_v35 = vld [vmem:[%s7342_s1 + $0x288] sm:$0xff]  ;;  %v5722_v43 = vld [vmem:[%s7342_s1 + $0x2c0] sm:$0xff]  ;;  %v5745_v44 = vld [vmem:[%s7342_s1 + $0x378] sm:$0xff] }
  0x2a   :  { %3387 = vmatpush.bf16.msrb.mxu3 %v5697_v36  ;;  %v5707_v36 = vld [vmem:[%s7342_s1 + $0x248] sm:$0xff]  ;;  %v5757_v1 = vld [vmem:[%s7342_s1 + $0x3d8] sm:$0xff] }
  0x2b   :  { %3349 = vmatpush.bf16.msrb.mxu0 %v5672_v37  ;;  %v5723_v37 = vld [vmem:[%s7342_s1 + $0x2c8] sm:$0xff] }
  0x2c   :  { %3375 = vmatpush.bf16.msrb.mxu2 %v5688_v38  ;;  %v5698_v38 = vld [vmem:[%s7342_s1 + $0x200] sm:$0xff] }
  0x2d   :  { %3362 = vmatpush.bf16.msrb.mxu1 %v5680_v41  ;;  %v5753_v41 = vld [vmem:[%s7342_s1 + $0x3b8] sm:$0xff] }
  0x2e   :  { %3388 = vmatpush.bf16.msrb.mxu3 %v5696_v42  ;;  %v5706_v42 = vld [vmem:[%s7342_s1 + $0x240] sm:$0xff] }
  0x2f   :  { %3350 = vmatpush.bf16.msrb.mxu0 %v5671_v45  ;;  %v844_v45 = vld [vmem:[#allocation1] sm:$0xff] }
  0x30   :  { %3376 = vmatpush.bf16.msrb.mxu2 %v5687_v46  ;;  %v846_v46 = vld [vmem:[#allocation1 + $0x12] sm:$0xff] }
  0x31   :  { %3363 = vmatpush.bf16.msrb.mxu1 %v5679_v47  ;;  %v5761_v47 = vld [vmem:[%s7342_s1 + $0x3f8] sm:$0xff] }
  0x32   :  { %3389 = vmatpush.bf16.msrb.mxu3 %v5695_v48  ;;  %v845_v48 = vld [vmem:[#allocation1 + $0x9] sm:$0xff] }
  0x33   :  { %3351 = vmatpush.bf16.msrb.mxu0 %v5670_v49  ;;  %v847_v49 = vld [vmem:[#allocation1 + $0x1b] sm:$0xff] }
  0x34   :  { %3377 = vmatpush.bf16.msrb.mxu2 %v5686_v50  ;;  %v5736_v50 = vld [vmem:[%s7342_s1 + $0x330] sm:$0xff] }
  0x35   :  { %3364 = vmatpush.bf16.msrb.mxu1 %v5678_v51  ;;  %v5752_v51 = vld [vmem:[%s7342_s1 + $0x3b0] sm:$0xff] }
  0x36   :  { %3390 = vmatpush.bf16.msrb.mxu3 %v5694_v52  ;;  %v5744_v52 = vld [vmem:[%s7342_s1 + $0x370] sm:$0xff] }
  0x37   :  { %3352 = vmatpush.bf16.msrb.mxu0 %v5669_v53  ;;  %v5760_v53 = vld [vmem:[%s7342_s1 + $0x3f0] sm:$0xff] }
  0x38   :  { %3378 = vmatpush.bf16.msrb.mxu2 %v5685_v54  ;;  %v5735_v54 = vld [vmem:[%s7342_s1 + $0x328] sm:$0xff] }
  0x39   :  { %3365 = vmatpush.bf16.msrb.mxu1 %v5677_v55  ;;  %v5751_v55 = vld [vmem:[%s7342_s1 + $0x3a8] sm:$0xff] }
  0x3a   :  { %3391 = vmatpush.bf16.msrb.mxu3 %v5693_v56  ;;  %v5743_v56 = vld [vmem:[%s7342_s1 + $0x368] sm:$0xff] }
  0x3b   :  { %3353 = vmatpush.bf16.msrb.mxu0 %v5668_v57  ;;  %v5759_v57 = vld [vmem:[%s7342_s1 + $0x3e8] sm:$0xff] }
  0x3c   :  { %3379 = vmatpush.bf16.msrb.mxu2 %v5684_v58  ;;  %v5734_v58 = vld [vmem:[%s7342_s1 + $0x320] sm:$0xff] }
  0x3d   :  { %3366 = vmatpush.bf16.msrb.mxu1 %v5676_v59  ;;  %v5750_v59 = vld [vmem:[%s7342_s1 + $0x3a0] sm:$0xff] }
  0x3e   :  { %3392 = vmatpush.bf16.msrb.mxu3 %v5692_v60  ;;  %v5742_v60 = vld [vmem:[%s7342_s1 + $0x360] sm:$0xff] }
  0x3f   :  { %3354 = vmatpush.bf16.msrb.mxu0 %v5667_v2  ;;  %v5732_v2 = vld [vmem:[%s7342_s1 + $0x310] sm:$0xff] }
  0x40   :  { %3380 = vmatpush.bf16.msrb.mxu2 %v5683_v3  ;;  %v5748_v3 = vld [vmem:[%s7342_s1 + $0x390] sm:$0xff] }
  0x41   :  { %3367 = vmatpush.bf16.msrb.mxu1 %v5675_v4  ;;  %v5740_v4 = vld [vmem:[%s7342_s1 + $0x350] sm:$0xff] }
  0x42   :  { %3393 = vmatpush.bf16.msrb.mxu3 %v5691_v5  ;;  %v5756_v5 = vld [vmem:[%s7342_s1 + $0x3d0] sm:$0xff] }
  0x43   :  { %3355 = vmatpush.bf16.msrb.mxu0 %v5666_v6  ;;  %v5731_v6 = vld [vmem:[%s7342_s1 + $0x308] sm:$0xff] }
  0x44   :  { %3381 = vmatpush.bf16.msrb.mxu2 %v5682_v7  ;;  %v5747_v7 = vld [vmem:[%s7342_s1 + $0x388] sm:$0xff] }
  0x45   :  { %3368 = vmatpush.bf16.msrb.mxu1 %v5674_v10  ;;  %v849_v10 = vld [vmem:[#allocation1 + $0x2d] sm:$0xff] }
  0x46   :  { %3394 = vmatpush.bf16.msrb.mxu3 %v5690_v11  ;;  %3356 = vmatmul.bf16.vlgmr.msrb.gmra.mxu0 %v838_v62  ;;  %v5733_v62 = vld [vmem:[%s7342_s1 + $0x318] sm:$0xff] }
  0x47   :  { %3400 = vmatpush.bf16.msra.mxu0 %v5705_v8  ;;  %3382 = vmatmul.bf16.vlgmr.msrb.gmra.mxu2 %v840_v61  ;;  %v5758_v61 = vld [vmem:[%s7342_s1 + $0x3e0] sm:$0xff] }
  0x48   :  { %3426 = vmatpush.bf16.msra.mxu2 %v5721_v9  ;;  %3369 = vmatmul.bf16.vlgmr.msrb.gmra.mxu1 %v839_v0  ;;  %v5741_v0 = vld [vmem:[%s7342_s1 + $0x358] sm:$0xff]  ;;  %v848_v8 = vld [vmem:[#allocation1 + $0x24] sm:$0xff] }
  0x49   :  { %3413 = vmatpush.bf16.msra.mxu1 %v5713_v12  ;;  %3395 = vmatmul.bf16.vlgmr.msrb.gmra.mxu3 %v841_v63  ;;  %v5749_v63 = vld [vmem:[%s7342_s1 + $0x398] sm:$0xff]  ;;  %v39_v12 = vld [vmem:[%s7341_s0 + $0x10] sm:$0xff] }
  0x4a   :  { %3439 = vmatpush.bf16.msra.mxu3 %v5729_v13  ;;  %v850_v9 = vld [vmem:[#allocation1 + $0x36] sm:$0xff]  ;;  %v851_v11 = vld [vmem:[#allocation1 + $0x3f] sm:$0xff]  ;;  %v5739_v13 = vld [vmem:[%s7342_s1 + $0x348] sm:$0xff] }
  0x4b   :  { %3401 = vmatpush.bf16.msra.mxu0 %v5704_v14  ;;  %853 = vst [vmem:[#allocation1] ss:$9 sm:$0xff] %v39_v12  ;;  %v5755_v14 = vld [vmem:[%s7342_s1 + $0x3c8] sm:$0xff]  ;;  %v5813_v12 = vld [vmem:[%s7342_s1 + $0x598] sm:$0xff] }
  0x4c   :  { %3427 = vmatpush.bf16.msra.mxu2 %v5720_v15  ;;  %v5730_v15 = vld [vmem:[%s7342_s1 + $0x300] sm:$0xff] }
  0x4d   :  { %3414 = vmatpush.bf16.msra.mxu1 %v5712_v16  ;;  %v5746_v16 = vld [vmem:[%s7342_s1 + $0x380] sm:$0xff] }
  0x4e   :  { %3440 = vmatpush.bf16.msra.mxu3 %v5728_v17  ;;  %v5769_v17 = vld [vmem:[%s7342_s1 + $0x438] sm:$0xff] }
  0x4f   :  { %3402 = vmatpush.bf16.msra.mxu0 %v5703_v18  ;;  %v5785_v18 = vld [vmem:[%s7342_s1 + $0x4b8] sm:$0xff] }
  0x50   :  { %3428 = vmatpush.bf16.msra.mxu2 %v5719_v19  ;;  %v5738_v19 = vld [vmem:[%s7342_s1 + $0x340] sm:$0xff] }
  0x51   :  { %3415 = vmatpush.bf16.msra.mxu1 %v5711_v20  ;;  %v5754_v20 = vld [vmem:[%s7342_s1 + $0x3c0] sm:$0xff] }
  0x52   :  { %3441 = vmatpush.bf16.msra.mxu3 %v5727_v21  ;;  %v5777_v21 = vld [vmem:[%s7342_s1 + $0x478] sm:$0xff] }
  0x53   :  { %3403 = vmatpush.bf16.msra.mxu0 %v5702_v22  ;;  %v5793_v22 = vld [vmem:[%s7342_s1 + $0x4f8] sm:$0xff] }
  0x54   :  { %3429 = vmatpush.bf16.msra.mxu2 %v5718_v23  ;;  %v5768_v23 = vld [vmem:[%s7342_s1 + $0x430] sm:$0xff] }
  0x55   :  { %3416 = vmatpush.bf16.msra.mxu1 %v5710_v24  ;;  %v5784_v24 = vld [vmem:[%s7342_s1 + $0x4b0] sm:$0xff] }
  0x56   :  { %3442 = vmatpush.bf16.msra.mxu3 %v5726_v25  ;;  %v5776_v25 = vld [vmem:[%s7342_s1 + $0x470] sm:$0xff] }
  0x57   :  { %3404 = vmatpush.bf16.msra.mxu0 %v5701_v26  ;;  %v5792_v26 = vld [vmem:[%s7342_s1 + $0x4f0] sm:$0xff] }
  0x58   :  { %3430 = vmatpush.bf16.msra.mxu2 %v5717_v27  ;;  %v5767_v27 = vld [vmem:[%s7342_s1 + $0x428] sm:$0xff] }
  0x59   :  { %3417 = vmatpush.bf16.msra.mxu1 %v5709_v28  ;;  %v5783_v28 = vld [vmem:[%s7342_s1 + $0x4a8] sm:$0xff] }
  0x5a   :  { %3443 = vmatpush.bf16.msra.mxu3 %v5725_v29  ;;  %v5775_v29 = vld [vmem:[%s7342_s1 + $0x468] sm:$0xff] }
  0x5b   :  { %3405 = vmatpush.bf16.msra.mxu0 %v5700_v30  ;;  %v5791_v30 = vld [vmem:[%s7342_s1 + $0x4e8] sm:$0xff] }
  0x5c   :  { %3431 = vmatpush.bf16.msra.mxu2 %v5716_v31  ;;  %v5766_v31 = vld [vmem:[%s7342_s1 + $0x420] sm:$0xff] }
  0x5d   :  { %3418 = vmatpush.bf16.msra.mxu1 %v5708_v32  ;;  %v5782_v32 = vld [vmem:[%s7342_s1 + $0x4a0] sm:$0xff] }
  0x5e   :  { %3444 = vmatpush.bf16.msra.mxu3 %v5724_v33  ;;  %v5774_v33 = vld [vmem:[%s7342_s1 + $0x460] sm:$0xff] }
  0x5f   :  { %3406 = vmatpush.bf16.msra.mxu0 %v5699_v34  ;;  %v5790_v34 = vld [vmem:[%s7342_s1 + $0x4e0] sm:$0xff] }
  0x60   :  { %3432 = vmatpush.bf16.msra.mxu2 %v5715_v35  ;;  %v5765_v35 = vld [vmem:[%s7342_s1 + $0x418] sm:$0xff] }
  0x61   :  { %3419 = vmatpush.bf16.msra.mxu1 %v5707_v36  ;;  %v5781_v36 = vld [vmem:[%s7342_s1 + $0x498] sm:$0xff] }
  0x62   :  { %3445 = vmatpush.bf16.msra.mxu3 %v5723_v37  ;;  %v5773_v37 = vld [vmem:[%s7342_s1 + $0x458] sm:$0xff] }
  0x63   :  { %3407 = vmatpush.bf16.msra.mxu0 %v5698_v38  ;;  %v5789_v38 = vld [vmem:[%s7342_s1 + $0x4d8] sm:$0xff] }
  0x64   :  { %3433 = vmatpush.bf16.msra.mxu2 %v5714_v39  ;;  %v5764_v39 = vld [vmem:[%s7342_s1 + $0x410] sm:$0xff] }
  0x65   :  { %3420 = vmatpush.bf16.msra.mxu1 %v5706_v42  ;;  %v5788_v42 = vld [vmem:[%s7342_s1 + $0x4d0] sm:$0xff] }
  0x66   :  { %3446 = vmatpush.bf16.msra.mxu3 %v5722_v43  ;;  %3408 = vmatmul.bf16.vlgmr.msra.gmra.mxu0 %v844_v45  ;;  %v5763_v43 = vld [vmem:[%s7342_s1 + $0x408] sm:$0xff] }
  0x67   :  { %3452 = vmatpush.bf16.msrb.mxu0 %v5737_v40  ;;  %3434 = vmatmul.bf16.vlgmr.msra.gmra.mxu2 %v846_v46  ;;  %v5780_v40 = vld [vmem:[%s7342_s1 + $0x490] sm:$0xff]  ;;  %v5771_v45 = vld [vmem:[%s7342_s1 + $0x448] sm:$0xff] }
  0x68   :  { %3478 = vmatpush.bf16.msrb.mxu2 %v5753_v41  ;;  %3421 = vmatmul.bf16.vlgmr.msra.gmra.mxu1 %v845_v48  ;;  %v5772_v41 = vld [vmem:[%s7342_s1 + $0x450] sm:$0xff]  ;;  %v5787_v46 = vld [vmem:[%s7342_s1 + $0x4c8] sm:$0xff]  ;;  %v5778_v48 = vld [vmem:[%s7342_s1 + $0x480] sm:$0xff] }
  0x69   :  { %3465 = vmatpush.bf16.msrb.mxu1 %v5745_v44  ;;  %3447 = vmatmul.bf16.vlgmr.msra.gmra.mxu3 %v847_v49  ;;  %v5779_v44 = vld [vmem:[%s7342_s1 + $0x488] sm:$0xff]  ;;  %v5801_v49 = vld [vmem:[%s7342_s1 + $0x538] sm:$0xff] }
  0x6a   :  { %3491 = vmatpush.bf16.msrb.mxu3 %v5761_v47  ;;  %v5762_v47 = vld [vmem:[%s7342_s1 + $0x400] sm:$0xff] }
  0x6b   :  { %3453 = vmatpush.bf16.msrb.mxu0 %v5736_v50  ;;  %v5817_v50 = vld [vmem:[%s7342_s1 + $0x5b8] sm:$0xff] }
  0x6c   :  { %3479 = vmatpush.bf16.msrb.mxu2 %v5752_v51  ;;  %v5770_v51 = vld [vmem:[%s7342_s1 + $0x440] sm:$0xff] }
  0x6d   :  { %3466 = vmatpush.bf16.msrb.mxu1 %v5744_v52  ;;  %v5786_v52 = vld [vmem:[%s7342_s1 + $0x4c0] sm:$0xff] }
  0x6e   :  { %3492 = vmatpush.bf16.msrb.mxu3 %v5760_v53  ;;  %v5809_v53 = vld [vmem:[%s7342_s1 + $0x578] sm:$0xff] }
  0x6f   :  { %3454 = vmatpush.bf16.msrb.mxu0 %v5735_v54  ;;  %v854_v54 = vld [vmem:[#allocation1] sm:$0xff] }
  0x70   :  { %3480 = vmatpush.bf16.msrb.mxu2 %v5751_v55  ;;  %v856_v55 = vld [vmem:[#allocation1 + $0x12] sm:$0xff] }
  0x71   :  { %3467 = vmatpush.bf16.msrb.mxu1 %v5743_v56  ;;  %v5825_v56 = vld [vmem:[%s7342_s1 + $0x5f8] sm:$0xff] }
  0x72   :  { %3493 = vmatpush.bf16.msrb.mxu3 %v5759_v57  ;;  %v855_v57 = vld [vmem:[#allocation1 + $0x9] sm:$0xff] }
  0x73   :  { %3455 = vmatpush.bf16.msrb.mxu0 %v5734_v58  ;;  %v857_v58 = vld [vmem:[#allocation1 + $0x1b] sm:$0xff] }
  0x74   :  { %3481 = vmatpush.bf16.msrb.mxu2 %v5750_v59  ;;  %v5800_v59 = vld [vmem:[%s7342_s1 + $0x530] sm:$0xff] }
  0x75   :  { %3468 = vmatpush.bf16.msrb.mxu1 %v5742_v60  ;;  %v5816_v60 = vld [vmem:[%s7342_s1 + $0x5b0] sm:$0xff] }
  0x76   :  { %3494 = vmatpush.bf16.msrb.mxu3 %v5758_v61  ;;  %v5808_v61 = vld [vmem:[%s7342_s1 + $0x570] sm:$0xff] }
  0x77   :  { %3456 = vmatpush.bf16.msrb.mxu0 %v5733_v62  ;;  %v5824_v62 = vld [vmem:[%s7342_s1 + $0x5f0] sm:$0xff] }
  0x78   :  { %3482 = vmatpush.bf16.msrb.mxu2 %v5749_v63  ;;  %v5799_v63 = vld [vmem:[%s7342_s1 + $0x528] sm:$0xff] }
  0x79   :  { %3469 = vmatpush.bf16.msrb.mxu1 %v5741_v0  ;;  %v5815_v0 = vld [vmem:[%s7342_s1 + $0x5a8] sm:$0xff] }
  0x7a   :  { %3495 = vmatpush.bf16.msrb.mxu3 %v5757_v1  ;;  %v5807_v1 = vld [vmem:[%s7342_s1 + $0x568] sm:$0xff] }
  0x7b   :  { %3457 = vmatpush.bf16.msrb.mxu0 %v5732_v2  ;;  %v5823_v2 = vld [vmem:[%s7342_s1 + $0x5e8] sm:$0xff] }
  0x7c   :  { %3483 = vmatpush.bf16.msrb.mxu2 %v5748_v3  ;;  %v6038_v3 = vld [vmem:[%s7343_s2] ss:$0 sm:$0xff] }
  0x7d   :  { %3470 = vmatpush.bf16.msrb.mxu1 %v5740_v4  ;;  %v5798_v4 = vld [vmem:[%s7342_s1 + $0x520] sm:$0xff] }
  0x7e   :  { %3496 = vmatpush.bf16.msrb.mxu3 %v5756_v5  ;;  %v5814_v5 = vld [vmem:[%s7342_s1 + $0x5a0] sm:$0xff] }
  0x7f   :  { %3458 = vmatpush.bf16.msrb.mxu0 %v5731_v6 }
  0x80   :  { %3484 = vmatpush.bf16.msrb.mxu2 %v5747_v7  ;;  %v5806_v7 = vld [vmem:[%s7342_s1 + $0x560] sm:$0xff] }
  0x81   :  { %3471 = vmatpush.bf16.msrb.mxu1 %v5739_v13 }
  0x82   :  { %3497 = vmatpush.bf16.msrb.mxu3 %v5755_v14  ;;  %v5805_v14 = vld [vmem:[%s7342_s1 + $0x558] sm:$0xff] }
  0x83   :  { %3459 = vmatpush.bf16.msrb.mxu0 %v5730_v15  ;;  %v5821_v15 = vld [vmem:[%s7342_s1 + $0x5d8] sm:$0xff] }
  0x84   :  { %3485 = vmatpush.bf16.msrb.mxu2 %v5746_v16 }
  0x85   :  { %3472 = vmatpush.bf16.msrb.mxu1 %v5738_v19 }
  0x86   :  { %3498 = vmatpush.bf16.msrb.mxu3 %v5754_v20  ;;  %3460 = vmatmul.bf16.vlgmr.msrb.gmra.mxu0 %v848_v8  ;;  %v5822_v8 = vld [vmem:[%s7342_s1 + $0x5e0] sm:$0xff] }
  0x87   :  { %3504 = vmatpush.bf16.msra.mxu0 %v5769_v17  ;;  %3486 = vmatmul.bf16.vlgmr.msrb.gmra.mxu2 %v850_v9  ;;  %v5796_v17 = vld [vmem:[%s7342_s1 + $0x510] sm:$0xff] }
  0x88   :  { %3530 = vmatpush.bf16.msra.mxu2 %v5785_v18  ;;  %3473 = vmatmul.bf16.vlgmr.msrb.gmra.mxu1 %v849_v10  ;;  %v5812_v18 = vld [vmem:[%s7342_s1 + $0x590] sm:$0xff] }
  0x89   :  { %3517 = vmatpush.bf16.msra.mxu1 %v5777_v21  ;;  %3499 = vmatmul.bf16.vlgmr.msrb.gmra.mxu3 %v851_v11  ;;  %v5797_v11 = vld [vmem:[%s7342_s1 + $0x518] sm:$0xff] }
  0x8a   :  { %3543 = vmatpush.bf16.msra.mxu3 %v5793_v22  ;;  %v5804_v22 = vld [vmem:[%s7342_s1 + $0x550] sm:$0xff] }
  0x8b   :  { %3505 = vmatpush.bf16.msra.mxu0 %v5768_v23  ;;  %v5820_v23 = vld [vmem:[%s7342_s1 + $0x5d0] sm:$0xff] }
  0x8c   :  { %3531 = vmatpush.bf16.msra.mxu2 %v5784_v24  ;;  %v5795_v24 = vld [vmem:[%s7342_s1 + $0x508] sm:$0xff] }
  0x8d   :  { %3518 = vmatpush.bf16.msra.mxu1 %v5776_v25 }
  0x8e   :  { %3544 = vmatpush.bf16.msra.mxu3 %v5792_v26  ;;  %v5811_v26 = vld [vmem:[%s7342_s1 + $0x588] sm:$0xff] }
  0x8f   :  { %3506 = vmatpush.bf16.msra.mxu0 %v5767_v27  ;;  %v858_v27 = vld [vmem:[#allocation1 + $0x24] sm:$0xff] }
  0x90   :  { %3532 = vmatpush.bf16.msra.mxu2 %v5783_v28  ;;  %v860_v28 = vld [vmem:[#allocation1 + $0x36] sm:$0xff] }
  0x91   :  { %3519 = vmatpush.bf16.msra.mxu1 %v5775_v29 }
  0x92   :  { %3545 = vmatpush.bf16.msra.mxu3 %v5791_v30  ;;  %v859_v30 = vld [vmem:[#allocation1 + $0x2d] sm:$0xff] }
  0x93   :  { %3507 = vmatpush.bf16.msra.mxu0 %v5766_v31  ;;  %v861_v31 = vld [vmem:[#allocation1 + $0x3f] sm:$0xff] }
  0x94   :  { %3533 = vmatpush.bf16.msra.mxu2 %v5782_v32  ;;  %v40_v32 = vld [vmem:[%s7341_s0 + $0x18] sm:$0xff] }
  0x95   :  { %3520 = vmatpush.bf16.msra.mxu1 %v5774_v33  ;;  %863 = vst [vmem:[#allocation1] ss:$9 sm:$0xff] %v40_v32  ;;  %v5803_v33 = vld [vmem:[%s7342_s1 + $0x548] sm:$0xff]  ;;  %v5888_v32 = vld [vmem:[%s7342_s1 + $0x7f0] sm:$0xff] }
  0x96   :  { %3546 = vmatpush.bf16.msra.mxu3 %v5790_v34  ;;  %v5819_v34 = vld [vmem:[%s7342_s1 + $0x5c8] sm:$0xff] }
  0x97   :  { %3508 = vmatpush.bf16.msra.mxu0 %v5765_v35 }
  0x98   :  { %3534 = vmatpush.bf16.msra.mxu2 %v5781_v36  ;;  %v5794_v36 = vld [vmem:[%s7342_s1 + $0x500] sm:$0xff] }
  0x99   :  { %3521 = vmatpush.bf16.msra.mxu1 %v5773_v37  ;;  %v5810_v37 = vld [vmem:[%s7342_s1 + $0x580] sm:$0xff] }
  0x9a   :  { %3547 = vmatpush.bf16.msra.mxu3 %v5789_v38  ;;  %v5833_v38 = vld [vmem:[%s7342_s1 + $0x638] sm:$0xff] }
  0x9b   :  { %3509 = vmatpush.bf16.msra.mxu0 %v5764_v39  ;;  %v5849_v39 = vld [vmem:[%s7342_s1 + $0x6b8] sm:$0xff] }
  0x9c   :  { %3535 = vmatpush.bf16.msra.mxu2 %v5780_v40 }
  0x9d   :  { %3522 = vmatpush.bf16.msra.mxu1 %v5772_v41  ;;  %v5802_v41 = vld [vmem:[%s7342_s1 + $0x540] sm:$0xff] }
  0x9e   :  { %3548 = vmatpush.bf16.msra.mxu3 %v5788_v42  ;;  %v5818_v42 = vld [vmem:[%s7342_s1 + $0x5c0] sm:$0xff] }
  0x9f   :  { %3510 = vmatpush.bf16.msra.mxu0 %v5763_v43  ;;  %v5841_v43 = vld [vmem:[%s7342_s1 + $0x678] sm:$0xff] }
  0xa0   :  { %3536 = vmatpush.bf16.msra.mxu2 %v5779_v44  ;;  %v5857_v44 = vld [vmem:[%s7342_s1 + $0x6f8] sm:$0xff] }
  0xa1   :  { %3523 = vmatpush.bf16.msra.mxu1 %v5771_v45  ;;  %v5832_v45 = vld [vmem:[%s7342_s1 + $0x630] sm:$0xff] }
  0xa2   :  { %3549 = vmatpush.bf16.msra.mxu3 %v5787_v46  ;;  %v5848_v46 = vld [vmem:[%s7342_s1 + $0x6b0] sm:$0xff] }
  0xa3   :  { %3511 = vmatpush.bf16.msra.mxu0 %v5762_v47  ;;  %v3305_v6 = vpop.f32.mrf.mxu0  ;;  %v5840_v47 = vld [vmem:[%s7342_s1 + $0x670] sm:$0xff] }
  0xa4   :  { %3537 = vmatpush.bf16.msra.mxu2 %v5778_v48  ;;  %v3306_v9 = vadd.f32 %v6038_v3, %v3305_v6  ;;  %v5856_v48 = vld [vmem:[%s7342_s1 + $0x6f0] sm:$0xff] }
  0xa5   :  { %3524 = vmatpush.bf16.msra.mxu1 %v5770_v51  ;;  %v3318_v10 = vpop.f32.mrf.mxu1  ;;  %v5839_v51 = vld [vmem:[%s7342_s1 + $0x668] sm:$0xff]  ;;  %v5828_v3 = vld [vmem:[%s7342_s1 + $0x610] sm:$0xff] }
  0xa6   :  { %3550 = vmatpush.bf16.msra.mxu3 %v5786_v52  ;;  %3512 = vmatmul.bf16.vlgmr.msra.gmra.mxu0 %v854_v54  ;;  %v3319_v13 = vadd.f32 %v3318_v10, %v3306_v9  ;;  %v5855_v52 = vld [vmem:[%s7342_s1 + $0x6e8] sm:$0xff]  ;;  %v5846_v54 = vld [vmem:[%s7342_s1 + $0x6a0] sm:$0xff]  ;;  %v5852_v9 = vld [vmem:[%s7342_s1 + $0x6d0] sm:$0xff] }
  0xa7   :  { %3556 = vmatpush.bf16.msrb.mxu0 %v5801_v49  ;;  %3538 = vmatmul.bf16.vlgmr.msra.gmra.mxu2 %v856_v55  ;;  %v5831_v49 = vld [vmem:[%s7342_s1 + $0x628] sm:$0xff] }
  0xa8   :  { %3582 = vmatpush.bf16.msrb.mxu2 %v5817_v50  ;;  %3525 = vmatmul.bf16.vlgmr.msra.gmra.mxu1 %v855_v57  ;;  %v5847_v50 = vld [vmem:[%s7342_s1 + $0x6a8] sm:$0xff]  ;;  %v5838_v57 = vld [vmem:[%s7342_s1 + $0x660] sm:$0xff] }
  0xa9   :  { %3569 = vmatpush.bf16.msrb.mxu1 %v5809_v53  ;;  %3551 = vmatmul.bf16.vlgmr.msra.gmra.mxu3 %v857_v58  ;;  %v5830_v53 = vld [vmem:[%s7342_s1 + $0x620] sm:$0xff] }
  0xaa   :  { %3595 = vmatpush.bf16.msrb.mxu3 %v5825_v56  ;;  %v3331_v16 = vpop.f32.mrf.mxu2  ;;  %v5854_v58 = vld [vmem:[%s7342_s1 + $0x6e0] sm:$0xff] }
  0xab   :  { %3557 = vmatpush.bf16.msrb.mxu0 %v5800_v59  ;;  %v3332_v19 = vadd.f32 %v3331_v16, %v3319_v13  ;;  %v3307_v21 = vpop.f32.mrf.mxu0  ;;  %v5835_v13 = vld [vmem:[%s7342_s1 + $0x648] sm:$0xff]  ;;  %v5826_v16 = vld [vmem:[%s7342_s1 + $0x600] sm:$0xff] }
  0xac   :  { %3583 = vmatpush.bf16.msrb.mxu2 %v5816_v60  ;;  %v3344_v20 = vpop.f32.mrf.mxu3  ;;  %v5834_v21 = vld [vmem:[%s7342_s1 + $0x640] sm:$0xff] }
  0xad   :  { %3570 = vmatpush.bf16.msrb.mxu1 %v5808_v61  ;;  %v3345_v25 = vadd.f32 %v3344_v20, %v3332_v19  ;;  %v3320_v29 = vpop.f32.mrf.mxu1  ;;  %v5829_v61 = vld [vmem:[%s7342_s1 + $0x618] sm:$0xff] }
  0xae   :  { %3596 = vmatpush.bf16.msrb.mxu3 %v5824_v62  ;;  %v5845_v62 = vld [vmem:[%s7342_s1 + $0x698] sm:$0xff]  ;;  %v5864_v29 = vld [vmem:[%s7342_s1 + $0x730] sm:$0xff] }
  0xaf   :  { %3558 = vmatpush.bf16.msrb.mxu0 %v5799_v63  ;;  %v5837_v63 = vld [vmem:[%s7342_s1 + $0x658] sm:$0xff] }
  0xb0   :  { %3584 = vmatpush.bf16.msrb.mxu2 %v5815_v0  ;;  %v5853_v0 = vld [vmem:[%s7342_s1 + $0x6d8] sm:$0xff] }
  0xb1   :  { %3571 = vmatpush.bf16.msrb.mxu1 %v5807_v1  ;;  %v5865_v19 = vld [vmem:[%s7342_s1 + $0x738] sm:$0xff] }
  0xb2   :  { %3597 = vmatpush.bf16.msrb.mxu3 %v5823_v2  ;;  %v3333_v35 = vpop.f32.mrf.mxu2  ;;  %v5881_v20 = vld [vmem:[%s7342_s1 + $0x7b8] sm:$0xff] }
  0xb3   :  { %3559 = vmatpush.bf16.msrb.mxu0 %v5798_v4  ;;  %v5844_v4 = vld [vmem:[%s7342_s1 + $0x690] sm:$0xff]  ;;  %v5871_v35 = vld [vmem:[%s7342_s1 + $0x768] sm:$0xff] }
  0xb4   :  { %3585 = vmatpush.bf16.msrb.mxu2 %v5814_v5  ;;  %v3346_v40 = vpop.f32.mrf.mxu3 }
  0xb5   :  { %3572 = vmatpush.bf16.msrb.mxu1 %v5806_v7  ;;  %v5878_v40 = vld [vmem:[%s7342_s1 + $0x7a0] sm:$0xff] }
  0xb6   :  { %3598 = vmatpush.bf16.msrb.mxu3 %v5822_v8  ;;  %v5836_v8 = vld [vmem:[%s7342_s1 + $0x650] sm:$0xff] }
  0xb7   :  { %3560 = vmatpush.bf16.msrb.mxu0 %v5797_v11  ;;  %v5827_v11 = vld [vmem:[%s7342_s1 + $0x608] sm:$0xff] }
  0xb8   :  { %3586 = vmatpush.bf16.msrb.mxu2 %v5813_v12  ;;  %v5843_v12 = vld [vmem:[%s7342_s1 + $0x688] sm:$0xff] }
  0xb9   :  { %3573 = vmatpush.bf16.msrb.mxu1 %v5805_v14  ;;  %v5851_v14 = vld [vmem:[%s7342_s1 + $0x6c8] sm:$0xff] }
  0xba   :  { %3599 = vmatpush.bf16.msrb.mxu3 %v5821_v15 }
  0xbb   :  { %3561 = vmatpush.bf16.msrb.mxu0 %v5796_v17  ;;  %v5842_v17 = vld [vmem:[%s7342_s1 + $0x680] sm:$0xff] }
  0xbc   :  { %3587 = vmatpush.bf16.msrb.mxu2 %v5812_v18 }
  0xbd   :  { %3574 = vmatpush.bf16.msrb.mxu1 %v5804_v22  ;;  %v5850_v22 = vld [vmem:[%s7342_s1 + $0x6c0] sm:$0xff] }
  0xbe   :  { %3600 = vmatpush.bf16.msrb.mxu3 %v5820_v23  ;;  %v5873_v23 = vld [vmem:[%s7342_s1 + $0x778] sm:$0xff] }
  0xbf   :  { %3562 = vmatpush.bf16.msrb.mxu0 %v5795_v24  ;;  %v864_v24 = vld [vmem:[#allocation1] sm:$0xff] }
  0xc0   :  { %3588 = vmatpush.bf16.msrb.mxu2 %v5811_v26  ;;  %v5889_v26 = vld [vmem:[%s7342_s1 + $0x7f8] sm:$0xff] }
  0xc1   :  { %3575 = vmatpush.bf16.msrb.mxu1 %v5803_v33  ;;  %v5863_v33 = vld [vmem:[%s7342_s1 + $0x728] sm:$0xff] }
  0xc2   :  { %3601 = vmatpush.bf16.msrb.mxu3 %v5819_v34  ;;  %v5879_v34 = vld [vmem:[%s7342_s1 + $0x7a8] sm:$0xff] }
  0xc3   :  { %3563 = vmatpush.bf16.msrb.mxu0 %v5794_v36  ;;  %v3357_v55 = vpop.f32.mrf.mxu0  ;;  %v5887_v36 = vld [vmem:[%s7342_s1 + $0x7e8] sm:$0xff] }
  0xc4   :  { %3589 = vmatpush.bf16.msrb.mxu2 %v5810_v37  ;;  %v3358_v56 = vadd.f32 %v3357_v55, %v3345_v25  ;;  %v866_v25 = vld [vmem:[#allocation1 + $0x12] sm:$0xff] }
  0xc5   :  { %3576 = vmatpush.bf16.msrb.mxu1 %v5802_v41  ;;  %v3370_v59 = vpop.f32.mrf.mxu1  ;;  %v5876_v55 = vld [vmem:[%s7342_s1 + $0x790] sm:$0xff] }
  0xc6   :  { %3602 = vmatpush.bf16.msrb.mxu3 %v5818_v42  ;;  %3564 = vmatmul.bf16.vlgmr.msrb.gmra.mxu0 %v858_v27  ;;  %v3371_v60 = vadd.f32 %v3370_v59, %v3358_v56  ;;  %v865_v27 = vld [vmem:[#allocation1 + $0x9] sm:$0xff] }
  0xc7   :  { %3608 = vmatpush.bf16.msra.mxu0 %v5833_v38  ;;  %3590 = vmatmul.bf16.vlgmr.msrb.gmra.mxu2 %v860_v28  ;;  %v867_v28 = vld [vmem:[#allocation1 + $0x1b] sm:$0xff]  ;;  %v5859_v59 = vld [vmem:[%s7342_s1 + $0x708] sm:$0xff] }
  0xc8   :  { %3634 = vmatpush.bf16.msra.mxu2 %v5849_v39  ;;  %3577 = vmatmul.bf16.vlgmr.msrb.gmra.mxu1 %v859_v30  ;;  %v5880_v30 = vld [vmem:[%s7342_s1 + $0x7b0] sm:$0xff]  ;;  %v5862_v39 = vld [vmem:[%s7342_s1 + $0x720] sm:$0xff] }
  0xc9   :  { %3621 = vmatpush.bf16.msra.mxu1 %v5841_v43  ;;  %3603 = vmatmul.bf16.vlgmr.msrb.gmra.mxu3 %v861_v31  ;;  %v5872_v31 = vld [vmem:[%s7342_s1 + $0x770] sm:$0xff]  ;;  %v5870_v43 = vld [vmem:[%s7342_s1 + $0x760] sm:$0xff] }
  0xca   :  { %3647 = vmatpush.bf16.msra.mxu3 %v5857_v44  ;;  %v3383_v1 = vpop.f32.mrf.mxu2  ;;  %v5886_v44 = vld [vmem:[%s7342_s1 + $0x7e0] sm:$0xff] }
  0xcb   :  { %3609 = vmatpush.bf16.msra.mxu0 %v5832_v45  ;;  %v3384_v2 = vadd.f32 %v3383_v1, %v3371_v60  ;;  %v3359_v6 = vpop.f32.mrf.mxu0  ;;  %v5861_v45 = vld [vmem:[%s7342_s1 + $0x718] sm:$0xff]  ;;  %v5875_v60 = vld [vmem:[%s7342_s1 + $0x788] sm:$0xff] }
  0xcc   :  { %3635 = vmatpush.bf16.msra.mxu2 %v5848_v46  ;;  %v3396_v5 = vpop.f32.mrf.mxu3  ;;  %v5877_v46 = vld [vmem:[%s7342_s1 + $0x798] sm:$0xff]  ;;  %v5858_v6 = vld [vmem:[%s7342_s1 + $0x700] sm:$0xff] }
  0xcd   :  { %3622 = vmatpush.bf16.msra.mxu1 %v5840_v47  ;;  %v3397_v7 = vadd.f32 %v3396_v5, %v3384_v2  ;;  %v3372_v10 = vpop.f32.mrf.mxu1  ;;  %v41_v2 = vld [vmem:[%s7341_s0 + $0x20] sm:$0xff] }
  0xce   :  { %3648 = vmatpush.bf16.msra.mxu3 %v5856_v48  ;;  %v5866_v10 = vld [vmem:[%s7342_s1 + $0x740] sm:$0xff] }
  0xcf   :  { %3610 = vmatpush.bf16.msra.mxu0 %v5831_v49  ;;  %v5869_v49 = vld [vmem:[%s7342_s1 + $0x758] sm:$0xff] }
  0xd0   :  { %3636 = vmatpush.bf16.msra.mxu2 %v5847_v50  ;;  %v5885_v50 = vld [vmem:[%s7342_s1 + $0x7d8] sm:$0xff] }
  0xd1   :  { %3623 = vmatpush.bf16.msra.mxu1 %v5839_v51 }
  0xd2   :  { %3649 = vmatpush.bf16.msra.mxu3 %v5855_v52  ;;  %v3385_v15 = vpop.f32.mrf.mxu2 }
  0xd3   :  { %3611 = vmatpush.bf16.msra.mxu0 %v5830_v53  ;;  %v5912_v15 = vld [vmem:[%s7342_s1 + $0x8b0] sm:$0xff] }
  0xd4   :  { %3637 = vmatpush.bf16.msra.mxu2 %v5846_v54  ;;  %v3398_v18 = vpop.f32.mrf.mxu3  ;;  %v5860_v54 = vld [vmem:[%s7342_s1 + $0x710] sm:$0xff] }
  0xd5   :  { %3624 = vmatpush.bf16.msra.mxu1 %v5838_v57  ;;  %v5868_v57 = vld [vmem:[%s7342_s1 + $0x750] sm:$0xff]  ;;  %v5895_v18 = vld [vmem:[%s7342_s1 + $0x828] sm:$0xff] }
  0xd6   :  { %3650 = vmatpush.bf16.msra.mxu3 %v5854_v58  ;;  %v5884_v58 = vld [vmem:[%s7342_s1 + $0x7d0] sm:$0xff] }
  0xd7   :  { %3612 = vmatpush.bf16.msra.mxu0 %v5829_v61  ;;  %v868_v61 = vld [vmem:[#allocation1 + $0x24] sm:$0xff] }
  0xd8   :  { %3638 = vmatpush.bf16.msra.mxu2 %v5845_v62  ;;  %v870_v62 = vld [vmem:[#allocation1 + $0x36] sm:$0xff] }
  0xd9   :  { %3625 = vmatpush.bf16.msra.mxu1 %v5837_v63  ;;  %v869_v63 = vld [vmem:[#allocation1 + $0x2d] sm:$0xff] }
  0xda   :  { %3651 = vmatpush.bf16.msra.mxu3 %v5853_v0  ;;  %v871_v0 = vld [vmem:[#allocation1 + $0x3f] sm:$0xff] }
  0xdb   :  { %3613 = vmatpush.bf16.msra.mxu0 %v5828_v3  ;;  %873 = vst [vmem:[#allocation1] ss:$9 sm:$0xff] %v41_v2  ;;  %v5867_v3 = vld [vmem:[%s7342_s1 + $0x748] sm:$0xff] }
  0xdc   :  { %3639 = vmatpush.bf16.msra.mxu2 %v5844_v4  ;;  %v5883_v4 = vld [vmem:[%s7342_s1 + $0x7c8] sm:$0xff] }
  0xdd   :  { %3626 = vmatpush.bf16.msra.mxu1 %v5836_v8  ;;  %v5897_v8 = vld [vmem:[%s7342_s1 + $0x838] sm:$0xff]  ;;  %v5927_v2 = vld [vmem:[%s7342_s1 + $0x928] sm:$0xff] }
  0xde   :  { %3652 = vmatpush.bf16.msra.mxu3 %v5852_v9  ;;  %v5913_v9 = vld [vmem:[%s7342_s1 + $0x8b8] sm:$0xff] }
  0xdf   :  { %3614 = vmatpush.bf16.msra.mxu0 %v5827_v11  ;;  %v5882_v11 = vld [vmem:[%s7342_s1 + $0x7c0] sm:$0xff] }
  0xe0   :  { %3640 = vmatpush.bf16.msra.mxu2 %v5843_v12  ;;  %v5905_v12 = vld [vmem:[%s7342_s1 + $0x878] sm:$0xff] }
  0xe1   :  { %3627 = vmatpush.bf16.msra.mxu1 %v5835_v13  ;;  %v5921_v13 = vld [vmem:[%s7342_s1 + $0x8f8] sm:$0xff] }
  0xe2   :  { %3653 = vmatpush.bf16.msra.mxu3 %v5851_v14  ;;  %v5896_v14 = vld [vmem:[%s7342_s1 + $0x830] sm:$0xff] }
  0xe3   :  { %3615 = vmatpush.bf16.msra.mxu0 %v5826_v16  ;;  %v3409_v37 = vpop.f32.mrf.mxu0  ;;  %v5904_v16 = vld [vmem:[%s7342_s1 + $0x870] sm:$0xff] }
  0xe4   :  { %3641 = vmatpush.bf16.msra.mxu2 %v5842_v17  ;;  %v3410_v38 = vadd.f32 %v3409_v37, %v3397_v7  ;;  %v5874_v7 = vld [vmem:[%s7342_s1 + $0x780] sm:$0xff]  ;;  %v5920_v17 = vld [vmem:[%s7342_s1 + $0x8f0] sm:$0xff] }
  0xe5   :  { %3628 = vmatpush.bf16.msra.mxu1 %v5834_v21  ;;  %v3422_v41 = vpop.f32.mrf.mxu1  ;;  %v5919_v21 = vld [vmem:[%s7342_s1 + $0x8e8] sm:$0xff] }
  0xe6   :  { %3654 = vmatpush.bf16.msra.mxu3 %v5850_v22  ;;  %3616 = vmatmul.bf16.vlgmr.msra.gmra.mxu0 %v864_v24  ;;  %v3423_v42 = vadd.f32 %v3422_v41, %v3410_v38  ;;  %v5894_v24 = vld [vmem:[%s7342_s1 + $0x820] sm:$0xff] }
  0xe7   :  { %3660 = vmatpush.bf16.msrb.mxu0 %v5865_v19  ;;  %3642 = vmatmul.bf16.vlgmr.msra.gmra.mxu2 %v866_v25  ;;  %v5911_v19 = vld [vmem:[%s7342_s1 + $0x8a8] sm:$0xff]  ;;  %v5910_v25 = vld [vmem:[%s7342_s1 + $0x8a0] sm:$0xff] }
  0xe8   :  { %3686 = vmatpush.bf16.msrb.mxu2 %v5881_v20  ;;  %3629 = vmatmul.bf16.vlgmr.msra.gmra.mxu1 %v865_v27  ;;  %v5903_v20 = vld [vmem:[%s7342_s1 + $0x868] sm:$0xff] }
  0xe9   :  { %3673 = vmatpush.bf16.msrb.mxu1 %v5873_v23  ;;  %3655 = vmatmul.bf16.vlgmr.msra.gmra.mxu3 %v867_v28  ;;  %v5902_v28 = vld [vmem:[%s7342_s1 + $0x860] sm:$0xff] }
  0xea   :  { %3699 = vmatpush.bf16.msrb.mxu3 %v5889_v26  ;;  %v3435_v47 = vpop.f32.mrf.mxu2 }
  0xeb   :  { %3661 = vmatpush.bf16.msrb.mxu0 %v5864_v29  ;;  %v3436_v48 = vadd.f32 %v3435_v47, %v3423_v42  ;;  %v3411_v52 = vpop.f32.mrf.mxu0  ;;  %v5918_v29 = vld [vmem:[%s7342_s1 + $0x8e0] sm:$0xff]  ;;  %v5900_v42 = vld [vmem:[%s7342_s1 + $0x850] sm:$0xff]  ;;  %v5899_v47 = vld [vmem:[%s7342_s1 + $0x848] sm:$0xff] }
  0xec   :  { %3687 = vmatpush.bf16.msrb.mxu2 %v5880_v30  ;;  %v3448_v51 = vpop.f32.mrf.mxu3  ;;  %v5893_v30 = vld [vmem:[%s7342_s1 + $0x818] sm:$0xff] }
  0xed   :  { %3674 = vmatpush.bf16.msrb.mxu1 %v5872_v31  ;;  %v6876_v53 = vadd.f32 %v3448_v51, %v3436_v48  ;;  %v3424_v56 = vpop.f32.mrf.mxu1  ;;  %v5909_v31 = vld [vmem:[%s7342_s1 + $0x898] sm:$0xff]  ;;  %v5915_v48 = vld [vmem:[%s7342_s1 + $0x8c8] sm:$0xff]  ;;  %v5906_v51 = vld [vmem:[%s7342_s1 + $0x880] sm:$0xff] }
  0xee   :  { %3700 = vmatpush.bf16.msrb.mxu3 %v5888_v32  ;;  %v5929_v52 = vld [vmem:[%s7342_s1 + $0x938] sm:$0xff] }
  0xef   :  { %3662 = vmatpush.bf16.msrb.mxu0 %v5863_v33  ;;  %v5937_v56 = vld [vmem:[%s7342_s1 + $0x978] sm:$0xff] }
  0xf0   :  { %3688 = vmatpush.bf16.msrb.mxu2 %v5879_v34  ;;  %v5901_v34 = vld [vmem:[%s7342_s1 + $0x858] sm:$0xff] }
  0xf1   :  { %3675 = vmatpush.bf16.msrb.mxu1 %v5871_v35  ;;  %v5917_v35 = vld [vmem:[%s7342_s1 + $0x8d8] sm:$0xff] }
  0xf2   :  { %3701 = vmatpush.bf16.msrb.mxu3 %v5887_v36  ;;  %v3437_v1 = vpop.f32.mrf.mxu2 }
  0xf3   :  { %3663 = vmatpush.bf16.msrb.mxu0 %v5862_v39  ;;  %v5892_v39 = vld [vmem:[%s7342_s1 + $0x810] sm:$0xff] }
  0xf4   :  { %3689 = vmatpush.bf16.msrb.mxu2 %v5878_v40  ;;  %v3450_v5 = vpop.f32.mrf.mxu3  ;;  %v5908_v40 = vld [vmem:[%s7342_s1 + $0x890] sm:$0xff] }
  0xf5   :  { %3676 = vmatpush.bf16.msrb.mxu1 %v5870_v43  ;;  %v5916_v43 = vld [vmem:[%s7342_s1 + $0x8d0] sm:$0xff]  ;;  %v5951_v5 = vld [vmem:[%s7342_s1 + $0x9e8] sm:$0xff] }
  0xf6   :  { %3702 = vmatpush.bf16.msrb.mxu3 %v5886_v44  ;;  %v5891_v44 = vld [vmem:[%s7342_s1 + $0x808] sm:$0xff]  ;;  %v5952_v1 = vld [vmem:[%s7342_s1 + $0x9f0] sm:$0xff] }
  0xf7   :  { %3664 = vmatpush.bf16.msrb.mxu0 %v5861_v45  ;;  %v5907_v45 = vld [vmem:[%s7342_s1 + $0x888] sm:$0xff] }
  0xf8   :  { %3690 = vmatpush.bf16.msrb.mxu2 %v5877_v46 }
  0xf9   :  { %3677 = vmatpush.bf16.msrb.mxu1 %v5869_v49 }
  0xfa   :  { %3703 = vmatpush.bf16.msrb.mxu3 %v5885_v50  ;;  %v5890_v50 = vld [vmem:[%s7342_s1 + $0x800] sm:$0xff] }
  0xfb   :  { %3665 = vmatpush.bf16.msrb.mxu0 %v5860_v54  ;;  %v5898_v54 = vld [vmem:[%s7342_s1 + $0x840] sm:$0xff] }
  0xfc   :  { %3691 = vmatpush.bf16.msrb.mxu2 %v5876_v55  ;;  %v5914_v55 = vld [vmem:[%s7342_s1 + $0x8c0] sm:$0xff] }
  0xfd   :  { %3678 = vmatpush.bf16.msrb.mxu1 %v5868_v57  ;;  %v874_v57 = vld [vmem:[#allocation1] sm:$0xff] }
  0xfe   :  { %3704 = vmatpush.bf16.msrb.mxu3 %v5884_v58  ;;  %v876_v58 = vld [vmem:[#allocation1 + $0x12] sm:$0xff] }
  0xff   :  { %3666 = vmatpush.bf16.msrb.mxu0 %v5859_v59  ;;  %v5953_v59 = vld [vmem:[%s7342_s1 + $0x9f8] sm:$0xff] }
 0x100   :  { %3692 = vmatpush.bf16.msrb.mxu2 %v5875_v60  ;;  %v875_v60 = vld [vmem:[#allocation1 + $0x9] sm:$0xff] }
 0x101   :  { %3679 = vmatpush.bf16.msrb.mxu1 %v5867_v3  ;;  %v5943_v3 = vld [vmem:[%s7342_s1 + $0x9a8] sm:$0xff] }
 0x102   :  { %3705 = vmatpush.bf16.msrb.mxu3 %v5883_v4  ;;  %v5935_v4 = vld [vmem:[%s7342_s1 + $0x968] sm:$0xff] }
 0x103   :  { %3667 = vmatpush.bf16.msrb.mxu0 %v5858_v6  ;;  %v3461_v22 = vpop.f32.mrf.mxu0 }
 0x104   :  { %3693 = vmatpush.bf16.msrb.mxu2 %v5874_v7  ;;  %v3462_v23 = vadd.f32 %v3461_v22, %v6876_v53  ;;  %v5945_v53 = vld [vmem:[%s7342_s1 + $0x9b8] sm:$0xff] }
 0x105   :  { %3680 = vmatpush.bf16.msrb.mxu1 %v5866_v10  ;;  %v3474_v26 = vpop.f32.mrf.mxu1 }
 0x106   :  { %3706 = vmatpush.bf16.msrb.mxu3 %v5882_v11  ;;  %3668 = vmatmul.bf16.vlgmr.msrb.gmra.mxu0 %v868_v61  ;;  %v3475_v27 = vadd.f32 %v3474_v26, %v3462_v23  ;;  %v877_v61 = vld [vmem:[#allocation1 + $0x1b] sm:$0xff]  ;;  %v5924_v23 = vld [vmem:[%s7342_s1 + $0x910] sm:$0xff] }
 0x107   :  { %3712 = vmatpush.bf16.msra.mxu0 %v5897_v8  ;;  %3694 = vmatmul.bf16.vlgmr.msrb.gmra.mxu2 %v870_v62  ;;  %v5928_v62 = vld [vmem:[%s7342_s1 + $0x930] sm:$0xff]  ;;  %v5926_v8 = vld [vmem:[%s7342_s1 + $0x920] sm:$0xff] }
 0x108   :  { %3738 = vmatpush.bf16.msra.mxu2 %v5913_v9  ;;  %3681 = vmatmul.bf16.vlgmr.msrb.gmra.mxu1 %v869_v63  ;;  %v5944_v63 = vld [vmem:[%s7342_s1 + $0x9b0] sm:$0xff]  ;;  %v5942_v9 = vld [vmem:[%s7342_s1 + $0x9a0] sm:$0xff] }
 0x109   :  { %3725 = vmatpush.bf16.msra.mxu1 %v5905_v12  ;;  %3707 = vmatmul.bf16.vlgmr.msrb.gmra.mxu3 %v871_v0  ;;  %v5936_v0 = vld [vmem:[%s7342_s1 + $0x970] sm:$0xff]  ;;  %v5934_v12 = vld [vmem:[%s7342_s1 + $0x960] sm:$0xff] }
 0x10a   :  { %3751 = vmatpush.bf16.msra.mxu3 %v5921_v13  ;;  %v3487_v32 = vpop.f32.mrf.mxu2  ;;  %v5950_v13 = vld [vmem:[%s7342_s1 + $0x9e0] sm:$0xff]  ;;  %v5932_v26 = vld [vmem:[%s7342_s1 + $0x950] sm:$0xff] }
 0x10b   :  { %3713 = vmatpush.bf16.msra.mxu0 %v5896_v14  ;;  %v3488_v33 = vadd.f32 %v3487_v32, %v3475_v27  ;;  %v3463_v37 = vpop.f32.mrf.mxu0  ;;  %v5925_v14 = vld [vmem:[%s7342_s1 + $0x918] sm:$0xff]  ;;  %v5948_v27 = vld [vmem:[%s7342_s1 + $0x9d0] sm:$0xff] }
 0x10c   :  { %3739 = vmatpush.bf16.msra.mxu2 %v5912_v15  ;;  %v3500_v36 = vpop.f32.mrf.mxu3  ;;  %v5941_v15 = vld [vmem:[%s7342_s1 + $0x998] sm:$0xff]  ;;  %v879_v32 = vld [vmem:[#allocation1 + $0x2d] sm:$0xff] }
 0x10d   :  { %3726 = vmatpush.bf16.msra.mxu1 %v5904_v16  ;;  %v3501_v38 = vadd.f32 %v3500_v36, %v3488_v33  ;;  %v3476_v41 = vpop.f32.mrf.mxu1  ;;  %v881_v33 = vld [vmem:[#allocation1 + $0x3f] sm:$0xff]  ;;  %v5931_v36 = vld [vmem:[%s7342_s1 + $0x948] sm:$0xff] }
 0x10e   :  { %3752 = vmatpush.bf16.msra.mxu3 %v5920_v17  ;;  %v5947_v37 = vld [vmem:[%s7342_s1 + $0x9c8] sm:$0xff]  ;;  %v5961_v41 = vld [vmem:[%s7342_s1 + $0xa38] sm:$0xff] }
 0x10f   :  { %3714 = vmatpush.bf16.msra.mxu0 %v5895_v18  ;;  %v5933_v18 = vld [vmem:[%s7342_s1 + $0x958] sm:$0xff] }
 0x110   :  { %3740 = vmatpush.bf16.msra.mxu2 %v5911_v19  ;;  %v5949_v19 = vld [vmem:[%s7342_s1 + $0x9d8] sm:$0xff] }
 0x111   :  { %3727 = vmatpush.bf16.msra.mxu1 %v5903_v20 }
 0x112   :  { %3753 = vmatpush.bf16.msra.mxu3 %v5919_v21  ;;  %v3489_v46 = vpop.f32.mrf.mxu2 }
 0x113   :  { %3715 = vmatpush.bf16.msra.mxu0 %v5894_v24  ;;  %v5940_v24 = vld [vmem:[%s7342_s1 + $0x990] sm:$0xff]  ;;  %v5985_v46 = vld [vmem:[%s7342_s1 + $0xaf8] sm:$0xff] }
 0x114   :  { %3741 = vmatpush.bf16.msra.mxu2 %v5910_v25  ;;  %v3502_v49 = vpop.f32.mrf.mxu3 }
 0x115   :  { %3728 = vmatpush.bf16.msra.mxu1 %v5902_v28  ;;  %v5923_v28 = vld [vmem:[%s7342_s1 + $0x908] sm:$0xff]  ;;  %v5968_v49 = vld [vmem:[%s7342_s1 + $0xa70] sm:$0xff] }
 0x116   :  { %3754 = vmatpush.bf16.msra.mxu3 %v5918_v29  ;;  %v5939_v29 = vld [vmem:[%s7342_s1 + $0x988] sm:$0xff] }
 0x117   :  { %3716 = vmatpush.bf16.msra.mxu0 %v5893_v30  ;;  %v878_v30 = vld [vmem:[#allocation1 + $0x24] sm:$0xff] }
 0x118   :  { %3742 = vmatpush.bf16.msra.mxu2 %v5909_v31  ;;  %v880_v31 = vld [vmem:[#allocation1 + $0x36] sm:$0xff] }
 0x119   :  { %3729 = vmatpush.bf16.msra.mxu1 %v5901_v34 }
 0x11a   :  { %3755 = vmatpush.bf16.msra.mxu3 %v5917_v35  ;;  %v42_v35 = vld [vmem:[%s7341_s0 + $0x28] sm:$0xff] }
 0x11b   :  { %3717 = vmatpush.bf16.msra.mxu0 %v5892_v39  ;;  %883 = vst [vmem:[#allocation1] ss:$9 sm:$0xff] %v42_v35  ;;  %v5922_v39 = vld [vmem:[%s7342_s1 + $0x900] sm:$0xff]  ;;  %v5991_v35 = vld [vmem:[%s7342_s1 + $0xb28] sm:$0xff] }
 0x11c   :  { %3743 = vmatpush.bf16.msra.mxu2 %v5908_v40  ;;  %v5938_v40 = vld [vmem:[%s7342_s1 + $0x980] sm:$0xff] }
 0x11d   :  { %3730 = vmatpush.bf16.msra.mxu1 %v5900_v42  ;;  %v5977_v42 = vld [vmem:[%s7342_s1 + $0xab8] sm:$0xff] }
 0x11e   :  { %3756 = vmatpush.bf16.msra.mxu3 %v5916_v43  ;;  %v5930_v43 = vld [vmem:[%s7342_s1 + $0x940] sm:$0xff] }
 0x11f   :  { %3718 = vmatpush.bf16.msra.mxu0 %v5891_v44  ;;  %v5946_v44 = vld [vmem:[%s7342_s1 + $0x9c0] sm:$0xff] }
 0x120   :  { %3744 = vmatpush.bf16.msra.mxu2 %v5907_v45  ;;  %v5969_v45 = vld [vmem:[%s7342_s1 + $0xa78] sm:$0xff] }
 0x121   :  { %3731 = vmatpush.bf16.msra.mxu1 %v5899_v47  ;;  %v5960_v47 = vld [vmem:[%s7342_s1 + $0xa30] sm:$0xff] }
 0x122   :  { %3757 = vmatpush.bf16.msra.mxu3 %v5915_v48  ;;  %v5976_v48 = vld [vmem:[%s7342_s1 + $0xab0] sm:$0xff] }
 0x123   :  { %3719 = vmatpush.bf16.msra.mxu0 %v5890_v50  ;;  %v3513_v6 = vpop.f32.mrf.mxu0  ;;  %v5984_v50 = vld [vmem:[%s7342_s1 + $0xaf0] sm:$0xff] }
 0x124   :  { %3745 = vmatpush.bf16.msra.mxu2 %v5906_v51  ;;  %v3514_v7 = vadd.f32 %v3513_v6, %v3501_v38  ;;  %v5959_v51 = vld [vmem:[%s7342_s1 + $0xa28] sm:$0xff] }
 0x125   :  { %3732 = vmatpush.bf16.msra.mxu1 %v5898_v54  ;;  %v3526_v10 = vpop.f32.mrf.mxu1  ;;  %v5983_v54 = vld [vmem:[%s7342_s1 + $0xae8] sm:$0xff] }
 0x126   :  { %3758 = vmatpush.bf16.msra.mxu3 %v5914_v55  ;;  %3720 = vmatmul.bf16.vlgmr.msra.gmra.mxu0 %v874_v57  ;;  %v3527_v11 = vadd.f32 %v3526_v10, %v3514_v7  ;;  %v5958_v57 = vld [vmem:[%s7342_s1 + $0xa20] sm:$0xff] }
 0x127   :  { %3764 = vmatpush.bf16.msrb.mxu0 %v5929_v52  ;;  %3746 = vmatmul.bf16.vlgmr.msra.gmra.mxu2 %v876_v58  ;;  %v5975_v52 = vld [vmem:[%s7342_s1 + $0xaa8] sm:$0xff]  ;;  %v5974_v58 = vld [vmem:[%s7342_s1 + $0xaa0] sm:$0xff] }
 0x128   :  { %3790 = vmatpush.bf16.msrb.mxu2 %v5945_v53  ;;  %3733 = vmatmul.bf16.vlgmr.msra.gmra.mxu1 %v875_v60  ;;  %v5967_v53 = vld [vmem:[%s7342_s1 + $0xa68] sm:$0xff] }
 0x129   :  { %3777 = vmatpush.bf16.msrb.mxu1 %v5937_v56  ;;  %3759 = vmatmul.bf16.vlgmr.msra.gmra.mxu3 %v877_v61  ;;  %v5966_v61 = vld [vmem:[%s7342_s1 + $0xa60] sm:$0xff] }
 0x12a   :  { %3803 = vmatpush.bf16.msrb.mxu3 %v5953_v59  ;;  %v3539_v16 = vpop.f32.mrf.mxu2 }
 0x12b   :  { %3765 = vmatpush.bf16.msrb.mxu0 %v5928_v62  ;;  %v3540_v17 = vadd.f32 %v3539_v16, %v3527_v11  ;;  %v3515_v21 = vpop.f32.mrf.mxu0  ;;  %v5982_v62 = vld [vmem:[%s7342_s1 + $0xae0] sm:$0xff]  ;;  %v5964_v11 = vld [vmem:[%s7342_s1 + $0xa50] sm:$0xff]  ;;  %v5963_v16 = vld [vmem:[%s7342_s1 + $0xa48] sm:$0xff] }
 0x12c   :  { %3791 = vmatpush.bf16.msrb.mxu2 %v5944_v63  ;;  %v3552_v20 = vpop.f32.mrf.mxu3  ;;  %v5957_v63 = vld [vmem:[%s7342_s1 + $0xa18] sm:$0xff] }
 0x12d   :  { %3778 = vmatpush.bf16.msrb.mxu1 %v5936_v0  ;;  %v7074_v22 = vadd.f32 %v3552_v20, %v3540_v17  ;;  %v3528_v25 = vpop.f32.mrf.mxu1  ;;  %v5973_v0 = vld [vmem:[%s7342_s1 + $0xa98] sm:$0xff]  ;;  %v5979_v17 = vld [vmem:[%s7342_s1 + $0xac8] sm:$0xff]  ;;  %v5970_v20 = vld [vmem:[%s7342_s1 + $0xa80] sm:$0xff] }
 0x12e   :  { %3804 = vmatpush.bf16.msrb.mxu3 %v5952_v1  ;;  %v5993_v21 = vld [vmem:[%s7342_s1 + $0xb38] sm:$0xff] }
 0x12f   :  { %3766 = vmatpush.bf16.msrb.mxu0 %v5927_v2  ;;  %v6001_v25 = vld [vmem:[%s7342_s1 + $0xb78] sm:$0xff] }
 0x130   :  { %3792 = vmatpush.bf16.msrb.mxu2 %v5943_v3  ;;  %v5965_v3 = vld [vmem:[%s7342_s1 + $0xa58] sm:$0xff] }
 0x131   :  { %3779 = vmatpush.bf16.msrb.mxu1 %v5935_v4  ;;  %v5981_v4 = vld [vmem:[%s7342_s1 + $0xad8] sm:$0xff] }
 0x132   :  { %3805 = vmatpush.bf16.msrb.mxu3 %v5951_v5  ;;  %v3541_v34 = vpop.f32.mrf.mxu2 }
 0x133   :  { %3767 = vmatpush.bf16.msrb.mxu0 %v5926_v8  ;;  %v5956_v8 = vld [vmem:[%s7342_s1 + $0xa10] sm:$0xff] }
 0x134   :  { %3793 = vmatpush.bf16.msrb.mxu2 %v5942_v9  ;;  %v3554_v38 = vpop.f32.mrf.mxu3  ;;  %v5972_v9 = vld [vmem:[%s7342_s1 + $0xa90] sm:$0xff] }
 0x135   :  { %3780 = vmatpush.bf16.msrb.mxu1 %v5934_v12  ;;  %v5980_v12 = vld [vmem:[%s7342_s1 + $0xad0] sm:$0xff]  ;;  %v6015_v38 = vld [vmem:[%s7342_s1 + $0xbe8] sm:$0xff] }
 0x136   :  { %3806 = vmatpush.bf16.msrb.mxu3 %v5950_v13  ;;  %v5955_v13 = vld [vmem:[%s7342_s1 + $0xa08] sm:$0xff]  ;;  %v6016_v34 = vld [vmem:[%s7342_s1 + $0xbf0] sm:$0xff] }
 0x137   :  { %3768 = vmatpush.bf16.msrb.mxu0 %v5925_v14  ;;  %v5971_v14 = vld [vmem:[%s7342_s1 + $0xa88] sm:$0xff] }
 0x138   :  { %3794 = vmatpush.bf16.msrb.mxu2 %v5941_v15 }
 0x139   :  { %3781 = vmatpush.bf16.msrb.mxu1 %v5933_v18 }
 0x13a   :  { %3807 = vmatpush.bf16.msrb.mxu3 %v5949_v19  ;;  %v5954_v19 = vld [vmem:[%s7342_s1 + $0xa00] sm:$0xff] }
 0x13b   :  { %3769 = vmatpush.bf16.msrb.mxu0 %v5924_v23  ;;  %v5962_v23 = vld [vmem:[%s7342_s1 + $0xa40] sm:$0xff] }
 0x13c   :  { %3795 = vmatpush.bf16.msrb.mxu2 %v5940_v24  ;;  %v5978_v24 = vld [vmem:[%s7342_s1 + $0xac0] sm:$0xff] }
 0x13d   :  { %3782 = vmatpush.bf16.msrb.mxu1 %v5932_v26  ;;  %v884_v26 = vld [vmem:[#allocation1] sm:$0xff] }
 0x13e   :  { %3808 = vmatpush.bf16.msrb.mxu3 %v5948_v27  ;;  %v886_v27 = vld [vmem:[#allocation1 + $0x12] sm:$0xff] }
 0x13f   :  { %3770 = vmatpush.bf16.msrb.mxu0 %v5923_v28  ;;  %v6017_v28 = vld [vmem:[%s7342_s1 + $0xbf8] sm:$0xff] }
 0x140   :  { %3796 = vmatpush.bf16.msrb.mxu2 %v5939_v29  ;;  %v885_v29 = vld [vmem:[#allocation1 + $0x9] sm:$0xff] }
 0x141   :  { %3783 = vmatpush.bf16.msrb.mxu1 %v5931_v36  ;;  %v6007_v36 = vld [vmem:[%s7342_s1 + $0xba8] sm:$0xff] }
 0x142   :  { %3809 = vmatpush.bf16.msrb.mxu3 %v5947_v37  ;;  %v5999_v37 = vld [vmem:[%s7342_s1 + $0xb68] sm:$0xff] }
 0x143   :  { %3771 = vmatpush.bf16.msrb.mxu0 %v5922_v39  ;;  %v3565_v55 = vpop.f32.mrf.mxu0 }
 0x144   :  { %3797 = vmatpush.bf16.msrb.mxu2 %v5938_v40  ;;  %v3566_v56 = vadd.f32 %v3565_v55, %v7074_v22  ;;  %v6009_v22 = vld [vmem:[%s7342_s1 + $0xbb8] sm:$0xff] }
 0x145   :  { %3784 = vmatpush.bf16.msrb.mxu1 %v5930_v43  ;;  %v3578_v59 = vpop.f32.mrf.mxu1 }
 0x146   :  { %3810 = vmatpush.bf16.msrb.mxu3 %v5946_v44  ;;  %3772 = vmatmul.bf16.vlgmr.msrb.gmra.mxu0 %v878_v30  ;;  %v3579_v60 = vadd.f32 %v3578_v59, %v3566_v56  ;;  %v887_v30 = vld [vmem:[#allocation1 + $0x1b] sm:$0xff]  ;;  %v5988_v56 = vld [vmem:[%s7342_s1 + $0xb10] sm:$0xff] }
 0x147   :  { %3816 = vmatpush.bf16.msra.mxu0 %v5961_v41  ;;  %3798 = vmatmul.bf16.vlgmr.msrb.gmra.mxu2 %v880_v31  ;;  %v5992_v31 = vld [vmem:[%s7342_s1 + $0xb30] sm:$0xff]  ;;  %v5990_v41 = vld [vmem:[%s7342_s1 + $0xb20] sm:$0xff] }
 0x148   :  { %3842 = vmatpush.bf16.msra.mxu2 %v5977_v42  ;;  %3785 = vmatmul.bf16.vlgmr.msrb.gmra.mxu1 %v879_v32  ;;  %v6008_v32 = vld [vmem:[%s7342_s1 + $0xbb0] sm:$0xff]  ;;  %v6006_v42 = vld [vmem:[%s7342_s1 + $0xba0] sm:$0xff] }
 0x149   :  { %3829 = vmatpush.bf16.msra.mxu1 %v5969_v45  ;;  %3811 = vmatmul.bf16.vlgmr.msrb.gmra.mxu3 %v881_v33  ;;  %v6000_v33 = vld [vmem:[%s7342_s1 + $0xb70] sm:$0xff]  ;;  %v5998_v45 = vld [vmem:[%s7342_s1 + $0xb60] sm:$0xff] }
 0x14a   :  { %3855 = vmatpush.bf16.msra.mxu3 %v5985_v46  ;;  %v3591_v1 = vpop.f32.mrf.mxu2  ;;  %v6014_v46 = vld [vmem:[%s7342_s1 + $0xbe0] sm:$0xff]  ;;  %v5996_v59 = vld [vmem:[%s7342_s1 + $0xb50] sm:$0xff] }
 0x14b   :  { %3817 = vmatpush.bf16.msra.mxu0 %v5960_v47  ;;  %v3592_v2 = vadd.f32 %v3591_v1, %v3579_v60  ;;  %v3567_v6 = vpop.f32.mrf.mxu0  ;;  %v5989_v47 = vld [vmem:[%s7342_s1 + $0xb18] sm:$0xff]  ;;  %v6012_v60 = vld [vmem:[%s7342_s1 + $0xbd0] sm:$0xff] }
 0x14c   :  { %3843 = vmatpush.bf16.msra.mxu2 %v5976_v48  ;;  %v3604_v5 = vpop.f32.mrf.mxu3  ;;  %v6005_v48 = vld [vmem:[%s7342_s1 + $0xb98] sm:$0xff]  ;;  %v889_v1 = vld [vmem:[#allocation1 + $0x2d] sm:$0xff] }
 0x14d   :  { %3830 = vmatpush.bf16.msra.mxu1 %v5968_v49  ;;  %v3605_v7 = vadd.f32 %v3604_v5, %v3592_v2  ;;  %v3580_v10 = vpop.f32.mrf.mxu1  ;;  %v891_v2 = vld [vmem:[#allocation1 + $0x3f] sm:$0xff]  ;;  %v5995_v5 = vld [vmem:[%s7342_s1 + $0xb48] sm:$0xff] }
 0x14e   :  { %3856 = vmatpush.bf16.msra.mxu3 %v5984_v50  ;;  %v6011_v6 = vld [vmem:[%s7342_s1 + $0xbc8] sm:$0xff]  ;;  %v6025_v10 = vld [vmem:[%s7342_s1 + $0xc38] sm:$0xff] }
 0x14f   :  { %3818 = vmatpush.bf16.msra.mxu0 %v5959_v51  ;;  %v5997_v51 = vld [vmem:[%s7342_s1 + $0xb58] sm:$0xff] }
 0x150   :  { %3844 = vmatpush.bf16.msra.mxu2 %v5975_v52  ;;  %v6013_v52 = vld [vmem:[%s7342_s1 + $0xbd8] sm:$0xff] }
 0x151   :  { %3831 = vmatpush.bf16.msra.mxu1 %v5967_v53 }
 0x152   :  { %3857 = vmatpush.bf16.msra.mxu3 %v5983_v54  ;;  %v3593_v15 = vpop.f32.mrf.mxu2 }
 0x153   :  { %3819 = vmatpush.bf16.msra.mxu0 %v5958_v57  ;;  %v6004_v57 = vld [vmem:[%s7342_s1 + $0xb90] sm:$0xff] }
 0x154   :  { %3845 = vmatpush.bf16.msra.mxu2 %v5974_v58  ;;  %v3606_v18 = vpop.f32.mrf.mxu3 }
 0x155   :  { %3832 = vmatpush.bf16.msra.mxu1 %v5966_v61  ;;  %v5987_v61 = vld [vmem:[%s7342_s1 + $0xb08] sm:$0xff] }
 0x156   :  { %3858 = vmatpush.bf16.msra.mxu3 %v5982_v62  ;;  %v6003_v62 = vld [vmem:[%s7342_s1 + $0xb88] sm:$0xff] }
 0x157   :  { %3820 = vmatpush.bf16.msra.mxu0 %v5957_v63  ;;  %v888_v63 = vld [vmem:[#allocation1 + $0x24] sm:$0xff] }
 0x158   :  { %3846 = vmatpush.bf16.msra.mxu2 %v5973_v0  ;;  %v890_v0 = vld [vmem:[#allocation1 + $0x36] sm:$0xff] }
 0x159   :  { %3833 = vmatpush.bf16.msra.mxu1 %v5965_v3 }
 0x15a   :  { %3859 = vmatpush.bf16.msra.mxu3 %v5981_v4  ;;  %v43_v4 = vld [vmem:[%s7341_s0 + $0x30] sm:$0x1] }
 0x15b   :  { %3821 = vmatpush.bf16.msra.mxu0 %v5956_v8  ;;  %893 = vst [vmem:[#allocation1] ss:$9 sm:$0xff] %v43_v4  ;;  %v5986_v8 = vld [vmem:[%s7342_s1 + $0xb00] sm:$0xff] }
 0x15c   :  { %3847 = vmatpush.bf16.msra.mxu2 %v5972_v9  ;;  %v6002_v9 = vld [vmem:[%s7342_s1 + $0xb80] sm:$0xff] }
 0x15d   :  { %3834 = vmatpush.bf16.msra.mxu1 %v5964_v11  ;;  %v5994_v11 = vld [vmem:[%s7342_s1 + $0xb40] sm:$0xff] }
 0x15e   :  { %3860 = vmatpush.bf16.msra.mxu3 %v5980_v12  ;;  %v6010_v12 = vld [vmem:[%s7342_s1 + $0xbc0] sm:$0xff] }
 0x15f   :  { %3822 = vmatpush.bf16.msra.mxu0 %v5955_v13  ;;  %v6024_v13 = vld [vmem:[%s7342_s1 + $0xc30] sm:$0xff] }
 0x160   :  { %3848 = vmatpush.bf16.msra.mxu2 %v5971_v14  ;;  %v6023_v14 = vld [vmem:[%s7342_s1 + $0xc28] sm:$0xff] }
 0x161   :  { %3835 = vmatpush.bf16.msra.mxu1 %v5963_v16 }
 0x162   :  { %3861 = vmatpush.bf16.msra.mxu3 %v5979_v17  ;;  %v6022_v17 = vld [vmem:[%s7342_s1 + $0xc20] sm:$0xff] }
 0x163   :  { %3823 = vmatpush.bf16.msra.mxu0 %v5954_v19  ;;  %v3617_v39 = vpop.f32.mrf.mxu0 }
 0x164   :  { %3849 = vmatpush.bf16.msra.mxu2 %v5970_v20  ;;  %v3618_v40 = vadd.f32 %v3617_v39, %v3605_v7  ;;  %v6021_v20 = vld [vmem:[%s7342_s1 + $0xc18] sm:$0xff] }
 0x165   :  { %3836 = vmatpush.bf16.msra.mxu1 %v5962_v23  ;;  %v3630_v43 = vpop.f32.mrf.mxu1 }
 0x166   :  { %3862 = vmatpush.bf16.msra.mxu3 %v5978_v24  ;;  %3824 = vmatmul.bf16.vlgmr.msra.gmra.mxu0 %v884_v26  ;;  %v3631_v44 = vadd.f32 %v3630_v43, %v3618_v40  ;;  %v6020_v26 = vld [vmem:[%s7342_s1 + $0xc10] sm:$0xff] }
 0x167   :  { %3868 = vmatpush.bf16.msrb.mxu0 %v5993_v21  ;;  %3850 = vmatmul.bf16.vlgmr.msra.gmra.mxu2 %v886_v27 }
 0x168   :  { %3894 = vmatpush.bf16.msrb.mxu2 %v6009_v22  ;;  %3837 = vmatmul.bf16.vlgmr.msra.gmra.mxu1 %v885_v29 }
 0x169   :  { %3881 = vmatpush.bf16.msrb.mxu1 %v6001_v25  ;;  %3863 = vmatmul.bf16.vlgmr.msra.gmra.mxu3 %v887_v30 }
 0x16a   :  { %3907 = vmatpush.bf16.msrb.mxu3 %v6017_v28  ;;  %v3643_v49 = vpop.f32.mrf.mxu2  ;;  %v6019_v28 = vld [vmem:[%s7342_s1 + $0xc08] sm:$0xff] }
 0x16b   :  { %3869 = vmatpush.bf16.msrb.mxu0 %v5992_v31  ;;  %v3644_v50 = vadd.f32 %v3643_v49, %v3631_v44  ;;  %v3619_v54 = vpop.f32.mrf.mxu0  ;;  %v6018_v31 = vld [vmem:[%s7342_s1 + $0xc00] sm:$0xff] }
 0x16c   :  { %3895 = vmatpush.bf16.msrb.mxu2 %v6008_v32  ;;  %v3656_v53 = vpop.f32.mrf.mxu3  ;;  %v894_v32 = vld [vmem:[#allocation1] sm:$0xff] }
 0x16d   :  { %3882 = vmatpush.bf16.msrb.mxu1 %v6000_v33  ;;  %v3657_v55 = vadd.f32 %v3656_v53, %v3644_v50  ;;  %v3632_v58 = vpop.f32.mrf.mxu1 }
 0x16e   :  { %3908 = vmatpush.bf16.msrb.mxu3 %v6016_v34  ;;  %v6033_v58 = vld [vmem:[#allocation2 + $0x38] sm:$0xff] }
 0x16f   :  { %3870 = vmatpush.bf16.msrb.mxu0 %v5991_v35 }
 0x170   :  { %3896 = vmatpush.bf16.msrb.mxu2 %v6007_v36 }
 0x171   :  { %3883 = vmatpush.bf16.msrb.mxu1 %v5999_v37 }
 0x172   :  { %3909 = vmatpush.bf16.msrb.mxu3 %v6015_v38  ;;  %v3645_v3 = vpop.f32.mrf.mxu2 }
 0x173   :  { %3871 = vmatpush.bf16.msrb.mxu0 %v5990_v41 }
 0x174   :  { %3897 = vmatpush.bf16.msrb.mxu2 %v6006_v42  ;;  %v3658_v7 = vpop.f32.mrf.mxu3 }
 0x175   :  { %3884 = vmatpush.bf16.msrb.mxu1 %v5998_v45  ;;  %v6027_v7 = vld [vmem:[#allocation2 + $0x8] sm:$0xff] }
 0x176   :  { %3910 = vmatpush.bf16.msrb.mxu3 %v6014_v46 }
 0x177   :  { %3872 = vmatpush.bf16.msrb.mxu0 %v5989_v47 }
 0x178   :  { %3898 = vmatpush.bf16.msrb.mxu2 %v6005_v48 }
 0x179   :  { %3885 = vmatpush.bf16.msrb.mxu1 %v5997_v51 }
 0x17a   :  { %3911 = vmatpush.bf16.msrb.mxu3 %v6013_v52 }
 0x17b   :  { %3873 = vmatpush.bf16.msrb.mxu0 %v5988_v56 }
 0x17c   :  { %3899 = vmatpush.bf16.msrb.mxu2 %v6004_v57 }
 0x17d   :  { %3886 = vmatpush.bf16.msrb.mxu1 %v5996_v59 }
 0x17e   :  { %3912 = vmatpush.bf16.msrb.mxu3 %v6012_v60 }
 0x17f   :  { %3874 = vmatpush.bf16.msrb.mxu0 %v5987_v61  ;;  %v6032_v61 = vld [vmem:[#allocation2 + $0x30] sm:$0xff] }
 0x180   :  { %3900 = vmatpush.bf16.msrb.mxu2 %v6003_v62 }
 0x181   :  { %3887 = vmatpush.bf16.msrb.mxu1 %v5995_v5  ;;  %v6029_v5 = vld [vmem:[#allocation2 + $0x18] sm:$0xff] }
 0x182   :  { %3913 = vmatpush.bf16.msrb.mxu3 %v6011_v6  ;;  %v6028_v6 = vld [vmem:[#allocation2 + $0x10] sm:$0xff] }
 0x183   :  { %3875 = vmatpush.bf16.msrb.mxu0 %v5986_v8  ;;  %v3669_v15 = vpop.f32.mrf.mxu0 }
 0x184   :  { %3901 = vmatpush.bf16.msrb.mxu2 %v6002_v9  ;;  %v3670_v16 = vadd.f32 %v3669_v15, %v3657_v55  ;;  %v6026_v9 = vld [vmem:[#allocation2] sm:$0xff] }
 0x185   :  { %3888 = vmatpush.bf16.msrb.mxu1 %v5994_v11  ;;  %v3682_v18 = vpop.f32.mrf.mxu1 }
 0x186   :  { %3914 = vmatpush.bf16.msrb.mxu3 %v6010_v12  ;;  %3876 = vmatmul.bf16.vlgmr.msrb.gmra.mxu0 %v888_v63  ;;  %v3683_v19 = vadd.f32 %v3682_v18, %v3670_v16 }
 0x187   :  { %3920 = vmatpush.bf16.msra.mxu0 %v6025_v10  ;;  %3902 = vmatmul.bf16.vlgmr.msrb.gmra.mxu2 %v890_v0  ;;  %v6031_v0 = vld [vmem:[#allocation2 + $0x28] sm:$0xff] }
 0x188   :  { %3889 = vmatmul.bf16.vlgmr.msrb.gmra.mxu1 %v889_v1 }
 0x189   :  { %3915 = vmatmul.bf16.vlgmr.msrb.gmra.mxu3 %v891_v2  ;;  %4003 = vmatpush.bf16.msra.mxu1 %v6033_v58  ;;  %v6030_v2 = vld [vmem:[#allocation2 + $0x20] sm:$0xff] }
 0x18a   :  { %v3695_v21 = vpop.f32.mrf.mxu2 }
 0x18b   :  { %3921 = vmatpush.bf16.msra.mxu0 %v6024_v13  ;;  %v3696_v22 = vadd.f32 %v3695_v21, %v3683_v19  ;;  %v3671_v24 = vpop.f32.mrf.mxu0 }
 0x18c   :  { %v3708_v23 = vpop.f32.mrf.mxu3 }
 0x18d   :  { %v3709_v25 = vadd.f32 %v3708_v23, %v3696_v22  ;;  %v3684_v27 = vpop.f32.mrf.mxu1  ;;  %4004 = vmatpush.bf16.msra.mxu1 %v6032_v61 }
 0x18f   :  { %3922 = vmatpush.bf16.msra.mxu0 %v6023_v14 }
 0x191   :  { %4005 = vmatpush.bf16.msra.mxu1 %v6031_v0 }
 0x192   :  { %v3697_v29 = vpop.f32.mrf.mxu2 }
 0x193   :  { %3923 = vmatpush.bf16.msra.mxu0 %v6022_v17 }
 0x194   :  { %v3710_v30 = vpop.f32.mrf.mxu3 }
 0x195   :  { %4006 = vmatpush.bf16.msra.mxu1 %v6030_v2  ;;  %v6039_v30 = vld [vmem:[%s7345_s4] ss:$0 sm:$0xff] }
 0x197   :  { %3924 = vmatpush.bf16.msra.mxu0 %v6021_v20 }
 0x199   :  { %4007 = vmatpush.bf16.msra.mxu1 %v6029_v5 }
 0x19b   :  { %3925 = vmatpush.bf16.msra.mxu0 %v6020_v26 }
 0x19d   :  { %4008 = vmatpush.bf16.msra.mxu1 %v6028_v6 }
 0x19f   :  { %3926 = vmatpush.bf16.msra.mxu0 %v6019_v28 }
 0x1a1   :  { %4009 = vmatpush.bf16.msra.mxu1 %v6027_v7 }
 0x1a3   :  { %3927 = vmatpush.bf16.msra.mxu0 %v6018_v31  ;;  %v3721_v33 = vpop.f32.mrf.mxu0 }
 0x1a4   :  { %v3722_v34 = vadd.f32 %v3721_v33, %v3709_v25 }
 0x1a5   :  { %v3734_v35 = vpop.f32.mrf.mxu1  ;;  %4010 = vmatpush.bf16.msra.mxu1 %v6026_v9 }
 0x1a6   :  { %3928 = vmatmul.bf16.vlgmr.msra.gmra.mxu0 %v894_v32  ;;  %v3735_v36 = vadd.f32 %v3734_v35, %v3722_v34 }
 0x1aa   :  { %v3747_v37 = vpop.f32.mrf.mxu2 }
 0x1ab   :  { %v3748_v38 = vadd.f32 %v3747_v37, %v3735_v36  ;;  %v3723_v40 = vpop.f32.mrf.mxu0 }
 0x1ac   :  { %v3760_v39 = vpop.f32.mrf.mxu3 }
 0x1ad   :  { %v3761_v41 = vadd.f32 %v3760_v39, %v3748_v38  ;;  %v3736_v42 = vpop.f32.mrf.mxu1 }
 0x1b2   :  { %v3749_v43 = vpop.f32.mrf.mxu2 }
 0x1b4   :  { %v3762_v44 = vpop.f32.mrf.mxu3 }
 0x1c3   :  { %v3773_v45 = vpop.f32.mrf.mxu0 }
 0x1c4   :  { %v3774_v46 = vadd.f32 %v3773_v45, %v3761_v41 }
 0x1c5   :  { %v3786_v47 = vpop.f32.mrf.mxu1 }
 0x1c6   :  { %v3787_v48 = vadd.f32 %v3786_v47, %v3774_v46 }
 0x1ca   :  { %v3799_v49 = vpop.f32.mrf.mxu2 }
 0x1cb   :  { %v3800_v50 = vadd.f32 %v3799_v49, %v3787_v48  ;;  %v3775_v52 = vpop.f32.mrf.mxu0 }
 0x1cc   :  { %v3812_v51 = vpop.f32.mrf.mxu3 }
 0x1cd   :  { %v3813_v53 = vadd.f32 %v3812_v51, %v3800_v50  ;;  %v3788_v54 = vpop.f32.mrf.mxu1 }
 0x1d2   :  { %v3801_v55 = vpop.f32.mrf.mxu2 }
 0x1d4   :  { %v3814_v56 = vpop.f32.mrf.mxu3 }
 0x1e3   :  { %v3825_v57 = vpop.f32.mrf.mxu0 }
 0x1e4   :  { %v3826_v12 = vadd.f32 %v3825_v57, %v3813_v53 }
 0x1e5   :  { %v3838_v59 = vpop.f32.mrf.mxu1 }
 0x1e6   :  { %v3839_v16 = vadd.f32 %v3838_v59, %v3826_v12 }
 0x1ea   :  { %v3851_v60 = vpop.f32.mrf.mxu2 }
 0x1eb   :  { %v3827_v63 = vpop.f32.mrf.mxu0  ;;  %v3852_v17 = vadd.f32 %v3851_v60, %v3839_v16 }
 0x1ec   :  { %v3864_v62 = vpop.f32.mrf.mxu3 }
 0x1ed   :  { %v3840_v1 = vpop.f32.mrf.mxu1  ;;  %v3865_v20 = vadd.f32 %v3864_v62, %v3852_v17 }
 0x1f2   :  { %v3853_v3 = vpop.f32.mrf.mxu2 }
 0x1f4   :  { %v3866_v4 = vpop.f32.mrf.mxu3 }
 0x203   :  { %v3877_v8 = vpop.f32.mrf.mxu0 }
 0x204   :  { %v3878_v21 = vadd.f32 %v3877_v8, %v3865_v20 }
 0x205   :  { %v3890_v10 = vpop.f32.mrf.mxu1 }
 0x206   :  { %v3891_v22 = vadd.f32 %v3890_v10, %v3878_v21 }
 0x20a   :  { %v3903_v11 = vpop.f32.mrf.mxu2 }
 0x20b   :  { %v3879_v14 = vpop.f32.mrf.mxu0  ;;  %v3904_v23 = vadd.f32 %v3903_v11, %v3891_v22 }
 0x20c   :  { %v3916_v13 = vpop.f32.mrf.mxu3 }
 0x20d   :  { %v3892_v15 = vpop.f32.mrf.mxu1  ;;  %v3917_v24 = vadd.f32 %v3916_v13, %v3904_v23 }
 0x212   :  { %v3905_v18 = vpop.f32.mrf.mxu2 }
 0x214   :  { %v3918_v19 = vpop.f32.mrf.mxu3 }
 0x223   :  { %v3929_v25 = vpop.f32.mrf.mxu0 }
 0x224   :  { %v3930_v26 = vadd.f32 %v3929_v25, %v3917_v24 }
 0x226   :  { %v3933_v27 = vmax.f32 %v3930_v26, 0.0 }
 0x228   :  { %v3934_v28 = vpack.c.bf16 %v3933_v27, %v3933_v27 }
 0x22a   :  { %4011 = vmatmul.bf16.vlgmr.msra.gmra.mxu1 %v3934_v28 }
 0x22b   :  { %v3931_v29 = vpop.f32.mrf.mxu0 }
 0x2a7   :  { %v4012_v31 = vpop.f32.mrf.mxu1 }
 0x2a8   :  { %v4013_v32 = vadd.f32 %v6039_v30, %v4012_v31 }
 0x2aa   :  { %4016 = vst [vmem:[#allocation5] sm:$0x3] %v4013_v32 }
 0x2ab   :  { %4027 = dma.vmem_to_hbm [thread:$0]  %s4023_s29, 32, %s4025_s6, [#allocation4]  }
 0x2af   :  { %v4014_v33 = vpop.f32.mrf.mxu1 }
 0x2b0   :  { %6090 = dma.done.wait [#allocation4], 32  }
 0x2b1   :  { %6091 = vsyncadd [#allocation4], 4294967264 }
 0x2b2   :  { %4032 = vsyncpa [#allocation3], 1 }
 0x2b3   :  { %4033 = vsyncpa [#allocation4], 1 }

</bundles_post_ra>
